<compile_context>
chip_gen: v7x
topology: tpu7x:2x2x1
jax: 0.10.0
libtpu: 0.0.40
codegen_flags: <defaults>
</compile_context>

<pallas_src>
import jax
import jax.numpy as jnp
from jax import lax
from jax.experimental import pallas as pl
from jax.experimental.pallas import tpu as pltpu

TILE_B = 8      # images per grid step; multiple of 8 keeps all row slices sublane-aligned
C_PAD = 128     # padded channel count (real Cout = 10) -> lane-dense outputs
K1_PAD = 32     # conv1 contraction: 25 taps + bias column, padded
K2_PAD = 256    # conv2 contraction: 250 + bias column, padded (MXU aligned)
P1 = 144        # 12*12 pooled positions after conv1
P2 = 16         # 4*4  pooled positions after conv2


# ----------------------------- Pallas kernels ------------------------------

def _conv1_pool_kernel(p_ref, w_ref, y_ref, acc_ref):
    """relu(maxpool(conv1(x) + b1)) for one batch tile.

    p_ref:   (4*TILE_B*P1, K1_PAD)  im2col patches, rows ordered (quadrant, image, pos)
    w_ref:   (K1_PAD, C_PAD)        conv1 weight with bias folded in (row 25)
    y_ref:   (TILE_B*P1, C_PAD)     pooled output, rows (image, pos)
    acc_ref: (4*TILE_B*P1, C_PAD)   VMEM scratch for the single collapsed matmul
    """
    # One large MXU push covering all 4 pooling quadrants.
    acc_ref[...] = jnp.dot(p_ref[...], w_ref[...],
                           preferred_element_type=jnp.float32)
    n = TILE_B * P1
    chunk = P1  # process 144 output rows per iteration -> small VPU live range
    for i in range(n // chunk):
        r = i * chunk
        m = jnp.maximum(
            jnp.maximum(acc_ref[0 * n + r:0 * n + r + chunk, :],
                        acc_ref[1 * n + r:1 * n + r + chunk, :]),
            jnp.maximum(acc_ref[2 * n + r:2 * n + r + chunk, :],
                        acc_ref[3 * n + r:3 * n + r + chunk, :]))
        y_ref[r:r + chunk, :] = jnp.maximum(m, 0.0)


def _conv2_pool_linear_kernel(p_ref, w_ref, wf_ref, bf_ref, y_ref, o_ref, acc_ref):
    """relu(maxpool(conv2(.) + b2)) followed by the fused Linear, one batch tile.

    p_ref:   (4*P2*TILE_B, K2_PAD)  patches, rows ordered (quadrant, pos, image)
    w_ref:   (K2_PAD, C_PAD)        conv2 weight with bias folded in (row 250)
    wf_ref:  (P2, C_PAD, C_PAD)     Linear weight regrouped by spatial position
    bf_ref:  (1, C_PAD)             Linear bias
    y_ref:   (P2*TILE_B, C_PAD)     pooled conv2 activations, rows (pos, image)
    o_ref:   (TILE_B, C_PAD)        logits
    acc_ref: (4*P2*TILE_B, C_PAD)   VMEM scratch
    """
    acc_ref[...] = jnp.dot(p_ref[...], w_ref[...],
                           preferred_element_type=jnp.float32)
    n = P2 * TILE_B
    m = jnp.maximum(jnp.maximum(acc_ref[0 * n:1 * n, :], acc_ref[1 * n:2 * n, :]),
                    jnp.maximum(acc_ref[2 * n:3 * n, :], acc_ref[3 * n:4 * n, :]))
    y_ref[...] = jnp.maximum(m, 0.0)

    # Fused Linear: contract over (spatial position, channel). Rows for a fixed
    # position are contiguous (pos-major layout), so each step is an aligned dot.
    logits = jnp.zeros((TILE_B, C_PAD), jnp.float32)
    for s in range(P2):
        logits = logits + jnp.dot(y_ref[s * TILE_B:(s + 1) * TILE_B, :],
                                  wf_ref[s],
                                  preferred_element_type=jnp.float32)
    o_ref[...] = logits + bf_ref[...]


# ----------------------------- pallas_call wrappers -------------------------

def _compiler_params():
    return pltpu.CompilerParams(
        dimension_semantics=("parallel",),
        vmem_limit_bytes=32 * 1024 * 1024)


def _conv1_pool(p1_rows, w1p, num_tiles):
    rows_in, rows_out = 4 * TILE_B * P1, TILE_B * P1
    return pl.pallas_call(
        _conv1_pool_kernel,
        out_shape=jax.ShapeDtypeStruct((num_tiles * rows_out, C_PAD), jnp.float32),
        grid=(num_tiles,),
        in_specs=[pl.BlockSpec((rows_in, K1_PAD), lambda t: (t, 0)),
                  pl.BlockSpec((K1_PAD, C_PAD), lambda t: (0, 0))],
        out_specs=pl.BlockSpec((rows_out, C_PAD), lambda t: (t, 0)),
        scratch_shapes=[pltpu.VMEM((rows_in, C_PAD), jnp.float32)],
        compiler_params=_compiler_params(),
    )(p1_rows, w1p)


def _conv2_pool_linear(p2_rows, w2p, wf3, bfp, num_tiles):
    rows_in, rows_out = 4 * P2 * TILE_B, P2 * TILE_B
    return pl.pallas_call(
        _conv2_pool_linear_kernel,
        out_shape=(jax.ShapeDtypeStruct((num_tiles * rows_out, C_PAD), jnp.float32),
                   jax.ShapeDtypeStruct((num_tiles * TILE_B, C_PAD), jnp.float32)),
        grid=(num_tiles,),
        in_specs=[pl.BlockSpec((rows_in, K2_PAD), lambda t: (t, 0)),
                  pl.BlockSpec((K2_PAD, C_PAD), lambda t: (0, 0)),
                  pl.BlockSpec((P2, C_PAD, C_PAD), lambda t: (0, 0, 0)),
                  pl.BlockSpec((1, C_PAD), lambda t: (0, 0))],
        out_specs=(pl.BlockSpec((rows_out, C_PAD), lambda t: (t, 0)),
                   pl.BlockSpec((TILE_B, C_PAD), lambda t: (t, 0))),
        scratch_shapes=[pltpu.VMEM((rows_in, C_PAD), jnp.float32)],
        compiler_params=_compiler_params(),
    )(p2_rows, w2p, wf3, bfp)


# ------------------------------- JAX glue -----------------------------------

def _quadrant_patches(x_nhwc, ksize=5):
    """im2col grouped by 2x2 pooling quadrant.

    x_nhwc: (B, H, W, C) -> (4, B, PH*PW, C*ksize*ksize); K ordered (c, kh, kw)
    to match torch weight.reshape(O, C*k*k).
    """
    B, H, W, C = x_nhwc.shape
    OH, OW = H - ksize + 1, W - ksize + 1
    PH, PW = OH // 2, OW // 2
    quads = []
    for qi in range(2):
        for qj in range(2):
            taps = []
            for kh in range(ksize):
                for kw in range(ksize):
                    taps.append(x_nhwc[:, qi + kh:qi + kh + 2 * PH:2,
                                          qj + kw:qj + kw + 2 * PW:2, :])
            p = jnp.stack(taps, axis=-1)                       # (B,PH,PW,C,k*k)
            quads.append(p.reshape(B, PH * PW, C * ksize * ksize))
    return jnp.stack(quads, axis=0)                            # (4,B,PH*PW,K)


def _append_bias_column(p, k_pad):
    four, b, n, k = p.shape
    cols = [p, jnp.ones((four, b, n, 1), p.dtype)]
    if k_pad > k + 1:
        cols.append(jnp.zeros((four, b, n, k_pad - k - 1), p.dtype))
    return jnp.concatenate(cols, axis=-1)


def _pack_conv_weight(w, b, k_pad):
    cout = w.shape[0]
    k = w.shape[1] * w.shape[2] * w.shape[3]
    wm = w.reshape(cout, k).T.astype(jnp.float32)              # (K, Cout)
    wm = jnp.concatenate([wm, b.astype(jnp.float32)[None, :]], axis=0)
    return jnp.pad(wm, ((0, k_pad - k - 1), (0, C_PAD - cout)))


def _pack_linear_weight(wf):
    # wf: (160, 10) with feature index f = c*16 + s (torch NCHW flatten, s = h*4+w)
    wf3 = wf.astype(jnp.float32).reshape(10, P2, 10).transpose(1, 0, 2)   # (s,c,o)
    return jnp.pad(wf3, ((0, 0), (0, C_PAD - 10), (0, C_PAD - 10)))


def cnn_forward(x_nchw, params):
    """Mirrors CNN.forward: returns (logits (B,10), flattened features (B,160))."""
    w1, b1, w2, b2, wf, bf = params
    B = x_nchw.shape[0]
    B_pad = ((B + TILE_B - 1) // TILE_B) * TILE_B
    T = B_pad // TILE_B

    x = jnp.transpose(x_nchw, (0, 2, 3, 1)).astype(jnp.float32)          # NCHW -> NHWC
    if B_pad != B:
        x = jnp.pad(x, ((0, B_pad - B), (0, 0), (0, 0), (0, 0)))

    # --- conv1 + ReLU + MaxPool(2): one Pallas kernel ---
    p1 = _append_bias_column(_quadrant_patches(x), K1_PAD)               # (4,Bp,144,32)
    p1_rows = (p1.reshape(4, T, TILE_B, P1, K1_PAD)
                 .transpose(1, 0, 2, 3, 4)
                 .reshape(T * 4 * TILE_B * P1, K1_PAD))
    w1p = _pack_conv_weight(w1, b1, K1_PAD)
    y1 = _conv1_pool(p1_rows, w1p, T)                                    # (Bp*144, 128)

    # --- conv2 + ReLU + MaxPool(2) + Linear: one Pallas kernel ---
    # TODO(synk): build these patches on-chip (strided VMEM loads) so both conv
    # stages fuse into a single pallas_call and y1 never round-trips HBM.
    y1_act = y1.reshape(B_pad, 12, 12, C_PAD)[..., :10]
    p2 = _append_bias_column(_quadrant_patches(y1_act), K2_PAD)          # (4,Bp,16,256)
    p2_rows = (p2.reshape(4, T, TILE_B, P2, K2_PAD)
                 .transpose(1, 0, 3, 2, 4)
                 .reshape(T * 4 * P2 * TILE_B, K2_PAD))
    w2p = _pack_conv_weight(w2, b2, K2_PAD)
    wf3 = _pack_linear_weight(wf)
    bfp = jnp.pad(bf.astype(jnp.float32), (0, C_PAD - 10)).reshape(1, C_PAD)

    y2, logits = _conv2_pool_linear(p2_rows, w2p, wf3, bfp, T)

    # unpack to torch layouts
    feat = (y2.reshape(T, P2, TILE_B, C_PAD)
              .transpose(0, 2, 3, 1)
              .reshape(B_pad, C_PAD, P2)[:B, :10, :]
              .reshape(B, 10 * P2))
    out = logits[:B, :10]
    return out, feat


# ------------------------- pure-JAX reference check --------------------------

def cnn_reference(x_nchw, params):
    w1, b1, w2, b2, wf, bf = params
    dn = ("NCHW", "OIHW", "NCHW")

    def block(x, w, b):
        y = lax.conv_general_dilated(x, w, (1, 1), "VALID", dimension_numbers=dn,
                                     precision=lax.Precision.HIGHEST)
        y = jnp.maximum(y + b[None, :, None, None], 0.0)
        return lax.reduce_window(y, -jnp.inf, lax.max,
                                 (1, 1, 2, 2), (1, 1, 2, 2), "VALID")

    y = block(block(x_nchw, w1, b1), w2, b2)
    feat = y.reshape(y.shape[0], -1)
    return feat @ wf + bf, feat


# ---------------------------------- main -------------------------------------

if __name__ == "__main__":
    key = jax.random.PRNGKey(0)
    ks = jax.random.split(key, 7)
    B = 2
    x = jax.random.normal(ks[0], (B, 1, 28, 28), jnp.float32)
    # deterministic synthetic parameters (shapes from CNN.__init__)
    w1 = jax.random.normal(ks[1], (10, 1, 5, 5), jnp.float32) * 0.1
    b1 = jax.random.normal(ks[2], (10,), jnp.float32) * 0.1
    w2 = jax.random.normal(ks[3], (10, 10, 5, 5), jnp.float32) * 0.1
    b2 = jax.random.normal(ks[4], (10,), jnp.float32) * 0.1
    wf = jax.random.normal(ks[5], (160, 10), jnp.float32) * 0.1   # == torch linear weight.T
    bf = jax.random.normal(ks[6], (10,), jnp.float32) * 0.1
    params = (w1, b1, w2, b2, wf, bf)

    out, feat = jax.jit(cnn_forward)(x, params)
    jax.block_until_ready((out, feat))
    assert out.shape == (B, 10) and feat.shape == (B, 160)

    out_ref, feat_ref = cnn_reference(x, params)
    assert jnp.allclose(feat, feat_ref, atol=1e-2, rtol=1e-2)
    assert jnp.allclose(out, out_ref, atol=1e-2, rtol=1e-2)

    print("KERNEL_OK")
</pallas_src>

<mosaic_0001>
module attributes {stable_mosaic.version = 11 : i64} {
  func.func @_conv1_pool_kernel(%arg0: i32, %arg1: memref<4608x32xf32, #tpu.memory_space<vmem>>, %arg2: memref<32x128xf32, #tpu.memory_space<vmem>>, %arg3: memref<1152x128xf32, #tpu.memory_space<vmem>>, %arg4: memref<4608x128xf32, #tpu.memory_space<vmem>>) attributes {dimension_semantics = [#tpu.dimension_semantics<parallel>], iteration_bounds = array<i64: 1>, scalar_prefetch = 0 : i64, scratch_operands = 1 : i64, tpu.core_type = #tpu.core_type<tc>, window_params = [{transform_indices = @transform_0, window_bounds = array<i64: 4608, 32>}, {pipeline_mode = #tpu.pipeline_mode<synchronous>, transform_indices = @transform_1, window_bounds = array<i64: 32, 128>}, {transform_indices = @transform_2, window_bounds = array<i64: 1152, 128>}]} {
    %c0 = arith.constant 0 : index
    %c0_0 = arith.constant 0 : index
    %0 = vector.load %arg1[%c0, %c0_0] : memref<4608x32xf32, #tpu.memory_space<vmem>>, vector<4608x32xf32>
    %c0_1 = arith.constant 0 : index
    %c0_2 = arith.constant 0 : index
    %1 = vector.load %arg2[%c0_1, %c0_2] : memref<32x128xf32, #tpu.memory_space<vmem>>, vector<32x128xf32>
    %cst = arith.constant dense<0.000000e+00> : vector<4608x128xf32>
    %2 = tpu.matmul %0, %1, %cst {dimension_numbers = #tpu.dot_dimension_numbers<[1], [0], [0], [1], [0, 0, 1, 1], [], []>} : vector<4608x32xf32>, vector<32x128xf32>, vector<4608x128xf32> -> vector<4608x128xf32>
    %c0_3 = arith.constant 0 : index
    %c0_4 = arith.constant 0 : index
    %3 = vector.load %arg4[%c0_3, %c0_4] : memref<4608x128xf32, #tpu.memory_space<vmem>>, vector<4608x128xf32>
    tpu.vector_store %arg4[%c0_3, %c0_4], %2 {strides = array<i32>} : memref<4608x128xf32, #tpu.memory_space<vmem>>, vector<4608x128xf32>,
    %c0_5 = arith.constant 0 : index
    %c0_6 = arith.constant 0 : index
    %4 = vector.load %arg4[%c0_5, %c0_6] : memref<4608x128xf32, #tpu.memory_space<vmem>>, vector<144x128xf32>
    %c1152 = arith.constant 1152 : index
    %c0_7 = arith.constant 0 : index
    %5 = vector.load %arg4[%c1152, %c0_7] : memref<4608x128xf32, #tpu.memory_space<vmem>>, vector<144x128xf32>
    %6 = arith.maximumf %4, %5 : vector<144x128xf32>
    %c2304 = arith.constant 2304 : index
    %c0_8 = arith.constant 0 : index
    %7 = vector.load %arg4[%c2304, %c0_8] : memref<4608x128xf32, #tpu.memory_space<vmem>>, vector<144x128xf32>
    %c3456 = arith.constant 3456 : index
    %c0_9 = arith.constant 0 : index
    %8 = vector.load %arg4[%c3456, %c0_9] : memref<4608x128xf32, #tpu.memory_space<vmem>>, vector<144x128xf32>
    %9 = arith.maximumf %7, %8 : vector<144x128xf32>
    %10 = arith.maximumf %6, %9 : vector<144x128xf32>
    %cst_10 = arith.constant 0.000000e+00 : f32
    %11 = vector.broadcast %cst_10 : f32 to vector<144x128xf32>
    %12 = arith.maximumf %10, %11 : vector<144x128xf32>
    %c0_11 = arith.constant 0 : index
    %c0_12 = arith.constant 0 : index
    %13 = vector.load %arg3[%c0_11, %c0_12] : memref<1152x128xf32, #tpu.memory_space<vmem>>, vector<144x128xf32>
    tpu.vector_store %arg3[%c0_11, %c0_12], %12 {strides = array<i32>} : memref<1152x128xf32, #tpu.memory_space<vmem>>, vector<144x128xf32>,
    %c144 = arith.constant 144 : index
    %c0_13 = arith.constant 0 : index
    %14 = vector.load %arg4[%c144, %c0_13] : memref<4608x128xf32, #tpu.memory_space<vmem>>, vector<144x128xf32>
    %c1296 = arith.constant 1296 : index
    %c0_14 = arith.constant 0 : index
    %15 = vector.load %arg4[%c1296, %c0_14] : memref<4608x128xf32, #tpu.memory_space<vmem>>, vector<144x128xf32>
    %16 = arith.maximumf %14, %15 : vector<144x128xf32>
    %c2448 = arith.constant 2448 : index
    %c0_15 = arith.constant 0 : index
    %17 = vector.load %arg4[%c2448, %c0_15] : memref<4608x128xf32, #tpu.memory_space<vmem>>, vector<144x128xf32>
    %c3600 = arith.constant 3600 : index
    %c0_16 = arith.constant 0 : index
    %18 = vector.load %arg4[%c3600, %c0_16] : memref<4608x128xf32, #tpu.memory_space<vmem>>, vector<144x128xf32>
    %19 = arith.maximumf %17, %18 : vector<144x128xf32>
    %20 = arith.maximumf %16, %19 : vector<144x128xf32>
    %cst_17 = arith.constant 0.000000e+00 : f32
    %21 = vector.broadcast %cst_17 : f32 to vector<144x128xf32>
    %22 = arith.maximumf %20, %21 : vector<144x128xf32>
    %c144_18 = arith.constant 144 : index
    %c0_19 = arith.constant 0 : index
    %23 = vector.load %arg3[%c144_18, %c0_19] : memref<1152x128xf32, #tpu.memory_space<vmem>>, vector<144x128xf32>
    tpu.vector_store %arg3[%c144_18, %c0_19], %22 {strides = array<i32>} : memref<1152x128xf32, #tpu.memory_space<vmem>>, vector<144x128xf32>,
    %c288 = arith.constant 288 : index
    %c0_20 = arith.constant 0 : index
    %24 = vector.load %arg4[%c288, %c0_20] : memref<4608x128xf32, #tpu.memory_space<vmem>>, vector<144x128xf32>
    %c1440 = arith.constant 1440 : index
    %c0_21 = arith.constant 0 : index
    %25 = vector.load %arg4[%c1440, %c0_21] : memref<4608x128xf32, #tpu.memory_space<vmem>>, vector<144x128xf32>
    %26 = arith.maximumf %24, %25 : vector<144x128xf32>
    %c2592 = arith.constant 2592 : index
    %c0_22 = arith.constant 0 : index
    %27 = vector.load %arg4[%c2592, %c0_22] : memref<4608x128xf32, #tpu.memory_space<vmem>>, vector<144x128xf32>
    %c3744 = arith.constant 3744 : index
    %c0_23 = arith.constant 0 : index
    %28 = vector.load %arg4[%c3744, %c0_23] : memref<4608x128xf32, #tpu.memory_space<vmem>>, vector<144x128xf32>
    %29 = arith.maximumf %27, %28 : vector<144x128xf32>
    %30 = arith.maximumf %26, %29 : vector<144x128xf32>
    %cst_24 = arith.constant 0.000000e+00 : f32
    %31 = vector.broadcast %cst_24 : f32 to vector<144x128xf32>
    %32 = arith.maximumf %30, %31 : vector<144x128xf32>
    %c288_25 = arith.constant 288 : index
    %c0_26 = arith.constant 0 : index
    %33 = vector.load %arg3[%c288_25, %c0_26] : memref<1152x128xf32, #tpu.memory_space<vmem>>, vector<144x128xf32>
    tpu.vector_store %arg3[%c288_25, %c0_26], %32 {strides = array<i32>} : memref<1152x128xf32, #tpu.memory_space<vmem>>, vector<144x128xf32>,
    %c432 = arith.constant 432 : index
    %c0_27 = arith.constant 0 : index
    %34 = vector.load %arg4[%c432, %c0_27] : memref<4608x128xf32, #tpu.memory_space<vmem>>, vector<144x128xf32>
    %c1584 = arith.constant 1584 : index
    %c0_28 = arith.constant 0 : index
    %35 = vector.load %arg4[%c1584, %c0_28] : memref<4608x128xf32, #tpu.memory_space<vmem>>, vector<144x128xf32>
    %36 = arith.maximumf %34, %35 : vector<144x128xf32>
    %c2736 = arith.constant 2736 : index
    %c0_29 = arith.constant 0 : index
    %37 = vector.load %arg4[%c2736, %c0_29] : memref<4608x128xf32, #tpu.memory_space<vmem>>, vector<144x128xf32>
    %c3888 = arith.constant 3888 : index
    %c0_30 = arith.constant 0 : index
    %38 = vector.load %arg4[%c3888, %c0_30] : memref<4608x128xf32, #tpu.memory_space<vmem>>, vector<144x128xf32>
    %39 = arith.maximumf %37, %38 : vector<144x128xf32>
    %40 = arith.maximumf %36, %39 : vector<144x128xf32>
    %cst_31 = arith.constant 0.000000e+00 : f32
    %41 = vector.broadcast %cst_31 : f32 to vector<144x128xf32>
    %42 = arith.maximumf %40, %41 : vector<144x128xf32>
    %c432_32 = arith.constant 432 : index
    %c0_33 = arith.constant 0 : index
    %43 = vector.load %arg3[%c432_32, %c0_33] : memref<1152x128xf32, #tpu.memory_space<vmem>>, vector<144x128xf32>
    tpu.vector_store %arg3[%c432_32, %c0_33], %42 {strides = array<i32>} : memref<1152x128xf32, #tpu.memory_space<vmem>>, vector<144x128xf32>,
    %c576 = arith.constant 576 : index
    %c0_34 = arith.constant 0 : index
    %44 = vector.load %arg4[%c576, %c0_34] : memref<4608x128xf32, #tpu.memory_space<vmem>>, vector<144x128xf32>
    %c1728 = arith.constant 1728 : index
    %c0_35 = arith.constant 0 : index
    %45 = vector.load %arg4[%c1728, %c0_35] : memref<4608x128xf32, #tpu.memory_space<vmem>>, vector<144x128xf32>
    %46 = arith.maximumf %44, %45 : vector<144x128xf32>
    %c2880 = arith.constant 2880 : index
    %c0_36 = arith.constant 0 : index
    %47 = vector.load %arg4[%c2880, %c0_36] : memref<4608x128xf32, #tpu.memory_space<vmem>>, vector<144x128xf32>
    %c4032 = arith.constant 4032 : index
    %c0_37 = arith.constant 0 : index
    %48 = vector.load %arg4[%c4032, %c0_37] : memref<4608x128xf32, #tpu.memory_space<vmem>>, vector<144x128xf32>
    %49 = arith.maximumf %47, %48 : vector<144x128xf32>
    %50 = arith.maximumf %46, %49 : vector<144x128xf32>
    %cst_38 = arith.constant 0.000000e+00 : f32
    %51 = vector.broadcast %cst_38 : f32 to vector<144x128xf32>
    %52 = arith.maximumf %50, %51 : vector<144x128xf32>
    %c576_39 = arith.constant 576 : index
    %c0_40 = arith.constant 0 : index
    %53 = vector.load %arg3[%c576_39, %c0_40] : memref<1152x128xf32, #tpu.memory_space<vmem>>, vector<144x128xf32>
    tpu.vector_store %arg3[%c576_39, %c0_40], %52 {strides = array<i32>} : memref<1152x128xf32, #tpu.memory_space<vmem>>, vector<144x128xf32>,
    %c720 = arith.constant 720 : index
    %c0_41 = arith.constant 0 : index
    %54 = vector.load %arg4[%c720, %c0_41] : memref<4608x128xf32, #tpu.memory_space<vmem>>, vector<144x128xf32>
    %c1872 = arith.constant 1872 : index
    %c0_42 = arith.constant 0 : index
    %55 = vector.load %arg4[%c1872, %c0_42] : memref<4608x128xf32, #tpu.memory_space<vmem>>, vector<144x128xf32>
    %56 = arith.maximumf %54, %55 : vector<144x128xf32>
    %c3024 = arith.constant 3024 : index
    %c0_43 = arith.constant 0 : index
    %57 = vector.load %arg4[%c3024, %c0_43] : memref<4608x128xf32, #tpu.memory_space<vmem>>, vector<144x128xf32>
    %c4176 = arith.constant 4176 : index
    %c0_44 = arith.constant 0 : index
    %58 = vector.load %arg4[%c4176, %c0_44] : memref<4608x128xf32, #tpu.memory_space<vmem>>, vector<144x128xf32>
    %59 = arith.maximumf %57, %58 : vector<144x128xf32>
    %60 = arith.maximumf %56, %59 : vector<144x128xf32>
    %cst_45 = arith.constant 0.000000e+00 : f32
    %61 = vector.broadcast %cst_45 : f32 to vector<144x128xf32>
    %62 = arith.maximumf %60, %61 : vector<144x128xf32>
    %c720_46 = arith.constant 720 : index
    %c0_47 = arith.constant 0 : index
    %63 = vector.load %arg3[%c720_46, %c0_47] : memref<1152x128xf32, #tpu.memory_space<vmem>>, vector<144x128xf32>
    tpu.vector_store %arg3[%c720_46, %c0_47], %62 {strides = array<i32>} : memref<1152x128xf32, #tpu.memory_space<vmem>>, vector<144x128xf32>,
    %c864 = arith.constant 864 : index
    %c0_48 = arith.constant 0 : index
    %64 = vector.load %arg4[%c864, %c0_48] : memref<4608x128xf32, #tpu.memory_space<vmem>>, vector<144x128xf32>
    %c2016 = arith.constant 2016 : index
    %c0_49 = arith.constant 0 : index
    %65 = vector.load %arg4[%c2016, %c0_49] : memref<4608x128xf32, #tpu.memory_space<vmem>>, vector<144x128xf32>
    %66 = arith.maximumf %64, %65 : vector<144x128xf32>
    %c3168 = arith.constant 3168 : index
    %c0_50 = arith.constant 0 : index
    %67 = vector.load %arg4[%c3168, %c0_50] : memref<4608x128xf32, #tpu.memory_space<vmem>>, vector<144x128xf32>
    %c4320 = arith.constant 4320 : index
    %c0_51 = arith.constant 0 : index
    %68 = vector.load %arg4[%c4320, %c0_51] : memref<4608x128xf32, #tpu.memory_space<vmem>>, vector<144x128xf32>
    %69 = arith.maximumf %67, %68 : vector<144x128xf32>
    %70 = arith.maximumf %66, %69 : vector<144x128xf32>
    %cst_52 = arith.constant 0.000000e+00 : f32
    %71 = vector.broadcast %cst_52 : f32 to vector<144x128xf32>
    %72 = arith.maximumf %70, %71 : vector<144x128xf32>
    %c864_53 = arith.constant 864 : index
    %c0_54 = arith.constant 0 : index
    %73 = vector.load %arg3[%c864_53, %c0_54] : memref<1152x128xf32, #tpu.memory_space<vmem>>, vector<144x128xf32>
    tpu.vector_store %arg3[%c864_53, %c0_54], %72 {strides = array<i32>} : memref<1152x128xf32, #tpu.memory_space<vmem>>, vector<144x128xf32>,
    %c1008 = arith.constant 1008 : index
    %c0_55 = arith.constant 0 : index
    %74 = vector.load %arg4[%c1008, %c0_55] : memref<4608x128xf32, #tpu.memory_space<vmem>>, vector<144x128xf32>
    %c2160 = arith.constant 2160 : index
    %c0_56 = arith.constant 0 : index
    %75 = vector.load %arg4[%c2160, %c0_56] : memref<4608x128xf32, #tpu.memory_space<vmem>>, vector<144x128xf32>
    %76 = arith.maximumf %74, %75 : vector<144x128xf32>
    %c3312 = arith.constant 3312 : index
    %c0_57 = arith.constant 0 : index
    %77 = vector.load %arg4[%c3312, %c0_57] : memref<4608x128xf32, #tpu.memory_space<vmem>>, vector<144x128xf32>
    %c4464 = arith.constant 4464 : index
    %c0_58 = arith.constant 0 : index
    %78 = vector.load %arg4[%c4464, %c0_58] : memref<4608x128xf32, #tpu.memory_space<vmem>>, vector<144x128xf32>
    %79 = arith.maximumf %77, %78 : vector<144x128xf32>
    %80 = arith.maximumf %76, %79 : vector<144x128xf32>
    %cst_59 = arith.constant 0.000000e+00 : f32
    %81 = vector.broadcast %cst_59 : f32 to vector<144x128xf32>
    %82 = arith.maximumf %80, %81 : vector<144x128xf32>
    %c1008_60 = arith.constant 1008 : index
    %c0_61 = arith.constant 0 : index
    %83 = vector.load %arg3[%c1008_60, %c0_61] : memref<1152x128xf32, #tpu.memory_space<vmem>>, vector<144x128xf32>
    tpu.vector_store %arg3[%c1008_60, %c0_61], %82 {strides = array<i32>} : memref<1152x128xf32, #tpu.memory_space<vmem>>, vector<144x128xf32>,
    return
  }
  func.func @transform_0(%arg0: i32) -> (i32, i32) {
    %c0_i32 = arith.constant 0 : i32
    %c0_i32_0 = arith.constant 0 : i32
    return %arg0, %c0_i32 : i32, i32
  }
  func.func @transform_1(%arg0: i32) -> (i32, i32) {
    %c0_i32 = arith.constant 0 : i32
    %c0_i32_0 = arith.constant 0 : i32
    %c0_i32_1 = arith.constant 0 : i32
    return %c0_i32, %c0_i32_0 : i32, i32
  }
  func.func @transform_2(%arg0: i32) -> (i32, i32) {
    %c0_i32 = arith.constant 0 : i32
    %c0_i32_0 = arith.constant 0 : i32
    return %arg0, %c0_i32 : i32, i32
  }
}

module attributes {stable_mosaic.version = 11 : i64} {
  func.func @_conv2_pool_linear_kernel(%arg0: i32, %arg1: memref<512x256xf32, #tpu.memory_space<vmem>>, %arg2: memref<256x128xf32, #tpu.memory_space<vmem>>, %arg3: memref<16x128x128xf32, #tpu.memory_space<vmem>>, %arg4: memref<1x128xf32, #tpu.memory_space<vmem>>, %arg5: memref<128x128xf32, #tpu.memory_space<vmem>>, %arg6: memref<8x128xf32, #tpu.memory_space<vmem>>, %arg7: memref<512x128xf32, #tpu.memory_space<vmem>>) attributes {dimension_semantics = [#tpu.dimension_semantics<parallel>], iteration_bounds = array<i64: 1>, scalar_prefetch = 0 : i64, scratch_operands = 1 : i64, tpu.core_type = #tpu.core_type<tc>, window_params = [{transform_indices = @transform_0, window_bounds = array<i64: 512, 256>}, {pipeline_mode = #tpu.pipeline_mode<synchronous>, transform_indices = @transform_1, window_bounds = array<i64: 256, 128>}, {pipeline_mode = #tpu.pipeline_mode<synchronous>, transform_indices = @transform_2, window_bounds = array<i64: 16, 128, 128>}, {pipeline_mode = #tpu.pipeline_mode<synchronous>, transform_indices = @transform_3, window_bounds = array<i64: 1, 128>}, {transform_indices = @transform_4, window_bounds = array<i64: 128, 128>}, {transform_indices = @transform_5, window_bounds = array<i64: 8, 128>}]} {
    %c0 = arith.constant 0 : index
    %c0_0 = arith.constant 0 : index
    %0 = vector.load %arg1[%c0, %c0_0] : memref<512x256xf32, #tpu.memory_space<vmem>>, vector<512x256xf32>
    %c0_1 = arith.constant 0 : index
    %c0_2 = arith.constant 0 : index
    %1 = vector.load %arg2[%c0_1, %c0_2] : memref<256x128xf32, #tpu.memory_space<vmem>>, vector<256x128xf32>
    %cst = arith.constant dense<0.000000e+00> : vector<512x128xf32>
    %2 = tpu.matmul %0, %1, %cst {dimension_numbers = #tpu.dot_dimension_numbers<[1], [0], [0], [1], [0, 0, 1, 1], [], []>} : vector<512x256xf32>, vector<256x128xf32>, vector<512x128xf32> -> vector<512x128xf32>
    %c0_3 = arith.constant 0 : index
    %c0_4 = arith.constant 0 : index
    %3 = vector.load %arg7[%c0_3, %c0_4] : memref<512x128xf32, #tpu.memory_space<vmem>>, vector<512x128xf32>
    tpu.vector_store %arg7[%c0_3, %c0_4], %2 {strides = array<i32>} : memref<512x128xf32, #tpu.memory_space<vmem>>, vector<512x128xf32>,
    %c0_5 = arith.constant 0 : index
    %c0_6 = arith.constant 0 : index
    %4 = vector.load %arg7[%c0_5, %c0_6] : memref<512x128xf32, #tpu.memory_space<vmem>>, vector<128x128xf32>
    %c128 = arith.constant 128 : index
    %c0_7 = arith.constant 0 : index
    %5 = vector.load %arg7[%c128, %c0_7] : memref<512x128xf32, #tpu.memory_space<vmem>>, vector<128x128xf32>
    %6 = arith.maximumf %4, %5 : vector<128x128xf32>
    %c256 = arith.constant 256 : index
    %c0_8 = arith.constant 0 : index
    %7 = vector.load %arg7[%c256, %c0_8] : memref<512x128xf32, #tpu.memory_space<vmem>>, vector<128x128xf32>
    %c384 = arith.constant 384 : index
    %c0_9 = arith.constant 0 : index
    %8 = vector.load %arg7[%c384, %c0_9] : memref<512x128xf32, #tpu.memory_space<vmem>>, vector<128x128xf32>
    %9 = arith.maximumf %7, %8 : vector<128x128xf32>
    %10 = arith.maximumf %6, %9 : vector<128x128xf32>
    %cst_10 = arith.constant 0.000000e+00 : f32
    %11 = vector.broadcast %cst_10 : f32 to vector<128x128xf32>
    %12 = arith.maximumf %10, %11 : vector<128x128xf32>
    %c0_11 = arith.constant 0 : index
    %c0_12 = arith.constant 0 : index
    %13 = vector.load %arg5[%c0_11, %c0_12] : memref<128x128xf32, #tpu.memory_space<vmem>>, vector<128x128xf32>
    tpu.vector_store %arg5[%c0_11, %c0_12], %12 {strides = array<i32>} : memref<128x128xf32, #tpu.memory_space<vmem>>, vector<128x128xf32>,
    %cst_13 = arith.constant 0.000000e+00 : f32
    %14 = vector.broadcast %cst_13 : f32 to vector<8x128xf32>
    %c0_14 = arith.constant 0 : index
    %c0_15 = arith.constant 0 : index
    %15 = vector.load %arg5[%c0_14, %c0_15] : memref<128x128xf32, #tpu.memory_space<vmem>>, vector<8x128xf32>
    %c0_16 = arith.constant 0 : index
    %c0_17 = arith.constant 0 : index
    %c0_18 = arith.constant 0 : index
    %16 = vector.load %arg3[%c0_16, %c0_17, %c0_18] : memref<16x128x128xf32, #tpu.memory_space<vmem>>, vector<1x128x128xf32>
    %17 = vector.shape_cast %16 : vector<1x128x128xf32> to vector<128x128xf32>
    %cst_19 = arith.constant dense<0.000000e+00> : vector<8x128xf32>
    %18 = tpu.matmul %15, %17, %cst_19 {dimension_numbers = #tpu.dot_dimension_numbers<[1], [0], [0], [1], [0, 0, 1, 1], [], []>} : vector<8x128xf32>, vector<128x128xf32>, vector<8x128xf32> -> vector<8x128xf32>
    %19 = arith.addf %14, %18 : vector<8x128xf32>
    %c8 = arith.constant 8 : index
    %c0_20 = arith.constant 0 : index
    %20 = vector.load %arg5[%c8, %c0_20] : memref<128x128xf32, #tpu.memory_space<vmem>>, vector<8x128xf32>
    %c1 = arith.constant 1 : index
    %c0_21 = arith.constant 0 : index
    %c0_22 = arith.constant 0 : index
    %21 = vector.load %arg3[%c1, %c0_21, %c0_22] : memref<16x128x128xf32, #tpu.memory_space<vmem>>, vector<1x128x128xf32>
    %22 = vector.shape_cast %21 : vector<1x128x128xf32> to vector<128x128xf32>
    %cst_23 = arith.constant dense<0.000000e+00> : vector<8x128xf32>
    %23 = tpu.matmul %20, %22, %cst_23 {dimension_numbers = #tpu.dot_dimension_numbers<[1], [0], [0], [1], [0, 0, 1, 1], [], []>} : vector<8x128xf32>, vector<128x128xf32>, vector<8x128xf32> -> vector<8x128xf32>
    %24 = arith.addf %19, %23 : vector<8x128xf32>
    %c16 = arith.constant 16 : index
    %c0_24 = arith.constant 0 : index
    %25 = vector.load %arg5[%c16, %c0_24] : memref<128x128xf32, #tpu.memory_space<vmem>>, vector<8x128xf32>
    %c2 = arith.constant 2 : index
    %c0_25 = arith.constant 0 : index
    %c0_26 = arith.constant 0 : index
    %26 = vector.load %arg3[%c2, %c0_25, %c0_26] : memref<16x128x128xf32, #tpu.memory_space<vmem>>, vector<1x128x128xf32>
    %27 = vector.shape_cast %26 : vector<1x128x128xf32> to vector<128x128xf32>
    %cst_27 = arith.constant dense<0.000000e+00> : vector<8x128xf32>
    %28 = tpu.matmul %25, %27, %cst_27 {dimension_numbers = #tpu.dot_dimension_numbers<[1], [0], [0], [1], [0, 0, 1, 1], [], []>} : vector<8x128xf32>, vector<128x128xf32>, vector<8x128xf32> -> vector<8x128xf32>
    %29 = arith.addf %24, %28 : vector<8x128xf32>
    %c24 = arith.constant 24 : index
    %c0_28 = arith.constant 0 : index
    %30 = vector.load %arg5[%c24, %c0_28] : memref<128x128xf32, #tpu.memory_space<vmem>>, vector<8x128xf32>
    %c3 = arith.constant 3 : index
    %c0_29 = arith.constant 0 : index
    %c0_30 = arith.constant 0 : index
    %31 = vector.load %arg3[%c3, %c0_29, %c0_30] : memref<16x128x128xf32, #tpu.memory_space<vmem>>, vector<1x128x128xf32>
    %32 = vector.shape_cast %31 : vector<1x128x128xf32> to vector<128x128xf32>
    %cst_31 = arith.constant dense<0.000000e+00> : vector<8x128xf32>
    %33 = tpu.matmul %30, %32, %cst_31 {dimension_numbers = #tpu.dot_dimension_numbers<[1], [0], [0], [1], [0, 0, 1, 1], [], []>} : vector<8x128xf32>, vector<128x128xf32>, vector<8x128xf32> -> vector<8x128xf32>
    %34 = arith.addf %29, %33 : vector<8x128xf32>
    %c32 = arith.constant 32 : index
    %c0_32 = arith.constant 0 : index
    %35 = vector.load %arg5[%c32, %c0_32] : memref<128x128xf32, #tpu.memory_space<vmem>>, vector<8x128xf32>
    %c4 = arith.constant 4 : index
    %c0_33 = arith.constant 0 : index
    %c0_34 = arith.constant 0 : index
    %36 = vector.load %arg3[%c4, %c0_33, %c0_34] : memref<16x128x128xf32, #tpu.memory_space<vmem>>, vector<1x128x128xf32>
    %37 = vector.shape_cast %36 : vector<1x128x128xf32> to vector<128x128xf32>
    %cst_35 = arith.constant dense<0.000000e+00> : vector<8x128xf32>
    %38 = tpu.matmul %35, %37, %cst_35 {dimension_numbers = #tpu.dot_dimension_numbers<[1], [0], [0], [1], [0, 0, 1, 1], [], []>} : vector<8x128xf32>, vector<128x128xf32>, vector<8x128xf32> -> vector<8x128xf32>
    %39 = arith.addf %34, %38 : vector<8x128xf32>
    %c40 = arith.constant 40 : index
    %c0_36 = arith.constant 0 : index
    %40 = vector.load %arg5[%c40, %c0_36] : memref<128x128xf32, #tpu.memory_space<vmem>>, vector<8x128xf32>
    %c5 = arith.constant 5 : index
    %c0_37 = arith.constant 0 : index
    %c0_38 = arith.constant 0 : index
    %41 = vector.load %arg3[%c5, %c0_37, %c0_38] : memref<16x128x128xf32, #tpu.memory_space<vmem>>, vector<1x128x128xf32>
    %42 = vector.shape_cast %41 : vector<1x128x128xf32> to vector<128x128xf32>
    %cst_39 = arith.constant dense<0.000000e+00> : vector<8x128xf32>
    %43 = tpu.matmul %40, %42, %cst_39 {dimension_numbers = #tpu.dot_dimension_numbers<[1], [0], [0], [1], [0, 0, 1, 1], [], []>} : vector<8x128xf32>, vector<128x128xf32>, vector<8x128xf32> -> vector<8x128xf32>
    %44 = arith.addf %39, %43 : vector<8x128xf32>
    %c48 = arith.constant 48 : index
    %c0_40 = arith.constant 0 : index
    %45 = vector.load %arg5[%c48, %c0_40] : memref<128x128xf32, #tpu.memory_space<vmem>>, vector<8x128xf32>
    %c6 = arith.constant 6 : index
    %c0_41 = arith.constant 0 : index
    %c0_42 = arith.constant 0 : index
    %46 = vector.load %arg3[%c6, %c0_41, %c0_42] : memref<16x128x128xf32, #tpu.memory_space<vmem>>, vector<1x128x128xf32>
    %47 = vector.shape_cast %46 : vector<1x128x128xf32> to vector<128x128xf32>
    %cst_43 = arith.constant dense<0.000000e+00> : vector<8x128xf32>
    %48 = tpu.matmul %45, %47, %cst_43 {dimension_numbers = #tpu.dot_dimension_numbers<[1], [0], [0], [1], [0, 0, 1, 1], [], []>} : vector<8x128xf32>, vector<128x128xf32>, vector<8x128xf32> -> vector<8x128xf32>
    %49 = arith.addf %44, %48 : vector<8x128xf32>
    %c56 = arith.constant 56 : index
    %c0_44 = arith.constant 0 : index
    %50 = vector.load %arg5[%c56, %c0_44] : memref<128x128xf32, #tpu.memory_space<vmem>>, vector<8x128xf32>
    %c7 = arith.constant 7 : index
    %c0_45 = arith.constant 0 : index
    %c0_46 = arith.constant 0 : index
    %51 = vector.load %arg3[%c7, %c0_45, %c0_46] : memref<16x128x128xf32, #tpu.memory_space<vmem>>, vector<1x128x128xf32>
    %52 = vector.shape_cast %51 : vector<1x128x128xf32> to vector<128x128xf32>
    %cst_47 = arith.constant dense<0.000000e+00> : vector<8x128xf32>
    %53 = tpu.matmul %50, %52, %cst_47 {dimension_numbers = #tpu.dot_dimension_numbers<[1], [0], [0], [1], [0, 0, 1, 1], [], []>} : vector<8x128xf32>, vector<128x128xf32>, vector<8x128xf32> -> vector<8x128xf32>
    %54 = arith.addf %49, %53 : vector<8x128xf32>
    %c64 = arith.constant 64 : index
    %c0_48 = arith.constant 0 : index
    %55 = vector.load %arg5[%c64, %c0_48] : memref<128x128xf32, #tpu.memory_space<vmem>>, vector<8x128xf32>
    %c8_49 = arith.constant 8 : index
    %c0_50 = arith.constant 0 : index
    %c0_51 = arith.constant 0 : index
    %56 = vector.load %arg3[%c8_49, %c0_50, %c0_51] : memref<16x128x128xf32, #tpu.memory_space<vmem>>, vector<1x128x128xf32>
    %57 = vector.shape_cast %56 : vector<1x128x128xf32> to vector<128x128xf32>
    %cst_52 = arith.constant dense<0.000000e+00> : vector<8x128xf32>
    %58 = tpu.matmul %55, %57, %cst_52 {dimension_numbers = #tpu.dot_dimension_numbers<[1], [0], [0], [1], [0, 0, 1, 1], [], []>} : vector<8x128xf32>, vector<128x128xf32>, vector<8x128xf32> -> vector<8x128xf32>
    %59 = arith.addf %54, %58 : vector<8x128xf32>
    %c72 = arith.constant 72 : index
    %c0_53 = arith.constant 0 : index
    %60 = vector.load %arg5[%c72, %c0_53] : memref<128x128xf32, #tpu.memory_space<vmem>>, vector<8x128xf32>
    %c9 = arith.constant 9 : index
    %c0_54 = arith.constant 0 : index
    %c0_55 = arith.constant 0 : index
    %61 = vector.load %arg3[%c9, %c0_54, %c0_55] : memref<16x128x128xf32, #tpu.memory_space<vmem>>, vector<1x128x128xf32>
    %62 = vector.shape_cast %61 : vector<1x128x128xf32> to vector<128x128xf32>
    %cst_56 = arith.constant dense<0.000000e+00> : vector<8x128xf32>
    %63 = tpu.matmul %60, %62, %cst_56 {dimension_numbers = #tpu.dot_dimension_numbers<[1], [0], [0], [1], [0, 0, 1, 1], [], []>} : vector<8x128xf32>, vector<128x128xf32>, vector<8x128xf32> -> vector<8x128xf32>
    %64 = arith.addf %59, %63 : vector<8x128xf32>
    %c80 = arith.constant 80 : index
    %c0_57 = arith.constant 0 : index
    %65 = vector.load %arg5[%c80, %c0_57] : memref<128x128xf32, #tpu.memory_space<vmem>>, vector<8x128xf32>
    %c10 = arith.constant 10 : index
    %c0_58 = arith.constant 0 : index
    %c0_59 = arith.constant 0 : index
    %66 = vector.load %arg3[%c10, %c0_58, %c0_59] : memref<16x128x128xf32, #tpu.memory_space<vmem>>, vector<1x128x128xf32>
    %67 = vector.shape_cast %66 : vector<1x128x128xf32> to vector<128x128xf32>
    %cst_60 = arith.constant dense<0.000000e+00> : vector<8x128xf32>
    %68 = tpu.matmul %65, %67, %cst_60 {dimension_numbers = #tpu.dot_dimension_numbers<[1], [0], [0], [1], [0, 0, 1, 1], [], []>} : vector<8x128xf32>, vector<128x128xf32>, vector<8x128xf32> -> vector<8x128xf32>
    %69 = arith.addf %64, %68 : vector<8x128xf32>
    %c88 = arith.constant 88 : index
    %c0_61 = arith.constant 0 : index
    %70 = vector.load %arg5[%c88, %c0_61] : memref<128x128xf32, #tpu.memory_space<vmem>>, vector<8x128xf32>
    %c11 = arith.constant 11 : index
    %c0_62 = arith.constant 0 : index
    %c0_63 = arith.constant 0 : index
    %71 = vector.load %arg3[%c11, %c0_62, %c0_63] : memref<16x128x128xf32, #tpu.memory_space<vmem>>, vector<1x128x128xf32>
    %72 = vector.shape_cast %71 : vector<1x128x128xf32> to vector<128x128xf32>
    %cst_64 = arith.constant dense<0.000000e+00> : vector<8x128xf32>
    %73 = tpu.matmul %70, %72, %cst_64 {dimension_numbers = #tpu.dot_dimension_numbers<[1], [0], [0], [1], [0, 0, 1, 1], [], []>} : vector<8x128xf32>, vector<128x128xf32>, vector<8x128xf32> -> vector<8x128xf32>
    %74 = arith.addf %69, %73 : vector<8x128xf32>
    %c96 = arith.constant 96 : index
    %c0_65 = arith.constant 0 : index
    %75 = vector.load %arg5[%c96, %c0_65] : memref<128x128xf32, #tpu.memory_space<vmem>>, vector<8x128xf32>
    %c12 = arith.constant 12 : index
    %c0_66 = arith.constant 0 : index
    %c0_67 = arith.constant 0 : index
    %76 = vector.load %arg3[%c12, %c0_66, %c0_67] : memref<16x128x128xf32, #tpu.memory_space<vmem>>, vector<1x128x128xf32>
    %77 = vector.shape_cast %76 : vector<1x128x128xf32> to vector<128x128xf32>
    %cst_68 = arith.constant dense<0.000000e+00> : vector<8x128xf32>
    %78 = tpu.matmul %75, %77, %cst_68 {dimension_numbers = #tpu.dot_dimension_numbers<[1], [0], [0], [1], [0, 0, 1, 1], [], []>} : vector<8x128xf32>, vector<128x128xf32>, vector<8x128xf32> -> vector<8x128xf32>
    %79 = arith.addf %74, %78 : vector<8x128xf32>
    %c104 = arith.constant 104 : index
    %c0_69 = arith.constant 0 : index
    %80 = vector.load %arg5[%c104, %c0_69] : memref<128x128xf32, #tpu.memory_space<vmem>>, vector<8x128xf32>
    %c13 = arith.constant 13 : index
    %c0_70 = arith.constant 0 : index
    %c0_71 = arith.constant 0 : index
    %81 = vector.load %arg3[%c13, %c0_70, %c0_71] : memref<16x128x128xf32, #tpu.memory_space<vmem>>, vector<1x128x128xf32>
    %82 = vector.shape_cast %81 : vector<1x128x128xf32> to vector<128x128xf32>
    %cst_72 = arith.constant dense<0.000000e+00> : vector<8x128xf32>
    %83 = tpu.matmul %80, %82, %cst_72 {dimension_numbers = #tpu.dot_dimension_numbers<[1], [0], [0], [1], [0, 0, 1, 1], [], []>} : vector<8x128xf32>, vector<128x128xf32>, vector<8x128xf32> -> vector<8x128xf32>
    %84 = arith.addf %79, %83 : vector<8x128xf32>
    %c112 = arith.constant 112 : index
    %c0_73 = arith.constant 0 : index
    %85 = vector.load %arg5[%c112, %c0_73] : memref<128x128xf32, #tpu.memory_space<vmem>>, vector<8x128xf32>
    %c14 = arith.constant 14 : index
    %c0_74 = arith.constant 0 : index
    %c0_75 = arith.constant 0 : index
    %86 = vector.load %arg3[%c14, %c0_74, %c0_75] : memref<16x128x128xf32, #tpu.memory_space<vmem>>, vector<1x128x128xf32>
    %87 = vector.shape_cast %86 : vector<1x128x128xf32> to vector<128x128xf32>
    %cst_76 = arith.constant dense<0.000000e+00> : vector<8x128xf32>
    %88 = tpu.matmul %85, %87, %cst_76 {dimension_numbers = #tpu.dot_dimension_numbers<[1], [0], [0], [1], [0, 0, 1, 1], [], []>} : vector<8x128xf32>, vector<128x128xf32>, vector<8x128xf32> -> vector<8x128xf32>
    %89 = arith.addf %84, %88 : vector<8x128xf32>
    %c120 = arith.constant 120 : index
    %c0_77 = arith.constant 0 : index
    %90 = vector.load %arg5[%c120, %c0_77] : memref<128x128xf32, #tpu.memory_space<vmem>>, vector<8x128xf32>
    %c15 = arith.constant 15 : index
    %c0_78 = arith.constant 0 : index
    %c0_79 = arith.constant 0 : index
    %91 = vector.load %arg3[%c15, %c0_78, %c0_79] : memref<16x128x128xf32, #tpu.memory_space<vmem>>, vector<1x128x128xf32>
    %92 = vector.shape_cast %91 : vector<1x128x128xf32> to vector<128x128xf32>
    %cst_80 = arith.constant dense<0.000000e+00> : vector<8x128xf32>
    %93 = tpu.matmul %90, %92, %cst_80 {dimension_numbers = #tpu.dot_dimension_numbers<[1], [0], [0], [1], [0, 0, 1, 1], [], []>} : vector<8x128xf32>, vector<128x128xf32>, vector<8x128xf32> -> vector<8x128xf32>
    %94 = arith.addf %89, %93 : vector<8x128xf32>
    %c0_81 = arith.constant 0 : index
    %c0_82 = arith.constant 0 : index
    %95 = vector.load %arg4[%c0_81, %c0_82] : memref<1x128xf32, #tpu.memory_space<vmem>>, vector<1x128xf32>
    %96 = vector.broadcast %95 : vector<1x128xf32> to vector<8x128xf32>
    %97 = arith.addf %94, %96 : vector<8x128xf32>
    %c0_83 = arith.constant 0 : index
    %c0_84 = arith.constant 0 : index
    %98 = vector.load %arg6[%c0_83, %c0_84] : memref<8x128xf32, #tpu.memory_space<vmem>>, vector<8x128xf32>
    tpu.vector_store %arg6[%c0_83, %c0_84], %97 {strides = array<i32>} : memref<8x128xf32, #tpu.memory_space<vmem>>, vector<8x128xf32>,
    return
  }
  func.func @transform_0(%arg0: i32) -> (i32, i32) {
    %c0_i32 = arith.constant 0 : i32
    %c0_i32_0 = arith.constant 0 : i32
    return %arg0, %c0_i32 : i32, i32
  }
  func.func @transform_1(%arg0: i32) -> (i32, i32) {
    %c0_i32 = arith.constant 0 : i32
    %c0_i32_0 = arith.constant 0 : i32
    %c0_i32_1 = arith.constant 0 : i32
    return %c0_i32, %c0_i32_0 : i32, i32
  }
  func.func @transform_2(%arg0: i32) -> (i32, i32, i32) {
    %c0_i32 = arith.constant 0 : i32
    %c0_i32_0 = arith.constant 0 : i32
    %c0_i32_1 = arith.constant 0 : i32
    %c0_i32_2 = arith.constant 0 : i32
    return %c0_i32, %c0_i32_0, %c0_i32_1 : i32, i32, i32
  }
  func.func @transform_3(%arg0: i32) -> (i32, i32) {
    %c0_i32 = arith.constant 0 : i32
    %c0_i32_0 = arith.constant 0 : i32
    %c0_i32_1 = arith.constant 0 : i32
    return %c0_i32, %c0_i32_0 : i32, i32
  }
  func.func @transform_4(%arg0: i32) -> (i32, i32) {
    %c0_i32 = arith.constant 0 : i32
    %c0_i32_0 = arith.constant 0 : i32
    return %arg0, %c0_i32 : i32, i32
  }
  func.func @transform_5(%arg0: i32) -> (i32, i32) {
    %c0_i32 = arith.constant 0 : i32
    %c0_i32_0 = arith.constant 0 : i32
    return %arg0, %c0_i32 : i32, i32
  }
}

</mosaic_0001>

<bundles_post_ra>
// kernel: cnn_forward.2
= control target key start
LH: loop header
LB: loop body
LE: loop exit
PB: predicated region body
PF: predicated region fallthrough
CT: control target
= control target key end

     0   :  { %vm591_vm0 = vcmask 261120   ;;  %s12808_s1 = inlined_call_operand.vmem [shape: f32[32,128], index: 1, kind: input, shape index: {}]   ;;  %s12809_s0 = inlined_call_operand.vmem [shape: f32[4608,32], index: 0, kind: input, shape index: {}]   ;;  %s12810_s2 = inlined_call_operand.vmem [shape: f32[1152,128], index: 2, kind: output, shape index: {}]  }
   0x1   :  { %v587_v0 = vld [vmem:[%s12808_s1] sm:$0xff]  ;;  %v588_v1 = vld [vmem:[%s12808_s1 + $0x8] sm:$0xff]  ;;  %v589_v2 = vld [vmem:[%s12808_s1 + $0x10] sm:$0xff] }
   0x2   :  { %v9169_v3 = vpack.c.bf16 %v588_v1, %v587_v0  ;;  %v590_v4 = vld [vmem:[%s12808_s1 + $0x18] sm:$0xff]  ;;  %v11_v5 = vld [vmem:[%s12809_s0] sm:$0xff]  ;;  %v12_v8 = vld [vmem:[%s12809_s0 + $0x8] sm:$0xff] }
   0x3   :  { %v299_v6 = vld [vmem:[%s12809_s0 + $0x900] sm:$0xff]  ;;  %v9173_v7 = vpack.c.bf16 %v590_v4, %v589_v2  ;;  %8305 = vmatprep.mubr.msk.f32.mxu0 %vm591_vm0, %v11_v5  ;;  %v300_v9 = vld [vmem:[%s12809_s0 + $0x908] sm:$0xff]  ;;  %v13_v10 = vld [vmem:[%s12809_s0 + $0x10] sm:$0xff] }
   0x4   :  { %8737 = vmatprep.mubr.msk.f32.mxu1 %vm591_vm0, %v299_v6  ;;  %9170 = vmatprep.subr.bf16.mxu0 %v9169_v3  ;;  %v301_v11 = vld [vmem:[%s12809_s0 + $0x910] sm:$0xff]  ;;  %v14_v12 = vld [vmem:[%s12809_s0 + $0x18] sm:$0xff]  ;;  %v15_v14 = vld [vmem:[%s12809_s0 + $0x20] sm:$0xff] }
   0x5   :  { %9177 = vmatprep.subr.bf16.mxu1 %v9169_v3  ;;  %9172 = vmatpush3.bf16.msra.mxu0 %v9169_v3  ;;  %v302_v13 = vld [vmem:[%s12809_s0 + $0x918] sm:$0xff]  ;;  %v303_v15 = vld [vmem:[%s12809_s0 + $0x920] sm:$0xff]  ;;  %v16_v16 = vld [vmem:[%s12809_s0 + $0x28] sm:$0xff] }
   0x6   :  { %9179 = vmatpush3.bf16.msra.mxu1 %v9169_v3  ;;  %9174 = vmatprep.subr.bf16.mxu0 %v9173_v7  ;;  %v304_v17 = vld [vmem:[%s12809_s0 + $0x928] sm:$0xff]  ;;  %v17_v18 = vld [vmem:[%s12809_s0 + $0x30] sm:$0xff]  ;;  %v18_v20 = vld [vmem:[%s12809_s0 + $0x38] sm:$0xff] }
   0x7   :  { %9178 = vmatprep.subr.bf16.mxu1 %v9173_v7  ;;  %v305_v19 = vld [vmem:[%s12809_s0 + $0x930] sm:$0xff]  ;;  %v306_v21 = vld [vmem:[%s12809_s0 + $0x938] sm:$0xff]  ;;  %v19_v22 = vld [vmem:[%s12809_s0 + $0x40] sm:$0xff] }
   0x8   :  { %v307_v23 = vld [vmem:[%s12809_s0 + $0x940] sm:$0xff]  ;;  %v20_v24 = vld [vmem:[%s12809_s0 + $0x48] sm:$0xff]  ;;  %v21_v26 = vld [vmem:[%s12809_s0 + $0x50] sm:$0xff] }
   0x9   :  { %9176 = vmatpush3.bf16.msra.mxu0 %v9173_v7  ;;  %v308_v25 = vld [vmem:[%s12809_s0 + $0x948] sm:$0xff]  ;;  %v309_v27 = vld [vmem:[%s12809_s0 + $0x950] sm:$0xff]  ;;  %v22_v28 = vld [vmem:[%s12809_s0 + $0x58] sm:$0xff] }
   0xa   :  { %9180 = vmatpush3.bf16.msra.mxu1 %v9173_v7  ;;  %v310_v29 = vld [vmem:[%s12809_s0 + $0x958] sm:$0xff]  ;;  %v23_v30 = vld [vmem:[%s12809_s0 + $0x60] sm:$0xff]  ;;  %v24_v32 = vld [vmem:[%s12809_s0 + $0x68] sm:$0xff] }
   0xb   :  { %v311_v31 = vld [vmem:[%s12809_s0 + $0x960] sm:$0xff]  ;;  %v312_v33 = vld [vmem:[%s12809_s0 + $0x968] sm:$0xff]  ;;  %v25_v34 = vld [vmem:[%s12809_s0 + $0x70] sm:$0xff] }
   0xc   :  { %8306 = vmatmul.mubr.msk.f32.vlgmr.msra.gmra.mrb[0].mxu0 %vm591_vm0, %v12_v8  ;;  %v313_v35 = vld [vmem:[%s12809_s0 + $0x970] sm:$0xff]  ;;  %v26_v36 = vld [vmem:[%s12809_s0 + $0x78] sm:$0xff]  ;;  %v27_v38 = vld [vmem:[%s12809_s0 + $0x80] sm:$0xff] }
   0xd   :  { %8738 = vmatmul.mubr.msk.f32.vlgmr.msra.gmra.mrb[0].mxu1 %vm591_vm0, %v300_v9  ;;  %8308 = vmatprep.mubr.msk.f32.mxu0 %vm591_vm0, %v13_v10  ;;  %v314_v37 = vld [vmem:[%s12809_s0 + $0x978] sm:$0xff]  ;;  %v315_v39 = vld [vmem:[%s12809_s0 + $0x980] sm:$0xff]  ;;  %v28_v40 = vld [vmem:[%s12809_s0 + $0x88] sm:$0xff] }
   0xe   :  { %8740 = vmatprep.mubr.msk.f32.mxu1 %vm591_vm0, %v301_v11  ;;  %v316_v41 = vld [vmem:[%s12809_s0 + $0x988] sm:$0xff]  ;;  %v29_v42 = vld [vmem:[%s12809_s0 + $0x90] sm:$0xff]  ;;  %v30_v44 = vld [vmem:[%s12809_s0 + $0x98] sm:$0xff] }
   0xf   :  { %v317_v43 = vld [vmem:[%s12809_s0 + $0x990] sm:$0xff]  ;;  %v318_v45 = vld [vmem:[%s12809_s0 + $0x998] sm:$0xff]  ;;  %v31_v46 = vld [vmem:[%s12809_s0 + $0xa0] sm:$0xff] }
  0x10   :  { %8309 = vmatmul.mubr.msk.f32.gmra.mrb[2].mxu0 %vm591_vm0, %v14_v12  ;;  %v319_v47 = vld [vmem:[%s12809_s0 + $0x9a0] sm:$0xff]  ;;  %v32_v48 = vld [vmem:[%s12809_s0 + $0xa8] sm:$0xff]  ;;  %v33_v50 = vld [vmem:[%s12809_s0 + $0xb0] sm:$0xff] }
  0x11   :  { %8741 = vmatmul.mubr.msk.f32.gmra.mrb[2].mxu1 %vm591_vm0, %v302_v13  ;;  %8311 = vmatprep.mubr.msk.f32.mxu0 %vm591_vm0, %v15_v14  ;;  %v320_v49 = vld [vmem:[%s12809_s0 + $0x9a8] sm:$0xff]  ;;  %v321_v51 = vld [vmem:[%s12809_s0 + $0x9b0] sm:$0xff]  ;;  %v34_v52 = vld [vmem:[%s12809_s0 + $0xb8] sm:$0xff] }
  0x12   :  { %8743 = vmatprep.mubr.msk.f32.mxu1 %vm591_vm0, %v303_v15  ;;  %v322_v53 = vld [vmem:[%s12809_s0 + $0x9b8] sm:$0xff]  ;;  %v35_v54 = vld [vmem:[%s12809_s0 + $0xc0] sm:$0xff]  ;;  %v36_v56 = vld [vmem:[%s12809_s0 + $0xc8] sm:$0xff] }
  0x13   :  { %v323_v55 = vld [vmem:[%s12809_s0 + $0x9c0] sm:$0xff]  ;;  %v324_v57 = vld [vmem:[%s12809_s0 + $0x9c8] sm:$0xff]  ;;  %v37_v58 = vld [vmem:[%s12809_s0 + $0xd0] sm:$0xff] }
  0x14   :  { %8312 = vmatmul.mubr.msk.f32.gmra.mrb[4].mxu0 %vm591_vm0, %v16_v16  ;;  %v325_v59 = vld [vmem:[%s12809_s0 + $0x9d0] sm:$0xff]  ;;  %v38_v60 = vld [vmem:[%s12809_s0 + $0xd8] sm:$0xff]  ;;  %v39_v62 = vld [vmem:[%s12809_s0 + $0xe0] sm:$0xff] }
  0x15   :  { %8744 = vmatmul.mubr.msk.f32.gmra.mrb[4].mxu1 %vm591_vm0, %v304_v17  ;;  %8314 = vmatprep.mubr.msk.f32.mxu0 %vm591_vm0, %v17_v18  ;;  %v326_v61 = vld [vmem:[%s12809_s0 + $0x9d8] sm:$0xff]  ;;  %v327_v63 = vld [vmem:[%s12809_s0 + $0x9e0] sm:$0xff]  ;;  %v40_v0 = vld [vmem:[%s12809_s0 + $0xe8] sm:$0xff] }
  0x16   :  { %8746 = vmatprep.mubr.msk.f32.mxu1 %vm591_vm0, %v305_v19  ;;  %v328_v1 = vld [vmem:[%s12809_s0 + $0x9e8] sm:$0xff]  ;;  %v41_v2 = vld [vmem:[%s12809_s0 + $0xf0] sm:$0xff]  ;;  %v42_v4 = vld [vmem:[%s12809_s0 + $0xf8] sm:$0xff] }
  0x17   :  { %v329_v3 = vld [vmem:[%s12809_s0 + $0x9f0] sm:$0xff]  ;;  %v330_v5 = vld [vmem:[%s12809_s0 + $0x9f8] sm:$0xff]  ;;  %v43_v6 = vld [vmem:[%s12809_s0 + $0x100] sm:$0xff] }
  0x18   :  { %8315 = vmatmul.mubr.msk.f32.gmra.mrb[6].mxu0 %vm591_vm0, %v18_v20  ;;  %v331_v7 = vld [vmem:[%s12809_s0 + $0xa00] sm:$0xff]  ;;  %v44_v8 = vld [vmem:[%s12809_s0 + $0x108] sm:$0xff]  ;;  %v45_v10 = vld [vmem:[%s12809_s0 + $0x110] sm:$0xff] }
  0x19   :  { %8747 = vmatmul.mubr.msk.f32.gmra.mrb[6].mxu1 %vm591_vm0, %v306_v21  ;;  %8317 = vmatprep.mubr.msk.f32.mxu0 %vm591_vm0, %v19_v22  ;;  %v332_v9 = vld [vmem:[%s12809_s0 + $0xa08] sm:$0xff]  ;;  %v333_v11 = vld [vmem:[%s12809_s0 + $0xa10] sm:$0xff]  ;;  %v46_v12 = vld [vmem:[%s12809_s0 + $0x118] sm:$0xff] }
  0x1a   :  { %8749 = vmatprep.mubr.msk.f32.mxu1 %vm591_vm0, %v307_v23  ;;  %v334_v13 = vld [vmem:[%s12809_s0 + $0xa18] sm:$0xff]  ;;  %v47_v14 = vld [vmem:[%s12809_s0 + $0x120] sm:$0xff]  ;;  %v48_v16 = vld [vmem:[%s12809_s0 + $0x128] sm:$0xff] }
  0x1b   :  { %v335_v15 = vld [vmem:[%s12809_s0 + $0xa20] sm:$0xff]  ;;  %v336_v17 = vld [vmem:[%s12809_s0 + $0xa28] sm:$0xff]  ;;  %v49_v18 = vld [vmem:[%s12809_s0 + $0x130] sm:$0xff] }
  0x1c   :  { %8318 = vmatmul.mubr.msk.f32.gmra.mrb[8].mxu0 %vm591_vm0, %v20_v24  ;;  %v337_v19 = vld [vmem:[%s12809_s0 + $0xa30] sm:$0xff]  ;;  %v50_v20 = vld [vmem:[%s12809_s0 + $0x138] sm:$0xff]  ;;  %v51_v22 = vld [vmem:[%s12809_s0 + $0x140] sm:$0xff] }
  0x1d   :  { %8750 = vmatmul.mubr.msk.f32.gmra.mrb[8].mxu1 %vm591_vm0, %v308_v25  ;;  %8320 = vmatprep.mubr.msk.f32.mxu0 %vm591_vm0, %v21_v26  ;;  %v338_v21 = vld [vmem:[%s12809_s0 + $0xa38] sm:$0xff]  ;;  %v339_v23 = vld [vmem:[%s12809_s0 + $0xa40] sm:$0xff]  ;;  %v52_v24 = vld [vmem:[%s12809_s0 + $0x148] sm:$0xff] }
  0x1e   :  { %8752 = vmatprep.mubr.msk.f32.mxu1 %vm591_vm0, %v309_v27  ;;  %v340_v25 = vld [vmem:[%s12809_s0 + $0xa48] sm:$0xff]  ;;  %v53_v26 = vld [vmem:[%s12809_s0 + $0x150] sm:$0xff] }
  0x1f   :  { %v341_v27 = vld [vmem:[%s12809_s0 + $0xa50] sm:$0xff] }
  0x20   :  { %8321 = vmatmul.mubr.msk.f32.gmra.mrb[10].mxu0 %vm591_vm0, %v22_v28  ;;  %v54_v28 = vld [vmem:[%s12809_s0 + $0x158] sm:$0xff] }
  0x21   :  { %8753 = vmatmul.mubr.msk.f32.gmra.mrb[10].mxu1 %vm591_vm0, %v310_v29  ;;  %8323 = vmatprep.mubr.msk.f32.mxu0 %vm591_vm0, %v23_v30  ;;  %v342_v29 = vld [vmem:[%s12809_s0 + $0xa58] sm:$0xff]  ;;  %v55_v30 = vld [vmem:[%s12809_s0 + $0x160] sm:$0xff] }
  0x22   :  { %8755 = vmatprep.mubr.msk.f32.mxu1 %vm591_vm0, %v311_v31  ;;  %v343_v31 = vld [vmem:[%s12809_s0 + $0xa60] sm:$0xff] }
  0x24   :  { %8324 = vmatmul.mubr.msk.f32.gmra.mrb[12].mxu0 %vm591_vm0, %v24_v32  ;;  %v56_v32 = vld [vmem:[%s12809_s0 + $0x168] sm:$0xff] }
  0x25   :  { %8756 = vmatmul.mubr.msk.f32.gmra.mrb[12].mxu1 %vm591_vm0, %v312_v33  ;;  %8326 = vmatprep.mubr.msk.f32.mxu0 %vm591_vm0, %v25_v34  ;;  %v344_v33 = vld [vmem:[%s12809_s0 + $0xa68] sm:$0xff]  ;;  %v57_v34 = vld [vmem:[%s12809_s0 + $0x170] sm:$0xff] }
  0x26   :  { %8758 = vmatprep.mubr.msk.f32.mxu1 %vm591_vm0, %v313_v35  ;;  %v345_v35 = vld [vmem:[%s12809_s0 + $0xa70] sm:$0xff] }
  0x28   :  { %8327 = vmatmul.mubr.msk.f32.gmra.mrb[14].mxu0 %vm591_vm0, %v26_v36  ;;  %v58_v36 = vld [vmem:[%s12809_s0 + $0x178] sm:$0xff] }
  0x29   :  { %8759 = vmatmul.mubr.msk.f32.gmra.mrb[14].mxu1 %vm591_vm0, %v314_v37  ;;  %8329 = vmatprep.mubr.msk.f32.mxu0 %vm591_vm0, %v27_v38  ;;  %v346_v37 = vld [vmem:[%s12809_s0 + $0xa78] sm:$0xff]  ;;  %v59_v38 = vld [vmem:[%s12809_s0 + $0x180] sm:$0xff] }
  0x2a   :  { %8761 = vmatprep.mubr.msk.f32.mxu1 %vm591_vm0, %v315_v39  ;;  %v347_v39 = vld [vmem:[%s12809_s0 + $0xa80] sm:$0xff] }
  0x2c   :  { %8330 = vmatmul.mubr.msk.f32.gmra.mrb[16].mxu0 %vm591_vm0, %v28_v40  ;;  %v60_v40 = vld [vmem:[%s12809_s0 + $0x188] sm:$0xff] }
  0x2d   :  { %8762 = vmatmul.mubr.msk.f32.gmra.mrb[16].mxu1 %vm591_vm0, %v316_v41  ;;  %8332 = vmatprep.mubr.msk.f32.mxu0 %vm591_vm0, %v29_v42  ;;  %v348_v41 = vld [vmem:[%s12809_s0 + $0xa88] sm:$0xff]  ;;  %v61_v42 = vld [vmem:[%s12809_s0 + $0x190] sm:$0xff] }
  0x2e   :  { %8764 = vmatprep.mubr.msk.f32.mxu1 %vm591_vm0, %v317_v43  ;;  %v349_v43 = vld [vmem:[%s12809_s0 + $0xa90] sm:$0xff] }
  0x30   :  { %8333 = vmatmul.mubr.msk.f32.gmra.mrb[18].mxu0 %vm591_vm0, %v30_v44  ;;  %v62_v44 = vld [vmem:[%s12809_s0 + $0x198] sm:$0xff] }
  0x31   :  { %8765 = vmatmul.mubr.msk.f32.gmra.mrb[18].mxu1 %vm591_vm0, %v318_v45  ;;  %8335 = vmatprep.mubr.msk.f32.mxu0 %vm591_vm0, %v31_v46  ;;  %v350_v45 = vld [vmem:[%s12809_s0 + $0xa98] sm:$0xff]  ;;  %v63_v46 = vld [vmem:[%s12809_s0 + $0x1a0] sm:$0xff] }
  0x32   :  { %8767 = vmatprep.mubr.msk.f32.mxu1 %vm591_vm0, %v319_v47  ;;  %v351_v47 = vld [vmem:[%s12809_s0 + $0xaa0] sm:$0xff] }
  0x34   :  { %8336 = vmatmul.mubr.msk.f32.gmra.mrb[20].mxu0 %vm591_vm0, %v32_v48  ;;  %v64_v48 = vld [vmem:[%s12809_s0 + $0x1a8] sm:$0xff] }
  0x35   :  { %8768 = vmatmul.mubr.msk.f32.gmra.mrb[20].mxu1 %vm591_vm0, %v320_v49  ;;  %8338 = vmatprep.mubr.msk.f32.mxu0 %vm591_vm0, %v33_v50  ;;  %v352_v49 = vld [vmem:[%s12809_s0 + $0xaa8] sm:$0xff]  ;;  %v65_v50 = vld [vmem:[%s12809_s0 + $0x1b0] sm:$0xff] }
  0x36   :  { %8770 = vmatprep.mubr.msk.f32.mxu1 %vm591_vm0, %v321_v51  ;;  %v353_v51 = vld [vmem:[%s12809_s0 + $0xab0] sm:$0xff] }
  0x38   :  { %8339 = vmatmul.mubr.msk.f32.gmra.mrb[22].mxu0 %vm591_vm0, %v34_v52  ;;  %v66_v52 = vld [vmem:[%s12809_s0 + $0x1b8] sm:$0xff] }
  0x39   :  { %8771 = vmatmul.mubr.msk.f32.gmra.mrb[22].mxu1 %vm591_vm0, %v322_v53  ;;  %8341 = vmatprep.mubr.msk.f32.mxu0 %vm591_vm0, %v35_v54  ;;  %v354_v53 = vld [vmem:[%s12809_s0 + $0xab8] sm:$0xff]  ;;  %v67_v54 = vld [vmem:[%s12809_s0 + $0x1c0] sm:$0xff] }
  0x3a   :  { %8773 = vmatprep.mubr.msk.f32.mxu1 %vm591_vm0, %v323_v55  ;;  %v355_v55 = vld [vmem:[%s12809_s0 + $0xac0] sm:$0xff] }
  0x3c   :  { %8342 = vmatmul.mubr.msk.f32.gmra.mrb[24].mxu0 %vm591_vm0, %v36_v56  ;;  %v68_v56 = vld [vmem:[%s12809_s0 + $0x1c8] sm:$0xff] }
  0x3d   :  { %8774 = vmatmul.mubr.msk.f32.gmra.mrb[24].mxu1 %vm591_vm0, %v324_v57  ;;  %8344 = vmatprep.mubr.msk.f32.mxu0 %vm591_vm0, %v37_v58  ;;  %v356_v57 = vld [vmem:[%s12809_s0 + $0xac8] sm:$0xff]  ;;  %v69_v58 = vld [vmem:[%s12809_s0 + $0x1d0] sm:$0xff] }
  0x3e   :  { %8776 = vmatprep.mubr.msk.f32.mxu1 %vm591_vm0, %v325_v59  ;;  %v357_v59 = vld [vmem:[%s12809_s0 + $0xad0] sm:$0xff] }
  0x40   :  { %8345 = vmatmul.mubr.msk.f32.gmra.mrb[26].mxu0 %vm591_vm0, %v38_v60  ;;  %v70_v60 = vld [vmem:[%s12809_s0 + $0x1d8] sm:$0xff] }
  0x41   :  { %8777 = vmatmul.mubr.msk.f32.gmra.mrb[26].mxu1 %vm591_vm0, %v326_v61  ;;  %8347 = vmatprep.mubr.msk.f32.mxu0 %vm591_vm0, %v39_v62  ;;  %v358_v61 = vld [vmem:[%s12809_s0 + $0xad8] sm:$0xff]  ;;  %v71_v62 = vld [vmem:[%s12809_s0 + $0x1e0] sm:$0xff] }
  0x42   :  { %8779 = vmatprep.mubr.msk.f32.mxu1 %vm591_vm0, %v327_v63  ;;  %v359_v63 = vld [vmem:[%s12809_s0 + $0xae0] sm:$0xff] }
  0x44   :  { %8348 = vmatmul.mubr.msk.f32.gmra.mrb[28].mxu0 %vm591_vm0, %v40_v0  ;;  %v72_v0 = vld [vmem:[%s12809_s0 + $0x1e8] sm:$0xff] }
  0x45   :  { %8780 = vmatmul.mubr.msk.f32.gmra.mrb[28].mxu1 %vm591_vm0, %v328_v1  ;;  %8350 = vmatprep.mubr.msk.f32.mxu0 %vm591_vm0, %v41_v2  ;;  %v360_v1 = vld [vmem:[%s12809_s0 + $0xae8] sm:$0xff]  ;;  %v73_v2 = vld [vmem:[%s12809_s0 + $0x1f0] sm:$0xff] }
  0x46   :  { %8782 = vmatprep.mubr.msk.f32.mxu1 %vm591_vm0, %v329_v3  ;;  %v361_v3 = vld [vmem:[%s12809_s0 + $0xaf0] sm:$0xff] }
  0x48   :  { %8351 = vmatmul.mubr.msk.f32.gmra.mrb[30].mxu0 %vm591_vm0, %v42_v4  ;;  %v74_v4 = vld [vmem:[%s12809_s0 + $0x1f8] sm:$0xff] }
  0x49   :  { %8783 = vmatmul.mubr.msk.f32.gmra.mrb[30].mxu1 %vm591_vm0, %v330_v5  ;;  %8353 = vmatprep.mubr.msk.f32.mxu0 %vm591_vm0, %v43_v6  ;;  %v362_v5 = vld [vmem:[%s12809_s0 + $0xaf8] sm:$0xff]  ;;  %v75_v6 = vld [vmem:[%s12809_s0 + $0x200] sm:$0xff] }
  0x4a   :  { %8785 = vmatprep.mubr.msk.f32.mxu1 %vm591_vm0, %v331_v7  ;;  %v363_v7 = vld [vmem:[%s12809_s0 + $0xb00] sm:$0xff] }
  0x4c   :  { %8354 = vmatmul.mubr.msk.f32.gmra.mrb[32].mxu0 %vm591_vm0, %v44_v8  ;;  %v76_v8 = vld [vmem:[%s12809_s0 + $0x208] sm:$0xff] }
  0x4d   :  { %8786 = vmatmul.mubr.msk.f32.gmra.mrb[32].mxu1 %vm591_vm0, %v332_v9  ;;  %8356 = vmatprep.mubr.msk.f32.mxu0 %vm591_vm0, %v45_v10  ;;  %v364_v9 = vld [vmem:[%s12809_s0 + $0xb08] sm:$0xff]  ;;  %v77_v10 = vld [vmem:[%s12809_s0 + $0x210] sm:$0xff] }
  0x4e   :  { %8788 = vmatprep.mubr.msk.f32.mxu1 %vm591_vm0, %v333_v11  ;;  %v365_v11 = vld [vmem:[%s12809_s0 + $0xb10] sm:$0xff] }
  0x50   :  { %8357 = vmatmul.mubr.msk.f32.gmra.mrb[34].mxu0 %vm591_vm0, %v46_v12  ;;  %v78_v12 = vld [vmem:[%s12809_s0 + $0x218] sm:$0xff] }
  0x51   :  { %8789 = vmatmul.mubr.msk.f32.gmra.mrb[34].mxu1 %vm591_vm0, %v334_v13  ;;  %8359 = vmatprep.mubr.msk.f32.mxu0 %vm591_vm0, %v47_v14  ;;  %v366_v13 = vld [vmem:[%s12809_s0 + $0xb18] sm:$0xff]  ;;  %v79_v14 = vld [vmem:[%s12809_s0 + $0x220] sm:$0xff] }
  0x52   :  { %8791 = vmatprep.mubr.msk.f32.mxu1 %vm591_vm0, %v335_v15  ;;  %v367_v15 = vld [vmem:[%s12809_s0 + $0xb20] sm:$0xff] }
  0x54   :  { %8360 = vmatmul.mubr.msk.f32.gmra.mrb[36].mxu0 %vm591_vm0, %v48_v16  ;;  %v80_v16 = vld [vmem:[%s12809_s0 + $0x228] sm:$0xff] }
  0x55   :  { %8792 = vmatmul.mubr.msk.f32.gmra.mrb[36].mxu1 %vm591_vm0, %v336_v17  ;;  %8362 = vmatprep.mubr.msk.f32.mxu0 %vm591_vm0, %v49_v18  ;;  %v368_v17 = vld [vmem:[%s12809_s0 + $0xb28] sm:$0xff]  ;;  %v81_v18 = vld [vmem:[%s12809_s0 + $0x230] sm:$0xff] }
  0x56   :  { %8794 = vmatprep.mubr.msk.f32.mxu1 %vm591_vm0, %v337_v19  ;;  %v369_v19 = vld [vmem:[%s12809_s0 + $0xb30] sm:$0xff] }
  0x58   :  { %8363 = vmatmul.mubr.msk.f32.gmra.mrb[38].mxu0 %vm591_vm0, %v50_v20  ;;  %v82_v20 = vld [vmem:[%s12809_s0 + $0x238] sm:$0xff] }
  0x59   :  { %8795 = vmatmul.mubr.msk.f32.gmra.mrb[38].mxu1 %vm591_vm0, %v338_v21  ;;  %8365 = vmatprep.mubr.msk.f32.mxu0 %vm591_vm0, %v51_v22  ;;  %v370_v21 = vld [vmem:[%s12809_s0 + $0xb38] sm:$0xff]  ;;  %v83_v22 = vld [vmem:[%s12809_s0 + $0x240] sm:$0xff] }
  0x5a   :  { %8797 = vmatprep.mubr.msk.f32.mxu1 %vm591_vm0, %v339_v23  ;;  %v371_v23 = vld [vmem:[%s12809_s0 + $0xb40] sm:$0xff] }
  0x5c   :  { %8366 = vmatmul.mubr.msk.f32.gmra.mrb[40].mxu0 %vm591_vm0, %v52_v24  ;;  %v84_v24 = vld [vmem:[%s12809_s0 + $0x248] sm:$0xff] }
  0x5d   :  { %8798 = vmatmul.mubr.msk.f32.gmra.mrb[40].mxu1 %vm591_vm0, %v340_v25  ;;  %8368 = vmatprep.mubr.msk.f32.mxu0 %vm591_vm0, %v53_v26  ;;  %v372_v25 = vld [vmem:[%s12809_s0 + $0xb48] sm:$0xff]  ;;  %v85_v26 = vld [vmem:[%s12809_s0 + $0x250] sm:$0xff] }
  0x5e   :  { %8800 = vmatprep.mubr.msk.f32.mxu1 %vm591_vm0, %v341_v27  ;;  %v373_v27 = vld [vmem:[%s12809_s0 + $0xb50] sm:$0xff] }
  0x60   :  { %8369 = vmatmul.mubr.msk.f32.gmra.mrb[42].mxu0 %vm591_vm0, %v54_v28  ;;  %v86_v28 = vld [vmem:[%s12809_s0 + $0x258] sm:$0xff] }
  0x61   :  { %8801 = vmatmul.mubr.msk.f32.gmra.mrb[42].mxu1 %vm591_vm0, %v342_v29  ;;  %8371 = vmatprep.mubr.msk.f32.mxu0 %vm591_vm0, %v55_v30  ;;  %v374_v29 = vld [vmem:[%s12809_s0 + $0xb58] sm:$0xff]  ;;  %v87_v30 = vld [vmem:[%s12809_s0 + $0x260] sm:$0xff] }
  0x62   :  { %8803 = vmatprep.mubr.msk.f32.mxu1 %vm591_vm0, %v343_v31  ;;  %v375_v31 = vld [vmem:[%s12809_s0 + $0xb60] sm:$0xff] }
  0x64   :  { %8372 = vmatmul.mubr.msk.f32.gmra.mrb[44].mxu0 %vm591_vm0, %v56_v32  ;;  %v88_v32 = vld [vmem:[%s12809_s0 + $0x268] sm:$0xff] }
  0x65   :  { %8804 = vmatmul.mubr.msk.f32.gmra.mrb[44].mxu1 %vm591_vm0, %v344_v33  ;;  %8374 = vmatprep.mubr.msk.f32.mxu0 %vm591_vm0, %v57_v34  ;;  %v376_v33 = vld [vmem:[%s12809_s0 + $0xb68] sm:$0xff]  ;;  %v89_v34 = vld [vmem:[%s12809_s0 + $0x270] sm:$0xff] }
  0x66   :  { %8806 = vmatprep.mubr.msk.f32.mxu1 %vm591_vm0, %v345_v35  ;;  %v377_v35 = vld [vmem:[%s12809_s0 + $0xb70] sm:$0xff] }
  0x68   :  { %8375 = vmatmul.mubr.msk.f32.gmra.mrb[46].mxu0 %vm591_vm0, %v58_v36  ;;  %v90_v36 = vld [vmem:[%s12809_s0 + $0x278] sm:$0xff] }
  0x69   :  { %8807 = vmatmul.mubr.msk.f32.gmra.mrb[46].mxu1 %vm591_vm0, %v346_v37  ;;  %8377 = vmatprep.mubr.msk.f32.mxu0 %vm591_vm0, %v59_v38  ;;  %v378_v37 = vld [vmem:[%s12809_s0 + $0xb78] sm:$0xff]  ;;  %v91_v38 = vld [vmem:[%s12809_s0 + $0x280] sm:$0xff] }
  0x6a   :  { %8809 = vmatprep.mubr.msk.f32.mxu1 %vm591_vm0, %v347_v39  ;;  %v379_v39 = vld [vmem:[%s12809_s0 + $0xb80] sm:$0xff] }
  0x6c   :  { %8378 = vmatmul.mubr.msk.f32.gmra.mrb[48].mxu0 %vm591_vm0, %v60_v40  ;;  %v92_v40 = vld [vmem:[%s12809_s0 + $0x288] sm:$0xff] }
  0x6d   :  { %8810 = vmatmul.mubr.msk.f32.gmra.mrb[48].mxu1 %vm591_vm0, %v348_v41  ;;  %8380 = vmatprep.mubr.msk.f32.mxu0 %vm591_vm0, %v61_v42  ;;  %v380_v41 = vld [vmem:[%s12809_s0 + $0xb88] sm:$0xff]  ;;  %v93_v42 = vld [vmem:[%s12809_s0 + $0x290] sm:$0xff] }
  0x6e   :  { %8812 = vmatprep.mubr.msk.f32.mxu1 %vm591_vm0, %v349_v43  ;;  %v381_v43 = vld [vmem:[%s12809_s0 + $0xb90] sm:$0xff] }
  0x70   :  { %8381 = vmatmul.mubr.msk.f32.gmra.mrb[50].mxu0 %vm591_vm0, %v62_v44  ;;  %v94_v44 = vld [vmem:[%s12809_s0 + $0x298] sm:$0xff] }
  0x71   :  { %8813 = vmatmul.mubr.msk.f32.gmra.mrb[50].mxu1 %vm591_vm0, %v350_v45  ;;  %8383 = vmatprep.mubr.msk.f32.mxu0 %vm591_vm0, %v63_v46  ;;  %v382_v45 = vld [vmem:[%s12809_s0 + $0xb98] sm:$0xff]  ;;  %v95_v46 = vld [vmem:[%s12809_s0 + $0x2a0] sm:$0xff] }
  0x72   :  { %8815 = vmatprep.mubr.msk.f32.mxu1 %vm591_vm0, %v351_v47  ;;  %v383_v47 = vld [vmem:[%s12809_s0 + $0xba0] sm:$0xff] }
  0x74   :  { %8384 = vmatmul.mubr.msk.f32.gmra.mrb[52].mxu0 %vm591_vm0, %v64_v48  ;;  %v96_v48 = vld [vmem:[%s12809_s0 + $0x2a8] sm:$0xff] }
  0x75   :  { %8816 = vmatmul.mubr.msk.f32.gmra.mrb[52].mxu1 %vm591_vm0, %v352_v49  ;;  %8386 = vmatprep.mubr.msk.f32.mxu0 %vm591_vm0, %v65_v50  ;;  %v384_v49 = vld [vmem:[%s12809_s0 + $0xba8] sm:$0xff]  ;;  %v97_v50 = vld [vmem:[%s12809_s0 + $0x2b0] sm:$0xff] }
  0x76   :  { %8818 = vmatprep.mubr.msk.f32.mxu1 %vm591_vm0, %v353_v51  ;;  %v385_v51 = vld [vmem:[%s12809_s0 + $0xbb0] sm:$0xff] }
  0x78   :  { %8387 = vmatmul.mubr.msk.f32.gmra.mrb[54].mxu0 %vm591_vm0, %v66_v52  ;;  %v98_v52 = vld [vmem:[%s12809_s0 + $0x2b8] sm:$0xff] }
  0x79   :  { %8819 = vmatmul.mubr.msk.f32.gmra.mrb[54].mxu1 %vm591_vm0, %v354_v53  ;;  %8389 = vmatprep.mubr.msk.f32.mxu0 %vm591_vm0, %v67_v54  ;;  %v386_v53 = vld [vmem:[%s12809_s0 + $0xbb8] sm:$0xff]  ;;  %v99_v54 = vld [vmem:[%s12809_s0 + $0x2c0] sm:$0xff] }
  0x7a   :  { %8821 = vmatprep.mubr.msk.f32.mxu1 %vm591_vm0, %v355_v55  ;;  %v387_v55 = vld [vmem:[%s12809_s0 + $0xbc0] sm:$0xff] }
  0x7c   :  { %8390 = vmatmul.mubr.msk.f32.gmra.mrb[56].mxu0 %vm591_vm0, %v68_v56  ;;  %v100_v56 = vld [vmem:[%s12809_s0 + $0x2c8] sm:$0xff] }
  0x7d   :  { %8822 = vmatmul.mubr.msk.f32.gmra.mrb[56].mxu1 %vm591_vm0, %v356_v57  ;;  %8392 = vmatprep.mubr.msk.f32.mxu0 %vm591_vm0, %v69_v58  ;;  %v388_v57 = vld [vmem:[%s12809_s0 + $0xbc8] sm:$0xff]  ;;  %v101_v58 = vld [vmem:[%s12809_s0 + $0x2d0] sm:$0xff] }
  0x7e   :  { %8824 = vmatprep.mubr.msk.f32.mxu1 %vm591_vm0, %v357_v59  ;;  %v389_v59 = vld [vmem:[%s12809_s0 + $0xbd0] sm:$0xff] }
  0x80   :  { %8393 = vmatmul.mubr.msk.f32.gmra.mrb[58].mxu0 %vm591_vm0, %v70_v60  ;;  %v102_v60 = vld [vmem:[%s12809_s0 + $0x2d8] sm:$0xff] }
  0x81   :  { %8825 = vmatmul.mubr.msk.f32.gmra.mrb[58].mxu1 %vm591_vm0, %v358_v61  ;;  %8395 = vmatprep.mubr.msk.f32.mxu0 %vm591_vm0, %v71_v62  ;;  %v390_v61 = vld [vmem:[%s12809_s0 + $0xbd8] sm:$0xff]  ;;  %v103_v62 = vld [vmem:[%s12809_s0 + $0x2e0] sm:$0xff] }
  0x82   :  { %8827 = vmatprep.mubr.msk.f32.mxu1 %vm591_vm0, %v359_v63  ;;  %v391_v63 = vld [vmem:[%s12809_s0 + $0xbe0] sm:$0xff] }
  0x84   :  { %8396 = vmatmul.mubr.msk.f32.gmra.mrb[60].mxu0 %vm591_vm0, %v72_v0  ;;  %v104_v0 = vld [vmem:[%s12809_s0 + $0x2e8] sm:$0xff] }
  0x85   :  { %8828 = vmatmul.mubr.msk.f32.gmra.mrb[60].mxu1 %vm591_vm0, %v360_v1  ;;  %8398 = vmatprep.mubr.msk.f32.mxu0 %vm591_vm0, %v73_v2  ;;  %v392_v1 = vld [vmem:[%s12809_s0 + $0xbe8] sm:$0xff]  ;;  %v105_v2 = vld [vmem:[%s12809_s0 + $0x2f0] sm:$0xff] }
  0x86   :  { %8830 = vmatprep.mubr.msk.f32.mxu1 %vm591_vm0, %v361_v3  ;;  %v393_v3 = vld [vmem:[%s12809_s0 + $0xbf0] sm:$0xff] }
  0x88   :  { %8399 = vmatmul.mubr.msk.f32.gmra.mrb[62].mxu0 %vm591_vm0, %v74_v4  ;;  %v106_v4 = vld [vmem:[%s12809_s0 + $0x2f8] sm:$0xff] }
  0x89   :  { %8831 = vmatmul.mubr.msk.f32.gmra.mrb[62].mxu1 %vm591_vm0, %v362_v5  ;;  %8401 = vmatprep.mubr.msk.f32.mxu0 %vm591_vm0, %v75_v6  ;;  %v394_v5 = vld [vmem:[%s12809_s0 + $0xbf8] sm:$0xff]  ;;  %v107_v6 = vld [vmem:[%s12809_s0 + $0x300] sm:$0xff] }
  0x8a   :  { %8833 = vmatprep.mubr.msk.f32.mxu1 %vm591_vm0, %v363_v7  ;;  %v395_v7 = vld [vmem:[%s12809_s0 + $0xc00] sm:$0xff] }
  0x8c   :  { %8402 = vmatmul.mubr.msk.f32.gmra.mrb[64].mxu0 %vm591_vm0, %v76_v8  ;;  %v108_v8 = vld [vmem:[%s12809_s0 + $0x308] sm:$0xff] }
  0x8d   :  { %8834 = vmatmul.mubr.msk.f32.gmra.mrb[64].mxu1 %vm591_vm0, %v364_v9  ;;  %8404 = vmatprep.mubr.msk.f32.mxu0 %vm591_vm0, %v77_v10  ;;  %v396_v9 = vld [vmem:[%s12809_s0 + $0xc08] sm:$0xff]  ;;  %v109_v10 = vld [vmem:[%s12809_s0 + $0x310] sm:$0xff] }
  0x8e   :  { %8836 = vmatprep.mubr.msk.f32.mxu1 %vm591_vm0, %v365_v11  ;;  %v397_v11 = vld [vmem:[%s12809_s0 + $0xc10] sm:$0xff] }
  0x90   :  { %8405 = vmatmul.mubr.msk.f32.gmra.mrb[66].mxu0 %vm591_vm0, %v78_v12  ;;  %v110_v12 = vld [vmem:[%s12809_s0 + $0x318] sm:$0xff] }
  0x91   :  { %8837 = vmatmul.mubr.msk.f32.gmra.mrb[66].mxu1 %vm591_vm0, %v366_v13  ;;  %8407 = vmatprep.mubr.msk.f32.mxu0 %vm591_vm0, %v79_v14  ;;  %v398_v13 = vld [vmem:[%s12809_s0 + $0xc18] sm:$0xff]  ;;  %v111_v14 = vld [vmem:[%s12809_s0 + $0x320] sm:$0xff] }
  0x92   :  { %8839 = vmatprep.mubr.msk.f32.mxu1 %vm591_vm0, %v367_v15  ;;  %v399_v15 = vld [vmem:[%s12809_s0 + $0xc20] sm:$0xff] }
  0x94   :  { %8408 = vmatmul.mubr.msk.f32.gmra.mrb[68].mxu0 %vm591_vm0, %v80_v16  ;;  %v112_v16 = vld [vmem:[%s12809_s0 + $0x328] sm:$0xff] }
  0x95   :  { %8840 = vmatmul.mubr.msk.f32.gmra.mrb[68].mxu1 %vm591_vm0, %v368_v17  ;;  %8410 = vmatprep.mubr.msk.f32.mxu0 %vm591_vm0, %v81_v18  ;;  %v400_v17 = vld [vmem:[%s12809_s0 + $0xc28] sm:$0xff]  ;;  %v113_v18 = vld [vmem:[%s12809_s0 + $0x330] sm:$0xff] }
  0x96   :  { %8842 = vmatprep.mubr.msk.f32.mxu1 %vm591_vm0, %v369_v19  ;;  %v401_v19 = vld [vmem:[%s12809_s0 + $0xc30] sm:$0xff] }
  0x98   :  { %8411 = vmatmul.mubr.msk.f32.gmra.mrb[70].mxu0 %vm591_vm0, %v82_v20  ;;  %v114_v20 = vld [vmem:[%s12809_s0 + $0x338] sm:$0xff] }
  0x99   :  { %8843 = vmatmul.mubr.msk.f32.gmra.mrb[70].mxu1 %vm591_vm0, %v370_v21  ;;  %8413 = vmatprep.mubr.msk.f32.mxu0 %vm591_vm0, %v83_v22  ;;  %v402_v21 = vld [vmem:[%s12809_s0 + $0xc38] sm:$0xff]  ;;  %v115_v22 = vld [vmem:[%s12809_s0 + $0x340] sm:$0xff] }
  0x9a   :  { %8845 = vmatprep.mubr.msk.f32.mxu1 %vm591_vm0, %v371_v23  ;;  %v403_v23 = vld [vmem:[%s12809_s0 + $0xc40] sm:$0xff] }
  0x9c   :  { %8414 = vmatmul.mubr.msk.f32.gmra.mrb[72].mxu0 %vm591_vm0, %v84_v24  ;;  %v116_v24 = vld [vmem:[%s12809_s0 + $0x348] sm:$0xff] }
  0x9d   :  { %8846 = vmatmul.mubr.msk.f32.gmra.mrb[72].mxu1 %vm591_vm0, %v372_v25  ;;  %8416 = vmatprep.mubr.msk.f32.mxu0 %vm591_vm0, %v85_v26  ;;  %v404_v25 = vld [vmem:[%s12809_s0 + $0xc48] sm:$0xff]  ;;  %v117_v26 = vld [vmem:[%s12809_s0 + $0x350] sm:$0xff] }
  0x9e   :  { %8848 = vmatprep.mubr.msk.f32.mxu1 %vm591_vm0, %v373_v27  ;;  %v405_v27 = vld [vmem:[%s12809_s0 + $0xc50] sm:$0xff] }
  0xa0   :  { %8417 = vmatmul.mubr.msk.f32.gmra.mrb[74].mxu0 %vm591_vm0, %v86_v28  ;;  %v118_v28 = vld [vmem:[%s12809_s0 + $0x358] sm:$0xff] }
  0xa1   :  { %8849 = vmatmul.mubr.msk.f32.gmra.mrb[74].mxu1 %vm591_vm0, %v374_v29  ;;  %8419 = vmatprep.mubr.msk.f32.mxu0 %vm591_vm0, %v87_v30  ;;  %v406_v29 = vld [vmem:[%s12809_s0 + $0xc58] sm:$0xff]  ;;  %v119_v30 = vld [vmem:[%s12809_s0 + $0x360] sm:$0xff] }
  0xa2   :  { %8851 = vmatprep.mubr.msk.f32.mxu1 %vm591_vm0, %v375_v31  ;;  %v407_v31 = vld [vmem:[%s12809_s0 + $0xc60] sm:$0xff] }
  0xa4   :  { %8420 = vmatmul.mubr.msk.f32.gmra.mrb[76].mxu0 %vm591_vm0, %v88_v32 }
  0xa5   :  { %8852 = vmatmul.mubr.msk.f32.gmra.mrb[76].mxu1 %vm591_vm0, %v376_v33  ;;  %8422 = vmatprep.mubr.msk.f32.mxu0 %vm591_vm0, %v89_v34 }
  0xa6   :  { %8854 = vmatprep.mubr.msk.f32.mxu1 %vm591_vm0, %v377_v35 }
  0xa8   :  { %8423 = vmatmul.mubr.msk.f32.gmra.mrb[78].mxu0 %vm591_vm0, %v90_v36  ;;  %v120_v36 = vld [vmem:[%s12809_s0 + $0x368] sm:$0xff] }
  0xa9   :  { %8855 = vmatmul.mubr.msk.f32.gmra.mrb[78].mxu1 %vm591_vm0, %v378_v37  ;;  %8425 = vmatprep.mubr.msk.f32.mxu0 %vm591_vm0, %v91_v38  ;;  %v408_v37 = vld [vmem:[%s12809_s0 + $0xc68] sm:$0xff]  ;;  %v121_v38 = vld [vmem:[%s12809_s0 + $0x370] sm:$0xff] }
  0xaa   :  { %8857 = vmatprep.mubr.msk.f32.mxu1 %vm591_vm0, %v379_v39  ;;  %v409_v39 = vld [vmem:[%s12809_s0 + $0xc70] sm:$0xff] }
  0xac   :  { %8426 = vmatmul.mubr.msk.f32.gmra.mrb[80].mxu0 %vm591_vm0, %v92_v40 }
  0xad   :  { %8858 = vmatmul.mubr.msk.f32.gmra.mrb[80].mxu1 %vm591_vm0, %v380_v41  ;;  %8428 = vmatprep.mubr.msk.f32.mxu0 %vm591_vm0, %v93_v42 }
  0xae   :  { %8860 = vmatprep.mubr.msk.f32.mxu1 %vm591_vm0, %v381_v43 }
  0xb0   :  { %8429 = vmatmul.mubr.msk.f32.gmra.mrb[82].mxu0 %vm591_vm0, %v94_v44  ;;  %v122_v44 = vld [vmem:[%s12809_s0 + $0x378] sm:$0xff] }
  0xb1   :  { %8861 = vmatmul.mubr.msk.f32.gmra.mrb[82].mxu1 %vm591_vm0, %v382_v45  ;;  %8431 = vmatprep.mubr.msk.f32.mxu0 %vm591_vm0, %v95_v46  ;;  %v410_v45 = vld [vmem:[%s12809_s0 + $0xc78] sm:$0xff]  ;;  %v123_v46 = vld [vmem:[%s12809_s0 + $0x380] sm:$0xff] }
  0xb2   :  { %8863 = vmatprep.mubr.msk.f32.mxu1 %vm591_vm0, %v383_v47  ;;  %v411_v47 = vld [vmem:[%s12809_s0 + $0xc80] sm:$0xff] }
  0xb4   :  { %8432 = vmatmul.mubr.msk.f32.gmra.mrb[84].mxu0 %vm591_vm0, %v96_v48 }
  0xb5   :  { %8864 = vmatmul.mubr.msk.f32.gmra.mrb[84].mxu1 %vm591_vm0, %v384_v49  ;;  %8434 = vmatprep.mubr.msk.f32.mxu0 %vm591_vm0, %v97_v50 }
  0xb6   :  { %8866 = vmatprep.mubr.msk.f32.mxu1 %vm591_vm0, %v385_v51 }
  0xb8   :  { %8435 = vmatmul.mubr.msk.f32.gmra.mrb[86].mxu0 %vm591_vm0, %v98_v52  ;;  %v124_v52 = vld [vmem:[%s12809_s0 + $0x388] sm:$0xff] }
  0xb9   :  { %8867 = vmatmul.mubr.msk.f32.gmra.mrb[86].mxu1 %vm591_vm0, %v386_v53  ;;  %8437 = vmatprep.mubr.msk.f32.mxu0 %vm591_vm0, %v99_v54  ;;  %v412_v53 = vld [vmem:[%s12809_s0 + $0xc88] sm:$0xff]  ;;  %v125_v54 = vld [vmem:[%s12809_s0 + $0x390] sm:$0xff] }
  0xba   :  { %8869 = vmatprep.mubr.msk.f32.mxu1 %vm591_vm0, %v387_v55  ;;  %v413_v55 = vld [vmem:[%s12809_s0 + $0xc90] sm:$0xff] }
  0xbc   :  { %8438 = vmatmul.mubr.msk.f32.gmra.mrb[88].mxu0 %vm591_vm0, %v100_v56 }
  0xbd   :  { %8870 = vmatmul.mubr.msk.f32.gmra.mrb[88].mxu1 %vm591_vm0, %v388_v57  ;;  %8440 = vmatprep.mubr.msk.f32.mxu0 %vm591_vm0, %v101_v58 }
  0xbe   :  { %8872 = vmatprep.mubr.msk.f32.mxu1 %vm591_vm0, %v389_v59 }
  0xc0   :  { %8441 = vmatmul.mubr.msk.f32.gmra.mrb[90].mxu0 %vm591_vm0, %v102_v60  ;;  %v126_v60 = vld [vmem:[%s12809_s0 + $0x398] sm:$0xff] }
  0xc1   :  { %8873 = vmatmul.mubr.msk.f32.gmra.mrb[90].mxu1 %vm591_vm0, %v390_v61  ;;  %8443 = vmatprep.mubr.msk.f32.mxu0 %vm591_vm0, %v103_v62  ;;  %v414_v61 = vld [vmem:[%s12809_s0 + $0xc98] sm:$0xff]  ;;  %v127_v62 = vld [vmem:[%s12809_s0 + $0x3a0] sm:$0xff] }
  0xc2   :  { %8875 = vmatprep.mubr.msk.f32.mxu1 %vm591_vm0, %v391_v63  ;;  %v415_v63 = vld [vmem:[%s12809_s0 + $0xca0] sm:$0xff] }
  0xc4   :  { %8444 = vmatmul.mubr.msk.f32.gmra.mrb[92].mxu0 %vm591_vm0, %v104_v0 }
  0xc5   :  { %8876 = vmatmul.mubr.msk.f32.gmra.mrb[92].mxu1 %vm591_vm0, %v392_v1  ;;  %8446 = vmatprep.mubr.msk.f32.mxu0 %vm591_vm0, %v105_v2 }
  0xc6   :  { %8878 = vmatprep.mubr.msk.f32.mxu1 %vm591_vm0, %v393_v3 }
  0xc8   :  { %8447 = vmatmul.mubr.msk.f32.gmra.mrb[94].mxu0 %vm591_vm0, %v106_v4  ;;  %v128_v4 = vld [vmem:[%s12809_s0 + $0x3a8] sm:$0xff] }
  0xc9   :  { %8879 = vmatmul.mubr.msk.f32.gmra.mrb[94].mxu1 %vm591_vm0, %v394_v5  ;;  %8449 = vmatprep.mubr.msk.f32.mxu0 %vm591_vm0, %v107_v6  ;;  %v416_v5 = vld [vmem:[%s12809_s0 + $0xca8] sm:$0xff]  ;;  %v129_v6 = vld [vmem:[%s12809_s0 + $0x3b0] sm:$0xff] }
  0xca   :  { %8881 = vmatprep.mubr.msk.f32.mxu1 %vm591_vm0, %v395_v7  ;;  %v417_v7 = vld [vmem:[%s12809_s0 + $0xcb0] sm:$0xff] }
  0xcc   :  { %8450 = vmatmul.mubr.msk.f32.gmra.mrb[96].mxu0 %vm591_vm0, %v108_v8 }
  0xcd   :  { %8882 = vmatmul.mubr.msk.f32.gmra.mrb[96].mxu1 %vm591_vm0, %v396_v9  ;;  %8452 = vmatprep.mubr.msk.f32.mxu0 %vm591_vm0, %v109_v10 }
  0xce   :  { %8884 = vmatprep.mubr.msk.f32.mxu1 %vm591_vm0, %v397_v11 }
  0xd0   :  { %8453 = vmatmul.mubr.msk.f32.gmra.mrb[98].mxu0 %vm591_vm0, %v110_v12  ;;  %v130_v12 = vld [vmem:[%s12809_s0 + $0x3b8] sm:$0xff] }
  0xd1   :  { %8885 = vmatmul.mubr.msk.f32.gmra.mrb[98].mxu1 %vm591_vm0, %v398_v13  ;;  %8455 = vmatprep.mubr.msk.f32.mxu0 %vm591_vm0, %v111_v14  ;;  %v418_v13 = vld [vmem:[%s12809_s0 + $0xcb8] sm:$0xff]  ;;  %v131_v14 = vld [vmem:[%s12809_s0 + $0x3c0] sm:$0xff] }
  0xd2   :  { %8887 = vmatprep.mubr.msk.f32.mxu1 %vm591_vm0, %v399_v15  ;;  %v419_v15 = vld [vmem:[%s12809_s0 + $0xcc0] sm:$0xff] }
  0xd4   :  { %8456 = vmatmul.mubr.msk.f32.gmra.mrb[100].mxu0 %vm591_vm0, %v112_v16 }
  0xd5   :  { %8888 = vmatmul.mubr.msk.f32.gmra.mrb[100].mxu1 %vm591_vm0, %v400_v17  ;;  %8458 = vmatprep.mubr.msk.f32.mxu0 %vm591_vm0, %v113_v18 }
  0xd6   :  { %8890 = vmatprep.mubr.msk.f32.mxu1 %vm591_vm0, %v401_v19 }
  0xd8   :  { %8459 = vmatmul.mubr.msk.f32.gmra.mrb[102].mxu0 %vm591_vm0, %v114_v20  ;;  %v132_v20 = vld [vmem:[%s12809_s0 + $0x3c8] sm:$0xff] }
  0xd9   :  { %8891 = vmatmul.mubr.msk.f32.gmra.mrb[102].mxu1 %vm591_vm0, %v402_v21  ;;  %8461 = vmatprep.mubr.msk.f32.mxu0 %vm591_vm0, %v115_v22  ;;  %v420_v21 = vld [vmem:[%s12809_s0 + $0xcc8] sm:$0xff]  ;;  %v133_v22 = vld [vmem:[%s12809_s0 + $0x3d0] sm:$0xff] }
  0xda   :  { %8893 = vmatprep.mubr.msk.f32.mxu1 %vm591_vm0, %v403_v23  ;;  %v421_v23 = vld [vmem:[%s12809_s0 + $0xcd0] sm:$0xff] }
  0xdc   :  { %8462 = vmatmul.mubr.msk.f32.gmra.mrb[104].mxu0 %vm591_vm0, %v116_v24 }
  0xdd   :  { %8894 = vmatmul.mubr.msk.f32.gmra.mrb[104].mxu1 %vm591_vm0, %v404_v25  ;;  %8464 = vmatprep.mubr.msk.f32.mxu0 %vm591_vm0, %v117_v26 }
  0xde   :  { %8896 = vmatprep.mubr.msk.f32.mxu1 %vm591_vm0, %v405_v27 }
  0xdf   :  { %v10076_v32 = vpop.f32.mrb[0].mxu0 }
  0xe0   :  { %v10078_v33 = vpop.f32.mrb[0].mxu1  ;;  %v10080_v34 = vpop.f32.mrb[1].mxu0  ;;  %8465 = vmatmul.mubr.msk.f32.gmra.mrb[106].mxu0 %vm591_vm0, %v118_v28  ;;  %v134_v28 = vld [vmem:[%s12809_s0 + $0x3d8] sm:$0xff] }
  0xe1   :  { %v10083_v35 = vpop.f32.mrb[1].mxu1  ;;  %8897 = vmatmul.mubr.msk.f32.gmra.mrb[106].mxu1 %vm591_vm0, %v406_v29  ;;  %8467 = vmatprep.mubr.msk.f32.mxu0 %vm591_vm0, %v119_v30  ;;  %v422_v29 = vld [vmem:[%s12809_s0 + $0xcd8] sm:$0xff]  ;;  %v135_v30 = vld [vmem:[%s12809_s0 + $0x3e0] sm:$0xff] }
  0xe2   :  { %8899 = vmatprep.mubr.msk.f32.mxu1 %vm591_vm0, %v407_v31  ;;  %v423_v31 = vld [vmem:[%s12809_s0 + $0xce0] sm:$0xff] }
  0xe3   :  { %v10100_v40 = vpop.f32.mrb[2].mxu0 }
  0xe4   :  { %v10102_v41 = vpop.f32.mrb[2].mxu1  ;;  %v10104_v42 = vpop.f32.mrb[3].mxu0  ;;  %8468 = vmatmul.mubr.msk.f32.gmra.mrb[108].mxu0 %vm591_vm0, %v120_v36 }
  0xe5   :  { %v10107_v43 = vpop.f32.mrb[3].mxu1  ;;  %8900 = vmatmul.mubr.msk.f32.gmra.mrb[108].mxu1 %vm591_vm0, %v408_v37  ;;  %8470 = vmatprep.mubr.msk.f32.mxu0 %vm591_vm0, %v121_v38 }
  0xe6   :  { %8902 = vmatprep.mubr.msk.f32.mxu1 %vm591_vm0, %v409_v39 }
  0xe7   :  { %v10124_v48 = vpop.f32.mrb[4].mxu0 }
  0xe8   :  { %v10126_v49 = vpop.f32.mrb[4].mxu1  ;;  %v10128_v50 = vpop.f32.mrb[5].mxu0  ;;  %8471 = vmatmul.mubr.msk.f32.gmra.mrb[110].mxu0 %vm591_vm0, %v122_v44  ;;  %v136_v44 = vld [vmem:[%s12809_s0 + $0x3e8] sm:$0xff] }
  0xe9   :  { %v10131_v51 = vpop.f32.mrb[5].mxu1  ;;  %8903 = vmatmul.mubr.msk.f32.gmra.mrb[110].mxu1 %vm591_vm0, %v410_v45  ;;  %8473 = vmatprep.mubr.msk.f32.mxu0 %vm591_vm0, %v123_v46  ;;  %v424_v45 = vld [vmem:[%s12809_s0 + $0xce8] sm:$0xff]  ;;  %v137_v46 = vld [vmem:[%s12809_s0 + $0x3f0] sm:$0xff] }
  0xea   :  { %8905 = vmatprep.mubr.msk.f32.mxu1 %vm591_vm0, %v411_v47  ;;  %v425_v47 = vld [vmem:[%s12809_s0 + $0xcf0] sm:$0xff] }
  0xeb   :  { %v10148_v56 = vpop.f32.mrb[6].mxu0 }
  0xec   :  { %v10150_v57 = vpop.f32.mrb[6].mxu1  ;;  %v10152_v58 = vpop.f32.mrb[7].mxu0  ;;  %8474 = vmatmul.mubr.msk.f32.gmra.mrb[112].mxu0 %vm591_vm0, %v124_v52 }
  0xed   :  { %v10155_v59 = vpop.f32.mrb[7].mxu1  ;;  %8906 = vmatmul.mubr.msk.f32.gmra.mrb[112].mxu1 %vm591_vm0, %v412_v53  ;;  %8476 = vmatprep.mubr.msk.f32.mxu0 %vm591_vm0, %v125_v54 }
  0xee   :  { %8908 = vmatprep.mubr.msk.f32.mxu1 %vm591_vm0, %v413_v55 }
  0xef   :  { %v10172_v0 = vpop.f32.mrb[8].mxu0 }
  0xf0   :  { %v10174_v1 = vpop.f32.mrb[8].mxu1  ;;  %v10176_v2 = vpop.f32.mrb[9].mxu0  ;;  %8477 = vmatmul.mubr.msk.f32.gmra.mrb[114].mxu0 %vm591_vm0, %v126_v60  ;;  %v138_v60 = vld [vmem:[%s12809_s0 + $0x3f8] sm:$0xff] }
  0xf1   :  { %v10179_v3 = vpop.f32.mrb[9].mxu1  ;;  %8909 = vmatmul.mubr.msk.f32.gmra.mrb[114].mxu1 %vm591_vm0, %v414_v61  ;;  %8479 = vmatprep.mubr.msk.f32.mxu0 %vm591_vm0, %v127_v62  ;;  %v426_v61 = vld [vmem:[%s12809_s0 + $0xcf8] sm:$0xff]  ;;  %v139_v62 = vld [vmem:[%s12809_s0 + $0x400] sm:$0xff] }
  0xf2   :  { %8911 = vmatprep.mubr.msk.f32.mxu1 %vm591_vm0, %v415_v63  ;;  %v427_v63 = vld [vmem:[%s12809_s0 + $0xd00] sm:$0xff] }
  0xf3   :  { %v10196_v8 = vpop.f32.mrb[10].mxu0 }
  0xf4   :  { %v10198_v9 = vpop.f32.mrb[10].mxu1  ;;  %v10200_v10 = vpop.f32.mrb[11].mxu0  ;;  %8480 = vmatmul.mubr.msk.f32.gmra.mrb[116].mxu0 %vm591_vm0, %v128_v4 }
  0xf5   :  { %v10203_v11 = vpop.f32.mrb[11].mxu1  ;;  %8912 = vmatmul.mubr.msk.f32.gmra.mrb[116].mxu1 %vm591_vm0, %v416_v5  ;;  %8482 = vmatprep.mubr.msk.f32.mxu0 %vm591_vm0, %v129_v6 }
  0xf6   :  { %8914 = vmatprep.mubr.msk.f32.mxu1 %vm591_vm0, %v417_v7 }
  0xf7   :  { %v10220_v16 = vpop.f32.mrb[12].mxu0 }
  0xf8   :  { %v10222_v17 = vpop.f32.mrb[12].mxu1  ;;  %v10224_v18 = vpop.f32.mrb[13].mxu0  ;;  %8483 = vmatmul.mubr.msk.f32.gmra.mrb[118].mxu0 %vm591_vm0, %v130_v12  ;;  %v140_v12 = vld [vmem:[%s12809_s0 + $0x408] sm:$0xff] }
  0xf9   :  { %v10227_v19 = vpop.f32.mrb[13].mxu1  ;;  %8915 = vmatmul.mubr.msk.f32.gmra.mrb[118].mxu1 %vm591_vm0, %v418_v13  ;;  %8485 = vmatprep.mubr.msk.f32.mxu0 %vm591_vm0, %v131_v14  ;;  %v428_v13 = vld [vmem:[%s12809_s0 + $0xd08] sm:$0xff]  ;;  %v141_v14 = vld [vmem:[%s12809_s0 + $0x410] sm:$0xff] }
  0xfa   :  { %8917 = vmatprep.mubr.msk.f32.mxu1 %vm591_vm0, %v419_v15  ;;  %v429_v15 = vld [vmem:[%s12809_s0 + $0xd10] sm:$0xff] }
  0xfb   :  { %v10244_v24 = vpop.f32.mrb[14].mxu0 }
  0xfc   :  { %v10246_v25 = vpop.f32.mrb[14].mxu1  ;;  %v10248_v26 = vpop.f32.mrb[15].mxu0  ;;  %8486 = vmatmul.mubr.msk.f32.gmra.mrb[120].mxu0 %vm591_vm0, %v132_v20 }
  0xfd   :  { %v10251_v27 = vpop.f32.mrb[15].mxu1  ;;  %8918 = vmatmul.mubr.msk.f32.gmra.mrb[120].mxu1 %vm591_vm0, %v420_v21  ;;  %8488 = vmatprep.mubr.msk.f32.mxu0 %vm591_vm0, %v133_v22 }
  0xfe   :  { %8920 = vmatprep.mubr.msk.f32.mxu1 %vm591_vm0, %v421_v23 }
  0xff   :  { %v10268_v36 = vpop.f32.mrb[16].mxu0 }
 0x100   :  { %v10270_v37 = vpop.f32.mrb[16].mxu1  ;;  %v10272_v38 = vpop.f32.mrb[17].mxu0  ;;  %8489 = vmatmul.mubr.msk.f32.gmra.mrb[122].mxu0 %vm591_vm0, %v134_v28  ;;  %v142_v28 = vld [vmem:[%s12809_s0 + $0x418] sm:$0xff] }
 0x101   :  { %v10275_v39 = vpop.f32.mrb[17].mxu1  ;;  %8921 = vmatmul.mubr.msk.f32.gmra.mrb[122].mxu1 %vm591_vm0, %v422_v29  ;;  %8491 = vmatprep.mubr.msk.f32.mxu0 %vm591_vm0, %v135_v30  ;;  %v430_v29 = vld [vmem:[%s12809_s0 + $0xd18] sm:$0xff]  ;;  %v143_v30 = vld [vmem:[%s12809_s0 + $0x420] sm:$0xff] }
 0x102   :  { %8923 = vmatprep.mubr.msk.f32.mxu1 %vm591_vm0, %v423_v31  ;;  %v431_v31 = vld [vmem:[%s12809_s0 + $0xd20] sm:$0xff] }
 0x103   :  { %v10292_v52 = vpop.f32.mrb[18].mxu0 }
 0x104   :  { %v10294_v53 = vpop.f32.mrb[18].mxu1  ;;  %v10296_v54 = vpop.f32.mrb[19].mxu0  ;;  %8492 = vmatmul.mubr.msk.f32.gmra.mrb[124].mxu0 %vm591_vm0, %v136_v44 }
 0x105   :  { %v10299_v55 = vpop.f32.mrb[19].mxu1  ;;  %8924 = vmatmul.mubr.msk.f32.gmra.mrb[124].mxu1 %vm591_vm0, %v424_v45  ;;  %8494 = vmatprep.mubr.msk.f32.mxu0 %vm591_vm0, %v137_v46 }
 0x106   :  { %8926 = vmatprep.mubr.msk.f32.mxu1 %vm591_vm0, %v425_v47 }
 0x107   :  { %v10316_v4 = vpop.f32.mrb[20].mxu0 }
 0x108   :  { %v10318_v5 = vpop.f32.mrb[20].mxu1  ;;  %v10320_v6 = vpop.f32.mrb[21].mxu0  ;;  %8495 = vmatmul.mubr.msk.f32.gmra.mrb[126].mxu0 %vm591_vm0, %v138_v60  ;;  %v144_v60 = vld [vmem:[%s12809_s0 + $0x428] sm:$0xff] }
 0x109   :  { %v10323_v7 = vpop.f32.mrb[21].mxu1  ;;  %8927 = vmatmul.mubr.msk.f32.gmra.mrb[126].mxu1 %vm591_vm0, %v426_v61  ;;  %8497 = vmatprep.mubr.msk.f32.mxu0 %vm591_vm0, %v139_v62  ;;  %v432_v61 = vld [vmem:[%s12809_s0 + $0xd28] sm:$0xff]  ;;  %v145_v62 = vld [vmem:[%s12809_s0 + $0x430] sm:$0xff] }
 0x10a   :  { %8929 = vmatprep.mubr.msk.f32.mxu1 %vm591_vm0, %v427_v63  ;;  %v433_v63 = vld [vmem:[%s12809_s0 + $0xd30] sm:$0xff] }
 0x10b   :  { %v10340_v20 = vpop.f32.mrb[22].mxu0 }
 0x10c   :  { %v10342_v21 = vpop.f32.mrb[22].mxu1  ;;  %v10344_v22 = vpop.f32.mrb[23].mxu0  ;;  %8498 = vmatmul.mubr.msk.f32.gmra.mrb[128].mxu0 %vm591_vm0, %v140_v12 }
 0x10d   :  { %v10347_v23 = vpop.f32.mrb[23].mxu1  ;;  %8930 = vmatmul.mubr.msk.f32.gmra.mrb[128].mxu1 %vm591_vm0, %v428_v13  ;;  %8500 = vmatprep.mubr.msk.f32.mxu0 %vm591_vm0, %v141_v14 }
 0x10e   :  { %8932 = vmatprep.mubr.msk.f32.mxu1 %vm591_vm0, %v429_v15 }
 0x10f   :  { %v10364_v44 = vpop.f32.mrb[24].mxu0 }
 0x110   :  { %v10366_v45 = vpop.f32.mrb[24].mxu1  ;;  %v10368_v46 = vpop.f32.mrb[25].mxu0  ;;  %8501 = vmatmul.mubr.msk.f32.gmra.mrb[130].mxu0 %vm591_vm0, %v142_v28  ;;  %v146_v28 = vld [vmem:[%s12809_s0 + $0x438] sm:$0xff] }
 0x111   :  { %12811 = vst [vmem:[#allocation3_spill] sm:$0xff] %v10368_v46  ;;  %v10371_v47 = vpop.f32.mrb[25].mxu1  ;;  %8933 = vmatmul.mubr.msk.f32.gmra.mrb[130].mxu1 %vm591_vm0, %v430_v29  ;;  %8503 = vmatprep.mubr.msk.f32.mxu0 %vm591_vm0, %v143_v30  ;;  %v434_v29 = vld [vmem:[%s12809_s0 + $0xd38] sm:$0xff]  ;;  %v147_v30 = vld [vmem:[%s12809_s0 + $0x440] sm:$0xff] }
 0x112   :  { %12812 = vst [vmem:[#allocation4_spill] sm:$0xff] %v10371_v47  ;;  %8935 = vmatprep.mubr.msk.f32.mxu1 %vm591_vm0, %v431_v31  ;;  %v435_v31 = vld [vmem:[%s12809_s0 + $0xd40] sm:$0xff] }
 0x113   :  { %v10388_v12 = vpop.f32.mrb[26].mxu0 }
 0x114   :  { %12813 = vst [vmem:[#allocation5_spill] sm:$0xff] %v10388_v12  ;;  %v10390_v13 = vpop.f32.mrb[26].mxu1  ;;  %v10392_v14 = vpop.f32.mrb[27].mxu0  ;;  %8504 = vmatmul.mubr.msk.f32.gmra.mrb[132].mxu0 %vm591_vm0, %v144_v60 }
 0x115   :  { %12814 = vst [vmem:[#allocation6_spill] sm:$0xff] %v10390_v13  ;;  %12815 = vst [vmem:[#allocation7_spill] sm:$0xff] %v10392_v14  ;;  %v10395_v15 = vpop.f32.mrb[27].mxu1  ;;  %8936 = vmatmul.mubr.msk.f32.gmra.mrb[132].mxu1 %vm591_vm0, %v432_v61  ;;  %8506 = vmatprep.mubr.msk.f32.mxu0 %vm591_vm0, %v145_v62 }
 0x116   :  { %12816 = vst [vmem:[#allocation8_spill] sm:$0xff] %v10395_v15  ;;  %8938 = vmatprep.mubr.msk.f32.mxu1 %vm591_vm0, %v433_v63  ;;  %v148_v15 = vld [vmem:[%s12809_s0 + $0x448] sm:$0xff] }
 0x117   :  { %v10412_v60 = vpop.f32.mrb[28].mxu0 }
 0x118   :  { %12817 = vst [vmem:[#allocation9_spill] sm:$0xff] %v10412_v60  ;;  %v10414_v61 = vpop.f32.mrb[28].mxu1  ;;  %v10416_v62 = vpop.f32.mrb[29].mxu0  ;;  %8507 = vmatmul.mubr.msk.f32.gmra.mrb[134].mxu0 %vm591_vm0, %v146_v28  ;;  %v149_v28 = vld [vmem:[%s12809_s0 + $0x450] sm:$0xff]  ;;  %v150_v60 = vld [vmem:[%s12809_s0 + $0x458] sm:$0xff] }
 0x119   :  { %12818 = vst [vmem:[#allocation10_spill] sm:$0xff] %v10414_v61  ;;  %12819 = vst [vmem:[#allocation11_spill] sm:$0xff] %v10416_v62  ;;  %v10419_v63 = vpop.f32.mrb[29].mxu1  ;;  %8939 = vmatmul.mubr.msk.f32.gmra.mrb[134].mxu1 %vm591_vm0, %v434_v29  ;;  %8509 = vmatprep.mubr.msk.f32.mxu0 %vm591_vm0, %v147_v30  ;;  %v436_v61 = vld [vmem:[%s12809_s0 + $0xd48] sm:$0xff]  ;;  %v437_v29 = vld [vmem:[%s12809_s0 + $0xd50] sm:$0xff] }
 0x11a   :  { %12820 = vst [vmem:[#allocation12_spill] sm:$0xff] %v10419_v63  ;;  %8941 = vmatprep.mubr.msk.f32.mxu1 %vm591_vm0, %v435_v31 }
 0x11b   :  { %v10436_v63 = vpop.f32.mrb[30].mxu0 }
 0x11c   :  { %12821 = vst [vmem:[#allocation13_spill] sm:$0xff] %v10436_v63  ;;  %v10438_v30 = vpop.f32.mrb[30].mxu1  ;;  %v10440_v31 = vpop.f32.mrb[31].mxu0  ;;  %8510 = vmatmul.mubr.msk.f32.gmra.mrb[136].mxu0 %vm591_vm0, %v148_v15  ;;  %v151_v15 = vld [vmem:[%s12809_s0 + $0x460] sm:$0xff]  ;;  %v152_v63 = vld [vmem:[%s12809_s0 + $0x468] sm:$0xff] }
 0x11d   :  { %12822 = vst [vmem:[#allocation14_spill] sm:$0xff] %v10438_v30  ;;  %12823 = vst [vmem:[#allocation15_spill] sm:$0xff] %v10440_v31  ;;  %v10443_v62 = vpop.f32.mrb[31].mxu1  ;;  %8942 = vmatmul.mubr.msk.f32.gmra.mrb[136].mxu1 %vm591_vm0, %v436_v61  ;;  %8512 = vmatprep.mubr.msk.f32.mxu0 %vm591_vm0, %v149_v28  ;;  %v438_v30 = vld [vmem:[%s12809_s0 + $0xd58] sm:$0xff]  ;;  %v439_v61 = vld [vmem:[%s12809_s0 + $0xd60] sm:$0xff] }
 0x11e   :  { %12824 = vst [vmem:[#allocation16_spill] sm:$0xff] %v10443_v62  ;;  %8944 = vmatprep.mubr.msk.f32.mxu1 %vm591_vm0, %v437_v29 }
 0x11f   :  { %v10460_v62 = vpop.f32.mrb[32].mxu0 }
 0x120   :  { %12825 = vst [vmem:[#allocation17_spill] sm:$0xff] %v10460_v62  ;;  %v10462_v28 = vpop.f32.mrb[32].mxu1  ;;  %v10464_v29 = vpop.f32.mrb[33].mxu0  ;;  %8513 = vmatmul.mubr.msk.f32.gmra.mrb[138].mxu0 %vm591_vm0, %v150_v60  ;;  %v153_v60 = vld [vmem:[%s12809_s0 + $0x470] sm:$0xff]  ;;  %v154_v62 = vld [vmem:[%s12809_s0 + $0x478] sm:$0xff] }
 0x121   :  { %12826 = vst [vmem:[#allocation18_spill] sm:$0xff] %v10462_v28  ;;  %12827 = vst [vmem:[#allocation19_spill] sm:$0xff] %v10464_v29  ;;  %v10467_v31 = vpop.f32.mrb[33].mxu1  ;;  %8945 = vmatmul.mubr.msk.f32.gmra.mrb[138].mxu1 %vm591_vm0, %v438_v30  ;;  %8515 = vmatprep.mubr.msk.f32.mxu0 %vm591_vm0, %v151_v15  ;;  %v440_v28 = vld [vmem:[%s12809_s0 + $0xd68] sm:$0xff]  ;;  %v441_v30 = vld [vmem:[%s12809_s0 + $0xd70] sm:$0xff] }
 0x122   :  { %12828 = vst [vmem:[#allocation20_spill] sm:$0xff] %v10467_v31  ;;  %8947 = vmatprep.mubr.msk.f32.mxu1 %vm591_vm0, %v439_v61 }
 0x123   :  { %v10484_v31 = vpop.f32.mrb[34].mxu0 }
 0x124   :  { %12829 = vst [vmem:[#allocation21_spill] sm:$0xff] %v10484_v31  ;;  %v10486_v15 = vpop.f32.mrb[34].mxu1  ;;  %v10488_v61 = vpop.f32.mrb[35].mxu0  ;;  %8516 = vmatmul.mubr.msk.f32.gmra.mrb[140].mxu0 %vm591_vm0, %v152_v63  ;;  %v155_v63 = vld [vmem:[%s12809_s0 + $0x480] sm:$0xff]  ;;  %v156_v31 = vld [vmem:[%s12809_s0 + $0x488] sm:$0xff] }
 0x125   :  { %12830 = vst [vmem:[#allocation22_spill] sm:$0xff] %v10486_v15  ;;  %12831 = vst [vmem:[#allocation23_spill] sm:$0xff] %v10488_v61  ;;  %v10491_v29 = vpop.f32.mrb[35].mxu1  ;;  %8948 = vmatmul.mubr.msk.f32.gmra.mrb[140].mxu1 %vm591_vm0, %v440_v28  ;;  %8518 = vmatprep.mubr.msk.f32.mxu0 %vm591_vm0, %v153_v60  ;;  %v442_v15 = vld [vmem:[%s12809_s0 + $0xd78] sm:$0xff]  ;;  %v443_v28 = vld [vmem:[%s12809_s0 + $0xd80] sm:$0xff] }
 0x126   :  { %12832 = vst [vmem:[#allocation24_spill] sm:$0xff] %v10491_v29  ;;  %8950 = vmatprep.mubr.msk.f32.mxu1 %vm591_vm0, %v441_v30 }
 0x127   :  { %v10508_v29 = vpop.f32.mrb[36].mxu0 }
 0x128   :  { %12833 = vst [vmem:[#allocation25_spill] sm:$0xff] %v10508_v29  ;;  %v10510_v60 = vpop.f32.mrb[36].mxu1  ;;  %v10512_v30 = vpop.f32.mrb[37].mxu0  ;;  %8519 = vmatmul.mubr.msk.f32.gmra.mrb[142].mxu0 %vm591_vm0, %v154_v62  ;;  %v157_v62 = vld [vmem:[%s12809_s0 + $0x490] sm:$0xff]  ;;  %v158_v29 = vld [vmem:[%s12809_s0 + $0x498] sm:$0xff] }
 0x129   :  { %12834 = vst [vmem:[#allocation26_spill] sm:$0xff] %v10510_v60  ;;  %12835 = vst [vmem:[#allocation27_spill] sm:$0xff] %v10512_v30  ;;  %v10515_v61 = vpop.f32.mrb[37].mxu1  ;;  %8951 = vmatmul.mubr.msk.f32.gmra.mrb[142].mxu1 %vm591_vm0, %v442_v15  ;;  %8521 = vmatprep.mubr.msk.f32.mxu0 %vm591_vm0, %v155_v63  ;;  %v444_v60 = vld [vmem:[%s12809_s0 + $0xd88] sm:$0xff]  ;;  %v445_v15 = vld [vmem:[%s12809_s0 + $0xd90] sm:$0xff] }
 0x12a   :  { %12836 = vst [vmem:[#allocation28_spill] sm:$0xff] %v10515_v61  ;;  %8953 = vmatprep.mubr.msk.f32.mxu1 %vm591_vm0, %v443_v28 }
 0x12b   :  { %v10532_v61 = vpop.f32.mrb[38].mxu0 }
 0x12c   :  { %12837 = vst [vmem:[#allocation29_spill] sm:$0xff] %v10532_v61  ;;  %v10534_v63 = vpop.f32.mrb[38].mxu1  ;;  %v10536_v28 = vpop.f32.mrb[39].mxu0  ;;  %8522 = vmatmul.mubr.msk.f32.gmra.mrb[144].mxu0 %vm591_vm0, %v156_v31  ;;  %v159_v31 = vld [vmem:[%s12809_s0 + $0x4a0] sm:$0xff]  ;;  %v160_v61 = vld [vmem:[%s12809_s0 + $0x4a8] sm:$0xff] }
 0x12d   :  { %12838 = vst [vmem:[#allocation30_spill] sm:$0xff] %v10534_v63  ;;  %12839 = vst [vmem:[#allocation31_spill] sm:$0xff] %v10536_v28  ;;  %v10539_v30 = vpop.f32.mrb[39].mxu1  ;;  %8954 = vmatmul.mubr.msk.f32.gmra.mrb[144].mxu1 %vm591_vm0, %v444_v60  ;;  %8524 = vmatprep.mubr.msk.f32.mxu0 %vm591_vm0, %v157_v62  ;;  %v446_v63 = vld [vmem:[%s12809_s0 + $0xd98] sm:$0xff]  ;;  %v447_v60 = vld [vmem:[%s12809_s0 + $0xda0] sm:$0xff] }
 0x12e   :  { %12840 = vst [vmem:[#allocation32_spill] sm:$0xff] %v10539_v30  ;;  %8956 = vmatprep.mubr.msk.f32.mxu1 %vm591_vm0, %v445_v15 }
 0x12f   :  { %v10556_v30 = vpop.f32.mrb[40].mxu0 }
 0x130   :  { %12841 = vst [vmem:[#allocation33_spill] sm:$0xff] %v10556_v30  ;;  %v10558_v62 = vpop.f32.mrb[40].mxu1  ;;  %v10560_v15 = vpop.f32.mrb[41].mxu0  ;;  %8525 = vmatmul.mubr.msk.f32.gmra.mrb[146].mxu0 %vm591_vm0, %v158_v29  ;;  %v161_v29 = vld [vmem:[%s12809_s0 + $0x4b0] sm:$0xff]  ;;  %v162_v30 = vld [vmem:[%s12809_s0 + $0x4b8] sm:$0xff] }
 0x131   :  { %12842 = vst [vmem:[#allocation34_spill] sm:$0xff] %v10558_v62  ;;  %12843 = vst [vmem:[#allocation35_spill] sm:$0xff] %v10560_v15  ;;  %v10563_v28 = vpop.f32.mrb[41].mxu1  ;;  %8957 = vmatmul.mubr.msk.f32.gmra.mrb[146].mxu1 %vm591_vm0, %v446_v63  ;;  %8527 = vmatprep.mubr.msk.f32.mxu0 %vm591_vm0, %v159_v31  ;;  %v448_v62 = vld [vmem:[%s12809_s0 + $0xda8] sm:$0xff]  ;;  %v449_v63 = vld [vmem:[%s12809_s0 + $0xdb0] sm:$0xff] }
 0x132   :  { %12844 = vst [vmem:[#allocation36_spill] sm:$0xff] %v10563_v28  ;;  %8959 = vmatprep.mubr.msk.f32.mxu1 %vm591_vm0, %v447_v60 }
 0x133   :  { %v10580_v28 = vpop.f32.mrb[42].mxu0 }
 0x134   :  { %12845 = vst [vmem:[#allocation37_spill] sm:$0xff] %v10580_v28  ;;  %v10582_v31 = vpop.f32.mrb[42].mxu1  ;;  %v10584_v60 = vpop.f32.mrb[43].mxu0  ;;  %8528 = vmatmul.mubr.msk.f32.gmra.mrb[148].mxu0 %vm591_vm0, %v160_v61  ;;  %v163_v61 = vld [vmem:[%s12809_s0 + $0x4c0] sm:$0xff]  ;;  %v164_v28 = vld [vmem:[%s12809_s0 + $0x4c8] sm:$0xff] }
 0x135   :  { %12846 = vst [vmem:[#allocation38_spill] sm:$0xff] %v10582_v31  ;;  %12847 = vst [vmem:[#allocation39_spill] sm:$0xff] %v10584_v60  ;;  %v10587_v15 = vpop.f32.mrb[43].mxu1  ;;  %8960 = vmatmul.mubr.msk.f32.gmra.mrb[148].mxu1 %vm591_vm0, %v448_v62  ;;  %8530 = vmatprep.mubr.msk.f32.mxu0 %vm591_vm0, %v161_v29  ;;  %v450_v31 = vld [vmem:[%s12809_s0 + $0xdb8] sm:$0xff]  ;;  %v451_v62 = vld [vmem:[%s12809_s0 + $0xdc0] sm:$0xff] }
 0x136   :  { %12848 = vst [vmem:[#allocation40_spill] sm:$0xff] %v10587_v15  ;;  %8962 = vmatprep.mubr.msk.f32.mxu1 %vm591_vm0, %v449_v63 }
 0x137   :  { %v10604_v15 = vpop.f32.mrb[44].mxu0 }
 0x138   :  { %12849 = vst [vmem:[#allocation41_spill] sm:$0xff] %v10604_v15  ;;  %v10606_v29 = vpop.f32.mrb[44].mxu1  ;;  %v10608_v63 = vpop.f32.mrb[45].mxu0  ;;  %8531 = vmatmul.mubr.msk.f32.gmra.mrb[150].mxu0 %vm591_vm0, %v162_v30  ;;  %v165_v30 = vld [vmem:[%s12809_s0 + $0x4d0] sm:$0xff]  ;;  %v166_v15 = vld [vmem:[%s12809_s0 + $0x4d8] sm:$0xff] }
 0x139   :  { %12850 = vst [vmem:[#allocation42_spill] sm:$0xff] %v10606_v29  ;;  %12851 = vst [vmem:[#allocation43_spill] sm:$0xff] %v10608_v63  ;;  %v10611_v60 = vpop.f32.mrb[45].mxu1  ;;  %8963 = vmatmul.mubr.msk.f32.gmra.mrb[150].mxu1 %vm591_vm0, %v450_v31  ;;  %8533 = vmatprep.mubr.msk.f32.mxu0 %vm591_vm0, %v163_v61  ;;  %v452_v29 = vld [vmem:[%s12809_s0 + $0xdc8] sm:$0xff]  ;;  %v453_v31 = vld [vmem:[%s12809_s0 + $0xdd0] sm:$0xff] }
 0x13a   :  { %12852 = vst [vmem:[#allocation44_spill] sm:$0xff] %v10611_v60  ;;  %8965 = vmatprep.mubr.msk.f32.mxu1 %vm591_vm0, %v451_v62 }
 0x13b   :  { %v10628_v60 = vpop.f32.mrb[46].mxu0 }
 0x13c   :  { %12853 = vst [vmem:[#allocation45_spill] sm:$0xff] %v10628_v60  ;;  %v10630_v61 = vpop.f32.mrb[46].mxu1  ;;  %v10632_v62 = vpop.f32.mrb[47].mxu0  ;;  %8534 = vmatmul.mubr.msk.f32.gmra.mrb[152].mxu0 %vm591_vm0, %v164_v28  ;;  %v167_v28 = vld [vmem:[%s12809_s0 + $0x4e0] sm:$0xff]  ;;  %v168_v60 = vld [vmem:[%s12809_s0 + $0x4e8] sm:$0xff] }
 0x13d   :  { %12854 = vst [vmem:[#allocation46_spill] sm:$0xff] %v10630_v61  ;;  %12855 = vst [vmem:[#allocation47_spill] sm:$0xff] %v10632_v62  ;;  %v10635_v63 = vpop.f32.mrb[47].mxu1  ;;  %8966 = vmatmul.mubr.msk.f32.gmra.mrb[152].mxu1 %vm591_vm0, %v452_v29  ;;  %8536 = vmatprep.mubr.msk.f32.mxu0 %vm591_vm0, %v165_v30  ;;  %v454_v61 = vld [vmem:[%s12809_s0 + $0xdd8] sm:$0xff]  ;;  %v455_v29 = vld [vmem:[%s12809_s0 + $0xde0] sm:$0xff] }
 0x13e   :  { %12856 = vst [vmem:[#allocation48_spill] sm:$0xff] %v10635_v63  ;;  %8968 = vmatprep.mubr.msk.f32.mxu1 %vm591_vm0, %v453_v31 }
 0x13f   :  { %v10652_v63 = vpop.f32.mrb[48].mxu0 }
 0x140   :  { %12857 = vst [vmem:[#allocation49_spill] sm:$0xff] %v10652_v63  ;;  %v10654_v30 = vpop.f32.mrb[48].mxu1  ;;  %v10656_v31 = vpop.f32.mrb[49].mxu0  ;;  %8537 = vmatmul.mubr.msk.f32.gmra.mrb[154].mxu0 %vm591_vm0, %v166_v15  ;;  %v169_v15 = vld [vmem:[%s12809_s0 + $0x4f0] sm:$0xff]  ;;  %v170_v63 = vld [vmem:[%s12809_s0 + $0x4f8] sm:$0xff] }
 0x141   :  { %12858 = vst [vmem:[#allocation50_spill] sm:$0xff] %v10654_v30  ;;  %12859 = vst [vmem:[#allocation51_spill] sm:$0xff] %v10656_v31  ;;  %v10659_v62 = vpop.f32.mrb[49].mxu1  ;;  %8969 = vmatmul.mubr.msk.f32.gmra.mrb[154].mxu1 %vm591_vm0, %v454_v61  ;;  %8539 = vmatprep.mubr.msk.f32.mxu0 %vm591_vm0, %v167_v28  ;;  %v456_v30 = vld [vmem:[%s12809_s0 + $0xde8] sm:$0xff]  ;;  %v457_v61 = vld [vmem:[%s12809_s0 + $0xdf0] sm:$0xff] }
 0x142   :  { %12860 = vst [vmem:[#allocation52_spill] sm:$0xff] %v10659_v62  ;;  %8971 = vmatprep.mubr.msk.f32.mxu1 %vm591_vm0, %v455_v29 }
 0x143   :  { %v10676_v62 = vpop.f32.mrb[50].mxu0 }
 0x144   :  { %12861 = vst [vmem:[#allocation53_spill] sm:$0xff] %v10676_v62  ;;  %v10678_v28 = vpop.f32.mrb[50].mxu1  ;;  %v10680_v29 = vpop.f32.mrb[51].mxu0  ;;  %8540 = vmatmul.mubr.msk.f32.gmra.mrb[156].mxu0 %vm591_vm0, %v168_v60  ;;  %v171_v60 = vld [vmem:[%s12809_s0 + $0x500] sm:$0xff]  ;;  %v172_v62 = vld [vmem:[%s12809_s0 + $0x508] sm:$0xff] }
 0x145   :  { %12862 = vst [vmem:[#allocation54_spill] sm:$0xff] %v10678_v28  ;;  %12863 = vst [vmem:[#allocation55_spill] sm:$0xff] %v10680_v29  ;;  %v10683_v31 = vpop.f32.mrb[51].mxu1  ;;  %8972 = vmatmul.mubr.msk.f32.gmra.mrb[156].mxu1 %vm591_vm0, %v456_v30  ;;  %8542 = vmatprep.mubr.msk.f32.mxu0 %vm591_vm0, %v169_v15  ;;  %v458_v28 = vld [vmem:[%s12809_s0 + $0xdf8] sm:$0xff]  ;;  %v459_v30 = vld [vmem:[%s12809_s0 + $0xe00] sm:$0xff] }
 0x146   :  { %12864 = vst [vmem:[#allocation56_spill] sm:$0xff] %v10683_v31  ;;  %8974 = vmatprep.mubr.msk.f32.mxu1 %vm591_vm0, %v457_v61 }
 0x147   :  { %v10700_v31 = vpop.f32.mrb[52].mxu0 }
 0x148   :  { %12865 = vst [vmem:[#allocation57_spill] sm:$0xff] %v10700_v31  ;;  %v10702_v15 = vpop.f32.mrb[52].mxu1  ;;  %v10704_v61 = vpop.f32.mrb[53].mxu0  ;;  %8543 = vmatmul.mubr.msk.f32.gmra.mrb[158].mxu0 %vm591_vm0, %v170_v63  ;;  %v173_v63 = vld [vmem:[%s12809_s0 + $0x510] sm:$0xff]  ;;  %v174_v31 = vld [vmem:[%s12809_s0 + $0x518] sm:$0xff] }
 0x149   :  { %12866 = vst [vmem:[#allocation58_spill] sm:$0xff] %v10702_v15  ;;  %12867 = vst [vmem:[#allocation59_spill] sm:$0xff] %v10704_v61  ;;  %v10707_v29 = vpop.f32.mrb[53].mxu1  ;;  %8975 = vmatmul.mubr.msk.f32.gmra.mrb[158].mxu1 %vm591_vm0, %v458_v28  ;;  %8545 = vmatprep.mubr.msk.f32.mxu0 %vm591_vm0, %v171_v60  ;;  %v460_v15 = vld [vmem:[%s12809_s0 + $0xe08] sm:$0xff]  ;;  %v461_v28 = vld [vmem:[%s12809_s0 + $0xe10] sm:$0xff] }
 0x14a   :  { %12868 = vst [vmem:[#allocation60_spill] sm:$0xff] %v10707_v29  ;;  %8977 = vmatprep.mubr.msk.f32.mxu1 %vm591_vm0, %v459_v30 }
 0x14b   :  { %v10724_v29 = vpop.f32.mrb[54].mxu0 }
 0x14c   :  { %12869 = vst [vmem:[#allocation61_spill] sm:$0xff] %v10724_v29  ;;  %v10726_v60 = vpop.f32.mrb[54].mxu1  ;;  %v10728_v30 = vpop.f32.mrb[55].mxu0  ;;  %8546 = vmatmul.mubr.msk.f32.gmra.mrb[160].mxu0 %vm591_vm0, %v172_v62  ;;  %v175_v62 = vld [vmem:[%s12809_s0 + $0x520] sm:$0xff]  ;;  %v176_v29 = vld [vmem:[%s12809_s0 + $0x528] sm:$0xff] }
 0x14d   :  { %12870 = vst [vmem:[#allocation62_spill] sm:$0xff] %v10726_v60  ;;  %12871 = vst [vmem:[#allocation63_spill] sm:$0xff] %v10728_v30  ;;  %v10731_v61 = vpop.f32.mrb[55].mxu1  ;;  %8978 = vmatmul.mubr.msk.f32.gmra.mrb[160].mxu1 %vm591_vm0, %v460_v15  ;;  %8548 = vmatprep.mubr.msk.f32.mxu0 %vm591_vm0, %v173_v63  ;;  %v462_v60 = vld [vmem:[%s12809_s0 + $0xe18] sm:$0xff]  ;;  %v463_v15 = vld [vmem:[%s12809_s0 + $0xe20] sm:$0xff] }
 0x14e   :  { %12872 = vst [vmem:[#allocation64_spill] sm:$0xff] %v10731_v61  ;;  %8980 = vmatprep.mubr.msk.f32.mxu1 %vm591_vm0, %v461_v28 }
 0x14f   :  { %v10748_v61 = vpop.f32.mrb[56].mxu0 }
 0x150   :  { %12873 = vst [vmem:[#allocation65_spill] sm:$0xff] %v10748_v61  ;;  %v10750_v63 = vpop.f32.mrb[56].mxu1  ;;  %v10752_v28 = vpop.f32.mrb[57].mxu0  ;;  %8549 = vmatmul.mubr.msk.f32.gmra.mrb[162].mxu0 %vm591_vm0, %v174_v31  ;;  %v177_v31 = vld [vmem:[%s12809_s0 + $0x530] sm:$0xff]  ;;  %v178_v61 = vld [vmem:[%s12809_s0 + $0x538] sm:$0xff] }
 0x151   :  { %12874 = vst [vmem:[#allocation66_spill] sm:$0xff] %v10750_v63  ;;  %12875 = vst [vmem:[#allocation67_spill] sm:$0xff] %v10752_v28  ;;  %v10755_v30 = vpop.f32.mrb[57].mxu1  ;;  %8981 = vmatmul.mubr.msk.f32.gmra.mrb[162].mxu1 %vm591_vm0, %v462_v60  ;;  %8551 = vmatprep.mubr.msk.f32.mxu0 %vm591_vm0, %v175_v62  ;;  %v464_v63 = vld [vmem:[%s12809_s0 + $0xe28] sm:$0xff]  ;;  %v465_v60 = vld [vmem:[%s12809_s0 + $0xe30] sm:$0xff] }
 0x152   :  { %12876 = vst [vmem:[#allocation68_spill] sm:$0xff] %v10755_v30  ;;  %8983 = vmatprep.mubr.msk.f32.mxu1 %vm591_vm0, %v463_v15 }
 0x153   :  { %v10772_v30 = vpop.f32.mrb[58].mxu0 }
 0x154   :  { %12877 = vst [vmem:[#allocation69_spill] sm:$0xff] %v10772_v30  ;;  %v10774_v62 = vpop.f32.mrb[58].mxu1  ;;  %v10776_v15 = vpop.f32.mrb[59].mxu0  ;;  %8552 = vmatmul.mubr.msk.f32.gmra.mrb[164].mxu0 %vm591_vm0, %v176_v29  ;;  %v179_v29 = vld [vmem:[%s12809_s0 + $0x540] sm:$0xff]  ;;  %v180_v30 = vld [vmem:[%s12809_s0 + $0x548] sm:$0xff] }
 0x155   :  { %12878 = vst [vmem:[#allocation70_spill] sm:$0xff] %v10774_v62  ;;  %12879 = vst [vmem:[#allocation71_spill] sm:$0xff] %v10776_v15  ;;  %v10779_v28 = vpop.f32.mrb[59].mxu1  ;;  %8984 = vmatmul.mubr.msk.f32.gmra.mrb[164].mxu1 %vm591_vm0, %v464_v63  ;;  %8554 = vmatprep.mubr.msk.f32.mxu0 %vm591_vm0, %v177_v31  ;;  %v466_v62 = vld [vmem:[%s12809_s0 + $0xe38] sm:$0xff]  ;;  %v467_v63 = vld [vmem:[%s12809_s0 + $0xe40] sm:$0xff] }
 0x156   :  { %12880 = vst [vmem:[#allocation72_spill] sm:$0xff] %v10779_v28  ;;  %8986 = vmatprep.mubr.msk.f32.mxu1 %vm591_vm0, %v465_v60 }
 0x157   :  { %v10796_v28 = vpop.f32.mrb[60].mxu0 }
 0x158   :  { %12881 = vst [vmem:[#allocation73_spill] sm:$0xff] %v10796_v28  ;;  %v10798_v31 = vpop.f32.mrb[60].mxu1  ;;  %v10800_v60 = vpop.f32.mrb[61].mxu0  ;;  %8555 = vmatmul.mubr.msk.f32.gmra.mrb[166].mxu0 %vm591_vm0, %v178_v61  ;;  %v181_v61 = vld [vmem:[%s12809_s0 + $0x550] sm:$0xff]  ;;  %v182_v28 = vld [vmem:[%s12809_s0 + $0x558] sm:$0xff] }
 0x159   :  { %12882 = vst [vmem:[#allocation74_spill] sm:$0xff] %v10798_v31  ;;  %12883 = vst [vmem:[#allocation75_spill] sm:$0xff] %v10800_v60  ;;  %v10803_v15 = vpop.f32.mrb[61].mxu1  ;;  %8987 = vmatmul.mubr.msk.f32.gmra.mrb[166].mxu1 %vm591_vm0, %v466_v62  ;;  %8557 = vmatprep.mubr.msk.f32.mxu0 %vm591_vm0, %v179_v29  ;;  %v468_v31 = vld [vmem:[%s12809_s0 + $0xe48] sm:$0xff]  ;;  %v469_v62 = vld [vmem:[%s12809_s0 + $0xe50] sm:$0xff] }
 0x15a   :  { %12884 = vst [vmem:[#allocation76_spill] sm:$0xff] %v10803_v15  ;;  %8989 = vmatprep.mubr.msk.f32.mxu1 %vm591_vm0, %v467_v63 }
 0x15b   :  { %v10820_v15 = vpop.f32.mrb[62].mxu0 }
 0x15c   :  { %12885 = vst [vmem:[#allocation77_spill] sm:$0xff] %v10820_v15  ;;  %v10822_v29 = vpop.f32.mrb[62].mxu1  ;;  %v10824_v63 = vpop.f32.mrb[63].mxu0  ;;  %8558 = vmatmul.mubr.msk.f32.gmra.mrb[168].mxu0 %vm591_vm0, %v180_v30  ;;  %v183_v30 = vld [vmem:[%s12809_s0 + $0x560] sm:$0xff]  ;;  %v184_v15 = vld [vmem:[%s12809_s0 + $0x568] sm:$0xff] }
 0x15d   :  { %12886 = vst [vmem:[#allocation78_spill] sm:$0xff] %v10822_v29  ;;  %12887 = vst [vmem:[#allocation79_spill] sm:$0xff] %v10824_v63  ;;  %v10827_v60 = vpop.f32.mrb[63].mxu1  ;;  %8990 = vmatmul.mubr.msk.f32.gmra.mrb[168].mxu1 %vm591_vm0, %v468_v31  ;;  %8560 = vmatprep.mubr.msk.f32.mxu0 %vm591_vm0, %v181_v61  ;;  %v470_v29 = vld [vmem:[%s12809_s0 + $0xe58] sm:$0xff]  ;;  %v471_v31 = vld [vmem:[%s12809_s0 + $0xe60] sm:$0xff] }
 0x15e   :  { %12888 = vst [vmem:[#allocation80_spill] sm:$0xff] %v10827_v60  ;;  %8992 = vmatprep.mubr.msk.f32.mxu1 %vm591_vm0, %v469_v62 }
 0x15f   :  { %v10844_v60 = vpop.f32.mrb[64].mxu0 }
 0x160   :  { %12889 = vst [vmem:[#allocation81_spill] sm:$0xff] %v10844_v60  ;;  %v10846_v61 = vpop.f32.mrb[64].mxu1  ;;  %v10848_v62 = vpop.f32.mrb[65].mxu0  ;;  %8561 = vmatmul.mubr.msk.f32.gmra.mrb[170].mxu0 %vm591_vm0, %v182_v28  ;;  %v185_v28 = vld [vmem:[%s12809_s0 + $0x570] sm:$0xff]  ;;  %v186_v60 = vld [vmem:[%s12809_s0 + $0x578] sm:$0xff] }
 0x161   :  { %12890 = vst [vmem:[#allocation82_spill] sm:$0xff] %v10846_v61  ;;  %12891 = vst [vmem:[#allocation83_spill] sm:$0xff] %v10848_v62  ;;  %v10851_v63 = vpop.f32.mrb[65].mxu1  ;;  %8993 = vmatmul.mubr.msk.f32.gmra.mrb[170].mxu1 %vm591_vm0, %v470_v29  ;;  %8563 = vmatprep.mubr.msk.f32.mxu0 %vm591_vm0, %v183_v30  ;;  %v472_v61 = vld [vmem:[%s12809_s0 + $0xe68] sm:$0xff]  ;;  %v473_v29 = vld [vmem:[%s12809_s0 + $0xe70] sm:$0xff] }
 0x162   :  { %12892 = vst [vmem:[#allocation84_spill] sm:$0xff] %v10851_v63  ;;  %8995 = vmatprep.mubr.msk.f32.mxu1 %vm591_vm0, %v471_v31 }
 0x163   :  { %v10868_v63 = vpop.f32.mrb[66].mxu0 }
 0x164   :  { %12893 = vst [vmem:[#allocation85_spill] sm:$0xff] %v10868_v63  ;;  %v10870_v30 = vpop.f32.mrb[66].mxu1  ;;  %v10872_v31 = vpop.f32.mrb[67].mxu0  ;;  %8564 = vmatmul.mubr.msk.f32.gmra.mrb[172].mxu0 %vm591_vm0, %v184_v15  ;;  %v187_v15 = vld [vmem:[%s12809_s0 + $0x580] sm:$0xff]  ;;  %v188_v63 = vld [vmem:[%s12809_s0 + $0x588] sm:$0xff] }
 0x165   :  { %12894 = vst [vmem:[#allocation86_spill] sm:$0xff] %v10870_v30  ;;  %12895 = vst [vmem:[#allocation87_spill] sm:$0xff] %v10872_v31  ;;  %v10875_v62 = vpop.f32.mrb[67].mxu1  ;;  %8996 = vmatmul.mubr.msk.f32.gmra.mrb[172].mxu1 %vm591_vm0, %v472_v61  ;;  %8566 = vmatprep.mubr.msk.f32.mxu0 %vm591_vm0, %v185_v28  ;;  %v474_v30 = vld [vmem:[%s12809_s0 + $0xe78] sm:$0xff]  ;;  %v475_v61 = vld [vmem:[%s12809_s0 + $0xe80] sm:$0xff] }
 0x166   :  { %12896 = vst [vmem:[#allocation88_spill] sm:$0xff] %v10875_v62  ;;  %8998 = vmatprep.mubr.msk.f32.mxu1 %vm591_vm0, %v473_v29 }
 0x167   :  { %v10892_v62 = vpop.f32.mrb[68].mxu0 }
 0x168   :  { %12897 = vst [vmem:[#allocation89_spill] sm:$0xff] %v10892_v62  ;;  %v10894_v28 = vpop.f32.mrb[68].mxu1  ;;  %v10896_v29 = vpop.f32.mrb[69].mxu0  ;;  %8567 = vmatmul.mubr.msk.f32.gmra.mrb[174].mxu0 %vm591_vm0, %v186_v60  ;;  %v189_v60 = vld [vmem:[%s12809_s0 + $0x590] sm:$0xff]  ;;  %v190_v62 = vld [vmem:[%s12809_s0 + $0x598] sm:$0xff] }
 0x169   :  { %12898 = vst [vmem:[#allocation90_spill] sm:$0xff] %v10894_v28  ;;  %12899 = vst [vmem:[#allocation91_spill] sm:$0xff] %v10896_v29  ;;  %v10899_v31 = vpop.f32.mrb[69].mxu1  ;;  %8999 = vmatmul.mubr.msk.f32.gmra.mrb[174].mxu1 %vm591_vm0, %v474_v30  ;;  %8569 = vmatprep.mubr.msk.f32.mxu0 %vm591_vm0, %v187_v15  ;;  %v476_v28 = vld [vmem:[%s12809_s0 + $0xe88] sm:$0xff]  ;;  %v477_v30 = vld [vmem:[%s12809_s0 + $0xe90] sm:$0xff] }
 0x16a   :  { %12900 = vst [vmem:[#allocation92_spill] sm:$0xff] %v10899_v31  ;;  %9001 = vmatprep.mubr.msk.f32.mxu1 %vm591_vm0, %v475_v61 }
 0x16b   :  { %v10916_v31 = vpop.f32.mrb[70].mxu0 }
 0x16c   :  { %12901 = vst [vmem:[#allocation93_spill] sm:$0xff] %v10916_v31  ;;  %v10918_v15 = vpop.f32.mrb[70].mxu1  ;;  %v10920_v61 = vpop.f32.mrb[71].mxu0  ;;  %8570 = vmatmul.mubr.msk.f32.gmra.mrb[176].mxu0 %vm591_vm0, %v188_v63  ;;  %v191_v63 = vld [vmem:[%s12809_s0 + $0x5a0] sm:$0xff]  ;;  %v192_v31 = vld [vmem:[%s12809_s0 + $0x5a8] sm:$0xff] }
 0x16d   :  { %12902 = vst [vmem:[#allocation94_spill] sm:$0xff] %v10918_v15  ;;  %12903 = vst [vmem:[#allocation95_spill] sm:$0xff] %v10920_v61  ;;  %v10923_v29 = vpop.f32.mrb[71].mxu1  ;;  %9002 = vmatmul.mubr.msk.f32.gmra.mrb[176].mxu1 %vm591_vm0, %v476_v28  ;;  %8572 = vmatprep.mubr.msk.f32.mxu0 %vm591_vm0, %v189_v60  ;;  %v478_v15 = vld [vmem:[%s12809_s0 + $0xe98] sm:$0xff]  ;;  %v479_v28 = vld [vmem:[%s12809_s0 + $0xea0] sm:$0xff] }
 0x16e   :  { %12904 = vst [vmem:[#allocation96_spill] sm:$0xff] %v10923_v29  ;;  %9004 = vmatprep.mubr.msk.f32.mxu1 %vm591_vm0, %v477_v30 }
 0x16f   :  { %v10940_v29 = vpop.f32.mrb[72].mxu0 }
 0x170   :  { %12905 = vst [vmem:[#allocation97_spill] sm:$0xff] %v10940_v29  ;;  %v10942_v60 = vpop.f32.mrb[72].mxu1  ;;  %v10944_v30 = vpop.f32.mrb[73].mxu0  ;;  %8573 = vmatmul.mubr.msk.f32.gmra.mrb[178].mxu0 %vm591_vm0, %v190_v62  ;;  %v193_v62 = vld [vmem:[%s12809_s0 + $0x5b0] sm:$0xff]  ;;  %v194_v29 = vld [vmem:[%s12809_s0 + $0x5b8] sm:$0xff] }
 0x171   :  { %12906 = vst [vmem:[#allocation98_spill] sm:$0xff] %v10942_v60  ;;  %12907 = vst [vmem:[#allocation99_spill] sm:$0xff] %v10944_v30  ;;  %v10947_v61 = vpop.f32.mrb[73].mxu1  ;;  %9005 = vmatmul.mubr.msk.f32.gmra.mrb[178].mxu1 %vm591_vm0, %v478_v15  ;;  %8575 = vmatprep.mubr.msk.f32.mxu0 %vm591_vm0, %v191_v63  ;;  %v480_v60 = vld [vmem:[%s12809_s0 + $0xea8] sm:$0xff]  ;;  %v481_v15 = vld [vmem:[%s12809_s0 + $0xeb0] sm:$0xff] }
 0x172   :  { %12908 = vst [vmem:[#allocation100_spill] sm:$0xff] %v10947_v61  ;;  %9007 = vmatprep.mubr.msk.f32.mxu1 %vm591_vm0, %v479_v28 }
 0x173   :  { %v10964_v61 = vpop.f32.mrb[74].mxu0 }
 0x174   :  { %12909 = vst [vmem:[#allocation101_spill] sm:$0xff] %v10964_v61  ;;  %v10966_v63 = vpop.f32.mrb[74].mxu1  ;;  %v10968_v28 = vpop.f32.mrb[75].mxu0  ;;  %8576 = vmatmul.mubr.msk.f32.gmra.mrb[180].mxu0 %vm591_vm0, %v192_v31  ;;  %v195_v31 = vld [vmem:[%s12809_s0 + $0x5c0] sm:$0xff]  ;;  %v196_v61 = vld [vmem:[%s12809_s0 + $0x5c8] sm:$0xff] }
 0x175   :  { %12910 = vst [vmem:[#allocation102_spill] sm:$0xff] %v10966_v63  ;;  %12911 = vst [vmem:[#allocation103_spill] sm:$0xff] %v10968_v28  ;;  %v10971_v30 = vpop.f32.mrb[75].mxu1  ;;  %9008 = vmatmul.mubr.msk.f32.gmra.mrb[180].mxu1 %vm591_vm0, %v480_v60  ;;  %8578 = vmatprep.mubr.msk.f32.mxu0 %vm591_vm0, %v193_v62  ;;  %v482_v63 = vld [vmem:[%s12809_s0 + $0xeb8] sm:$0xff]  ;;  %v483_v60 = vld [vmem:[%s12809_s0 + $0xec0] sm:$0xff] }
 0x176   :  { %12912 = vst [vmem:[#allocation104_spill] sm:$0xff] %v10971_v30  ;;  %9010 = vmatprep.mubr.msk.f32.mxu1 %vm591_vm0, %v481_v15 }
 0x177   :  { %v10988_v30 = vpop.f32.mrb[76].mxu0 }
 0x178   :  { %12913 = vst [vmem:[#allocation105_spill] sm:$0xff] %v10988_v30  ;;  %v10990_v62 = vpop.f32.mrb[76].mxu1  ;;  %v10992_v15 = vpop.f32.mrb[77].mxu0  ;;  %8579 = vmatmul.mubr.msk.f32.gmra.mrb[182].mxu0 %vm591_vm0, %v194_v29  ;;  %v197_v29 = vld [vmem:[%s12809_s0 + $0x5d0] sm:$0xff]  ;;  %v198_v30 = vld [vmem:[%s12809_s0 + $0x5d8] sm:$0xff] }
 0x179   :  { %12914 = vst [vmem:[#allocation106_spill] sm:$0xff] %v10990_v62  ;;  %12915 = vst [vmem:[#allocation107_spill] sm:$0xff] %v10992_v15  ;;  %v10995_v28 = vpop.f32.mrb[77].mxu1  ;;  %9011 = vmatmul.mubr.msk.f32.gmra.mrb[182].mxu1 %vm591_vm0, %v482_v63  ;;  %8581 = vmatprep.mubr.msk.f32.mxu0 %vm591_vm0, %v195_v31  ;;  %v484_v62 = vld [vmem:[%s12809_s0 + $0xec8] sm:$0xff]  ;;  %v485_v63 = vld [vmem:[%s12809_s0 + $0xed0] sm:$0xff] }
 0x17a   :  { %12916 = vst [vmem:[#allocation108_spill] sm:$0xff] %v10995_v28  ;;  %9013 = vmatprep.mubr.msk.f32.mxu1 %vm591_vm0, %v483_v60 }
 0x17b   :  { %v11012_v28 = vpop.f32.mrb[78].mxu0 }
 0x17c   :  { %12917 = vst [vmem:[#allocation109_spill] sm:$0xff] %v11012_v28  ;;  %v11014_v31 = vpop.f32.mrb[78].mxu1  ;;  %v11016_v60 = vpop.f32.mrb[79].mxu0  ;;  %8582 = vmatmul.mubr.msk.f32.gmra.mrb[184].mxu0 %vm591_vm0, %v196_v61  ;;  %v199_v61 = vld [vmem:[%s12809_s0 + $0x5e0] sm:$0xff]  ;;  %v200_v28 = vld [vmem:[%s12809_s0 + $0x5e8] sm:$0xff] }
 0x17d   :  { %12918 = vst [vmem:[#allocation110_spill] sm:$0xff] %v11014_v31  ;;  %12919 = vst [vmem:[#allocation111_spill] sm:$0xff] %v11016_v60  ;;  %v11019_v15 = vpop.f32.mrb[79].mxu1  ;;  %9014 = vmatmul.mubr.msk.f32.gmra.mrb[184].mxu1 %vm591_vm0, %v484_v62  ;;  %8584 = vmatprep.mubr.msk.f32.mxu0 %vm591_vm0, %v197_v29  ;;  %v486_v31 = vld [vmem:[%s12809_s0 + $0xed8] sm:$0xff]  ;;  %v487_v62 = vld [vmem:[%s12809_s0 + $0xee0] sm:$0xff] }
 0x17e   :  { %12920 = vst [vmem:[#allocation112_spill] sm:$0xff] %v11019_v15  ;;  %9016 = vmatprep.mubr.msk.f32.mxu1 %vm591_vm0, %v485_v63 }
 0x17f   :  { %v11036_v15 = vpop.f32.mrb[80].mxu0 }
 0x180   :  { %12921 = vst [vmem:[#allocation113_spill] sm:$0xff] %v11036_v15  ;;  %v11038_v29 = vpop.f32.mrb[80].mxu1  ;;  %v11040_v63 = vpop.f32.mrb[81].mxu0  ;;  %8585 = vmatmul.mubr.msk.f32.gmra.mrb[186].mxu0 %vm591_vm0, %v198_v30  ;;  %v201_v30 = vld [vmem:[%s12809_s0 + $0x5f0] sm:$0xff]  ;;  %v202_v15 = vld [vmem:[%s12809_s0 + $0x5f8] sm:$0xff] }
 0x181   :  { %12922 = vst [vmem:[#allocation114_spill] sm:$0xff] %v11038_v29  ;;  %12923 = vst [vmem:[#allocation115_spill] sm:$0xff] %v11040_v63  ;;  %v11043_v60 = vpop.f32.mrb[81].mxu1  ;;  %9017 = vmatmul.mubr.msk.f32.gmra.mrb[186].mxu1 %vm591_vm0, %v486_v31  ;;  %8587 = vmatprep.mubr.msk.f32.mxu0 %vm591_vm0, %v199_v61  ;;  %v488_v29 = vld [vmem:[%s12809_s0 + $0xee8] sm:$0xff]  ;;  %v489_v31 = vld [vmem:[%s12809_s0 + $0xef0] sm:$0xff] }
 0x182   :  { %12924 = vst [vmem:[#allocation116_spill] sm:$0xff] %v11043_v60  ;;  %9019 = vmatprep.mubr.msk.f32.mxu1 %vm591_vm0, %v487_v62 }
 0x183   :  { %v11060_v60 = vpop.f32.mrb[82].mxu0 }
 0x184   :  { %12925 = vst [vmem:[#allocation117_spill] sm:$0xff] %v11060_v60  ;;  %v11062_v61 = vpop.f32.mrb[82].mxu1  ;;  %v11064_v62 = vpop.f32.mrb[83].mxu0  ;;  %8588 = vmatmul.mubr.msk.f32.gmra.mrb[188].mxu0 %vm591_vm0, %v200_v28  ;;  %v203_v28 = vld [vmem:[%s12809_s0 + $0x600] sm:$0xff]  ;;  %v204_v60 = vld [vmem:[%s12809_s0 + $0x608] sm:$0xff] }
 0x185   :  { %12926 = vst [vmem:[#allocation118_spill] sm:$0xff] %v11062_v61  ;;  %12927 = vst [vmem:[#allocation119_spill] sm:$0xff] %v11064_v62  ;;  %v11067_v63 = vpop.f32.mrb[83].mxu1  ;;  %9020 = vmatmul.mubr.msk.f32.gmra.mrb[188].mxu1 %vm591_vm0, %v488_v29  ;;  %8590 = vmatprep.mubr.msk.f32.mxu0 %vm591_vm0, %v201_v30  ;;  %v490_v61 = vld [vmem:[%s12809_s0 + $0xef8] sm:$0xff]  ;;  %v491_v29 = vld [vmem:[%s12809_s0 + $0xf00] sm:$0xff] }
 0x186   :  { %12928 = vst [vmem:[#allocation120_spill] sm:$0xff] %v11067_v63  ;;  %9022 = vmatprep.mubr.msk.f32.mxu1 %vm591_vm0, %v489_v31 }
 0x187   :  { %v11084_v63 = vpop.f32.mrb[84].mxu0 }
 0x188   :  { %12929 = vst [vmem:[#allocation121_spill] sm:$0xff] %v11084_v63  ;;  %v11086_v30 = vpop.f32.mrb[84].mxu1  ;;  %v11088_v31 = vpop.f32.mrb[85].mxu0  ;;  %8591 = vmatmul.mubr.msk.f32.gmra.mrb[190].mxu0 %vm591_vm0, %v202_v15  ;;  %v205_v15 = vld [vmem:[%s12809_s0 + $0x610] sm:$0xff]  ;;  %v206_v63 = vld [vmem:[%s12809_s0 + $0x618] sm:$0xff] }
 0x189   :  { %12930 = vst [vmem:[#allocation122_spill] sm:$0xff] %v11086_v30  ;;  %12931 = vst [vmem:[#allocation123_spill] sm:$0xff] %v11088_v31  ;;  %v11091_v62 = vpop.f32.mrb[85].mxu1  ;;  %9023 = vmatmul.mubr.msk.f32.gmra.mrb[190].mxu1 %vm591_vm0, %v490_v61  ;;  %8593 = vmatprep.mubr.msk.f32.mxu0 %vm591_vm0, %v203_v28  ;;  %v492_v30 = vld [vmem:[%s12809_s0 + $0xf08] sm:$0xff]  ;;  %v493_v61 = vld [vmem:[%s12809_s0 + $0xf10] sm:$0xff] }
 0x18a   :  { %12932 = vst [vmem:[#allocation124_spill] sm:$0xff] %v11091_v62  ;;  %9025 = vmatprep.mubr.msk.f32.mxu1 %vm591_vm0, %v491_v29 }
 0x18b   :  { %v11108_v62 = vpop.f32.mrb[86].mxu0 }
 0x18c   :  { %12933 = vst [vmem:[#allocation125_spill] sm:$0xff] %v11108_v62  ;;  %v11110_v28 = vpop.f32.mrb[86].mxu1  ;;  %v11112_v29 = vpop.f32.mrb[87].mxu0  ;;  %8594 = vmatmul.mubr.msk.f32.gmra.mrb[192].mxu0 %vm591_vm0, %v204_v60  ;;  %v207_v60 = vld [vmem:[%s12809_s0 + $0x620] sm:$0xff]  ;;  %v208_v62 = vld [vmem:[%s12809_s0 + $0x628] sm:$0xff] }
 0x18d   :  { %12934 = vst [vmem:[#allocation126_spill] sm:$0xff] %v11110_v28  ;;  %12935 = vst [vmem:[#allocation127_spill] sm:$0xff] %v11112_v29  ;;  %v11115_v31 = vpop.f32.mrb[87].mxu1  ;;  %9026 = vmatmul.mubr.msk.f32.gmra.mrb[192].mxu1 %vm591_vm0, %v492_v30  ;;  %8596 = vmatprep.mubr.msk.f32.mxu0 %vm591_vm0, %v205_v15  ;;  %v494_v28 = vld [vmem:[%s12809_s0 + $0xf18] sm:$0xff]  ;;  %v495_v30 = vld [vmem:[%s12809_s0 + $0xf20] sm:$0xff] }
 0x18e   :  { %12936 = vst [vmem:[#allocation128_spill] sm:$0xff] %v11115_v31  ;;  %9028 = vmatprep.mubr.msk.f32.mxu1 %vm591_vm0, %v493_v61 }
 0x18f   :  { %v11132_v31 = vpop.f32.mrb[88].mxu0 }
 0x190   :  { %12937 = vst [vmem:[#allocation129_spill] sm:$0xff] %v11132_v31  ;;  %v11134_v15 = vpop.f32.mrb[88].mxu1  ;;  %v11136_v61 = vpop.f32.mrb[89].mxu0  ;;  %8597 = vmatmul.mubr.msk.f32.gmra.mrb[194].mxu0 %vm591_vm0, %v206_v63  ;;  %v209_v63 = vld [vmem:[%s12809_s0 + $0x630] sm:$0xff]  ;;  %v210_v31 = vld [vmem:[%s12809_s0 + $0x638] sm:$0xff] }
 0x191   :  { %12938 = vst [vmem:[#allocation130_spill] sm:$0xff] %v11134_v15  ;;  %12939 = vst [vmem:[#allocation131_spill] sm:$0xff] %v11136_v61  ;;  %v11139_v29 = vpop.f32.mrb[89].mxu1  ;;  %9029 = vmatmul.mubr.msk.f32.gmra.mrb[194].mxu1 %vm591_vm0, %v494_v28  ;;  %8599 = vmatprep.mubr.msk.f32.mxu0 %vm591_vm0, %v207_v60  ;;  %v496_v15 = vld [vmem:[%s12809_s0 + $0xf28] sm:$0xff]  ;;  %v497_v28 = vld [vmem:[%s12809_s0 + $0xf30] sm:$0xff] }
 0x192   :  { %12940 = vst [vmem:[#allocation132_spill] sm:$0xff] %v11139_v29  ;;  %9031 = vmatprep.mubr.msk.f32.mxu1 %vm591_vm0, %v495_v30 }
 0x193   :  { %v11156_v29 = vpop.f32.mrb[90].mxu0 }
 0x194   :  { %12941 = vst [vmem:[#allocation133_spill] sm:$0xff] %v11156_v29  ;;  %v11158_v60 = vpop.f32.mrb[90].mxu1  ;;  %v11160_v30 = vpop.f32.mrb[91].mxu0  ;;  %8600 = vmatmul.mubr.msk.f32.gmra.mrb[196].mxu0 %vm591_vm0, %v208_v62  ;;  %v211_v62 = vld [vmem:[%s12809_s0 + $0x640] sm:$0xff]  ;;  %v212_v29 = vld [vmem:[%s12809_s0 + $0x648] sm:$0xff] }
 0x195   :  { %12942 = vst [vmem:[#allocation134_spill] sm:$0xff] %v11158_v60  ;;  %12943 = vst [vmem:[#allocation135_spill] sm:$0xff] %v11160_v30  ;;  %v11163_v61 = vpop.f32.mrb[91].mxu1  ;;  %9032 = vmatmul.mubr.msk.f32.gmra.mrb[196].mxu1 %vm591_vm0, %v496_v15  ;;  %8602 = vmatprep.mubr.msk.f32.mxu0 %vm591_vm0, %v209_v63  ;;  %v498_v60 = vld [vmem:[%s12809_s0 + $0xf38] sm:$0xff]  ;;  %v499_v15 = vld [vmem:[%s12809_s0 + $0xf40] sm:$0xff] }
 0x196   :  { %12944 = vst [vmem:[#allocation136_spill] sm:$0xff] %v11163_v61  ;;  %9034 = vmatprep.mubr.msk.f32.mxu1 %vm591_vm0, %v497_v28 }
 0x197   :  { %v11180_v61 = vpop.f32.mrb[92].mxu0 }
 0x198   :  { %12945 = vst [vmem:[#allocation137_spill] sm:$0xff] %v11180_v61  ;;  %v11182_v63 = vpop.f32.mrb[92].mxu1  ;;  %v11184_v28 = vpop.f32.mrb[93].mxu0  ;;  %8603 = vmatmul.mubr.msk.f32.gmra.mrb[198].mxu0 %vm591_vm0, %v210_v31  ;;  %v213_v31 = vld [vmem:[%s12809_s0 + $0x650] sm:$0xff]  ;;  %v214_v61 = vld [vmem:[%s12809_s0 + $0x658] sm:$0xff] }
 0x199   :  { %12946 = vst [vmem:[#allocation138_spill] sm:$0xff] %v11182_v63  ;;  %12947 = vst [vmem:[#allocation139_spill] sm:$0xff] %v11184_v28  ;;  %v11187_v30 = vpop.f32.mrb[93].mxu1  ;;  %9035 = vmatmul.mubr.msk.f32.gmra.mrb[198].mxu1 %vm591_vm0, %v498_v60  ;;  %8605 = vmatprep.mubr.msk.f32.mxu0 %vm591_vm0, %v211_v62  ;;  %v500_v63 = vld [vmem:[%s12809_s0 + $0xf48] sm:$0xff]  ;;  %v501_v60 = vld [vmem:[%s12809_s0 + $0xf50] sm:$0xff] }
 0x19a   :  { %12948 = vst [vmem:[#allocation140_spill] sm:$0xff] %v11187_v30  ;;  %9037 = vmatprep.mubr.msk.f32.mxu1 %vm591_vm0, %v499_v15 }
 0x19b   :  { %v11204_v30 = vpop.f32.mrb[94].mxu0 }
 0x19c   :  { %12949 = vst [vmem:[#allocation141_spill] sm:$0xff] %v11204_v30  ;;  %v11206_v62 = vpop.f32.mrb[94].mxu1  ;;  %v11208_v15 = vpop.f32.mrb[95].mxu0  ;;  %8606 = vmatmul.mubr.msk.f32.gmra.mrb[200].mxu0 %vm591_vm0, %v212_v29  ;;  %v215_v29 = vld [vmem:[%s12809_s0 + $0x660] sm:$0xff]  ;;  %v216_v30 = vld [vmem:[%s12809_s0 + $0x668] sm:$0xff] }
 0x19d   :  { %12950 = vst [vmem:[#allocation142_spill] sm:$0xff] %v11206_v62  ;;  %12951 = vst [vmem:[#allocation143_spill] sm:$0xff] %v11208_v15  ;;  %v11211_v28 = vpop.f32.mrb[95].mxu1  ;;  %9038 = vmatmul.mubr.msk.f32.gmra.mrb[200].mxu1 %vm591_vm0, %v500_v63  ;;  %8608 = vmatprep.mubr.msk.f32.mxu0 %vm591_vm0, %v213_v31  ;;  %v502_v62 = vld [vmem:[%s12809_s0 + $0xf58] sm:$0xff]  ;;  %v503_v63 = vld [vmem:[%s12809_s0 + $0xf60] sm:$0xff] }
 0x19e   :  { %12952 = vst [vmem:[#allocation144_spill] sm:$0xff] %v11211_v28  ;;  %9040 = vmatprep.mubr.msk.f32.mxu1 %vm591_vm0, %v501_v60 }
 0x19f   :  { %v11228_v28 = vpop.f32.mrb[96].mxu0 }
 0x1a0   :  { %12953 = vst [vmem:[#allocation145_spill] sm:$0xff] %v11228_v28  ;;  %v11230_v31 = vpop.f32.mrb[96].mxu1  ;;  %v11232_v60 = vpop.f32.mrb[97].mxu0  ;;  %8609 = vmatmul.mubr.msk.f32.gmra.mrb[202].mxu0 %vm591_vm0, %v214_v61  ;;  %v217_v61 = vld [vmem:[%s12809_s0 + $0x670] sm:$0xff]  ;;  %v218_v28 = vld [vmem:[%s12809_s0 + $0x678] sm:$0xff] }
 0x1a1   :  { %12954 = vst [vmem:[#allocation146_spill] sm:$0xff] %v11230_v31  ;;  %12955 = vst [vmem:[#allocation147_spill] sm:$0xff] %v11232_v60  ;;  %v11235_v15 = vpop.f32.mrb[97].mxu1  ;;  %9041 = vmatmul.mubr.msk.f32.gmra.mrb[202].mxu1 %vm591_vm0, %v502_v62  ;;  %8611 = vmatprep.mubr.msk.f32.mxu0 %vm591_vm0, %v215_v29  ;;  %v504_v31 = vld [vmem:[%s12809_s0 + $0xf68] sm:$0xff]  ;;  %v505_v62 = vld [vmem:[%s12809_s0 + $0xf70] sm:$0xff] }
 0x1a2   :  { %12956 = vst [vmem:[#allocation148_spill] sm:$0xff] %v11235_v15  ;;  %9043 = vmatprep.mubr.msk.f32.mxu1 %vm591_vm0, %v503_v63 }
 0x1a3   :  { %v11252_v15 = vpop.f32.mrb[98].mxu0 }
 0x1a4   :  { %12957 = vst [vmem:[#allocation149_spill] sm:$0xff] %v11252_v15  ;;  %v11254_v29 = vpop.f32.mrb[98].mxu1  ;;  %v11256_v63 = vpop.f32.mrb[99].mxu0  ;;  %8612 = vmatmul.mubr.msk.f32.gmra.mrb[204].mxu0 %vm591_vm0, %v216_v30  ;;  %v219_v30 = vld [vmem:[%s12809_s0 + $0x680] sm:$0xff]  ;;  %v220_v15 = vld [vmem:[%s12809_s0 + $0x688] sm:$0xff] }
 0x1a5   :  { %12958 = vst [vmem:[#allocation150_spill] sm:$0xff] %v11254_v29  ;;  %12959 = vst [vmem:[#allocation151_spill] sm:$0xff] %v11256_v63  ;;  %v11259_v60 = vpop.f32.mrb[99].mxu1  ;;  %9044 = vmatmul.mubr.msk.f32.gmra.mrb[204].mxu1 %vm591_vm0, %v504_v31  ;;  %8614 = vmatprep.mubr.msk.f32.mxu0 %vm591_vm0, %v217_v61  ;;  %v506_v29 = vld [vmem:[%s12809_s0 + $0xf78] sm:$0xff]  ;;  %v507_v31 = vld [vmem:[%s12809_s0 + $0xf80] sm:$0xff] }
 0x1a6   :  { %12960 = vst [vmem:[#allocation152_spill] sm:$0xff] %v11259_v60  ;;  %9046 = vmatprep.mubr.msk.f32.mxu1 %vm591_vm0, %v505_v62 }
 0x1a7   :  { %v11276_v60 = vpop.f32.mrb[100].mxu0 }
 0x1a8   :  { %12961 = vst [vmem:[#allocation153_spill] sm:$0xff] %v11276_v60  ;;  %v11278_v61 = vpop.f32.mrb[100].mxu1  ;;  %v11280_v62 = vpop.f32.mrb[101].mxu0  ;;  %8615 = vmatmul.mubr.msk.f32.gmra.mrb[206].mxu0 %vm591_vm0, %v218_v28  ;;  %v221_v28 = vld [vmem:[%s12809_s0 + $0x690] sm:$0xff]  ;;  %v222_v60 = vld [vmem:[%s12809_s0 + $0x698] sm:$0xff] }
 0x1a9   :  { %12962 = vst [vmem:[#allocation154_spill] sm:$0xff] %v11278_v61  ;;  %12963 = vst [vmem:[#allocation155_spill] sm:$0xff] %v11280_v62  ;;  %v11283_v63 = vpop.f32.mrb[101].mxu1  ;;  %9047 = vmatmul.mubr.msk.f32.gmra.mrb[206].mxu1 %vm591_vm0, %v506_v29  ;;  %8617 = vmatprep.mubr.msk.f32.mxu0 %vm591_vm0, %v219_v30  ;;  %v508_v61 = vld [vmem:[%s12809_s0 + $0xf88] sm:$0xff]  ;;  %v509_v29 = vld [vmem:[%s12809_s0 + $0xf90] sm:$0xff] }
 0x1aa   :  { %12964 = vst [vmem:[#allocation156_spill] sm:$0xff] %v11283_v63  ;;  %9049 = vmatprep.mubr.msk.f32.mxu1 %vm591_vm0, %v507_v31 }
 0x1ab   :  { %v11300_v63 = vpop.f32.mrb[102].mxu0 }
 0x1ac   :  { %12965 = vst [vmem:[#allocation157_spill] sm:$0xff] %v11300_v63  ;;  %v11302_v30 = vpop.f32.mrb[102].mxu1  ;;  %v11304_v31 = vpop.f32.mrb[103].mxu0  ;;  %8618 = vmatmul.mubr.msk.f32.gmra.mrb[208].mxu0 %vm591_vm0, %v220_v15  ;;  %v223_v15 = vld [vmem:[%s12809_s0 + $0x6a0] sm:$0xff]  ;;  %v224_v63 = vld [vmem:[%s12809_s0 + $0x6a8] sm:$0xff] }
 0x1ad   :  { %12966 = vst [vmem:[#allocation158_spill] sm:$0xff] %v11302_v30  ;;  %12967 = vst [vmem:[#allocation159_spill] sm:$0xff] %v11304_v31  ;;  %v11307_v62 = vpop.f32.mrb[103].mxu1  ;;  %9050 = vmatmul.mubr.msk.f32.gmra.mrb[208].mxu1 %vm591_vm0, %v508_v61  ;;  %8620 = vmatprep.mubr.msk.f32.mxu0 %vm591_vm0, %v221_v28  ;;  %v510_v30 = vld [vmem:[%s12809_s0 + $0xf98] sm:$0xff]  ;;  %v511_v61 = vld [vmem:[%s12809_s0 + $0xfa0] sm:$0xff] }
 0x1ae   :  { %12968 = vst [vmem:[#allocation160_spill] sm:$0xff] %v11307_v62  ;;  %9052 = vmatprep.mubr.msk.f32.mxu1 %vm591_vm0, %v509_v29 }
 0x1af   :  { %v11324_v62 = vpop.f32.mrb[104].mxu0 }
 0x1b0   :  { %12969 = vst [vmem:[#allocation161_spill] sm:$0xff] %v11324_v62  ;;  %v11326_v28 = vpop.f32.mrb[104].mxu1  ;;  %v11328_v29 = vpop.f32.mrb[105].mxu0  ;;  %8621 = vmatmul.mubr.msk.f32.gmra.mrb[210].mxu0 %vm591_vm0, %v222_v60  ;;  %v225_v60 = vld [vmem:[%s12809_s0 + $0x6b0] sm:$0xff]  ;;  %v226_v62 = vld [vmem:[%s12809_s0 + $0x6b8] sm:$0xff] }
 0x1b1   :  { %12970 = vst [vmem:[#allocation162_spill] sm:$0xff] %v11326_v28  ;;  %12971 = vst [vmem:[#allocation163_spill] sm:$0xff] %v11328_v29  ;;  %v11331_v31 = vpop.f32.mrb[105].mxu1  ;;  %9053 = vmatmul.mubr.msk.f32.gmra.mrb[210].mxu1 %vm591_vm0, %v510_v30  ;;  %8623 = vmatprep.mubr.msk.f32.mxu0 %vm591_vm0, %v223_v15  ;;  %v512_v28 = vld [vmem:[%s12809_s0 + $0xfa8] sm:$0xff]  ;;  %v513_v30 = vld [vmem:[%s12809_s0 + $0xfb0] sm:$0xff] }
 0x1b2   :  { %12972 = vst [vmem:[#allocation164_spill] sm:$0xff] %v11331_v31  ;;  %9055 = vmatprep.mubr.msk.f32.mxu1 %vm591_vm0, %v511_v61 }
 0x1b3   :  { %v11348_v31 = vpop.f32.mrb[106].mxu0 }
 0x1b4   :  { %12973 = vst [vmem:[#allocation165_spill] sm:$0xff] %v11348_v31  ;;  %v11350_v15 = vpop.f32.mrb[106].mxu1  ;;  %v11352_v61 = vpop.f32.mrb[107].mxu0  ;;  %8624 = vmatmul.mubr.msk.f32.gmra.mrb[212].mxu0 %vm591_vm0, %v224_v63  ;;  %v227_v63 = vld [vmem:[%s12809_s0 + $0x6c0] sm:$0xff]  ;;  %v228_v31 = vld [vmem:[%s12809_s0 + $0x6c8] sm:$0xff] }
 0x1b5   :  { %12974 = vst [vmem:[#allocation166_spill] sm:$0xff] %v11350_v15  ;;  %12975 = vst [vmem:[#allocation167_spill] sm:$0xff] %v11352_v61  ;;  %v11355_v29 = vpop.f32.mrb[107].mxu1  ;;  %9056 = vmatmul.mubr.msk.f32.gmra.mrb[212].mxu1 %vm591_vm0, %v512_v28  ;;  %8626 = vmatprep.mubr.msk.f32.mxu0 %vm591_vm0, %v225_v60  ;;  %v514_v15 = vld [vmem:[%s12809_s0 + $0xfb8] sm:$0xff]  ;;  %v515_v28 = vld [vmem:[%s12809_s0 + $0xfc0] sm:$0xff] }
 0x1b6   :  { %12976 = vst [vmem:[#allocation168_spill] sm:$0xff] %v11355_v29  ;;  %9058 = vmatprep.mubr.msk.f32.mxu1 %vm591_vm0, %v513_v30 }
 0x1b7   :  { %v11372_v29 = vpop.f32.mrb[108].mxu0 }
 0x1b8   :  { %12977 = vst [vmem:[#allocation169_spill] sm:$0xff] %v11372_v29  ;;  %v11374_v60 = vpop.f32.mrb[108].mxu1  ;;  %v11376_v30 = vpop.f32.mrb[109].mxu0  ;;  %8627 = vmatmul.mubr.msk.f32.gmra.mrb[214].mxu0 %vm591_vm0, %v226_v62  ;;  %v229_v62 = vld [vmem:[%s12809_s0 + $0x6d0] sm:$0xff]  ;;  %v230_v29 = vld [vmem:[%s12809_s0 + $0x6d8] sm:$0xff] }
 0x1b9   :  { %12978 = vst [vmem:[#allocation170_spill] sm:$0xff] %v11374_v60  ;;  %12979 = vst [vmem:[#allocation171_spill] sm:$0xff] %v11376_v30  ;;  %v11379_v61 = vpop.f32.mrb[109].mxu1  ;;  %9059 = vmatmul.mubr.msk.f32.gmra.mrb[214].mxu1 %vm591_vm0, %v514_v15  ;;  %8629 = vmatprep.mubr.msk.f32.mxu0 %vm591_vm0, %v227_v63  ;;  %v516_v60 = vld [vmem:[%s12809_s0 + $0xfc8] sm:$0xff]  ;;  %v517_v15 = vld [vmem:[%s12809_s0 + $0xfd0] sm:$0xff] }
 0x1ba   :  { %12980 = vst [vmem:[#allocation172_spill] sm:$0xff] %v11379_v61  ;;  %9061 = vmatprep.mubr.msk.f32.mxu1 %vm591_vm0, %v515_v28 }
 0x1bb   :  { %v11396_v61 = vpop.f32.mrb[110].mxu0 }
 0x1bc   :  { %12981 = vst [vmem:[#allocation173_spill] sm:$0xff] %v11396_v61  ;;  %v11398_v63 = vpop.f32.mrb[110].mxu1  ;;  %v11400_v28 = vpop.f32.mrb[111].mxu0  ;;  %8630 = vmatmul.mubr.msk.f32.gmra.mrb[216].mxu0 %vm591_vm0, %v228_v31  ;;  %v231_v31 = vld [vmem:[%s12809_s0 + $0x6e0] sm:$0xff]  ;;  %v232_v61 = vld [vmem:[%s12809_s0 + $0x6e8] sm:$0xff] }
 0x1bd   :  { %12982 = vst [vmem:[#allocation174_spill] sm:$0xff] %v11398_v63  ;;  %12983 = vst [vmem:[#allocation175_spill] sm:$0xff] %v11400_v28  ;;  %v11403_v30 = vpop.f32.mrb[111].mxu1  ;;  %9062 = vmatmul.mubr.msk.f32.gmra.mrb[216].mxu1 %vm591_vm0, %v516_v60  ;;  %8632 = vmatprep.mubr.msk.f32.mxu0 %vm591_vm0, %v229_v62  ;;  %v518_v63 = vld [vmem:[%s12809_s0 + $0xfd8] sm:$0xff]  ;;  %v519_v60 = vld [vmem:[%s12809_s0 + $0xfe0] sm:$0xff] }
 0x1be   :  { %12984 = vst [vmem:[#allocation176_spill] sm:$0xff] %v11403_v30  ;;  %9064 = vmatprep.mubr.msk.f32.mxu1 %vm591_vm0, %v517_v15 }
 0x1bf   :  { %v11420_v30 = vpop.f32.mrb[112].mxu0 }
 0x1c0   :  { %12985 = vst [vmem:[#allocation177_spill] sm:$0xff] %v11420_v30  ;;  %v11422_v62 = vpop.f32.mrb[112].mxu1  ;;  %v11424_v15 = vpop.f32.mrb[113].mxu0  ;;  %8633 = vmatmul.mubr.msk.f32.gmra.mrb[218].mxu0 %vm591_vm0, %v230_v29  ;;  %v233_v29 = vld [vmem:[%s12809_s0 + $0x6f0] sm:$0xff]  ;;  %v234_v30 = vld [vmem:[%s12809_s0 + $0x6f8] sm:$0xff] }
 0x1c1   :  { %12986 = vst [vmem:[#allocation178_spill] sm:$0xff] %v11422_v62  ;;  %12987 = vst [vmem:[#allocation179_spill] sm:$0xff] %v11424_v15  ;;  %v11427_v28 = vpop.f32.mrb[113].mxu1  ;;  %9065 = vmatmul.mubr.msk.f32.gmra.mrb[218].mxu1 %vm591_vm0, %v518_v63  ;;  %8635 = vmatprep.mubr.msk.f32.mxu0 %vm591_vm0, %v231_v31  ;;  %v520_v62 = vld [vmem:[%s12809_s0 + $0xfe8] sm:$0xff]  ;;  %v521_v63 = vld [vmem:[%s12809_s0 + $0xff0] sm:$0xff] }
 0x1c2   :  { %12988 = vst [vmem:[#allocation180_spill] sm:$0xff] %v11427_v28  ;;  %9067 = vmatprep.mubr.msk.f32.mxu1 %vm591_vm0, %v519_v60 }
 0x1c3   :  { %v11444_v28 = vpop.f32.mrb[114].mxu0 }
 0x1c4   :  { %12989 = vst [vmem:[#allocation181_spill] sm:$0xff] %v11444_v28  ;;  %v11446_v31 = vpop.f32.mrb[114].mxu1  ;;  %v11448_v60 = vpop.f32.mrb[115].mxu0  ;;  %8636 = vmatmul.mubr.msk.f32.gmra.mrb[220].mxu0 %vm591_vm0, %v232_v61  ;;  %v235_v61 = vld [vmem:[%s12809_s0 + $0x700] sm:$0xff]  ;;  %v236_v28 = vld [vmem:[%s12809_s0 + $0x708] sm:$0xff] }
 0x1c5   :  { %12990 = vst [vmem:[#allocation182_spill] sm:$0xff] %v11446_v31  ;;  %12991 = vst [vmem:[#allocation183_spill] sm:$0xff] %v11448_v60  ;;  %v11451_v15 = vpop.f32.mrb[115].mxu1  ;;  %9068 = vmatmul.mubr.msk.f32.gmra.mrb[220].mxu1 %vm591_vm0, %v520_v62  ;;  %8638 = vmatprep.mubr.msk.f32.mxu0 %vm591_vm0, %v233_v29  ;;  %v522_v31 = vld [vmem:[%s12809_s0 + $0xff8] sm:$0xff]  ;;  %v523_v62 = vld [vmem:[%s12809_s0 + $0x1000] sm:$0xff] }
 0x1c6   :  { %12992 = vst [vmem:[#allocation184_spill] sm:$0xff] %v11451_v15  ;;  %9070 = vmatprep.mubr.msk.f32.mxu1 %vm591_vm0, %v521_v63 }
 0x1c7   :  { %v11468_v15 = vpop.f32.mrb[116].mxu0 }
 0x1c8   :  { %12993 = vst [vmem:[#allocation185_spill] sm:$0xff] %v11468_v15  ;;  %v11470_v29 = vpop.f32.mrb[116].mxu1  ;;  %v11472_v63 = vpop.f32.mrb[117].mxu0  ;;  %8639 = vmatmul.mubr.msk.f32.gmra.mrb[222].mxu0 %vm591_vm0, %v234_v30  ;;  %v237_v30 = vld [vmem:[%s12809_s0 + $0x710] sm:$0xff]  ;;  %v238_v15 = vld [vmem:[%s12809_s0 + $0x718] sm:$0xff] }
 0x1c9   :  { %12994 = vst [vmem:[#allocation186_spill] sm:$0xff] %v11470_v29  ;;  %12995 = vst [vmem:[#allocation187_spill] sm:$0xff] %v11472_v63  ;;  %v11475_v60 = vpop.f32.mrb[117].mxu1  ;;  %9071 = vmatmul.mubr.msk.f32.gmra.mrb[222].mxu1 %vm591_vm0, %v522_v31  ;;  %8641 = vmatprep.mubr.msk.f32.mxu0 %vm591_vm0, %v235_v61  ;;  %v524_v29 = vld [vmem:[%s12809_s0 + $0x1008] sm:$0xff]  ;;  %v525_v31 = vld [vmem:[%s12809_s0 + $0x1010] sm:$0xff] }
 0x1ca   :  { %12996 = vst [vmem:[#allocation188_spill] sm:$0xff] %v11475_v60  ;;  %9073 = vmatprep.mubr.msk.f32.mxu1 %vm591_vm0, %v523_v62 }
 0x1cb   :  { %v11492_v60 = vpop.f32.mrb[118].mxu0 }
 0x1cc   :  { %12997 = vst [vmem:[#allocation189_spill] sm:$0xff] %v11492_v60  ;;  %v11494_v61 = vpop.f32.mrb[118].mxu1  ;;  %v11496_v62 = vpop.f32.mrb[119].mxu0  ;;  %8642 = vmatmul.mubr.msk.f32.gmra.mrb[224].mxu0 %vm591_vm0, %v236_v28  ;;  %v239_v28 = vld [vmem:[%s12809_s0 + $0x720] sm:$0xff]  ;;  %v240_v60 = vld [vmem:[%s12809_s0 + $0x728] sm:$0xff] }
 0x1cd   :  { %12998 = vst [vmem:[#allocation190_spill] sm:$0xff] %v11494_v61  ;;  %12999 = vst [vmem:[#allocation191_spill] sm:$0xff] %v11496_v62  ;;  %v11499_v63 = vpop.f32.mrb[119].mxu1  ;;  %9074 = vmatmul.mubr.msk.f32.gmra.mrb[224].mxu1 %vm591_vm0, %v524_v29  ;;  %8644 = vmatprep.mubr.msk.f32.mxu0 %vm591_vm0, %v237_v30  ;;  %v526_v61 = vld [vmem:[%s12809_s0 + $0x1018] sm:$0xff]  ;;  %v527_v29 = vld [vmem:[%s12809_s0 + $0x1020] sm:$0xff] }
 0x1ce   :  { %13000 = vst [vmem:[#allocation192_spill] sm:$0xff] %v11499_v63  ;;  %9076 = vmatprep.mubr.msk.f32.mxu1 %vm591_vm0, %v525_v31 }
 0x1cf   :  { %v11516_v63 = vpop.f32.mrb[120].mxu0 }
 0x1d0   :  { %13001 = vst [vmem:[#allocation193_spill] sm:$0xff] %v11516_v63  ;;  %v11518_v30 = vpop.f32.mrb[120].mxu1  ;;  %v11520_v31 = vpop.f32.mrb[121].mxu0  ;;  %8645 = vmatmul.mubr.msk.f32.gmra.mrb[226].mxu0 %vm591_vm0, %v238_v15  ;;  %v241_v15 = vld [vmem:[%s12809_s0 + $0x730] sm:$0xff]  ;;  %v242_v63 = vld [vmem:[%s12809_s0 + $0x738] sm:$0xff] }
 0x1d1   :  { %13002 = vst [vmem:[#allocation194_spill] sm:$0xff] %v11518_v30  ;;  %13003 = vst [vmem:[#allocation195_spill] sm:$0xff] %v11520_v31  ;;  %v11523_v62 = vpop.f32.mrb[121].mxu1  ;;  %9077 = vmatmul.mubr.msk.f32.gmra.mrb[226].mxu1 %vm591_vm0, %v526_v61  ;;  %8647 = vmatprep.mubr.msk.f32.mxu0 %vm591_vm0, %v239_v28  ;;  %v528_v30 = vld [vmem:[%s12809_s0 + $0x1028] sm:$0xff]  ;;  %v529_v61 = vld [vmem:[%s12809_s0 + $0x1030] sm:$0xff] }
 0x1d2   :  { %13004 = vst [vmem:[#allocation196_spill] sm:$0xff] %v11523_v62  ;;  %9079 = vmatprep.mubr.msk.f32.mxu1 %vm591_vm0, %v527_v29 }
 0x1d3   :  { %v11540_v62 = vpop.f32.mrb[122].mxu0 }
 0x1d4   :  { %13005 = vst [vmem:[#allocation197_spill] sm:$0xff] %v11540_v62  ;;  %v11542_v28 = vpop.f32.mrb[122].mxu1  ;;  %v11544_v29 = vpop.f32.mrb[123].mxu0  ;;  %8648 = vmatmul.mubr.msk.f32.gmra.mrb[228].mxu0 %vm591_vm0, %v240_v60  ;;  %v243_v60 = vld [vmem:[%s12809_s0 + $0x740] sm:$0xff]  ;;  %v244_v62 = vld [vmem:[%s12809_s0 + $0x748] sm:$0xff] }
 0x1d5   :  { %13006 = vst [vmem:[#allocation198_spill] sm:$0xff] %v11542_v28  ;;  %13007 = vst [vmem:[#allocation199_spill] sm:$0xff] %v11544_v29  ;;  %v11547_v31 = vpop.f32.mrb[123].mxu1  ;;  %9080 = vmatmul.mubr.msk.f32.gmra.mrb[228].mxu1 %vm591_vm0, %v528_v30  ;;  %8650 = vmatprep.mubr.msk.f32.mxu0 %vm591_vm0, %v241_v15  ;;  %v530_v28 = vld [vmem:[%s12809_s0 + $0x1038] sm:$0xff]  ;;  %v531_v30 = vld [vmem:[%s12809_s0 + $0x1040] sm:$0xff] }
 0x1d6   :  { %13008 = vst [vmem:[#allocation200_spill] sm:$0xff] %v11547_v31  ;;  %9082 = vmatprep.mubr.msk.f32.mxu1 %vm591_vm0, %v529_v61 }
 0x1d7   :  { %v11564_v31 = vpop.f32.mrb[124].mxu0 }
 0x1d8   :  { %13009 = vst [vmem:[#allocation201_spill] sm:$0xff] %v11564_v31  ;;  %v11566_v15 = vpop.f32.mrb[124].mxu1  ;;  %v11568_v61 = vpop.f32.mrb[125].mxu0  ;;  %8651 = vmatmul.mubr.msk.f32.gmra.mrb[230].mxu0 %vm591_vm0, %v242_v63  ;;  %v245_v63 = vld [vmem:[%s12809_s0 + $0x750] sm:$0xff]  ;;  %v246_v31 = vld [vmem:[%s12809_s0 + $0x758] sm:$0xff] }
 0x1d9   :  { %13010 = vst [vmem:[#allocation202_spill] sm:$0xff] %v11566_v15  ;;  %13011 = vst [vmem:[#allocation203_spill] sm:$0xff] %v11568_v61  ;;  %v11571_v29 = vpop.f32.mrb[125].mxu1  ;;  %9083 = vmatmul.mubr.msk.f32.gmra.mrb[230].mxu1 %vm591_vm0, %v530_v28  ;;  %8653 = vmatprep.mubr.msk.f32.mxu0 %vm591_vm0, %v243_v60  ;;  %v532_v15 = vld [vmem:[%s12809_s0 + $0x1048] sm:$0xff]  ;;  %v533_v28 = vld [vmem:[%s12809_s0 + $0x1050] sm:$0xff] }
 0x1da   :  { %13012 = vst [vmem:[#allocation204_spill] sm:$0xff] %v11571_v29  ;;  %9085 = vmatprep.mubr.msk.f32.mxu1 %vm591_vm0, %v531_v30 }
 0x1db   :  { %v11588_v29 = vpop.f32.mrb[126].mxu0 }
 0x1dc   :  { %13013 = vst [vmem:[#allocation205_spill] sm:$0xff] %v11588_v29  ;;  %v11590_v60 = vpop.f32.mrb[126].mxu1  ;;  %v11592_v30 = vpop.f32.mrb[127].mxu0  ;;  %8654 = vmatmul.mubr.msk.f32.gmra.mrb[232].mxu0 %vm591_vm0, %v244_v62  ;;  %v247_v62 = vld [vmem:[%s12809_s0 + $0x760] sm:$0xff]  ;;  %v248_v29 = vld [vmem:[%s12809_s0 + $0x768] sm:$0xff] }
 0x1dd   :  { %13014 = vst [vmem:[#allocation206_spill] sm:$0xff] %v11590_v60  ;;  %13015 = vst [vmem:[#allocation207_spill] sm:$0xff] %v11592_v30  ;;  %v11595_v61 = vpop.f32.mrb[127].mxu1  ;;  %9086 = vmatmul.mubr.msk.f32.gmra.mrb[232].mxu1 %vm591_vm0, %v532_v15  ;;  %8656 = vmatprep.mubr.msk.f32.mxu0 %vm591_vm0, %v245_v63  ;;  %v534_v60 = vld [vmem:[%s12809_s0 + $0x1058] sm:$0xff]  ;;  %v535_v15 = vld [vmem:[%s12809_s0 + $0x1060] sm:$0xff] }
 0x1de   :  { %13016 = vst [vmem:[#allocation208_spill] sm:$0xff] %v11595_v61  ;;  %9088 = vmatprep.mubr.msk.f32.mxu1 %vm591_vm0, %v533_v28 }
 0x1df   :  { %v11612_v61 = vpop.f32.mrb[128].mxu0 }
 0x1e0   :  { %13017 = vst [vmem:[#allocation209_spill] sm:$0xff] %v11612_v61  ;;  %v11614_v63 = vpop.f32.mrb[128].mxu1  ;;  %v11616_v28 = vpop.f32.mrb[129].mxu0  ;;  %8657 = vmatmul.mubr.msk.f32.gmra.mrb[234].mxu0 %vm591_vm0, %v246_v31  ;;  %v249_v31 = vld [vmem:[%s12809_s0 + $0x770] sm:$0xff]  ;;  %v250_v61 = vld [vmem:[%s12809_s0 + $0x778] sm:$0xff] }
 0x1e1   :  { %13018 = vst [vmem:[#allocation210_spill] sm:$0xff] %v11614_v63  ;;  %13019 = vst [vmem:[#allocation211_spill] sm:$0xff] %v11616_v28  ;;  %v11619_v30 = vpop.f32.mrb[129].mxu1  ;;  %9089 = vmatmul.mubr.msk.f32.gmra.mrb[234].mxu1 %vm591_vm0, %v534_v60  ;;  %8659 = vmatprep.mubr.msk.f32.mxu0 %vm591_vm0, %v247_v62  ;;  %v536_v63 = vld [vmem:[%s12809_s0 + $0x1068] sm:$0xff]  ;;  %v537_v60 = vld [vmem:[%s12809_s0 + $0x1070] sm:$0xff] }
 0x1e2   :  { %13020 = vst [vmem:[#allocation212_spill] sm:$0xff] %v11619_v30  ;;  %9091 = vmatprep.mubr.msk.f32.mxu1 %vm591_vm0, %v535_v15 }
 0x1e3   :  { %v11636_v30 = vpop.f32.mrb[130].mxu0 }
 0x1e4   :  { %13021 = vst [vmem:[#allocation213_spill] sm:$0xff] %v11636_v30  ;;  %v11638_v62 = vpop.f32.mrb[130].mxu1  ;;  %v11640_v15 = vpop.f32.mrb[131].mxu0  ;;  %8660 = vmatmul.mubr.msk.f32.gmra.mrb[236].mxu0 %vm591_vm0, %v248_v29  ;;  %v251_v29 = vld [vmem:[%s12809_s0 + $0x780] sm:$0xff]  ;;  %v252_v30 = vld [vmem:[%s12809_s0 + $0x788] sm:$0xff] }
 0x1e5   :  { %13022 = vst [vmem:[#allocation214_spill] sm:$0xff] %v11638_v62  ;;  %13023 = vst [vmem:[#allocation215_spill] sm:$0xff] %v11640_v15  ;;  %v11643_v28 = vpop.f32.mrb[131].mxu1  ;;  %9092 = vmatmul.mubr.msk.f32.gmra.mrb[236].mxu1 %vm591_vm0, %v536_v63  ;;  %8662 = vmatprep.mubr.msk.f32.mxu0 %vm591_vm0, %v249_v31  ;;  %v538_v62 = vld [vmem:[%s12809_s0 + $0x1078] sm:$0xff]  ;;  %v539_v63 = vld [vmem:[%s12809_s0 + $0x1080] sm:$0xff] }
 0x1e6   :  { %13024 = vst [vmem:[#allocation216_spill] sm:$0xff] %v11643_v28  ;;  %9094 = vmatprep.mubr.msk.f32.mxu1 %vm591_vm0, %v537_v60 }
 0x1e7   :  { %v11660_v28 = vpop.f32.mrb[132].mxu0 }
 0x1e8   :  { %13025 = vst [vmem:[#allocation217_spill] sm:$0xff] %v11660_v28  ;;  %v11662_v31 = vpop.f32.mrb[132].mxu1  ;;  %v11664_v60 = vpop.f32.mrb[133].mxu0  ;;  %8663 = vmatmul.mubr.msk.f32.gmra.mrb[238].mxu0 %vm591_vm0, %v250_v61  ;;  %v253_v61 = vld [vmem:[%s12809_s0 + $0x790] sm:$0xff]  ;;  %v254_v28 = vld [vmem:[%s12809_s0 + $0x798] sm:$0xff] }
 0x1e9   :  { %13026 = vst [vmem:[#allocation218_spill] sm:$0xff] %v11662_v31  ;;  %13027 = vst [vmem:[#allocation219_spill] sm:$0xff] %v11664_v60  ;;  %v11667_v15 = vpop.f32.mrb[133].mxu1  ;;  %9095 = vmatmul.mubr.msk.f32.gmra.mrb[238].mxu1 %vm591_vm0, %v538_v62  ;;  %8665 = vmatprep.mubr.msk.f32.mxu0 %vm591_vm0, %v251_v29  ;;  %v540_v31 = vld [vmem:[%s12809_s0 + $0x1088] sm:$0xff]  ;;  %v541_v62 = vld [vmem:[%s12809_s0 + $0x1090] sm:$0xff] }
 0x1ea   :  { %13028 = vst [vmem:[#allocation220_spill] sm:$0xff] %v11667_v15  ;;  %9097 = vmatprep.mubr.msk.f32.mxu1 %vm591_vm0, %v539_v63 }
 0x1eb   :  { %v11684_v15 = vpop.f32.mrb[134].mxu0 }
 0x1ec   :  { %13029 = vst [vmem:[#allocation221_spill] sm:$0xff] %v11684_v15  ;;  %v11686_v29 = vpop.f32.mrb[134].mxu1  ;;  %v11688_v63 = vpop.f32.mrb[135].mxu0  ;;  %8666 = vmatmul.mubr.msk.f32.gmra.mrb[240].mxu0 %vm591_vm0, %v252_v30  ;;  %v255_v30 = vld [vmem:[%s12809_s0 + $0x7a0] sm:$0xff]  ;;  %v256_v15 = vld [vmem:[%s12809_s0 + $0x7a8] sm:$0xff] }
 0x1ed   :  { %13030 = vst [vmem:[#allocation222_spill] sm:$0xff] %v11686_v29  ;;  %13031 = vst [vmem:[#allocation223_spill] sm:$0xff] %v11688_v63  ;;  %v11691_v60 = vpop.f32.mrb[135].mxu1  ;;  %9098 = vmatmul.mubr.msk.f32.gmra.mrb[240].mxu1 %vm591_vm0, %v540_v31  ;;  %8668 = vmatprep.mubr.msk.f32.mxu0 %vm591_vm0, %v253_v61  ;;  %v542_v29 = vld [vmem:[%s12809_s0 + $0x1098] sm:$0xff]  ;;  %v543_v31 = vld [vmem:[%s12809_s0 + $0x10a0] sm:$0xff] }
 0x1ee   :  { %13032 = vst [vmem:[#allocation224_spill] sm:$0xff] %v11691_v60  ;;  %9100 = vmatprep.mubr.msk.f32.mxu1 %vm591_vm0, %v541_v62 }
 0x1ef   :  { %v11708_v60 = vpop.f32.mrb[136].mxu0 }
 0x1f0   :  { %13033 = vst [vmem:[#allocation225_spill] sm:$0xff] %v11708_v60  ;;  %v11710_v61 = vpop.f32.mrb[136].mxu1  ;;  %v11712_v62 = vpop.f32.mrb[137].mxu0  ;;  %8669 = vmatmul.mubr.msk.f32.gmra.mrb[242].mxu0 %vm591_vm0, %v254_v28  ;;  %v257_v28 = vld [vmem:[%s12809_s0 + $0x7b0] sm:$0xff]  ;;  %v258_v60 = vld [vmem:[%s12809_s0 + $0x7b8] sm:$0xff] }
 0x1f1   :  { %13034 = vst [vmem:[#allocation226_spill] sm:$0xff] %v11710_v61  ;;  %13035 = vst [vmem:[#allocation227_spill] sm:$0xff] %v11712_v62  ;;  %v11715_v63 = vpop.f32.mrb[137].mxu1  ;;  %9101 = vmatmul.mubr.msk.f32.gmra.mrb[242].mxu1 %vm591_vm0, %v542_v29  ;;  %8671 = vmatprep.mubr.msk.f32.mxu0 %vm591_vm0, %v255_v30  ;;  %v544_v61 = vld [vmem:[%s12809_s0 + $0x10a8] sm:$0xff]  ;;  %v545_v29 = vld [vmem:[%s12809_s0 + $0x10b0] sm:$0xff] }
 0x1f2   :  { %13036 = vst [vmem:[#allocation228_spill] sm:$0xff] %v11715_v63  ;;  %9103 = vmatprep.mubr.msk.f32.mxu1 %vm591_vm0, %v543_v31 }
 0x1f3   :  { %v11732_v63 = vpop.f32.mrb[138].mxu0 }
 0x1f4   :  { %13037 = vst [vmem:[#allocation229_spill] sm:$0xff] %v11732_v63  ;;  %v11734_v30 = vpop.f32.mrb[138].mxu1  ;;  %v11736_v31 = vpop.f32.mrb[139].mxu0  ;;  %8672 = vmatmul.mubr.msk.f32.gmra.mrb[244].mxu0 %vm591_vm0, %v256_v15  ;;  %v259_v15 = vld [vmem:[%s12809_s0 + $0x7c0] sm:$0xff]  ;;  %v260_v63 = vld [vmem:[%s12809_s0 + $0x7c8] sm:$0xff] }
 0x1f5   :  { %13038 = vst [vmem:[#allocation230_spill] sm:$0xff] %v11734_v30  ;;  %13039 = vst [vmem:[#allocation231_spill] sm:$0xff] %v11736_v31  ;;  %v11739_v62 = vpop.f32.mrb[139].mxu1  ;;  %9104 = vmatmul.mubr.msk.f32.gmra.mrb[244].mxu1 %vm591_vm0, %v544_v61  ;;  %8674 = vmatprep.mubr.msk.f32.mxu0 %vm591_vm0, %v257_v28  ;;  %v546_v30 = vld [vmem:[%s12809_s0 + $0x10b8] sm:$0xff]  ;;  %v547_v61 = vld [vmem:[%s12809_s0 + $0x10c0] sm:$0xff] }
 0x1f6   :  { %13040 = vst [vmem:[#allocation232_spill] sm:$0xff] %v11739_v62  ;;  %9106 = vmatprep.mubr.msk.f32.mxu1 %vm591_vm0, %v545_v29 }
 0x1f7   :  { %v11756_v62 = vpop.f32.mrb[140].mxu0 }
 0x1f8   :  { %13041 = vst [vmem:[#allocation233_spill] sm:$0xff] %v11756_v62  ;;  %v11758_v28 = vpop.f32.mrb[140].mxu1  ;;  %v11760_v29 = vpop.f32.mrb[141].mxu0  ;;  %8675 = vmatmul.mubr.msk.f32.gmra.mrb[246].mxu0 %vm591_vm0, %v258_v60  ;;  %v261_v60 = vld [vmem:[%s12809_s0 + $0x7d0] sm:$0xff]  ;;  %v262_v62 = vld [vmem:[%s12809_s0 + $0x7d8] sm:$0xff] }
 0x1f9   :  { %13042 = vst [vmem:[#allocation234_spill] sm:$0xff] %v11758_v28  ;;  %13043 = vst [vmem:[#allocation235_spill] sm:$0xff] %v11760_v29  ;;  %v11763_v31 = vpop.f32.mrb[141].mxu1  ;;  %9107 = vmatmul.mubr.msk.f32.gmra.mrb[246].mxu1 %vm591_vm0, %v546_v30  ;;  %8677 = vmatprep.mubr.msk.f32.mxu0 %vm591_vm0, %v259_v15  ;;  %v548_v28 = vld [vmem:[%s12809_s0 + $0x10c8] sm:$0xff]  ;;  %v549_v30 = vld [vmem:[%s12809_s0 + $0x10d0] sm:$0xff] }
 0x1fa   :  { %13044 = vst [vmem:[#allocation236_spill] sm:$0xff] %v11763_v31  ;;  %9109 = vmatprep.mubr.msk.f32.mxu1 %vm591_vm0, %v547_v61 }
 0x1fb   :  { %v11780_v31 = vpop.f32.mrb[142].mxu0 }
 0x1fc   :  { %13045 = vst [vmem:[#allocation237_spill] sm:$0xff] %v11780_v31  ;;  %v11782_v15 = vpop.f32.mrb[142].mxu1  ;;  %v11784_v61 = vpop.f32.mrb[143].mxu0  ;;  %8678 = vmatmul.mubr.msk.f32.gmra.mrb[248].mxu0 %vm591_vm0, %v260_v63  ;;  %v263_v63 = vld [vmem:[%s12809_s0 + $0x7e0] sm:$0xff] }
 0x1fd   :  { %13046 = vst [vmem:[#allocation238_spill] sm:$0xff] %v11782_v15  ;;  %13047 = vst [vmem:[#allocation239_spill] sm:$0xff] %v11784_v61  ;;  %v11787_v29 = vpop.f32.mrb[143].mxu1  ;;  %9110 = vmatmul.mubr.msk.f32.gmra.mrb[248].mxu1 %vm591_vm0, %v548_v28  ;;  %8680 = vmatprep.mubr.msk.f32.mxu0 %vm591_vm0, %v261_v60  ;;  %v550_v15 = vld [vmem:[%s12809_s0 + $0x10d8] sm:$0xff]  ;;  %v551_v28 = vld [vmem:[%s12809_s0 + $0x10e0] sm:$0xff] }
 0x1fe   :  { %13048 = vst [vmem:[#allocation240_spill] sm:$0xff] %v11787_v29  ;;  %9112 = vmatprep.mubr.msk.f32.mxu1 %vm591_vm0, %v549_v30 }
 0x1ff   :  { %v8523_v29 = vpop.f32.mrb[144].mxu0 }
 0x200   :  { %v8955_v60 = vpop.f32.mrb[144].mxu1  ;;  %v5878_v30 = vmax.f32 %v10076_v32, %v8523_v29  ;;  %v3106_v31 = vpop.f32.mrb[145].mxu0  ;;  %8681 = vmatmul.mubr.msk.f32.gmra.mrb[250].mxu0 %vm591_vm0, %v262_v62  ;;  %v264_v32 = vld [vmem:[%s12809_s0 + $0x7e8] sm:$0xff]  ;;  %v265_v29 = vld [vmem:[%s12809_s0 + $0x7f0] sm:$0xff] }
 0x201   :  { %v5932_v61 = vmax.f32 %v10078_v33, %v8955_v60  ;;  %v4546_v14 = vpop.f32.mrb[145].mxu1  ;;  %9113 = vmatmul.mubr.msk.f32.gmra.mrb[250].mxu1 %vm591_vm0, %v550_v15  ;;  %v5877_v13 = vmax.f32 %v10080_v34, %v3106_v31  ;;  %8683 = vmatprep.mubr.msk.f32.mxu0 %vm591_vm0, %v263_v63  ;;  %v552_v33 = vld [vmem:[%s12809_s0 + $0x10e8] sm:$0xff]  ;;  %v553_v34 = vld [vmem:[%s12809_s0 + $0x10f0] sm:$0xff] }
 0x202   :  { %v5931_v12 = vmax.f32 %v10083_v35, %v4546_v14  ;;  %9115 = vmatprep.mubr.msk.f32.mxu1 %vm591_vm0, %v551_v28 }
 0x203   :  { %v5950_v62 = vmax.f32 %v5878_v30, %v5932_v61  ;;  %v8526_v14 = vpop.f32.mrb[146].mxu0 }
 0x204   :  { %v5949_v35 = vmax.f32 %v5877_v13, %v5931_v12  ;;  %v8958_v31 = vpop.f32.mrb[146].mxu1  ;;  %v5880_v63 = vmax.f32 %v10100_v40, %v8526_v14  ;;  %v3116_v60 = vpop.f32.mrb[147].mxu0  ;;  %8684 = vmatmul.mubr.msk.f32.gmra.mrb[252].mxu0 %vm591_vm0, %v264_v32  ;;  %v266_v40 = vld [vmem:[%s12809_s0 + $0x7f8] sm:$0xff] }
 0x205   :  { %v5968_v15 = vmax.f32 %v5950_v62, 0.0  ;;  %v5934_v28 = vmax.f32 %v10102_v41, %v8958_v31  ;;  %v4556_v61 = vpop.f32.mrb[147].mxu1  ;;  %9116 = vmatmul.mubr.msk.f32.gmra.mrb[252].mxu1 %vm591_vm0, %v552_v33  ;;  %v5879_v47 = vmax.f32 %v10104_v42, %v3116_v60  ;;  %8686 = vmatprep.mubr.msk.f32.mxu0 %vm591_vm0, %v265_v29  ;;  %v554_v41 = vld [vmem:[%s12809_s0 + $0x10f8] sm:$0xff]  ;;  %v267_v42 = vld [vmem:[%s12809_s0 + $0x800] sm:$0xff] }
 0x206   :  { %v5967_v30 = vmax.f32 %v5949_v35, 0.0  ;;  %v5933_v46 = vmax.f32 %v10107_v43, %v4556_v61  ;;  %9118 = vmatprep.mubr.msk.f32.mxu1 %vm591_vm0, %v553_v34  ;;  %v555_v43 = vld [vmem:[%s12809_s0 + $0x1100] sm:$0xff] }
 0x207   :  { %5986 = vst [vmem:[%s12810_s2 + $0x8] sm:$0xff] %v5968_v15  ;;  %v5952_v12 = vmax.f32 %v5880_v63, %v5934_v28  ;;  %v8529_v32 = vpop.f32.mrb[148].mxu0 }
 0x208   :  { %5985 = vst [vmem:[%s12810_s2] sm:$0xff] %v5967_v30  ;;  %v5951_v13 = vmax.f32 %v5879_v47, %v5933_v46  ;;  %v8961_v33 = vpop.f32.mrb[148].mxu1  ;;  %v5882_v29 = vmax.f32 %v10124_v48, %v8529_v32  ;;  %v3126_v35 = vpop.f32.mrb[149].mxu0  ;;  %8687 = vmatmul.mubr.msk.f32.gmra.mrb[254].mxu0 %vm591_vm0, %v266_v40  ;;  %v268_v48 = vld [vmem:[%s12809_s0 + $0x808] sm:$0xff] }
 0x209   :  { %v5970_v62 = vmax.f32 %v5952_v12, 0.0  ;;  %v5936_v34 = vmax.f32 %v10126_v49, %v8961_v33  ;;  %v4566_v14 = vpop.f32.mrb[149].mxu1  ;;  %9119 = vmatmul.mubr.msk.f32.gmra.mrb[254].mxu1 %vm591_vm0, %v554_v41  ;;  %v5881_v15 = vmax.f32 %v10128_v50, %v3126_v35  ;;  %8689 = vmatprep.mubr.msk.f32.mxu0 %vm591_vm0, %v267_v42  ;;  %v556_v49 = vld [vmem:[%s12809_s0 + $0x1108] sm:$0xff]  ;;  %v269_v50 = vld [vmem:[%s12809_s0 + $0x810] sm:$0xff] }
 0x20a   :  { %v5969_v31 = vmax.f32 %v5951_v13, 0.0  ;;  %v5935_v63 = vmax.f32 %v10131_v51, %v4566_v14  ;;  %9121 = vmatprep.mubr.msk.f32.mxu1 %vm591_vm0, %v555_v43  ;;  %v557_v51 = vld [vmem:[%s12809_s0 + $0x1110] sm:$0xff] }
 0x20b   :  { %5988 = vst [vmem:[%s12810_s2 + $0x18] sm:$0xff] %v5970_v62  ;;  %v5954_v46 = vmax.f32 %v5882_v29, %v5936_v34  ;;  %v8532_v28 = vpop.f32.mrb[150].mxu0 }
 0x20c   :  { %5987 = vst [vmem:[%s12810_s2 + $0x10] sm:$0xff] %v5969_v31  ;;  %v5953_v47 = vmax.f32 %v5881_v15, %v5935_v63  ;;  %v8964_v60 = vpop.f32.mrb[150].mxu1  ;;  %v5884_v30 = vmax.f32 %v10148_v56, %v8532_v28  ;;  %v3136_v41 = vpop.f32.mrb[151].mxu0  ;;  %8690 = vmatmul.mubr.msk.f32.gmra.mrb[0].mxu0 %vm591_vm0, %v268_v48  ;;  %v270_v56 = vld [vmem:[%s12809_s0 + $0x818] sm:$0xff] }
 0x20d   :  { %v5972_v61 = vmax.f32 %v5954_v46, 0.0  ;;  %v5938_v40 = vmax.f32 %v10150_v57, %v8964_v60  ;;  %v4576_v12 = vpop.f32.mrb[151].mxu1  ;;  %9122 = vmatmul.mubr.msk.f32.gmra.mrb[0].mxu1 %vm591_vm0, %v556_v49  ;;  %v5883_v43 = vmax.f32 %v10152_v58, %v3136_v41  ;;  %8692 = vmatprep.mubr.msk.f32.mxu0 %vm591_vm0, %v269_v50  ;;  %v558_v57 = vld [vmem:[%s12809_s0 + $0x1118] sm:$0xff]  ;;  %v271_v58 = vld [vmem:[%s12809_s0 + $0x820] sm:$0xff] }
 0x20e   :  { %v5971_v42 = vmax.f32 %v5953_v47, 0.0  ;;  %v5937_v13 = vmax.f32 %v10155_v59, %v4576_v12  ;;  %9124 = vmatprep.mubr.msk.f32.mxu1 %vm591_vm0, %v557_v51  ;;  %v559_v59 = vld [vmem:[%s12809_s0 + $0x1120] sm:$0xff] }
 0x20f   :  { %5990 = vst [vmem:[%s12810_s2 + $0x28] sm:$0xff] %v5972_v61  ;;  %v5956_v32 = vmax.f32 %v5884_v30, %v5938_v40  ;;  %v8535_v62 = vpop.f32.mrb[152].mxu0 }
 0x210   :  { %5989 = vst [vmem:[%s12810_s2 + $0x20] sm:$0xff] %v5971_v42  ;;  %v5955_v33 = vmax.f32 %v5883_v43, %v5937_v13  ;;  %v8967_v29 = vpop.f32.mrb[152].mxu1  ;;  %v5886_v35 = vmax.f32 %v10172_v0, %v8535_v62  ;;  %v3146_v31 = vpop.f32.mrb[153].mxu0  ;;  %8693 = vmatmul.mubr.msk.f32.gmra.mrb[2].mxu0 %vm591_vm0, %v270_v56  ;;  %v272_v0 = vld [vmem:[%s12809_s0 + $0x828] sm:$0xff] }
 0x211   :  { %v5974_v34 = vmax.f32 %v5956_v32, 0.0  ;;  %v5940_v14 = vmax.f32 %v10174_v1, %v8967_v29  ;;  %v4586_v15 = vpop.f32.mrb[153].mxu1  ;;  %9125 = vmatmul.mubr.msk.f32.gmra.mrb[2].mxu1 %vm591_vm0, %v558_v57  ;;  %v5885_v48 = vmax.f32 %v10176_v2, %v3146_v31  ;;  %8695 = vmatprep.mubr.msk.f32.mxu0 %vm591_vm0, %v271_v58  ;;  %v560_v1 = vld [vmem:[%s12809_s0 + $0x1128] sm:$0xff]  ;;  %v273_v2 = vld [vmem:[%s12809_s0 + $0x830] sm:$0xff] }
 0x212   :  { %v5973_v63 = vmax.f32 %v5955_v33, 0.0  ;;  %v5939_v49 = vmax.f32 %v10179_v3, %v4586_v15  ;;  %9127 = vmatprep.mubr.msk.f32.mxu1 %vm591_vm0, %v559_v59  ;;  %v561_v3 = vld [vmem:[%s12809_s0 + $0x1130] sm:$0xff] }
 0x213   :  { %5992 = vst [vmem:[%s12810_s2 + $0x38] sm:$0xff] %v5974_v34  ;;  %v5958_v46 = vmax.f32 %v5886_v35, %v5940_v14  ;;  %v8538_v51 = vpop.f32.mrb[154].mxu0 }
 0x214   :  { %5991 = vst [vmem:[%s12810_s2 + $0x30] sm:$0xff] %v5973_v63  ;;  %v5957_v50 = vmax.f32 %v5885_v48, %v5939_v49  ;;  %v8970_v47 = vpop.f32.mrb[154].mxu1  ;;  %v5888_v60 = vmax.f32 %v10196_v8, %v8538_v51  ;;  %v3156_v30 = vpop.f32.mrb[155].mxu0  ;;  %8696 = vmatmul.mubr.msk.f32.gmra.mrb[4].mxu0 %vm591_vm0, %v272_v0  ;;  %v274_v8 = vld [vmem:[%s12809_s0 + $0x838] sm:$0xff] }
 0x215   :  { %v5976_v28 = vmax.f32 %v5958_v46, 0.0  ;;  %v5942_v61 = vmax.f32 %v10198_v9, %v8970_v47  ;;  %v4596_v40 = vpop.f32.mrb[155].mxu1  ;;  %9128 = vmatmul.mubr.msk.f32.gmra.mrb[4].mxu1 %vm591_vm0, %v560_v1  ;;  %v5887_v12 = vmax.f32 %v10200_v10, %v3156_v30  ;;  %8698 = vmatprep.mubr.msk.f32.mxu0 %vm591_vm0, %v273_v2  ;;  %v562_v9 = vld [vmem:[%s12809_s0 + $0x1138] sm:$0xff]  ;;  %v275_v10 = vld [vmem:[%s12809_s0 + $0x840] sm:$0xff] }
 0x216   :  { %v5975_v41 = vmax.f32 %v5957_v50, 0.0  ;;  %v5941_v42 = vmax.f32 %v10203_v11, %v4596_v40  ;;  %9130 = vmatprep.mubr.msk.f32.mxu1 %vm591_vm0, %v561_v3  ;;  %v563_v11 = vld [vmem:[%s12809_s0 + $0x1140] sm:$0xff] }
 0x217   :  { %5994 = vst [vmem:[%s12810_s2 + $0x48] sm:$0xff] %v5976_v28  ;;  %v5960_v43 = vmax.f32 %v5888_v60, %v5942_v61  ;;  %v8541_v56 = vpop.f32.mrb[156].mxu0 }
 0x218   :  { %5993 = vst [vmem:[%s12810_s2 + $0x40] sm:$0xff] %v5975_v41  ;;  %v5959_v13 = vmax.f32 %v5887_v12, %v5941_v42  ;;  %v8973_v57 = vpop.f32.mrb[156].mxu1  ;;  %v5890_v58 = vmax.f32 %v10220_v16, %v8541_v56  ;;  %v3166_v33 = vpop.f32.mrb[157].mxu0  ;;  %8699 = vmatmul.mubr.msk.f32.gmra.mrb[6].mxu0 %vm591_vm0, %v274_v8  ;;  %v276_v16 = vld [vmem:[%s12809_s0 + $0x848] sm:$0xff] }
 0x219   :  { %v5978_v32 = vmax.f32 %v5960_v43, 0.0  ;;  %v5944_v59 = vmax.f32 %v10222_v17, %v8973_v57  ;;  %v4606_v62 = vpop.f32.mrb[157].mxu1  ;;  %9131 = vmatmul.mubr.msk.f32.gmra.mrb[6].mxu1 %vm591_vm0, %v562_v9  ;;  %v5889_v34 = vmax.f32 %v10224_v18, %v3166_v33  ;;  %8701 = vmatprep.mubr.msk.f32.mxu0 %vm591_vm0, %v275_v10  ;;  %v564_v17 = vld [vmem:[%s12809_s0 + $0x1148] sm:$0xff]  ;;  %v277_v18 = vld [vmem:[%s12809_s0 + $0x850] sm:$0xff] }
 0x21a   :  { %v5977_v29 = vmax.f32 %v5959_v13, 0.0  ;;  %v5943_v35 = vmax.f32 %v10227_v19, %v4606_v62  ;;  %9133 = vmatprep.mubr.msk.f32.mxu1 %vm591_vm0, %v563_v11  ;;  %v565_v19 = vld [vmem:[%s12809_s0 + $0x1150] sm:$0xff] }
 0x21b   :  { %5996 = vst [vmem:[%s12810_s2 + $0x58] sm:$0xff] %v5978_v32  ;;  %v5962_v14 = vmax.f32 %v5890_v58, %v5944_v59  ;;  %v8544_v15 = vpop.f32.mrb[158].mxu0 }
 0x21c   :  { %5995 = vst [vmem:[%s12810_s2 + $0x50] sm:$0xff] %v5977_v29  ;;  %v5961_v31 = vmax.f32 %v5889_v34, %v5943_v35  ;;  %v8976_v63 = vpop.f32.mrb[158].mxu1  ;;  %v5892_v49 = vmax.f32 %v10244_v24, %v8544_v15  ;;  %v3176_v1 = vpop.f32.mrb[159].mxu0  ;;  %8702 = vmatmul.mubr.msk.f32.gmra.mrb[8].mxu0 %vm591_vm0, %v276_v16  ;;  %v278_v24 = vld [vmem:[%s12809_s0 + $0x858] sm:$0xff] }
 0x21d   :  { %v5980_v48 = vmax.f32 %v5962_v14, 0.0  ;;  %v5946_v0 = vmax.f32 %v10246_v25, %v8976_v63  ;;  %v4616_v46 = vpop.f32.mrb[159].mxu1  ;;  %9134 = vmatmul.mubr.msk.f32.gmra.mrb[8].mxu1 %vm591_vm0, %v564_v17  ;;  %v5891_v3 = vmax.f32 %v10248_v26, %v3176_v1  ;;  %8704 = vmatprep.mubr.msk.f32.mxu0 %vm591_vm0, %v277_v18  ;;  %v566_v25 = vld [vmem:[%s12809_s0 + $0x1158] sm:$0xff]  ;;  %v279_v26 = vld [vmem:[%s12809_s0 + $0x860] sm:$0xff] }
 0x21e   :  { %v5979_v2 = vmax.f32 %v5961_v31, 0.0  ;;  %v5945_v50 = vmax.f32 %v10251_v27, %v4616_v46  ;;  %9136 = vmatprep.mubr.msk.f32.mxu1 %vm591_vm0, %v565_v19  ;;  %v567_v27 = vld [vmem:[%s12809_s0 + $0x1160] sm:$0xff] }
 0x21f   :  { %5998 = vst [vmem:[%s12810_s2 + $0x68] sm:$0xff] %v5980_v48  ;;  %v5964_v51 = vmax.f32 %v5892_v49, %v5946_v0  ;;  %v8547_v28 = vpop.f32.mrb[160].mxu0 }
 0x220   :  { %5997 = vst [vmem:[%s12810_s2 + $0x60] sm:$0xff] %v5979_v2  ;;  %v5963_v47 = vmax.f32 %v5891_v3, %v5945_v50  ;;  %v8979_v60 = vpop.f32.mrb[160].mxu1  ;;  %v5894_v30 = vmax.f32 %v10268_v36, %v8547_v28  ;;  %v3186_v41 = vpop.f32.mrb[161].mxu0  ;;  %8705 = vmatmul.mubr.msk.f32.gmra.mrb[10].mxu0 %vm591_vm0, %v278_v24  ;;  %v280_v36 = vld [vmem:[%s12809_s0 + $0x868] sm:$0xff] }
 0x221   :  { %v5982_v61 = vmax.f32 %v5964_v51, 0.0  ;;  %v5948_v40 = vmax.f32 %v10270_v37, %v8979_v60  ;;  %v4626_v12 = vpop.f32.mrb[161].mxu1  ;;  %9137 = vmatmul.mubr.msk.f32.gmra.mrb[10].mxu1 %vm591_vm0, %v566_v25  ;;  %v5893_v8 = vmax.f32 %v10272_v38, %v3186_v41  ;;  %8707 = vmatprep.mubr.msk.f32.mxu0 %vm591_vm0, %v279_v26  ;;  %v568_v37 = vld [vmem:[%s12809_s0 + $0x1168] sm:$0xff]  ;;  %v281_v38 = vld [vmem:[%s12809_s0 + $0x870] sm:$0xff] }
 0x222   :  { %v5981_v42 = vmax.f32 %v5963_v47, 0.0  ;;  %v5947_v9 = vmax.f32 %v10275_v39, %v4626_v12  ;;  %9139 = vmatprep.mubr.msk.f32.mxu1 %vm591_vm0, %v567_v27  ;;  %v569_v39 = vld [vmem:[%s12809_s0 + $0x1170] sm:$0xff] }
 0x223   :  { %6000 = vst [vmem:[%s12810_s2 + $0x78] sm:$0xff] %v5982_v61  ;;  %v5966_v43 = vmax.f32 %v5894_v30, %v5948_v40  ;;  %v8550_v11 = vpop.f32.mrb[162].mxu0 }
 0x224   :  { %5999 = vst [vmem:[%s12810_s2 + $0x70] sm:$0xff] %v5981_v42  ;;  %v5965_v10 = vmax.f32 %v5893_v8, %v5947_v9  ;;  %v8982_v13 = vpop.f32.mrb[162].mxu1  ;;  %v6040_v57 = vmax.f32 %v10292_v52, %v8550_v11  ;;  %v3196_v58 = vpop.f32.mrb[163].mxu0  ;;  %8708 = vmatmul.mubr.msk.f32.gmra.mrb[12].mxu0 %vm591_vm0, %v280_v36  ;;  %v282_v52 = vld [vmem:[%s12809_s0 + $0x878] sm:$0xff]  ;;  %v13049_v36 = vld [vmem:[#allocation3_spill] sm:$0xff]  ;;  %v577_v11 = vld [vmem:[%s12809_s0 + $0x11b0] sm:$0xff] }
 0x225   :  { %v5984_v56 = vmax.f32 %v5966_v43, 0.0  ;;  %v6094_v32 = vmax.f32 %v10294_v53, %v8982_v13  ;;  %v4636_v59 = vpop.f32.mrb[163].mxu1  ;;  %9140 = vmatmul.mubr.msk.f32.gmra.mrb[12].mxu1 %vm591_vm0, %v568_v37  ;;  %v6039_v62 = vmax.f32 %v10296_v54, %v3196_v58  ;;  %8710 = vmatprep.mubr.msk.f32.mxu0 %vm591_vm0, %v281_v38  ;;  %v570_v53 = vld [vmem:[%s12809_s0 + $0x1178] sm:$0xff]  ;;  %v283_v54 = vld [vmem:[%s12809_s0 + $0x880] sm:$0xff]  ;;  %v13050_v43 = vld [vmem:[#allocation4_spill] sm:$0xff] }
 0x226   :  { %v5983_v33 = vmax.f32 %v5965_v10, 0.0  ;;  %v6093_v29 = vmax.f32 %v10299_v55, %v4636_v59  ;;  %9142 = vmatprep.mubr.msk.f32.mxu1 %vm591_vm0, %v569_v39  ;;  %v571_v55 = vld [vmem:[%s12809_s0 + $0x1180] sm:$0xff]  ;;  %v289_v10 = vld [vmem:[%s12809_s0 + $0x8b0] sm:$0xff] }
 0x227   :  { %6002 = vst [vmem:[%s12810_s2 + $0x88] sm:$0xff] %v5984_v56  ;;  %v6112_v34 = vmax.f32 %v6040_v57, %v6094_v32  ;;  %v8553_v16 = vpop.f32.mrb[164].mxu0  ;;  %v13051_v58 = vld [vmem:[#allocation5_spill] sm:$0xff] }
 0x228   :  { %6001 = vst [vmem:[%s12810_s2 + $0x80] sm:$0xff] %v5983_v33  ;;  %v6111_v35 = vmax.f32 %v6039_v62, %v6093_v29  ;;  %v8985_v17 = vpop.f32.mrb[164].mxu1  ;;  %v6042_v18 = vmax.f32 %v10316_v4, %v8553_v16  ;;  %v3206_v31 = vpop.f32.mrb[165].mxu0  ;;  %8711 = vmatmul.mubr.msk.f32.gmra.mrb[14].mxu0 %vm591_vm0, %v282_v52  ;;  %v284_v4 = vld [vmem:[%s12809_s0 + $0x888] sm:$0xff]  ;;  %v13052_v33 = vld [vmem:[#allocation6_spill] sm:$0xff] }
 0x229   :  { %v6130_v14 = vmax.f32 %v6112_v34, 0.0  ;;  %v6096_v19 = vmax.f32 %v10318_v5, %v8985_v17  ;;  %v4646_v15 = vpop.f32.mrb[165].mxu1  ;;  %9143 = vmatmul.mubr.msk.f32.gmra.mrb[14].mxu1 %vm591_vm0, %v570_v53  ;;  %v6041_v48 = vmax.f32 %v10320_v6, %v3206_v31  ;;  %8713 = vmatprep.mubr.msk.f32.mxu0 %vm591_vm0, %v283_v54  ;;  %v572_v5 = vld [vmem:[%s12809_s0 + $0x1188] sm:$0xff]  ;;  %v285_v6 = vld [vmem:[%s12809_s0 + $0x890] sm:$0xff]  ;;  %v13053_v34 = vld [vmem:[#allocation7_spill] sm:$0xff] }
 0x22a   :  { %v6129_v63 = vmax.f32 %v6111_v35, 0.0  ;;  %v6095_v49 = vmax.f32 %v10323_v7, %v4646_v15  ;;  %9145 = vmatprep.mubr.msk.f32.mxu1 %vm591_vm0, %v571_v55  ;;  %v573_v7 = vld [vmem:[%s12809_s0 + $0x1190] sm:$0xff]  ;;  %v13054_v55 = vld [vmem:[#allocation8_spill] sm:$0xff]  ;;  %v290_v16 = vld [vmem:[%s12809_s0 + $0x8b8] sm:$0xff] }
 0x22b   :  { %6148 = vst [vmem:[%s12810_s2 + $0x98] sm:$0xff] %v6130_v14  ;;  %v6114_v0 = vmax.f32 %v6042_v18, %v6096_v19  ;;  %v8556_v46 = vpop.f32.mrb[166].mxu0  ;;  %v578_v17 = vld [vmem:[%s12809_s0 + $0x11b8] sm:$0xff]  ;;  %v291_v18 = vld [vmem:[%s12809_s0 + $0x8c0] sm:$0xff] }
 0x22c   :  { %6147 = vst [vmem:[%s12810_s2 + $0x90] sm:$0xff] %v6129_v63  ;;  %v6113_v1 = vmax.f32 %v6041_v48, %v6095_v49  ;;  %v8988_v2 = vpop.f32.mrb[166].mxu1  ;;  %v6044_v50 = vmax.f32 %v10340_v20, %v8556_v46  ;;  %v3216_v25 = vpop.f32.mrb[167].mxu0  ;;  %8714 = vmatmul.mubr.msk.f32.gmra.mrb[16].mxu0 %vm591_vm0, %v284_v4  ;;  %v286_v20 = vld [vmem:[%s12809_s0 + $0x898] sm:$0xff]  ;;  %v579_v19 = vld [vmem:[%s12809_s0 + $0x11c0] sm:$0xff]  ;;  %v13055_v49 = vld [vmem:[#allocation9_spill] sm:$0xff] }
 0x22d   :  { %v6132_v3 = vmax.f32 %v6114_v0, 0.0  ;;  %v6098_v24 = vmax.f32 %v10342_v21, %v8988_v2  ;;  %v4656_v51 = vpop.f32.mrb[167].mxu1  ;;  %9146 = vmatmul.mubr.msk.f32.gmra.mrb[16].mxu1 %vm591_vm0, %v572_v5  ;;  %v6043_v27 = vmax.f32 %v10344_v22, %v3216_v25  ;;  %8716 = vmatprep.mubr.msk.f32.mxu0 %vm591_vm0, %v285_v6  ;;  %v574_v21 = vld [vmem:[%s12809_s0 + $0x1198] sm:$0xff]  ;;  %v287_v22 = vld [vmem:[%s12809_s0 + $0x8a0] sm:$0xff]  ;;  %v580_v25 = vld [vmem:[%s12809_s0 + $0x11c8] sm:$0xff] }
 0x22e   :  { %v6131_v26 = vmax.f32 %v6113_v1, 0.0  ;;  %v6097_v47 = vmax.f32 %v10347_v23, %v4656_v51  ;;  %9148 = vmatprep.mubr.msk.f32.mxu1 %vm591_vm0, %v573_v7  ;;  %v575_v23 = vld [vmem:[%s12809_s0 + $0x11a0] sm:$0xff]  ;;  %v13056_v5 = vld [vmem:[#allocation10_spill] sm:$0xff] }
 0x22f   :  { %6150 = vst [vmem:[%s12810_s2 + $0xa8] sm:$0xff] %v6132_v3  ;;  %v6116_v28 = vmax.f32 %v6044_v50, %v6098_v24  ;;  %v8559_v61 = vpop.f32.mrb[168].mxu0  ;;  %v13057_v46 = vld [vmem:[#allocation11_spill] sm:$0xff]  ;;  %v13058_v3 = vld [vmem:[#allocation12_spill] sm:$0xff] }
 0x230   :  { %6149 = vst [vmem:[%s12810_s2 + $0xa0] sm:$0xff] %v6131_v26  ;;  %v6115_v60 = vmax.f32 %v6043_v27, %v6097_v47  ;;  %v8991_v30 = vpop.f32.mrb[168].mxu1  ;;  %v6046_v41 = vmax.f32 %v10364_v44, %v8559_v61  ;;  %v3226_v42 = vpop.f32.mrb[169].mxu0  ;;  %8717 = vmatmul.mubr.msk.f32.gmra.mrb[18].mxu0 %vm591_vm0, %v286_v20  ;;  %v288_v44 = vld [vmem:[%s12809_s0 + $0x8a8] sm:$0xff]  ;;  %v293_v26 = vld [vmem:[%s12809_s0 + $0x8d0] sm:$0xff] }
 0x231   :  { %v6134_v40 = vmax.f32 %v6116_v28, 0.0  ;;  %v6100_v12 = vmax.f32 %v10366_v45, %v8991_v30  ;;  %v4666_v8 = vpop.f32.mrb[169].mxu1  ;;  %9149 = vmatmul.mubr.msk.f32.gmra.mrb[18].mxu1 %vm591_vm0, %v574_v21  ;;  %v6045_v37 = vmax.f32 %v13049_v36, %v3226_v42  ;;  %8719 = vmatprep.mubr.msk.f32.mxu0 %vm591_vm0, %v287_v22  ;;  %v576_v45 = vld [vmem:[%s12809_s0 + $0x11a8] sm:$0xff]  ;;  %v581_v27 = vld [vmem:[%s12809_s0 + $0x11d0] sm:$0xff]  ;;  %v294_v36 = vld [vmem:[%s12809_s0 + $0x8d8] sm:$0xff] }
 0x232   :  { %v6133_v9 = vmax.f32 %v6115_v60, 0.0  ;;  %v6099_v38 = vmax.f32 %v13050_v43, %v4666_v8  ;;  %9151 = vmatprep.mubr.msk.f32.mxu1 %vm591_vm0, %v575_v23  ;;  %v292_v24 = vld [vmem:[%s12809_s0 + $0x8c8] sm:$0xff]  ;;  %v13059_v22 = vld [vmem:[#allocation13_spill] sm:$0xff]  ;;  %v13060_v60 = vld [vmem:[#allocation14_spill] sm:$0xff] }
 0x233   :  { %6152 = vst [vmem:[%s12810_s2 + $0xb8] sm:$0xff] %v6134_v40  ;;  %v6118_v39 = vmax.f32 %v6046_v41, %v6100_v12  ;;  %v8562_v56 = vpop.f32.mrb[170].mxu0  ;;  %v13061_v12 = vld [vmem:[#allocation15_spill] sm:$0xff]  ;;  %v13062_v8 = vld [vmem:[#allocation16_spill] sm:$0xff] }
 0x234   :  { %6151 = vst [vmem:[%s12810_s2 + $0xb0] sm:$0xff] %v6133_v9  ;;  %v6117_v13 = vmax.f32 %v6045_v37, %v6099_v38  ;;  %v8994_v57 = vpop.f32.mrb[170].mxu1  ;;  %v6048_v59 = vmax.f32 %v13051_v58, %v8562_v56  ;;  %v3236_v29 = vpop.f32.mrb[171].mxu0  ;;  %8720 = vmatmul.mubr.msk.f32.gmra.mrb[20].mxu0 %vm591_vm0, %v288_v44  ;;  %v582_v37 = vld [vmem:[%s12809_s0 + $0x11d8] sm:$0xff]  ;;  %v295_v38 = vld [vmem:[%s12809_s0 + $0x8e0] sm:$0xff] }
 0x235   :  { %v6136_v32 = vmax.f32 %v6118_v39, 0.0  ;;  %v6102_v62 = vmax.f32 %v13052_v33, %v8994_v57  ;;  %v4676_v52 = vpop.f32.mrb[171].mxu1  ;;  %9152 = vmatmul.mubr.msk.f32.gmra.mrb[20].mxu1 %vm591_vm0, %v576_v45  ;;  %v6047_v54 = vmax.f32 %v13053_v34, %v3236_v29  ;;  %8722 = vmatprep.mubr.msk.f32.mxu0 %vm591_vm0, %v289_v10  ;;  %v583_v44 = vld [vmem:[%s12809_s0 + $0x11e0] sm:$0xff]  ;;  %v13064_v57 = vld [vmem:[#allocation18_spill] sm:$0xff]  ;;  %v296_v34 = vld [vmem:[%s12809_s0 + $0x8e8] sm:$0xff] }
 0x236   :  { %v6135_v53 = vmax.f32 %v6117_v13, 0.0  ;;  %v6101_v35 = vmax.f32 %v13054_v55, %v4676_v52  ;;  %9154 = vmatprep.mubr.msk.f32.mxu1 %vm591_vm0, %v577_v11  ;;  %v13063_v13 = vld [vmem:[#allocation17_spill] sm:$0xff]  ;;  %v13066_v52 = vld [vmem:[#allocation20_spill] sm:$0xff] }
 0x237   :  { %6154 = vst [vmem:[%s12810_s2 + $0xc8] sm:$0xff] %v6136_v32  ;;  %v6120_v14 = vmax.f32 %v6048_v59, %v6102_v62  ;;  %v8565_v15 = vpop.f32.mrb[172].mxu0  ;;  %v13065_v62 = vld [vmem:[#allocation19_spill] sm:$0xff] }
 0x238   :  { %6153 = vst [vmem:[%s12810_s2 + $0xc0] sm:$0xff] %v6135_v53  ;;  %v6119_v31 = vmax.f32 %v6047_v54, %v6101_v35  ;;  %v8997_v63 = vpop.f32.mrb[172].mxu1  ;;  %v6050_v4 = vmax.f32 %v13055_v49, %v8565_v15  ;;  %v3246_v6 = vpop.f32.mrb[173].mxu0  ;;  %8723 = vmatmul.mubr.msk.f32.gmra.mrb[22].mxu0 %vm591_vm0, %v290_v16  ;;  %v584_v54 = vld [vmem:[%s12809_s0 + $0x11e8] sm:$0xff]  ;;  %v297_v35 = vld [vmem:[%s12809_s0 + $0x8f0] sm:$0xff] }
 0x239   :  { %v6138_v48 = vmax.f32 %v6120_v14, 0.0  ;;  %v6104_v0 = vmax.f32 %v13056_v5, %v8997_v63  ;;  %v4686_v7 = vpop.f32.mrb[173].mxu1  ;;  %9155 = vmatmul.mubr.msk.f32.gmra.mrb[22].mxu1 %vm591_vm0, %v578_v17  ;;  %v6049_v2 = vmax.f32 %v13057_v46, %v3246_v6  ;;  %8725 = vmatprep.mubr.msk.f32.mxu0 %vm591_vm0, %v291_v18  ;;  %v585_v16 = vld [vmem:[%s12809_s0 + $0x11f0] sm:$0xff]  ;;  %v13068_v63 = vld [vmem:[#allocation22_spill] sm:$0xff] }
 0x23a   :  { %v6137_v1 = vmax.f32 %v6119_v31, 0.0  ;;  %v6103_v50 = vmax.f32 %v13058_v3, %v4686_v7  ;;  %9157 = vmatprep.mubr.msk.f32.mxu1 %vm591_vm0, %v579_v19  ;;  %v13067_v31 = vld [vmem:[#allocation21_spill] sm:$0xff]  ;;  %v13070_v7 = vld [vmem:[#allocation24_spill] sm:$0xff]  ;;  %v298_v46 = vld [vmem:[%s12809_s0 + $0x8f8] sm:$0xff] }
 0x23b   :  { %6156 = vst [vmem:[%s12810_s2 + $0xd8] sm:$0xff] %v6138_v48  ;;  %v6122_v51 = vmax.f32 %v6050_v4, %v6104_v0  ;;  %v8568_v20 = vpop.f32.mrb[174].mxu0  ;;  %v13069_v0 = vld [vmem:[#allocation23_spill] sm:$0xff] }
 0x23c   :  { %6155 = vst [vmem:[%s12810_s2 + $0xd0] sm:$0xff] %v6137_v1  ;;  %v6121_v47 = vmax.f32 %v6049_v2, %v6103_v50  ;;  %v9000_v21 = vpop.f32.mrb[174].mxu1  ;;  %v6052_v23 = vmax.f32 %v13059_v22, %v8568_v20  ;;  %v3256_v30 = vpop.f32.mrb[175].mxu0  ;;  %8726 = vmatmul.mubr.msk.f32.gmra.mrb[24].mxu0 %vm591_vm0, %v292_v24  ;;  %v586_v2 = vld [vmem:[%s12809_s0 + $0x11f8] sm:$0xff] }
 0x23d   :  { %v6140_v28 = vmax.f32 %v6122_v51, 0.0  ;;  %v6106_v61 = vmax.f32 %v13060_v60, %v9000_v21  ;;  %v4696_v40 = vpop.f32.mrb[175].mxu1  ;;  %9158 = vmatmul.mubr.msk.f32.gmra.mrb[24].mxu1 %vm591_vm0, %v580_v25  ;;  %v6051_v42 = vmax.f32 %v13061_v12, %v3256_v30  ;;  %8728 = vmatprep.mubr.msk.f32.mxu0 %vm591_vm0, %v293_v26  ;;  %v13071_v26 = vld [vmem:[#allocation25_spill] sm:$0xff] }
 0x23e   :  { %v6139_v41 = vmax.f32 %v6121_v47, 0.0  ;;  %v6105_v9 = vmax.f32 %v13062_v8, %v4696_v40  ;;  %9160 = vmatprep.mubr.msk.f32.mxu1 %vm591_vm0, %v581_v27  ;;  %v13072_v47 = vld [vmem:[#allocation26_spill] sm:$0xff] }
 0x23f   :  { %6158 = vst [vmem:[%s12810_s2 + $0xe8] sm:$0xff] %v6140_v28  ;;  %v6124_v43 = vmax.f32 %v6052_v23, %v6106_v61  ;;  %v8571_v39 = vpop.f32.mrb[176].mxu0  ;;  %v13073_v23 = vld [vmem:[#allocation27_spill] sm:$0xff]  ;;  %v13074_v61 = vld [vmem:[#allocation28_spill] sm:$0xff] }
 0x240   :  { %6157 = vst [vmem:[%s12810_s2 + $0xe0] sm:$0xff] %v6139_v41  ;;  %v6123_v45 = vmax.f32 %v6051_v42, %v6105_v9  ;;  %v9003_v10 = vpop.f32.mrb[176].mxu1  ;;  %v6054_v56 = vmax.f32 %v13063_v13, %v8571_v39  ;;  %v3266_v58 = vpop.f32.mrb[177].mxu0  ;;  %8729 = vmatmul.mubr.msk.f32.gmra.mrb[26].mxu0 %vm591_vm0, %v294_v36  ;;  %v13075_v9 = vld [vmem:[#allocation29_spill] sm:$0xff]  ;;  %v13077_v39 = vld [vmem:[#allocation31_spill] sm:$0xff] }
 0x241   :  { %v6142_v11 = vmax.f32 %v6124_v43, 0.0  ;;  %v6108_v32 = vmax.f32 %v13064_v57, %v9003_v10  ;;  %v4706_v59 = vpop.f32.mrb[177].mxu1  ;;  %9161 = vmatmul.mubr.msk.f32.gmra.mrb[26].mxu1 %vm591_vm0, %v582_v37  ;;  %v6053_v29 = vmax.f32 %v13065_v62, %v3266_v58  ;;  %8731 = vmatprep.mubr.msk.f32.mxu0 %vm591_vm0, %v295_v38  ;;  %v13076_v37 = vld [vmem:[#allocation30_spill] sm:$0xff] }
 0x242   :  { %v6141_v33 = vmax.f32 %v6123_v45, 0.0  ;;  %v6107_v53 = vmax.f32 %v13066_v52, %v4706_v59  ;;  %9163 = vmatprep.mubr.msk.f32.mxu1 %vm591_vm0, %v583_v44 }
 0x243   :  { %6160 = vst [vmem:[%s12810_s2 + $0xf8] sm:$0xff] %v6142_v11  ;;  %v6126_v55 = vmax.f32 %v6054_v56, %v6108_v32  ;;  %v8574_v14 = vpop.f32.mrb[178].mxu0  ;;  %v13078_v11 = vld [vmem:[#allocation32_spill] sm:$0xff] }
 0x244   :  { %6159 = vst [vmem:[%s12810_s2 + $0xf0] sm:$0xff] %v6141_v33  ;;  %v6125_v17 = vmax.f32 %v6053_v29, %v6107_v53  ;;  %v9006_v18 = vpop.f32.mrb[178].mxu1  ;;  %v6056_v15 = vmax.f32 %v13067_v31, %v8574_v14  ;;  %v3276_v49 = vpop.f32.mrb[179].mxu0  ;;  %8732 = vmatmul.mubr.msk.f32.gmra.mrb[28].mxu0 %vm591_vm0, %v296_v34  ;;  %v13079_v33 = vld [vmem:[#allocation33_spill] sm:$0xff]  ;;  %v13080_v29 = vld [vmem:[#allocation34_spill] sm:$0xff] }
 0x245   :  { %v6144_v19 = vmax.f32 %v6126_v55, 0.0  ;;  %v6110_v48 = vmax.f32 %v13068_v63, %v9006_v18  ;;  %v4716_v4 = vpop.f32.mrb[179].mxu1  ;;  %9164 = vmatmul.mubr.msk.f32.gmra.mrb[28].mxu1 %vm591_vm0, %v584_v54  ;;  %v6055_v6 = vmax.f32 %v13069_v0, %v3276_v49  ;;  %8734 = vmatprep.mubr.msk.f32.mxu0 %vm591_vm0, %v297_v35  ;;  %v13081_v55 = vld [vmem:[#allocation35_spill] sm:$0xff]  ;;  %v13083_v63 = vld [vmem:[#allocation37_spill] sm:$0xff]  ;;  %v13084_v49 = vld [vmem:[#allocation38_spill] sm:$0xff] }
 0x246   :  { %v6143_v5 = vmax.f32 %v6125_v17, 0.0  ;;  %v6109_v1 = vmax.f32 %v13070_v7, %v4716_v4  ;;  %9166 = vmatprep.mubr.msk.f32.mxu1 %vm591_vm0, %v585_v16  ;;  %v13082_v16 = vld [vmem:[#allocation36_spill] sm:$0xff]  ;;  %v13085_v7 = vld [vmem:[#allocation39_spill] sm:$0xff] }
 0x247   :  { %6162 = vst [vmem:[%s12810_s2 + $0x108] sm:$0xff] %v6144_v19  ;;  %v6128_v3 = vmax.f32 %v6056_v15, %v6110_v48  ;;  %v8577_v24 = vpop.f32.mrb[180].mxu0 }
 0x248   :  { %6161 = vst [vmem:[%s12810_s2 + $0x100] sm:$0xff] %v6143_v5  ;;  %v6127_v50 = vmax.f32 %v6055_v6, %v6109_v1  ;;  %v9009_v25 = vpop.f32.mrb[180].mxu1  ;;  %v6202_v27 = vmax.f32 %v13071_v26, %v8577_v24  ;;  %v3286_v21 = vpop.f32.mrb[181].mxu0  ;;  %8735 = vmatmul.mubr.msk.f32.gmra.mrb[30].mxu0 %vm591_vm0, %v298_v46  ;;  %v13086_v46 = vld [vmem:[#allocation40_spill] sm:$0xff]  ;;  %v13087_v26 = vld [vmem:[#allocation41_spill] sm:$0xff] }
 0x249   :  { %v6146_v51 = vmax.f32 %v6128_v3, 0.0  ;;  %v6256_v20 = vmax.f32 %v13072_v47, %v9009_v25  ;;  %v4726_v28 = vpop.f32.mrb[181].mxu1  ;;  %9167 = vmatmul.mubr.msk.f32.gmra.mrb[30].mxu1 %vm591_vm0, %v586_v2  ;;  %v6201_v60 = vmax.f32 %v13073_v23, %v3286_v21  ;;  %v13088_v47 = vld [vmem:[#allocation42_spill] sm:$0xff]  ;;  %v13089_v23 = vld [vmem:[#allocation43_spill] sm:$0xff] }
 0x24a   :  { %v6145_v22 = vmax.f32 %v6127_v50, 0.0  ;;  %v6255_v30 = vmax.f32 %v13074_v61, %v4726_v28  ;;  %v13090_v61 = vld [vmem:[#allocation44_spill] sm:$0xff] }
 0x24b   :  { %6164 = vst [vmem:[%s12810_s2 + $0x118] sm:$0xff] %v6146_v51  ;;  %v6274_v40 = vmax.f32 %v6202_v27, %v6256_v20  ;;  %v8580_v12 = vpop.f32.mrb[182].mxu0 }
 0x24c   :  { %6163 = vst [vmem:[%s12810_s2 + $0x110] sm:$0xff] %v6145_v22  ;;  %v6273_v41 = vmax.f32 %v6201_v60, %v6255_v30  ;;  %v9012_v42 = vpop.f32.mrb[182].mxu1  ;;  %v6204_v36 = vmax.f32 %v13075_v9, %v8580_v12  ;;  %v3296_v38 = vpop.f32.mrb[183].mxu0  ;;  %v13091_v9 = vld [vmem:[#allocation45_spill] sm:$0xff] }
 0x24d   :  { %v6292_v8 = vmax.f32 %v6274_v40, 0.0  ;;  %v6258_v43 = vmax.f32 %v13076_v37, %v9012_v42  ;;  %v4736_v44 = vpop.f32.mrb[183].mxu1  ;;  %v6203_v10 = vmax.f32 %v13077_v39, %v3296_v38  ;;  %v13092_v37 = vld [vmem:[#allocation46_spill] sm:$0xff]  ;;  %v13093_v39 = vld [vmem:[#allocation47_spill] sm:$0xff] }
 0x24e   :  { %v6291_v45 = vmax.f32 %v6273_v41, 0.0  ;;  %v6257_v13 = vmax.f32 %v13078_v11, %v4736_v44  ;;  %v13094_v11 = vld [vmem:[#allocation48_spill] sm:$0xff] }
 0x24f   :  { %6310 = vst [vmem:[%s12810_s2 + $0x128] sm:$0xff] %v6292_v8  ;;  %v6276_v56 = vmax.f32 %v6204_v36, %v6258_v43  ;;  %v8583_v32 = vpop.f32.mrb[184].mxu0 }
 0x250   :  { %6309 = vst [vmem:[%s12810_s2 + $0x120] sm:$0xff] %v6291_v45  ;;  %v6275_v57 = vmax.f32 %v6203_v10, %v6257_v13  ;;  %v9015_v58 = vpop.f32.mrb[184].mxu1  ;;  %v6206_v62 = vmax.f32 %v13079_v33, %v8583_v32  ;;  %v3306_v53 = vpop.f32.mrb[185].mxu0  ;;  %v13095_v33 = vld [vmem:[#allocation49_spill] sm:$0xff] }
 0x251   :  { %v6294_v59 = vmax.f32 %v6276_v56, 0.0  ;;  %v6260_v52 = vmax.f32 %v13080_v29, %v9015_v58  ;;  %v4746_v34 = vpop.f32.mrb[185].mxu1  ;;  %v6205_v35 = vmax.f32 %v13081_v55, %v3306_v53  ;;  %v13096_v29 = vld [vmem:[#allocation50_spill] sm:$0xff]  ;;  %v13097_v55 = vld [vmem:[#allocation51_spill] sm:$0xff] }
 0x252   :  { %v6293_v54 = vmax.f32 %v6275_v57, 0.0  ;;  %v6259_v17 = vmax.f32 %v13082_v16, %v4746_v34  ;;  %v13098_v16 = vld [vmem:[#allocation52_spill] sm:$0xff] }
 0x253   :  { %6312 = vst [vmem:[%s12810_s2 + $0x138] sm:$0xff] %v6294_v59  ;;  %v6278_v14 = vmax.f32 %v6206_v62, %v6260_v52  ;;  %v8586_v19 = vpop.f32.mrb[186].mxu0 }
 0x254   :  { %6311 = vst [vmem:[%s12810_s2 + $0x130] sm:$0xff] %v6293_v54  ;;  %v6277_v18 = vmax.f32 %v6205_v35, %v6259_v17  ;;  %v9018_v31 = vpop.f32.mrb[186].mxu1  ;;  %v6208_v48 = vmax.f32 %v13083_v63, %v8586_v19  ;;  %v3316_v5 = vpop.f32.mrb[187].mxu0  ;;  %v13099_v63 = vld [vmem:[#allocation53_spill] sm:$0xff] }
 0x255   :  { %v6296_v15 = vmax.f32 %v6278_v14, 0.0  ;;  %v6262_v4 = vmax.f32 %v13084_v49, %v9018_v31  ;;  %v4756_v0 = vpop.f32.mrb[187].mxu1  ;;  %v6207_v1 = vmax.f32 %v13085_v7, %v3316_v5  ;;  %v13100_v49 = vld [vmem:[#allocation54_spill] sm:$0xff]  ;;  %v13101_v7 = vld [vmem:[#allocation55_spill] sm:$0xff] }
 0x256   :  { %v6295_v6 = vmax.f32 %v6277_v18, 0.0  ;;  %v6261_v2 = vmax.f32 %v13086_v46, %v4756_v0  ;;  %v13102_v46 = vld [vmem:[#allocation56_spill] sm:$0xff] }
 0x257   :  { %6314 = vst [vmem:[%s12810_s2 + $0x148] sm:$0xff] %v6296_v15  ;;  %v6280_v3 = vmax.f32 %v6208_v48, %v6262_v4  ;;  %v8589_v24 = vpop.f32.mrb[188].mxu0 }
 0x258   :  { %6313 = vst [vmem:[%s12810_s2 + $0x140] sm:$0xff] %v6295_v6  ;;  %v6279_v50 = vmax.f32 %v6207_v1, %v6261_v2  ;;  %v9021_v25 = vpop.f32.mrb[188].mxu1  ;;  %v6210_v27 = vmax.f32 %v13087_v26, %v8589_v24  ;;  %v3326_v21 = vpop.f32.mrb[189].mxu0  ;;  %v13103_v26 = vld [vmem:[#allocation57_spill] sm:$0xff] }
 0x259   :  { %v6298_v51 = vmax.f32 %v6280_v3, 0.0  ;;  %v6264_v20 = vmax.f32 %v13088_v47, %v9021_v25  ;;  %v4766_v28 = vpop.f32.mrb[189].mxu1  ;;  %v6209_v60 = vmax.f32 %v13089_v23, %v3326_v21  ;;  %v13104_v47 = vld [vmem:[#allocation58_spill] sm:$0xff]  ;;  %v13105_v23 = vld [vmem:[#allocation59_spill] sm:$0xff] }
 0x25a   :  { %v6297_v22 = vmax.f32 %v6279_v50, 0.0  ;;  %v6263_v30 = vmax.f32 %v13090_v61, %v4766_v28  ;;  %v13106_v61 = vld [vmem:[#allocation60_spill] sm:$0xff] }
 0x25b   :  { %6316 = vst [vmem:[%s12810_s2 + $0x158] sm:$0xff] %v6298_v51  ;;  %v6282_v40 = vmax.f32 %v6210_v27, %v6264_v20  ;;  %v8592_v12 = vpop.f32.mrb[190].mxu0 }
 0x25c   :  { %6315 = vst [vmem:[%s12810_s2 + $0x150] sm:$0xff] %v6297_v22  ;;  %v6281_v41 = vmax.f32 %v6209_v60, %v6263_v30  ;;  %v9024_v42 = vpop.f32.mrb[190].mxu1  ;;  %v6212_v36 = vmax.f32 %v13091_v9, %v8592_v12  ;;  %v3336_v38 = vpop.f32.mrb[191].mxu0  ;;  %v13107_v9 = vld [vmem:[#allocation61_spill] sm:$0xff] }
 0x25d   :  { %v6300_v8 = vmax.f32 %v6282_v40, 0.0  ;;  %v6266_v43 = vmax.f32 %v13092_v37, %v9024_v42  ;;  %v4776_v44 = vpop.f32.mrb[191].mxu1  ;;  %v6211_v10 = vmax.f32 %v13093_v39, %v3336_v38  ;;  %v13108_v37 = vld [vmem:[#allocation62_spill] sm:$0xff]  ;;  %v13109_v39 = vld [vmem:[#allocation63_spill] sm:$0xff] }
 0x25e   :  { %v6299_v45 = vmax.f32 %v6281_v41, 0.0  ;;  %v6265_v13 = vmax.f32 %v13094_v11, %v4776_v44  ;;  %v13110_v11 = vld [vmem:[#allocation64_spill] sm:$0xff] }
 0x25f   :  { %6318 = vst [vmem:[%s12810_s2 + $0x168] sm:$0xff] %v6300_v8  ;;  %v6284_v56 = vmax.f32 %v6212_v36, %v6266_v43  ;;  %v8595_v32 = vpop.f32.mrb[192].mxu0 }
 0x260   :  { %6317 = vst [vmem:[%s12810_s2 + $0x160] sm:$0xff] %v6299_v45  ;;  %v6283_v57 = vmax.f32 %v6211_v10, %v6265_v13  ;;  %v9027_v58 = vpop.f32.mrb[192].mxu1  ;;  %v6214_v62 = vmax.f32 %v13095_v33, %v8595_v32  ;;  %v3346_v53 = vpop.f32.mrb[193].mxu0  ;;  %v13111_v33 = vld [vmem:[#allocation65_spill] sm:$0xff] }
 0x261   :  { %v6302_v59 = vmax.f32 %v6284_v56, 0.0  ;;  %v6268_v52 = vmax.f32 %v13096_v29, %v9027_v58  ;;  %v4786_v34 = vpop.f32.mrb[193].mxu1  ;;  %v6213_v35 = vmax.f32 %v13097_v55, %v3346_v53  ;;  %v13112_v29 = vld [vmem:[#allocation66_spill] sm:$0xff]  ;;  %v13113_v55 = vld [vmem:[#allocation67_spill] sm:$0xff] }
 0x262   :  { %v6301_v54 = vmax.f32 %v6283_v57, 0.0  ;;  %v6267_v17 = vmax.f32 %v13098_v16, %v4786_v34  ;;  %v13114_v16 = vld [vmem:[#allocation68_spill] sm:$0xff] }
 0x263   :  { %6320 = vst [vmem:[%s12810_s2 + $0x178] sm:$0xff] %v6302_v59  ;;  %v6286_v14 = vmax.f32 %v6214_v62, %v6268_v52  ;;  %v8598_v19 = vpop.f32.mrb[194].mxu0 }
 0x264   :  { %6319 = vst [vmem:[%s12810_s2 + $0x170] sm:$0xff] %v6301_v54  ;;  %v6285_v18 = vmax.f32 %v6213_v35, %v6267_v17  ;;  %v9030_v31 = vpop.f32.mrb[194].mxu1  ;;  %v6216_v48 = vmax.f32 %v13099_v63, %v8598_v19  ;;  %v3356_v5 = vpop.f32.mrb[195].mxu0  ;;  %v13115_v63 = vld [vmem:[#allocation69_spill] sm:$0xff] }
 0x265   :  { %v6304_v15 = vmax.f32 %v6286_v14, 0.0  ;;  %v6270_v4 = vmax.f32 %v13100_v49, %v9030_v31  ;;  %v4796_v0 = vpop.f32.mrb[195].mxu1  ;;  %v6215_v1 = vmax.f32 %v13101_v7, %v3356_v5  ;;  %v13116_v49 = vld [vmem:[#allocation70_spill] sm:$0xff]  ;;  %v13117_v7 = vld [vmem:[#allocation71_spill] sm:$0xff] }
 0x266   :  { %v6303_v6 = vmax.f32 %v6285_v18, 0.0  ;;  %v6269_v2 = vmax.f32 %v13102_v46, %v4796_v0  ;;  %v13118_v46 = vld [vmem:[#allocation72_spill] sm:$0xff] }
 0x267   :  { %6322 = vst [vmem:[%s12810_s2 + $0x188] sm:$0xff] %v6304_v15  ;;  %v6288_v3 = vmax.f32 %v6216_v48, %v6270_v4  ;;  %v8601_v24 = vpop.f32.mrb[196].mxu0 }
 0x268   :  { %6321 = vst [vmem:[%s12810_s2 + $0x180] sm:$0xff] %v6303_v6  ;;  %v6287_v50 = vmax.f32 %v6215_v1, %v6269_v2  ;;  %v9033_v25 = vpop.f32.mrb[196].mxu1  ;;  %v6218_v27 = vmax.f32 %v13103_v26, %v8601_v24  ;;  %v3366_v21 = vpop.f32.mrb[197].mxu0  ;;  %v13119_v26 = vld [vmem:[#allocation73_spill] sm:$0xff] }
 0x269   :  { %v6306_v51 = vmax.f32 %v6288_v3, 0.0  ;;  %v6272_v20 = vmax.f32 %v13104_v47, %v9033_v25  ;;  %v4806_v28 = vpop.f32.mrb[197].mxu1  ;;  %v6217_v60 = vmax.f32 %v13105_v23, %v3366_v21  ;;  %v13120_v47 = vld [vmem:[#allocation74_spill] sm:$0xff]  ;;  %v13121_v23 = vld [vmem:[#allocation75_spill] sm:$0xff] }
 0x26a   :  { %v6305_v22 = vmax.f32 %v6287_v50, 0.0  ;;  %v6271_v30 = vmax.f32 %v13106_v61, %v4806_v28  ;;  %v13122_v61 = vld [vmem:[#allocation76_spill] sm:$0xff] }
 0x26b   :  { %6324 = vst [vmem:[%s12810_s2 + $0x198] sm:$0xff] %v6306_v51  ;;  %v6290_v40 = vmax.f32 %v6218_v27, %v6272_v20  ;;  %v8604_v12 = vpop.f32.mrb[198].mxu0 }
 0x26c   :  { %6323 = vst [vmem:[%s12810_s2 + $0x190] sm:$0xff] %v6305_v22  ;;  %v6289_v41 = vmax.f32 %v6217_v60, %v6271_v30  ;;  %v9036_v42 = vpop.f32.mrb[198].mxu1  ;;  %v6364_v36 = vmax.f32 %v13107_v9, %v8604_v12  ;;  %v3376_v38 = vpop.f32.mrb[199].mxu0  ;;  %v13123_v9 = vld [vmem:[#allocation77_spill] sm:$0xff] }
 0x26d   :  { %v6308_v8 = vmax.f32 %v6290_v40, 0.0  ;;  %v6418_v43 = vmax.f32 %v13108_v37, %v9036_v42  ;;  %v4816_v44 = vpop.f32.mrb[199].mxu1  ;;  %v6363_v10 = vmax.f32 %v13109_v39, %v3376_v38  ;;  %v13124_v37 = vld [vmem:[#allocation78_spill] sm:$0xff]  ;;  %v13125_v39 = vld [vmem:[#allocation79_spill] sm:$0xff] }
 0x26e   :  { %v6307_v45 = vmax.f32 %v6289_v41, 0.0  ;;  %v6417_v13 = vmax.f32 %v13110_v11, %v4816_v44  ;;  %v13126_v11 = vld [vmem:[#allocation80_spill] sm:$0xff] }
 0x26f   :  { %6326 = vst [vmem:[%s12810_s2 + $0x1a8] sm:$0xff] %v6308_v8  ;;  %v6436_v56 = vmax.f32 %v6364_v36, %v6418_v43  ;;  %v8607_v32 = vpop.f32.mrb[200].mxu0 }
 0x270   :  { %6325 = vst [vmem:[%s12810_s2 + $0x1a0] sm:$0xff] %v6307_v45  ;;  %v6435_v57 = vmax.f32 %v6363_v10, %v6417_v13  ;;  %v9039_v58 = vpop.f32.mrb[200].mxu1  ;;  %v6366_v62 = vmax.f32 %v13111_v33, %v8607_v32  ;;  %v3386_v53 = vpop.f32.mrb[201].mxu0  ;;  %v13127_v33 = vld [vmem:[#allocation81_spill] sm:$0xff] }
 0x271   :  { %v6454_v59 = vmax.f32 %v6436_v56, 0.0  ;;  %v6420_v52 = vmax.f32 %v13112_v29, %v9039_v58  ;;  %v4826_v34 = vpop.f32.mrb[201].mxu1  ;;  %v6365_v35 = vmax.f32 %v13113_v55, %v3386_v53  ;;  %v13128_v29 = vld [vmem:[#allocation82_spill] sm:$0xff]  ;;  %v13129_v55 = vld [vmem:[#allocation83_spill] sm:$0xff] }
 0x272   :  { %v6453_v54 = vmax.f32 %v6435_v57, 0.0  ;;  %v6419_v17 = vmax.f32 %v13114_v16, %v4826_v34  ;;  %v13130_v16 = vld [vmem:[#allocation84_spill] sm:$0xff] }
 0x273   :  { %6472 = vst [vmem:[%s12810_s2 + $0x1b8] sm:$0xff] %v6454_v59  ;;  %v6438_v14 = vmax.f32 %v6366_v62, %v6420_v52  ;;  %v8610_v19 = vpop.f32.mrb[202].mxu0 }
 0x274   :  { %6471 = vst [vmem:[%s12810_s2 + $0x1b0] sm:$0xff] %v6453_v54  ;;  %v6437_v18 = vmax.f32 %v6365_v35, %v6419_v17  ;;  %v9042_v31 = vpop.f32.mrb[202].mxu1  ;;  %v6368_v48 = vmax.f32 %v13115_v63, %v8610_v19  ;;  %v3396_v5 = vpop.f32.mrb[203].mxu0  ;;  %v13131_v63 = vld [vmem:[#allocation85_spill] sm:$0xff] }
 0x275   :  { %v6456_v15 = vmax.f32 %v6438_v14, 0.0  ;;  %v6422_v4 = vmax.f32 %v13116_v49, %v9042_v31  ;;  %v4836_v0 = vpop.f32.mrb[203].mxu1  ;;  %v6367_v1 = vmax.f32 %v13117_v7, %v3396_v5  ;;  %v13132_v49 = vld [vmem:[#allocation86_spill] sm:$0xff]  ;;  %v13133_v7 = vld [vmem:[#allocation87_spill] sm:$0xff] }
 0x276   :  { %v6455_v6 = vmax.f32 %v6437_v18, 0.0  ;;  %v6421_v2 = vmax.f32 %v13118_v46, %v4836_v0  ;;  %v13134_v46 = vld [vmem:[#allocation88_spill] sm:$0xff] }
 0x277   :  { %6474 = vst [vmem:[%s12810_s2 + $0x1c8] sm:$0xff] %v6456_v15  ;;  %v6440_v3 = vmax.f32 %v6368_v48, %v6422_v4  ;;  %v8613_v24 = vpop.f32.mrb[204].mxu0 }
 0x278   :  { %6473 = vst [vmem:[%s12810_s2 + $0x1c0] sm:$0xff] %v6455_v6  ;;  %v6439_v50 = vmax.f32 %v6367_v1, %v6421_v2  ;;  %v9045_v25 = vpop.f32.mrb[204].mxu1  ;;  %v6370_v27 = vmax.f32 %v13119_v26, %v8613_v24  ;;  %v3406_v21 = vpop.f32.mrb[205].mxu0  ;;  %v13135_v26 = vld [vmem:[#allocation89_spill] sm:$0xff] }
 0x279   :  { %v6458_v51 = vmax.f32 %v6440_v3, 0.0  ;;  %v6424_v20 = vmax.f32 %v13120_v47, %v9045_v25  ;;  %v4846_v28 = vpop.f32.mrb[205].mxu1  ;;  %v6369_v60 = vmax.f32 %v13121_v23, %v3406_v21  ;;  %v13136_v47 = vld [vmem:[#allocation90_spill] sm:$0xff]  ;;  %v13137_v23 = vld [vmem:[#allocation91_spill] sm:$0xff] }
 0x27a   :  { %v6457_v22 = vmax.f32 %v6439_v50, 0.0  ;;  %v6423_v30 = vmax.f32 %v13122_v61, %v4846_v28  ;;  %v13138_v61 = vld [vmem:[#allocation92_spill] sm:$0xff] }
 0x27b   :  { %6476 = vst [vmem:[%s12810_s2 + $0x1d8] sm:$0xff] %v6458_v51  ;;  %v6442_v40 = vmax.f32 %v6370_v27, %v6424_v20  ;;  %v8616_v12 = vpop.f32.mrb[206].mxu0 }
 0x27c   :  { %6475 = vst [vmem:[%s12810_s2 + $0x1d0] sm:$0xff] %v6457_v22  ;;  %v6441_v41 = vmax.f32 %v6369_v60, %v6423_v30  ;;  %v9048_v42 = vpop.f32.mrb[206].mxu1  ;;  %v6372_v36 = vmax.f32 %v13123_v9, %v8616_v12  ;;  %v3416_v38 = vpop.f32.mrb[207].mxu0  ;;  %v13139_v9 = vld [vmem:[#allocation93_spill] sm:$0xff] }
 0x27d   :  { %v6460_v8 = vmax.f32 %v6442_v40, 0.0  ;;  %v6426_v43 = vmax.f32 %v13124_v37, %v9048_v42  ;;  %v4856_v44 = vpop.f32.mrb[207].mxu1  ;;  %v6371_v10 = vmax.f32 %v13125_v39, %v3416_v38  ;;  %v13140_v37 = vld [vmem:[#allocation94_spill] sm:$0xff]  ;;  %v13141_v39 = vld [vmem:[#allocation95_spill] sm:$0xff] }
 0x27e   :  { %v6459_v45 = vmax.f32 %v6441_v41, 0.0  ;;  %v6425_v13 = vmax.f32 %v13126_v11, %v4856_v44  ;;  %v13142_v11 = vld [vmem:[#allocation96_spill] sm:$0xff] }
 0x27f   :  { %6478 = vst [vmem:[%s12810_s2 + $0x1e8] sm:$0xff] %v6460_v8  ;;  %v6444_v56 = vmax.f32 %v6372_v36, %v6426_v43  ;;  %v8619_v32 = vpop.f32.mrb[208].mxu0 }
 0x280   :  { %6477 = vst [vmem:[%s12810_s2 + $0x1e0] sm:$0xff] %v6459_v45  ;;  %v6443_v57 = vmax.f32 %v6371_v10, %v6425_v13  ;;  %v9051_v58 = vpop.f32.mrb[208].mxu1  ;;  %v6374_v62 = vmax.f32 %v13127_v33, %v8619_v32  ;;  %v3426_v53 = vpop.f32.mrb[209].mxu0  ;;  %v13143_v33 = vld [vmem:[#allocation97_spill] sm:$0xff] }
 0x281   :  { %v6462_v59 = vmax.f32 %v6444_v56, 0.0  ;;  %v6428_v52 = vmax.f32 %v13128_v29, %v9051_v58  ;;  %v4866_v34 = vpop.f32.mrb[209].mxu1  ;;  %v6373_v35 = vmax.f32 %v13129_v55, %v3426_v53  ;;  %v13144_v29 = vld [vmem:[#allocation98_spill] sm:$0xff]  ;;  %v13145_v55 = vld [vmem:[#allocation99_spill] sm:$0xff] }
 0x282   :  { %v6461_v54 = vmax.f32 %v6443_v57, 0.0  ;;  %v6427_v17 = vmax.f32 %v13130_v16, %v4866_v34  ;;  %v13146_v16 = vld [vmem:[#allocation100_spill] sm:$0xff] }
 0x283   :  { %6480 = vst [vmem:[%s12810_s2 + $0x1f8] sm:$0xff] %v6462_v59  ;;  %v6446_v14 = vmax.f32 %v6374_v62, %v6428_v52  ;;  %v8622_v19 = vpop.f32.mrb[210].mxu0 }
 0x284   :  { %6479 = vst [vmem:[%s12810_s2 + $0x1f0] sm:$0xff] %v6461_v54  ;;  %v6445_v18 = vmax.f32 %v6373_v35, %v6427_v17  ;;  %v9054_v31 = vpop.f32.mrb[210].mxu1  ;;  %v6376_v48 = vmax.f32 %v13131_v63, %v8622_v19  ;;  %v3436_v5 = vpop.f32.mrb[211].mxu0  ;;  %v13147_v63 = vld [vmem:[#allocation101_spill] sm:$0xff] }
 0x285   :  { %v6464_v15 = vmax.f32 %v6446_v14, 0.0  ;;  %v6430_v4 = vmax.f32 %v13132_v49, %v9054_v31  ;;  %v4876_v0 = vpop.f32.mrb[211].mxu1  ;;  %v6375_v1 = vmax.f32 %v13133_v7, %v3436_v5  ;;  %v13148_v49 = vld [vmem:[#allocation102_spill] sm:$0xff]  ;;  %v13149_v7 = vld [vmem:[#allocation103_spill] sm:$0xff] }
 0x286   :  { %v6463_v6 = vmax.f32 %v6445_v18, 0.0  ;;  %v6429_v2 = vmax.f32 %v13134_v46, %v4876_v0  ;;  %v13150_v46 = vld [vmem:[#allocation104_spill] sm:$0xff] }
 0x287   :  { %6482 = vst [vmem:[%s12810_s2 + $0x208] sm:$0xff] %v6464_v15  ;;  %v6448_v3 = vmax.f32 %v6376_v48, %v6430_v4  ;;  %v8625_v24 = vpop.f32.mrb[212].mxu0 }
 0x288   :  { %6481 = vst [vmem:[%s12810_s2 + $0x200] sm:$0xff] %v6463_v6  ;;  %v6447_v50 = vmax.f32 %v6375_v1, %v6429_v2  ;;  %v9057_v25 = vpop.f32.mrb[212].mxu1  ;;  %v6378_v27 = vmax.f32 %v13135_v26, %v8625_v24  ;;  %v3446_v21 = vpop.f32.mrb[213].mxu0  ;;  %v13151_v26 = vld [vmem:[#allocation105_spill] sm:$0xff] }
 0x289   :  { %v6466_v51 = vmax.f32 %v6448_v3, 0.0  ;;  %v6432_v20 = vmax.f32 %v13136_v47, %v9057_v25  ;;  %v4886_v28 = vpop.f32.mrb[213].mxu1  ;;  %v6377_v60 = vmax.f32 %v13137_v23, %v3446_v21  ;;  %v13152_v47 = vld [vmem:[#allocation106_spill] sm:$0xff]  ;;  %v13153_v23 = vld [vmem:[#allocation107_spill] sm:$0xff] }
 0x28a   :  { %v6465_v22 = vmax.f32 %v6447_v50, 0.0  ;;  %v6431_v30 = vmax.f32 %v13138_v61, %v4886_v28  ;;  %v13154_v61 = vld [vmem:[#allocation108_spill] sm:$0xff] }
 0x28b   :  { %6484 = vst [vmem:[%s12810_s2 + $0x218] sm:$0xff] %v6466_v51  ;;  %v6450_v40 = vmax.f32 %v6378_v27, %v6432_v20  ;;  %v8628_v12 = vpop.f32.mrb[214].mxu0 }
 0x28c   :  { %6483 = vst [vmem:[%s12810_s2 + $0x210] sm:$0xff] %v6465_v22  ;;  %v6449_v41 = vmax.f32 %v6377_v60, %v6431_v30  ;;  %v9060_v42 = vpop.f32.mrb[214].mxu1  ;;  %v6380_v36 = vmax.f32 %v13139_v9, %v8628_v12  ;;  %v3456_v38 = vpop.f32.mrb[215].mxu0  ;;  %v13155_v9 = vld [vmem:[#allocation109_spill] sm:$0xff] }
 0x28d   :  { %v6468_v8 = vmax.f32 %v6450_v40, 0.0  ;;  %v6434_v43 = vmax.f32 %v13140_v37, %v9060_v42  ;;  %v4896_v44 = vpop.f32.mrb[215].mxu1  ;;  %v6379_v10 = vmax.f32 %v13141_v39, %v3456_v38  ;;  %v13156_v37 = vld [vmem:[#allocation110_spill] sm:$0xff]  ;;  %v13157_v39 = vld [vmem:[#allocation111_spill] sm:$0xff] }
 0x28e   :  { %v6467_v45 = vmax.f32 %v6449_v41, 0.0  ;;  %v6433_v13 = vmax.f32 %v13142_v11, %v4896_v44  ;;  %v13158_v11 = vld [vmem:[#allocation112_spill] sm:$0xff] }
 0x28f   :  { %6486 = vst [vmem:[%s12810_s2 + $0x228] sm:$0xff] %v6468_v8  ;;  %v6452_v56 = vmax.f32 %v6380_v36, %v6434_v43  ;;  %v8631_v32 = vpop.f32.mrb[216].mxu0 }
 0x290   :  { %6485 = vst [vmem:[%s12810_s2 + $0x220] sm:$0xff] %v6467_v45  ;;  %v6451_v57 = vmax.f32 %v6379_v10, %v6433_v13  ;;  %v9063_v58 = vpop.f32.mrb[216].mxu1  ;;  %v6526_v62 = vmax.f32 %v13143_v33, %v8631_v32  ;;  %v3466_v53 = vpop.f32.mrb[217].mxu0  ;;  %v13159_v33 = vld [vmem:[#allocation113_spill] sm:$0xff] }
 0x291   :  { %v6470_v59 = vmax.f32 %v6452_v56, 0.0  ;;  %v6580_v52 = vmax.f32 %v13144_v29, %v9063_v58  ;;  %v4906_v34 = vpop.f32.mrb[217].mxu1  ;;  %v6525_v35 = vmax.f32 %v13145_v55, %v3466_v53  ;;  %v13160_v29 = vld [vmem:[#allocation114_spill] sm:$0xff]  ;;  %v13161_v55 = vld [vmem:[#allocation115_spill] sm:$0xff] }
 0x292   :  { %v6469_v54 = vmax.f32 %v6451_v57, 0.0  ;;  %v6579_v17 = vmax.f32 %v13146_v16, %v4906_v34  ;;  %v13162_v16 = vld [vmem:[#allocation116_spill] sm:$0xff] }
 0x293   :  { %6488 = vst [vmem:[%s12810_s2 + $0x238] sm:$0xff] %v6470_v59  ;;  %v6598_v14 = vmax.f32 %v6526_v62, %v6580_v52  ;;  %v8634_v19 = vpop.f32.mrb[218].mxu0 }
 0x294   :  { %6487 = vst [vmem:[%s12810_s2 + $0x230] sm:$0xff] %v6469_v54  ;;  %v6597_v18 = vmax.f32 %v6525_v35, %v6579_v17  ;;  %v9066_v31 = vpop.f32.mrb[218].mxu1  ;;  %v6528_v48 = vmax.f32 %v13147_v63, %v8634_v19  ;;  %v3476_v5 = vpop.f32.mrb[219].mxu0  ;;  %v13163_v63 = vld [vmem:[#allocation117_spill] sm:$0xff] }
 0x295   :  { %v6616_v15 = vmax.f32 %v6598_v14, 0.0  ;;  %v6582_v4 = vmax.f32 %v13148_v49, %v9066_v31  ;;  %v4916_v0 = vpop.f32.mrb[219].mxu1  ;;  %v6527_v1 = vmax.f32 %v13149_v7, %v3476_v5  ;;  %v13164_v49 = vld [vmem:[#allocation118_spill] sm:$0xff]  ;;  %v13165_v7 = vld [vmem:[#allocation119_spill] sm:$0xff] }
 0x296   :  { %v6615_v6 = vmax.f32 %v6597_v18, 0.0  ;;  %v6581_v2 = vmax.f32 %v13150_v46, %v4916_v0  ;;  %v13166_v46 = vld [vmem:[#allocation120_spill] sm:$0xff] }
 0x297   :  { %6634 = vst [vmem:[%s12810_s2 + $0x248] sm:$0xff] %v6616_v15  ;;  %v6600_v3 = vmax.f32 %v6528_v48, %v6582_v4  ;;  %v8637_v24 = vpop.f32.mrb[220].mxu0 }
 0x298   :  { %6633 = vst [vmem:[%s12810_s2 + $0x240] sm:$0xff] %v6615_v6  ;;  %v6599_v50 = vmax.f32 %v6527_v1, %v6581_v2  ;;  %v9069_v25 = vpop.f32.mrb[220].mxu1  ;;  %v6530_v27 = vmax.f32 %v13151_v26, %v8637_v24  ;;  %v3486_v21 = vpop.f32.mrb[221].mxu0  ;;  %v13167_v26 = vld [vmem:[#allocation121_spill] sm:$0xff] }
 0x299   :  { %v6618_v51 = vmax.f32 %v6600_v3, 0.0  ;;  %v6584_v20 = vmax.f32 %v13152_v47, %v9069_v25  ;;  %v4926_v28 = vpop.f32.mrb[221].mxu1  ;;  %v6529_v60 = vmax.f32 %v13153_v23, %v3486_v21  ;;  %v13168_v47 = vld [vmem:[#allocation122_spill] sm:$0xff]  ;;  %v13169_v23 = vld [vmem:[#allocation123_spill] sm:$0xff] }
 0x29a   :  { %v6617_v22 = vmax.f32 %v6599_v50, 0.0  ;;  %v6583_v30 = vmax.f32 %v13154_v61, %v4926_v28  ;;  %v13170_v61 = vld [vmem:[#allocation124_spill] sm:$0xff] }
 0x29b   :  { %6636 = vst [vmem:[%s12810_s2 + $0x258] sm:$0xff] %v6618_v51  ;;  %v6602_v40 = vmax.f32 %v6530_v27, %v6584_v20  ;;  %v8640_v12 = vpop.f32.mrb[222].mxu0 }
 0x29c   :  { %6635 = vst [vmem:[%s12810_s2 + $0x250] sm:$0xff] %v6617_v22  ;;  %v6601_v41 = vmax.f32 %v6529_v60, %v6583_v30  ;;  %v9072_v42 = vpop.f32.mrb[222].mxu1  ;;  %v6532_v36 = vmax.f32 %v13155_v9, %v8640_v12  ;;  %v3496_v38 = vpop.f32.mrb[223].mxu0  ;;  %v13171_v9 = vld [vmem:[#allocation125_spill] sm:$0xff] }
 0x29d   :  { %v6620_v8 = vmax.f32 %v6602_v40, 0.0  ;;  %v6586_v43 = vmax.f32 %v13156_v37, %v9072_v42  ;;  %v4936_v44 = vpop.f32.mrb[223].mxu1  ;;  %v6531_v10 = vmax.f32 %v13157_v39, %v3496_v38  ;;  %v13172_v37 = vld [vmem:[#allocation126_spill] sm:$0xff]  ;;  %v13173_v39 = vld [vmem:[#allocation127_spill] sm:$0xff] }
 0x29e   :  { %v6619_v45 = vmax.f32 %v6601_v41, 0.0  ;;  %v6585_v13 = vmax.f32 %v13158_v11, %v4936_v44  ;;  %v13174_v11 = vld [vmem:[#allocation128_spill] sm:$0xff] }
 0x29f   :  { %6638 = vst [vmem:[%s12810_s2 + $0x268] sm:$0xff] %v6620_v8  ;;  %v6604_v56 = vmax.f32 %v6532_v36, %v6586_v43  ;;  %v8643_v32 = vpop.f32.mrb[224].mxu0 }
 0x2a0   :  { %6637 = vst [vmem:[%s12810_s2 + $0x260] sm:$0xff] %v6619_v45  ;;  %v6603_v57 = vmax.f32 %v6531_v10, %v6585_v13  ;;  %v9075_v58 = vpop.f32.mrb[224].mxu1  ;;  %v6534_v62 = vmax.f32 %v13159_v33, %v8643_v32  ;;  %v3506_v53 = vpop.f32.mrb[225].mxu0  ;;  %v13175_v33 = vld [vmem:[#allocation129_spill] sm:$0xff] }
 0x2a1   :  { %v6622_v59 = vmax.f32 %v6604_v56, 0.0  ;;  %v6588_v52 = vmax.f32 %v13160_v29, %v9075_v58  ;;  %v4946_v34 = vpop.f32.mrb[225].mxu1  ;;  %v6533_v35 = vmax.f32 %v13161_v55, %v3506_v53  ;;  %v13176_v29 = vld [vmem:[#allocation130_spill] sm:$0xff]  ;;  %v13177_v55 = vld [vmem:[#allocation131_spill] sm:$0xff] }
 0x2a2   :  { %v6621_v54 = vmax.f32 %v6603_v57, 0.0  ;;  %v6587_v17 = vmax.f32 %v13162_v16, %v4946_v34  ;;  %v13178_v16 = vld [vmem:[#allocation132_spill] sm:$0xff] }
 0x2a3   :  { %6640 = vst [vmem:[%s12810_s2 + $0x278] sm:$0xff] %v6622_v59  ;;  %v6606_v14 = vmax.f32 %v6534_v62, %v6588_v52  ;;  %v8646_v19 = vpop.f32.mrb[226].mxu0 }
 0x2a4   :  { %6639 = vst [vmem:[%s12810_s2 + $0x270] sm:$0xff] %v6621_v54  ;;  %v6605_v18 = vmax.f32 %v6533_v35, %v6587_v17  ;;  %v9078_v31 = vpop.f32.mrb[226].mxu1  ;;  %v6536_v48 = vmax.f32 %v13163_v63, %v8646_v19  ;;  %v3516_v5 = vpop.f32.mrb[227].mxu0  ;;  %v13179_v63 = vld [vmem:[#allocation133_spill] sm:$0xff] }
 0x2a5   :  { %v6624_v15 = vmax.f32 %v6606_v14, 0.0  ;;  %v6590_v4 = vmax.f32 %v13164_v49, %v9078_v31  ;;  %v4956_v0 = vpop.f32.mrb[227].mxu1  ;;  %v6535_v1 = vmax.f32 %v13165_v7, %v3516_v5  ;;  %v13180_v49 = vld [vmem:[#allocation134_spill] sm:$0xff]  ;;  %v13181_v7 = vld [vmem:[#allocation135_spill] sm:$0xff] }
 0x2a6   :  { %v6623_v6 = vmax.f32 %v6605_v18, 0.0  ;;  %v6589_v2 = vmax.f32 %v13166_v46, %v4956_v0  ;;  %v13182_v46 = vld [vmem:[#allocation136_spill] sm:$0xff] }
 0x2a7   :  { %6642 = vst [vmem:[%s12810_s2 + $0x288] sm:$0xff] %v6624_v15  ;;  %v6608_v3 = vmax.f32 %v6536_v48, %v6590_v4  ;;  %v8649_v24 = vpop.f32.mrb[228].mxu0 }
 0x2a8   :  { %6641 = vst [vmem:[%s12810_s2 + $0x280] sm:$0xff] %v6623_v6  ;;  %v6607_v50 = vmax.f32 %v6535_v1, %v6589_v2  ;;  %v9081_v25 = vpop.f32.mrb[228].mxu1  ;;  %v6538_v27 = vmax.f32 %v13167_v26, %v8649_v24  ;;  %v3526_v21 = vpop.f32.mrb[229].mxu0  ;;  %v13183_v26 = vld [vmem:[#allocation137_spill] sm:$0xff] }
 0x2a9   :  { %v6626_v51 = vmax.f32 %v6608_v3, 0.0  ;;  %v6592_v20 = vmax.f32 %v13168_v47, %v9081_v25  ;;  %v4966_v28 = vpop.f32.mrb[229].mxu1  ;;  %v6537_v60 = vmax.f32 %v13169_v23, %v3526_v21  ;;  %v13184_v47 = vld [vmem:[#allocation138_spill] sm:$0xff]  ;;  %v13185_v23 = vld [vmem:[#allocation139_spill] sm:$0xff] }
 0x2aa   :  { %v6625_v22 = vmax.f32 %v6607_v50, 0.0  ;;  %v6591_v30 = vmax.f32 %v13170_v61, %v4966_v28  ;;  %v13186_v61 = vld [vmem:[#allocation140_spill] sm:$0xff] }
 0x2ab   :  { %6644 = vst [vmem:[%s12810_s2 + $0x298] sm:$0xff] %v6626_v51  ;;  %v6610_v40 = vmax.f32 %v6538_v27, %v6592_v20  ;;  %v8652_v12 = vpop.f32.mrb[230].mxu0 }
 0x2ac   :  { %6643 = vst [vmem:[%s12810_s2 + $0x290] sm:$0xff] %v6625_v22  ;;  %v6609_v41 = vmax.f32 %v6537_v60, %v6591_v30  ;;  %v9084_v42 = vpop.f32.mrb[230].mxu1  ;;  %v6540_v36 = vmax.f32 %v13171_v9, %v8652_v12  ;;  %v3536_v38 = vpop.f32.mrb[231].mxu0  ;;  %v13187_v9 = vld [vmem:[#allocation141_spill] sm:$0xff] }
 0x2ad   :  { %v6628_v8 = vmax.f32 %v6610_v40, 0.0  ;;  %v6594_v43 = vmax.f32 %v13172_v37, %v9084_v42  ;;  %v4976_v44 = vpop.f32.mrb[231].mxu1  ;;  %v6539_v10 = vmax.f32 %v13173_v39, %v3536_v38  ;;  %v13188_v37 = vld [vmem:[#allocation142_spill] sm:$0xff]  ;;  %v13189_v39 = vld [vmem:[#allocation143_spill] sm:$0xff] }
 0x2ae   :  { %v6627_v45 = vmax.f32 %v6609_v41, 0.0  ;;  %v6593_v13 = vmax.f32 %v13174_v11, %v4976_v44  ;;  %v13190_v11 = vld [vmem:[#allocation144_spill] sm:$0xff] }
 0x2af   :  { %6646 = vst [vmem:[%s12810_s2 + $0x2a8] sm:$0xff] %v6628_v8  ;;  %v6612_v56 = vmax.f32 %v6540_v36, %v6594_v43  ;;  %v8655_v32 = vpop.f32.mrb[232].mxu0 }
 0x2b0   :  { %6645 = vst [vmem:[%s12810_s2 + $0x2a0] sm:$0xff] %v6627_v45  ;;  %v6611_v57 = vmax.f32 %v6539_v10, %v6593_v13  ;;  %v9087_v58 = vpop.f32.mrb[232].mxu1  ;;  %v6542_v62 = vmax.f32 %v13175_v33, %v8655_v32  ;;  %v3546_v53 = vpop.f32.mrb[233].mxu0  ;;  %v13191_v33 = vld [vmem:[#allocation145_spill] sm:$0xff] }
 0x2b1   :  { %v6630_v59 = vmax.f32 %v6612_v56, 0.0  ;;  %v6596_v52 = vmax.f32 %v13176_v29, %v9087_v58  ;;  %v4986_v34 = vpop.f32.mrb[233].mxu1  ;;  %v6541_v35 = vmax.f32 %v13177_v55, %v3546_v53  ;;  %v13192_v29 = vld [vmem:[#allocation146_spill] sm:$0xff]  ;;  %v13193_v55 = vld [vmem:[#allocation147_spill] sm:$0xff] }
 0x2b2   :  { %v6629_v54 = vmax.f32 %v6611_v57, 0.0  ;;  %v6595_v17 = vmax.f32 %v13178_v16, %v4986_v34  ;;  %v13194_v16 = vld [vmem:[#allocation148_spill] sm:$0xff] }
 0x2b3   :  { %6648 = vst [vmem:[%s12810_s2 + $0x2b8] sm:$0xff] %v6630_v59  ;;  %v6614_v14 = vmax.f32 %v6542_v62, %v6596_v52  ;;  %v8658_v19 = vpop.f32.mrb[234].mxu0 }
 0x2b4   :  { %6647 = vst [vmem:[%s12810_s2 + $0x2b0] sm:$0xff] %v6629_v54  ;;  %v6613_v18 = vmax.f32 %v6541_v35, %v6595_v17  ;;  %v9090_v31 = vpop.f32.mrb[234].mxu1  ;;  %v6688_v48 = vmax.f32 %v13179_v63, %v8658_v19  ;;  %v3556_v5 = vpop.f32.mrb[235].mxu0  ;;  %v13195_v63 = vld [vmem:[#allocation149_spill] sm:$0xff] }
 0x2b5   :  { %v6632_v15 = vmax.f32 %v6614_v14, 0.0  ;;  %v6742_v4 = vmax.f32 %v13180_v49, %v9090_v31  ;;  %v4996_v0 = vpop.f32.mrb[235].mxu1  ;;  %v6687_v1 = vmax.f32 %v13181_v7, %v3556_v5  ;;  %v13196_v49 = vld [vmem:[#allocation150_spill] sm:$0xff]  ;;  %v13197_v7 = vld [vmem:[#allocation151_spill] sm:$0xff] }
 0x2b6   :  { %v6631_v6 = vmax.f32 %v6613_v18, 0.0  ;;  %v6741_v2 = vmax.f32 %v13182_v46, %v4996_v0  ;;  %v13198_v46 = vld [vmem:[#allocation152_spill] sm:$0xff] }
 0x2b7   :  { %6650 = vst [vmem:[%s12810_s2 + $0x2c8] sm:$0xff] %v6632_v15  ;;  %v6760_v3 = vmax.f32 %v6688_v48, %v6742_v4  ;;  %v8661_v24 = vpop.f32.mrb[236].mxu0 }
 0x2b8   :  { %6649 = vst [vmem:[%s12810_s2 + $0x2c0] sm:$0xff] %v6631_v6  ;;  %v6759_v50 = vmax.f32 %v6687_v1, %v6741_v2  ;;  %v9093_v25 = vpop.f32.mrb[236].mxu1  ;;  %v6690_v27 = vmax.f32 %v13183_v26, %v8661_v24  ;;  %v3566_v21 = vpop.f32.mrb[237].mxu0  ;;  %v13199_v26 = vld [vmem:[#allocation153_spill] sm:$0xff] }
 0x2b9   :  { %v6778_v51 = vmax.f32 %v6760_v3, 0.0  ;;  %v6744_v20 = vmax.f32 %v13184_v47, %v9093_v25  ;;  %v5006_v28 = vpop.f32.mrb[237].mxu1  ;;  %v6689_v60 = vmax.f32 %v13185_v23, %v3566_v21  ;;  %v13200_v47 = vld [vmem:[#allocation154_spill] sm:$0xff]  ;;  %v13201_v23 = vld [vmem:[#allocation155_spill] sm:$0xff] }
 0x2ba   :  { %v6777_v22 = vmax.f32 %v6759_v50, 0.0  ;;  %v6743_v30 = vmax.f32 %v13186_v61, %v5006_v28  ;;  %v13202_v61 = vld [vmem:[#allocation156_spill] sm:$0xff] }
 0x2bb   :  { %6796 = vst [vmem:[%s12810_s2 + $0x2d8] sm:$0xff] %v6778_v51  ;;  %v6762_v40 = vmax.f32 %v6690_v27, %v6744_v20  ;;  %v8664_v12 = vpop.f32.mrb[238].mxu0 }
 0x2bc   :  { %6795 = vst [vmem:[%s12810_s2 + $0x2d0] sm:$0xff] %v6777_v22  ;;  %v6761_v41 = vmax.f32 %v6689_v60, %v6743_v30  ;;  %v9096_v42 = vpop.f32.mrb[238].mxu1  ;;  %v6692_v36 = vmax.f32 %v13187_v9, %v8664_v12  ;;  %v3576_v38 = vpop.f32.mrb[239].mxu0  ;;  %v13203_v9 = vld [vmem:[#allocation157_spill] sm:$0xff] }
 0x2bd   :  { %v6780_v8 = vmax.f32 %v6762_v40, 0.0  ;;  %v6746_v43 = vmax.f32 %v13188_v37, %v9096_v42  ;;  %v5016_v44 = vpop.f32.mrb[239].mxu1  ;;  %v6691_v10 = vmax.f32 %v13189_v39, %v3576_v38  ;;  %v13204_v37 = vld [vmem:[#allocation158_spill] sm:$0xff]  ;;  %v13205_v39 = vld [vmem:[#allocation159_spill] sm:$0xff] }
 0x2be   :  { %v6779_v45 = vmax.f32 %v6761_v41, 0.0  ;;  %v6745_v13 = vmax.f32 %v13190_v11, %v5016_v44  ;;  %v13206_v11 = vld [vmem:[#allocation160_spill] sm:$0xff] }
 0x2bf   :  { %6798 = vst [vmem:[%s12810_s2 + $0x2e8] sm:$0xff] %v6780_v8  ;;  %v6764_v56 = vmax.f32 %v6692_v36, %v6746_v43  ;;  %v8667_v32 = vpop.f32.mrb[240].mxu0 }
 0x2c0   :  { %6797 = vst [vmem:[%s12810_s2 + $0x2e0] sm:$0xff] %v6779_v45  ;;  %v6763_v57 = vmax.f32 %v6691_v10, %v6745_v13  ;;  %v9099_v58 = vpop.f32.mrb[240].mxu1  ;;  %v6694_v62 = vmax.f32 %v13191_v33, %v8667_v32  ;;  %v3586_v53 = vpop.f32.mrb[241].mxu0  ;;  %v13207_v33 = vld [vmem:[#allocation161_spill] sm:$0xff] }
 0x2c1   :  { %v6782_v59 = vmax.f32 %v6764_v56, 0.0  ;;  %v6748_v52 = vmax.f32 %v13192_v29, %v9099_v58  ;;  %v5026_v34 = vpop.f32.mrb[241].mxu1  ;;  %v6693_v35 = vmax.f32 %v13193_v55, %v3586_v53  ;;  %v13208_v29 = vld [vmem:[#allocation162_spill] sm:$0xff]  ;;  %v13209_v55 = vld [vmem:[#allocation163_spill] sm:$0xff] }
 0x2c2   :  { %v6781_v54 = vmax.f32 %v6763_v57, 0.0  ;;  %v6747_v17 = vmax.f32 %v13194_v16, %v5026_v34  ;;  %v13210_v16 = vld [vmem:[#allocation164_spill] sm:$0xff] }
 0x2c3   :  { %6800 = vst [vmem:[%s12810_s2 + $0x2f8] sm:$0xff] %v6782_v59  ;;  %v6766_v14 = vmax.f32 %v6694_v62, %v6748_v52  ;;  %v8670_v19 = vpop.f32.mrb[242].mxu0 }
 0x2c4   :  { %6799 = vst [vmem:[%s12810_s2 + $0x2f0] sm:$0xff] %v6781_v54  ;;  %v6765_v18 = vmax.f32 %v6693_v35, %v6747_v17  ;;  %v9102_v31 = vpop.f32.mrb[242].mxu1  ;;  %v6696_v48 = vmax.f32 %v13195_v63, %v8670_v19  ;;  %v3596_v5 = vpop.f32.mrb[243].mxu0  ;;  %v13211_v63 = vld [vmem:[#allocation165_spill] sm:$0xff] }
 0x2c5   :  { %v6784_v15 = vmax.f32 %v6766_v14, 0.0  ;;  %v6750_v4 = vmax.f32 %v13196_v49, %v9102_v31  ;;  %v5036_v0 = vpop.f32.mrb[243].mxu1  ;;  %v6695_v1 = vmax.f32 %v13197_v7, %v3596_v5  ;;  %v13212_v49 = vld [vmem:[#allocation166_spill] sm:$0xff]  ;;  %v13213_v7 = vld [vmem:[#allocation167_spill] sm:$0xff] }
 0x2c6   :  { %v6783_v6 = vmax.f32 %v6765_v18, 0.0  ;;  %v6749_v2 = vmax.f32 %v13198_v46, %v5036_v0  ;;  %v13214_v46 = vld [vmem:[#allocation168_spill] sm:$0xff] }
 0x2c7   :  { %6802 = vst [vmem:[%s12810_s2 + $0x308] sm:$0xff] %v6784_v15  ;;  %v6768_v3 = vmax.f32 %v6696_v48, %v6750_v4  ;;  %v8673_v24 = vpop.f32.mrb[244].mxu0 }
 0x2c8   :  { %6801 = vst [vmem:[%s12810_s2 + $0x300] sm:$0xff] %v6783_v6  ;;  %v6767_v50 = vmax.f32 %v6695_v1, %v6749_v2  ;;  %v9105_v25 = vpop.f32.mrb[244].mxu1  ;;  %v6698_v27 = vmax.f32 %v13199_v26, %v8673_v24  ;;  %v3606_v21 = vpop.f32.mrb[245].mxu0  ;;  %v13215_v26 = vld [vmem:[#allocation169_spill] sm:$0xff] }
 0x2c9   :  { %v6786_v51 = vmax.f32 %v6768_v3, 0.0  ;;  %v6752_v20 = vmax.f32 %v13200_v47, %v9105_v25  ;;  %v5046_v28 = vpop.f32.mrb[245].mxu1  ;;  %v6697_v60 = vmax.f32 %v13201_v23, %v3606_v21  ;;  %v13216_v47 = vld [vmem:[#allocation170_spill] sm:$0xff]  ;;  %v13217_v23 = vld [vmem:[#allocation171_spill] sm:$0xff] }
 0x2ca   :  { %v6785_v22 = vmax.f32 %v6767_v50, 0.0  ;;  %v6751_v30 = vmax.f32 %v13202_v61, %v5046_v28  ;;  %v13218_v61 = vld [vmem:[#allocation172_spill] sm:$0xff] }
 0x2cb   :  { %6804 = vst [vmem:[%s12810_s2 + $0x318] sm:$0xff] %v6786_v51  ;;  %v6770_v40 = vmax.f32 %v6698_v27, %v6752_v20  ;;  %v8676_v12 = vpop.f32.mrb[246].mxu0 }
 0x2cc   :  { %6803 = vst [vmem:[%s12810_s2 + $0x310] sm:$0xff] %v6785_v22  ;;  %v6769_v41 = vmax.f32 %v6697_v60, %v6751_v30  ;;  %v9108_v42 = vpop.f32.mrb[246].mxu1  ;;  %v6700_v36 = vmax.f32 %v13203_v9, %v8676_v12  ;;  %v3616_v38 = vpop.f32.mrb[247].mxu0  ;;  %v13219_v9 = vld [vmem:[#allocation173_spill] sm:$0xff] }
 0x2cd   :  { %v6788_v8 = vmax.f32 %v6770_v40, 0.0  ;;  %v6754_v43 = vmax.f32 %v13204_v37, %v9108_v42  ;;  %v5056_v44 = vpop.f32.mrb[247].mxu1  ;;  %v6699_v10 = vmax.f32 %v13205_v39, %v3616_v38  ;;  %v13220_v37 = vld [vmem:[#allocation174_spill] sm:$0xff]  ;;  %v13221_v39 = vld [vmem:[#allocation175_spill] sm:$0xff] }
 0x2ce   :  { %v6787_v45 = vmax.f32 %v6769_v41, 0.0  ;;  %v6753_v13 = vmax.f32 %v13206_v11, %v5056_v44  ;;  %v13222_v11 = vld [vmem:[#allocation176_spill] sm:$0xff] }
 0x2cf   :  { %6806 = vst [vmem:[%s12810_s2 + $0x328] sm:$0xff] %v6788_v8  ;;  %v6772_v56 = vmax.f32 %v6700_v36, %v6754_v43  ;;  %v8679_v32 = vpop.f32.mrb[248].mxu0 }
 0x2d0   :  { %6805 = vst [vmem:[%s12810_s2 + $0x320] sm:$0xff] %v6787_v45  ;;  %v6771_v57 = vmax.f32 %v6699_v10, %v6753_v13  ;;  %v9111_v58 = vpop.f32.mrb[248].mxu1  ;;  %v6702_v62 = vmax.f32 %v13207_v33, %v8679_v32  ;;  %v3626_v53 = vpop.f32.mrb[249].mxu0  ;;  %v13223_v33 = vld [vmem:[#allocation177_spill] sm:$0xff] }
 0x2d1   :  { %v6790_v59 = vmax.f32 %v6772_v56, 0.0  ;;  %v6756_v52 = vmax.f32 %v13208_v29, %v9111_v58  ;;  %v5066_v34 = vpop.f32.mrb[249].mxu1  ;;  %v6701_v35 = vmax.f32 %v13209_v55, %v3626_v53  ;;  %v13224_v29 = vld [vmem:[#allocation178_spill] sm:$0xff]  ;;  %v13225_v55 = vld [vmem:[#allocation179_spill] sm:$0xff] }
 0x2d2   :  { %v6789_v54 = vmax.f32 %v6771_v57, 0.0  ;;  %v6755_v17 = vmax.f32 %v13210_v16, %v5066_v34  ;;  %v13226_v16 = vld [vmem:[#allocation180_spill] sm:$0xff] }
 0x2d3   :  { %6808 = vst [vmem:[%s12810_s2 + $0x338] sm:$0xff] %v6790_v59  ;;  %v6774_v14 = vmax.f32 %v6702_v62, %v6756_v52  ;;  %v8682_v19 = vpop.f32.mrb[250].mxu0 }
 0x2d4   :  { %6807 = vst [vmem:[%s12810_s2 + $0x330] sm:$0xff] %v6789_v54  ;;  %v6773_v18 = vmax.f32 %v6701_v35, %v6755_v17  ;;  %v9114_v31 = vpop.f32.mrb[250].mxu1  ;;  %v6704_v48 = vmax.f32 %v13211_v63, %v8682_v19  ;;  %v3636_v5 = vpop.f32.mrb[251].mxu0  ;;  %v13227_v63 = vld [vmem:[#allocation181_spill] sm:$0xff] }
 0x2d5   :  { %v6792_v15 = vmax.f32 %v6774_v14, 0.0  ;;  %v6758_v4 = vmax.f32 %v13212_v49, %v9114_v31  ;;  %v5076_v0 = vpop.f32.mrb[251].mxu1  ;;  %v6703_v1 = vmax.f32 %v13213_v7, %v3636_v5  ;;  %v13228_v49 = vld [vmem:[#allocation182_spill] sm:$0xff]  ;;  %v13229_v7 = vld [vmem:[#allocation183_spill] sm:$0xff] }
 0x2d6   :  { %v6791_v6 = vmax.f32 %v6773_v18, 0.0  ;;  %v6757_v2 = vmax.f32 %v13214_v46, %v5076_v0  ;;  %v13230_v46 = vld [vmem:[#allocation184_spill] sm:$0xff] }
 0x2d7   :  { %6810 = vst [vmem:[%s12810_s2 + $0x348] sm:$0xff] %v6792_v15  ;;  %v6776_v3 = vmax.f32 %v6704_v48, %v6758_v4  ;;  %v8685_v24 = vpop.f32.mrb[252].mxu0 }
 0x2d8   :  { %6809 = vst [vmem:[%s12810_s2 + $0x340] sm:$0xff] %v6791_v6  ;;  %v6775_v50 = vmax.f32 %v6703_v1, %v6757_v2  ;;  %v9117_v25 = vpop.f32.mrb[252].mxu1  ;;  %v6850_v27 = vmax.f32 %v13215_v26, %v8685_v24  ;;  %v3646_v21 = vpop.f32.mrb[253].mxu0  ;;  %v13231_v26 = vld [vmem:[#allocation185_spill] sm:$0xff] }
 0x2d9   :  { %v6794_v51 = vmax.f32 %v6776_v3, 0.0  ;;  %v6904_v20 = vmax.f32 %v13216_v47, %v9117_v25  ;;  %v5086_v28 = vpop.f32.mrb[253].mxu1  ;;  %v6849_v60 = vmax.f32 %v13217_v23, %v3646_v21  ;;  %v13232_v47 = vld [vmem:[#allocation186_spill] sm:$0xff]  ;;  %v13233_v23 = vld [vmem:[#allocation187_spill] sm:$0xff] }
 0x2da   :  { %v6793_v22 = vmax.f32 %v6775_v50, 0.0  ;;  %v6903_v30 = vmax.f32 %v13218_v61, %v5086_v28  ;;  %v13234_v61 = vld [vmem:[#allocation188_spill] sm:$0xff] }
 0x2db   :  { %6812 = vst [vmem:[%s12810_s2 + $0x358] sm:$0xff] %v6794_v51  ;;  %v6922_v40 = vmax.f32 %v6850_v27, %v6904_v20  ;;  %v8688_v12 = vpop.f32.mrb[254].mxu0 }
 0x2dc   :  { %6811 = vst [vmem:[%s12810_s2 + $0x350] sm:$0xff] %v6793_v22  ;;  %v6921_v41 = vmax.f32 %v6849_v60, %v6903_v30  ;;  %v9120_v42 = vpop.f32.mrb[254].mxu1  ;;  %v6852_v36 = vmax.f32 %v13219_v9, %v8688_v12  ;;  %v3656_v38 = vpop.f32.mrb[255].mxu0  ;;  %v13235_v9 = vld [vmem:[#allocation189_spill] sm:$0xff] }
 0x2dd   :  { %v6940_v8 = vmax.f32 %v6922_v40, 0.0  ;;  %v6906_v43 = vmax.f32 %v13220_v37, %v9120_v42  ;;  %v5096_v44 = vpop.f32.mrb[255].mxu1  ;;  %v6851_v10 = vmax.f32 %v13221_v39, %v3656_v38  ;;  %v13236_v37 = vld [vmem:[#allocation190_spill] sm:$0xff]  ;;  %v13237_v39 = vld [vmem:[#allocation191_spill] sm:$0xff] }
 0x2de   :  { %v6939_v45 = vmax.f32 %v6921_v41, 0.0  ;;  %v6905_v13 = vmax.f32 %v13222_v11, %v5096_v44  ;;  %v13238_v11 = vld [vmem:[#allocation192_spill] sm:$0xff] }
 0x2df   :  { %6958 = vst [vmem:[%s12810_s2 + $0x368] sm:$0xff] %v6940_v8  ;;  %v6924_v56 = vmax.f32 %v6852_v36, %v6906_v43  ;;  %v8691_v32 = vpop.f32.mrb[0].mxu0 }
 0x2e0   :  { %6957 = vst [vmem:[%s12810_s2 + $0x360] sm:$0xff] %v6939_v45  ;;  %v6923_v57 = vmax.f32 %v6851_v10, %v6905_v13  ;;  %v9123_v58 = vpop.f32.mrb[0].mxu1  ;;  %v6854_v62 = vmax.f32 %v13223_v33, %v8691_v32  ;;  %v3666_v53 = vpop.f32.mrb[1].mxu0  ;;  %v13239_v33 = vld [vmem:[#allocation193_spill] sm:$0xff] }
 0x2e1   :  { %v6942_v59 = vmax.f32 %v6924_v56, 0.0  ;;  %v6908_v52 = vmax.f32 %v13224_v29, %v9123_v58  ;;  %v5106_v34 = vpop.f32.mrb[1].mxu1  ;;  %v6853_v35 = vmax.f32 %v13225_v55, %v3666_v53  ;;  %v13240_v29 = vld [vmem:[#allocation194_spill] sm:$0xff]  ;;  %v13241_v55 = vld [vmem:[#allocation195_spill] sm:$0xff] }
 0x2e2   :  { %v6941_v54 = vmax.f32 %v6923_v57, 0.0  ;;  %v6907_v17 = vmax.f32 %v13226_v16, %v5106_v34  ;;  %v13242_v16 = vld [vmem:[#allocation196_spill] sm:$0xff] }
 0x2e3   :  { %6960 = vst [vmem:[%s12810_s2 + $0x378] sm:$0xff] %v6942_v59  ;;  %v6926_v14 = vmax.f32 %v6854_v62, %v6908_v52  ;;  %v8694_v19 = vpop.f32.mrb[2].mxu0 }
 0x2e4   :  { %6959 = vst [vmem:[%s12810_s2 + $0x370] sm:$0xff] %v6941_v54  ;;  %v6925_v18 = vmax.f32 %v6853_v35, %v6907_v17  ;;  %v9126_v31 = vpop.f32.mrb[2].mxu1  ;;  %v6856_v48 = vmax.f32 %v13227_v63, %v8694_v19  ;;  %v3676_v5 = vpop.f32.mrb[3].mxu0  ;;  %v13243_v63 = vld [vmem:[#allocation197_spill] sm:$0xff] }
 0x2e5   :  { %v6944_v15 = vmax.f32 %v6926_v14, 0.0  ;;  %v6910_v4 = vmax.f32 %v13228_v49, %v9126_v31  ;;  %v5116_v0 = vpop.f32.mrb[3].mxu1  ;;  %v6855_v1 = vmax.f32 %v13229_v7, %v3676_v5  ;;  %v13244_v49 = vld [vmem:[#allocation198_spill] sm:$0xff]  ;;  %v13245_v7 = vld [vmem:[#allocation199_spill] sm:$0xff] }
 0x2e6   :  { %v6943_v6 = vmax.f32 %v6925_v18, 0.0  ;;  %v6909_v2 = vmax.f32 %v13230_v46, %v5116_v0  ;;  %v13246_v46 = vld [vmem:[#allocation200_spill] sm:$0xff] }
 0x2e7   :  { %6962 = vst [vmem:[%s12810_s2 + $0x388] sm:$0xff] %v6944_v15  ;;  %v6928_v3 = vmax.f32 %v6856_v48, %v6910_v4  ;;  %v8697_v24 = vpop.f32.mrb[4].mxu0 }
 0x2e8   :  { %6961 = vst [vmem:[%s12810_s2 + $0x380] sm:$0xff] %v6943_v6  ;;  %v6927_v50 = vmax.f32 %v6855_v1, %v6909_v2  ;;  %v9129_v25 = vpop.f32.mrb[4].mxu1  ;;  %v6858_v27 = vmax.f32 %v13231_v26, %v8697_v24  ;;  %v3686_v21 = vpop.f32.mrb[5].mxu0  ;;  %v13247_v26 = vld [vmem:[#allocation201_spill] sm:$0xff] }
 0x2e9   :  { %v6946_v51 = vmax.f32 %v6928_v3, 0.0  ;;  %v6912_v20 = vmax.f32 %v13232_v47, %v9129_v25  ;;  %v5126_v28 = vpop.f32.mrb[5].mxu1  ;;  %v6857_v60 = vmax.f32 %v13233_v23, %v3686_v21  ;;  %v13248_v47 = vld [vmem:[#allocation202_spill] sm:$0xff]  ;;  %v13249_v23 = vld [vmem:[#allocation203_spill] sm:$0xff] }
 0x2ea   :  { %v6945_v22 = vmax.f32 %v6927_v50, 0.0  ;;  %v6911_v30 = vmax.f32 %v13234_v61, %v5126_v28  ;;  %v13250_v61 = vld [vmem:[#allocation204_spill] sm:$0xff] }
 0x2eb   :  { %6964 = vst [vmem:[%s12810_s2 + $0x398] sm:$0xff] %v6946_v51  ;;  %v6930_v40 = vmax.f32 %v6858_v27, %v6912_v20  ;;  %v8700_v12 = vpop.f32.mrb[6].mxu0 }
 0x2ec   :  { %6963 = vst [vmem:[%s12810_s2 + $0x390] sm:$0xff] %v6945_v22  ;;  %v6929_v41 = vmax.f32 %v6857_v60, %v6911_v30  ;;  %v9132_v42 = vpop.f32.mrb[6].mxu1  ;;  %v6860_v36 = vmax.f32 %v13235_v9, %v8700_v12  ;;  %v3696_v38 = vpop.f32.mrb[7].mxu0  ;;  %v13251_v9 = vld [vmem:[#allocation205_spill] sm:$0xff] }
 0x2ed   :  { %v6948_v8 = vmax.f32 %v6930_v40, 0.0  ;;  %v6914_v43 = vmax.f32 %v13236_v37, %v9132_v42  ;;  %v5136_v44 = vpop.f32.mrb[7].mxu1  ;;  %v6859_v10 = vmax.f32 %v13237_v39, %v3696_v38  ;;  %v13252_v37 = vld [vmem:[#allocation206_spill] sm:$0xff]  ;;  %v13253_v39 = vld [vmem:[#allocation207_spill] sm:$0xff] }
 0x2ee   :  { %v6947_v45 = vmax.f32 %v6929_v41, 0.0  ;;  %v6913_v13 = vmax.f32 %v13238_v11, %v5136_v44  ;;  %v13254_v11 = vld [vmem:[#allocation208_spill] sm:$0xff] }
 0x2ef   :  { %6966 = vst [vmem:[%s12810_s2 + $0x3a8] sm:$0xff] %v6948_v8  ;;  %v6932_v56 = vmax.f32 %v6860_v36, %v6914_v43  ;;  %v8703_v32 = vpop.f32.mrb[8].mxu0 }
 0x2f0   :  { %6965 = vst [vmem:[%s12810_s2 + $0x3a0] sm:$0xff] %v6947_v45  ;;  %v6931_v57 = vmax.f32 %v6859_v10, %v6913_v13  ;;  %v9135_v58 = vpop.f32.mrb[8].mxu1  ;;  %v6862_v62 = vmax.f32 %v13239_v33, %v8703_v32  ;;  %v3706_v53 = vpop.f32.mrb[9].mxu0  ;;  %v13255_v33 = vld [vmem:[#allocation209_spill] sm:$0xff] }
 0x2f1   :  { %v6950_v59 = vmax.f32 %v6932_v56, 0.0  ;;  %v6916_v52 = vmax.f32 %v13240_v29, %v9135_v58  ;;  %v5146_v34 = vpop.f32.mrb[9].mxu1  ;;  %v6861_v35 = vmax.f32 %v13241_v55, %v3706_v53  ;;  %v13256_v29 = vld [vmem:[#allocation210_spill] sm:$0xff]  ;;  %v13257_v55 = vld [vmem:[#allocation211_spill] sm:$0xff] }
 0x2f2   :  { %v6949_v54 = vmax.f32 %v6931_v57, 0.0  ;;  %v6915_v17 = vmax.f32 %v13242_v16, %v5146_v34  ;;  %v13258_v16 = vld [vmem:[#allocation212_spill] sm:$0xff] }
 0x2f3   :  { %6968 = vst [vmem:[%s12810_s2 + $0x3b8] sm:$0xff] %v6950_v59  ;;  %v6934_v14 = vmax.f32 %v6862_v62, %v6916_v52  ;;  %v8706_v19 = vpop.f32.mrb[10].mxu0 }
 0x2f4   :  { %6967 = vst [vmem:[%s12810_s2 + $0x3b0] sm:$0xff] %v6949_v54  ;;  %v6933_v18 = vmax.f32 %v6861_v35, %v6915_v17  ;;  %v9138_v31 = vpop.f32.mrb[10].mxu1  ;;  %v6864_v48 = vmax.f32 %v13243_v63, %v8706_v19  ;;  %v3716_v5 = vpop.f32.mrb[11].mxu0  ;;  %v13259_v63 = vld [vmem:[#allocation213_spill] sm:$0xff] }
 0x2f5   :  { %v6952_v15 = vmax.f32 %v6934_v14, 0.0  ;;  %v6918_v4 = vmax.f32 %v13244_v49, %v9138_v31  ;;  %v5156_v0 = vpop.f32.mrb[11].mxu1  ;;  %v6863_v1 = vmax.f32 %v13245_v7, %v3716_v5  ;;  %v13260_v49 = vld [vmem:[#allocation214_spill] sm:$0xff]  ;;  %v13261_v7 = vld [vmem:[#allocation215_spill] sm:$0xff] }
 0x2f6   :  { %v6951_v6 = vmax.f32 %v6933_v18, 0.0  ;;  %v6917_v2 = vmax.f32 %v13246_v46, %v5156_v0  ;;  %v13262_v46 = vld [vmem:[#allocation216_spill] sm:$0xff] }
 0x2f7   :  { %6970 = vst [vmem:[%s12810_s2 + $0x3c8] sm:$0xff] %v6952_v15  ;;  %v6936_v3 = vmax.f32 %v6864_v48, %v6918_v4  ;;  %v8709_v24 = vpop.f32.mrb[12].mxu0 }
 0x2f8   :  { %6969 = vst [vmem:[%s12810_s2 + $0x3c0] sm:$0xff] %v6951_v6  ;;  %v6935_v50 = vmax.f32 %v6863_v1, %v6917_v2  ;;  %v9141_v25 = vpop.f32.mrb[12].mxu1  ;;  %v6866_v27 = vmax.f32 %v13247_v26, %v8709_v24  ;;  %v3726_v21 = vpop.f32.mrb[13].mxu0  ;;  %v13263_v26 = vld [vmem:[#allocation217_spill] sm:$0xff] }
 0x2f9   :  { %v6954_v51 = vmax.f32 %v6936_v3, 0.0  ;;  %v6920_v20 = vmax.f32 %v13248_v47, %v9141_v25  ;;  %v5166_v28 = vpop.f32.mrb[13].mxu1  ;;  %v6865_v60 = vmax.f32 %v13249_v23, %v3726_v21  ;;  %v13264_v47 = vld [vmem:[#allocation218_spill] sm:$0xff]  ;;  %v13265_v23 = vld [vmem:[#allocation219_spill] sm:$0xff] }
 0x2fa   :  { %v6953_v22 = vmax.f32 %v6935_v50, 0.0  ;;  %v6919_v30 = vmax.f32 %v13250_v61, %v5166_v28  ;;  %v13266_v61 = vld [vmem:[#allocation220_spill] sm:$0xff] }
 0x2fb   :  { %6972 = vst [vmem:[%s12810_s2 + $0x3d8] sm:$0xff] %v6954_v51  ;;  %v6938_v40 = vmax.f32 %v6866_v27, %v6920_v20  ;;  %v8712_v12 = vpop.f32.mrb[14].mxu0 }
 0x2fc   :  { %6971 = vst [vmem:[%s12810_s2 + $0x3d0] sm:$0xff] %v6953_v22  ;;  %v6937_v41 = vmax.f32 %v6865_v60, %v6919_v30  ;;  %v9144_v42 = vpop.f32.mrb[14].mxu1  ;;  %v7012_v36 = vmax.f32 %v13251_v9, %v8712_v12  ;;  %v3736_v38 = vpop.f32.mrb[15].mxu0  ;;  %v13267_v9 = vld [vmem:[#allocation221_spill] sm:$0xff] }
 0x2fd   :  { %v6956_v8 = vmax.f32 %v6938_v40, 0.0  ;;  %v7066_v43 = vmax.f32 %v13252_v37, %v9144_v42  ;;  %v5176_v44 = vpop.f32.mrb[15].mxu1  ;;  %v7011_v10 = vmax.f32 %v13253_v39, %v3736_v38  ;;  %v13268_v37 = vld [vmem:[#allocation222_spill] sm:$0xff]  ;;  %v13269_v39 = vld [vmem:[#allocation223_spill] sm:$0xff] }
 0x2fe   :  { %v6955_v45 = vmax.f32 %v6937_v41, 0.0  ;;  %v7065_v13 = vmax.f32 %v13254_v11, %v5176_v44  ;;  %v13270_v11 = vld [vmem:[#allocation224_spill] sm:$0xff] }
 0x2ff   :  { %6974 = vst [vmem:[%s12810_s2 + $0x3e8] sm:$0xff] %v6956_v8  ;;  %v7084_v56 = vmax.f32 %v7012_v36, %v7066_v43  ;;  %v8715_v32 = vpop.f32.mrb[16].mxu0 }
 0x300   :  { %6973 = vst [vmem:[%s12810_s2 + $0x3e0] sm:$0xff] %v6955_v45  ;;  %v7083_v57 = vmax.f32 %v7011_v10, %v7065_v13  ;;  %v9147_v58 = vpop.f32.mrb[16].mxu1  ;;  %v7014_v62 = vmax.f32 %v13255_v33, %v8715_v32  ;;  %v3746_v53 = vpop.f32.mrb[17].mxu0  ;;  %v13271_v33 = vld [vmem:[#allocation225_spill] sm:$0xff] }
 0x301   :  { %v7102_v59 = vmax.f32 %v7084_v56, 0.0  ;;  %v7068_v52 = vmax.f32 %v13256_v29, %v9147_v58  ;;  %v5186_v34 = vpop.f32.mrb[17].mxu1  ;;  %v7013_v35 = vmax.f32 %v13257_v55, %v3746_v53  ;;  %v13272_v29 = vld [vmem:[#allocation226_spill] sm:$0xff]  ;;  %v13273_v55 = vld [vmem:[#allocation227_spill] sm:$0xff] }
 0x302   :  { %v7101_v54 = vmax.f32 %v7083_v57, 0.0  ;;  %v7067_v17 = vmax.f32 %v13258_v16, %v5186_v34  ;;  %v13274_v16 = vld [vmem:[#allocation228_spill] sm:$0xff] }
 0x303   :  { %7120 = vst [vmem:[%s12810_s2 + $0x3f8] sm:$0xff] %v7102_v59  ;;  %v7086_v14 = vmax.f32 %v7014_v62, %v7068_v52  ;;  %v8718_v19 = vpop.f32.mrb[18].mxu0 }
 0x304   :  { %7119 = vst [vmem:[%s12810_s2 + $0x3f0] sm:$0xff] %v7101_v54  ;;  %v7085_v18 = vmax.f32 %v7013_v35, %v7067_v17  ;;  %v9150_v31 = vpop.f32.mrb[18].mxu1  ;;  %v7016_v48 = vmax.f32 %v13259_v63, %v8718_v19  ;;  %v3756_v5 = vpop.f32.mrb[19].mxu0  ;;  %v13275_v63 = vld [vmem:[#allocation229_spill] sm:$0xff] }
 0x305   :  { %v7104_v15 = vmax.f32 %v7086_v14, 0.0  ;;  %v7070_v4 = vmax.f32 %v13260_v49, %v9150_v31  ;;  %v5196_v0 = vpop.f32.mrb[19].mxu1  ;;  %v7015_v1 = vmax.f32 %v13261_v7, %v3756_v5  ;;  %v13276_v49 = vld [vmem:[#allocation230_spill] sm:$0xff]  ;;  %v13277_v7 = vld [vmem:[#allocation231_spill] sm:$0xff] }
 0x306   :  { %v7103_v6 = vmax.f32 %v7085_v18, 0.0  ;;  %v7069_v2 = vmax.f32 %v13262_v46, %v5196_v0  ;;  %v13278_v46 = vld [vmem:[#allocation232_spill] sm:$0xff] }
 0x307   :  { %7122 = vst [vmem:[%s12810_s2 + $0x408] sm:$0xff] %v7104_v15  ;;  %v7088_v3 = vmax.f32 %v7016_v48, %v7070_v4  ;;  %v8721_v24 = vpop.f32.mrb[20].mxu0 }
 0x308   :  { %7121 = vst [vmem:[%s12810_s2 + $0x400] sm:$0xff] %v7103_v6  ;;  %v7087_v50 = vmax.f32 %v7015_v1, %v7069_v2  ;;  %v9153_v25 = vpop.f32.mrb[20].mxu1  ;;  %v7018_v27 = vmax.f32 %v13263_v26, %v8721_v24  ;;  %v3766_v21 = vpop.f32.mrb[21].mxu0  ;;  %v13279_v26 = vld [vmem:[#allocation233_spill] sm:$0xff] }
 0x309   :  { %v7106_v51 = vmax.f32 %v7088_v3, 0.0  ;;  %v7072_v20 = vmax.f32 %v13264_v47, %v9153_v25  ;;  %v5206_v28 = vpop.f32.mrb[21].mxu1  ;;  %v7017_v60 = vmax.f32 %v13265_v23, %v3766_v21  ;;  %v13280_v47 = vld [vmem:[#allocation234_spill] sm:$0xff]  ;;  %v13281_v23 = vld [vmem:[#allocation235_spill] sm:$0xff] }
 0x30a   :  { %v7105_v22 = vmax.f32 %v7087_v50, 0.0  ;;  %v7071_v30 = vmax.f32 %v13266_v61, %v5206_v28  ;;  %v13282_v61 = vld [vmem:[#allocation236_spill] sm:$0xff] }
 0x30b   :  { %7124 = vst [vmem:[%s12810_s2 + $0x418] sm:$0xff] %v7106_v51  ;;  %v7090_v40 = vmax.f32 %v7018_v27, %v7072_v20  ;;  %v8724_v12 = vpop.f32.mrb[22].mxu0 }
 0x30c   :  { %7123 = vst [vmem:[%s12810_s2 + $0x410] sm:$0xff] %v7105_v22  ;;  %v7089_v41 = vmax.f32 %v7017_v60, %v7071_v30  ;;  %v9156_v42 = vpop.f32.mrb[22].mxu1  ;;  %v7020_v36 = vmax.f32 %v13267_v9, %v8724_v12  ;;  %v3776_v38 = vpop.f32.mrb[23].mxu0  ;;  %v13283_v9 = vld [vmem:[#allocation237_spill] sm:$0xff] }
 0x30d   :  { %v7108_v8 = vmax.f32 %v7090_v40, 0.0  ;;  %v7074_v43 = vmax.f32 %v13268_v37, %v9156_v42  ;;  %v5216_v44 = vpop.f32.mrb[23].mxu1  ;;  %v7019_v10 = vmax.f32 %v13269_v39, %v3776_v38  ;;  %v13284_v37 = vld [vmem:[#allocation238_spill] sm:$0xff]  ;;  %v13285_v39 = vld [vmem:[#allocation239_spill] sm:$0xff] }
 0x30e   :  { %v7107_v45 = vmax.f32 %v7089_v41, 0.0  ;;  %v7073_v13 = vmax.f32 %v13270_v11, %v5216_v44  ;;  %v13286_v11 = vld [vmem:[#allocation240_spill] sm:$0xff] }
 0x30f   :  { %7126 = vst [vmem:[%s12810_s2 + $0x428] sm:$0xff] %v7108_v8  ;;  %v7092_v56 = vmax.f32 %v7020_v36, %v7074_v43  ;;  %v8727_v32 = vpop.f32.mrb[24].mxu0 }
 0x310   :  { %7125 = vst [vmem:[%s12810_s2 + $0x420] sm:$0xff] %v7107_v45  ;;  %v7091_v57 = vmax.f32 %v7019_v10, %v7073_v13  ;;  %v9159_v58 = vpop.f32.mrb[24].mxu1  ;;  %v7022_v62 = vmax.f32 %v13271_v33, %v8727_v32  ;;  %v3786_v53 = vpop.f32.mrb[25].mxu0 }
 0x311   :  { %v7110_v59 = vmax.f32 %v7092_v56, 0.0  ;;  %v7076_v52 = vmax.f32 %v13272_v29, %v9159_v58  ;;  %v5226_v34 = vpop.f32.mrb[25].mxu1  ;;  %v7021_v35 = vmax.f32 %v13273_v55, %v3786_v53 }
 0x312   :  { %v7109_v54 = vmax.f32 %v7091_v57, 0.0  ;;  %v7075_v17 = vmax.f32 %v13274_v16, %v5226_v34 }
 0x313   :  { %7128 = vst [vmem:[%s12810_s2 + $0x438] sm:$0xff] %v7110_v59  ;;  %v7094_v14 = vmax.f32 %v7022_v62, %v7076_v52  ;;  %v8730_v19 = vpop.f32.mrb[26].mxu0 }
 0x314   :  { %7127 = vst [vmem:[%s12810_s2 + $0x430] sm:$0xff] %v7109_v54  ;;  %v7093_v18 = vmax.f32 %v7021_v35, %v7075_v17  ;;  %v9162_v31 = vpop.f32.mrb[26].mxu1  ;;  %v7024_v48 = vmax.f32 %v13275_v63, %v8730_v19  ;;  %v3796_v5 = vpop.f32.mrb[27].mxu0 }
 0x315   :  { %v7112_v15 = vmax.f32 %v7094_v14, 0.0  ;;  %v7078_v4 = vmax.f32 %v13276_v49, %v9162_v31  ;;  %v5236_v0 = vpop.f32.mrb[27].mxu1  ;;  %v7023_v1 = vmax.f32 %v13277_v7, %v3796_v5 }
 0x316   :  { %v7111_v6 = vmax.f32 %v7093_v18, 0.0  ;;  %v7077_v2 = vmax.f32 %v13278_v46, %v5236_v0 }
 0x317   :  { %7130 = vst [vmem:[%s12810_s2 + $0x448] sm:$0xff] %v7112_v15  ;;  %v7096_v3 = vmax.f32 %v7024_v48, %v7078_v4  ;;  %v8733_v24 = vpop.f32.mrb[28].mxu0 }
 0x318   :  { %7129 = vst [vmem:[%s12810_s2 + $0x440] sm:$0xff] %v7111_v6  ;;  %v7095_v50 = vmax.f32 %v7023_v1, %v7077_v2  ;;  %v9165_v25 = vpop.f32.mrb[28].mxu1  ;;  %v7026_v27 = vmax.f32 %v13279_v26, %v8733_v24  ;;  %v3806_v21 = vpop.f32.mrb[29].mxu0 }
 0x319   :  { %v7114_v51 = vmax.f32 %v7096_v3, 0.0  ;;  %v7080_v20 = vmax.f32 %v13280_v47, %v9165_v25  ;;  %v5246_v28 = vpop.f32.mrb[29].mxu1  ;;  %v7025_v60 = vmax.f32 %v13281_v23, %v3806_v21 }
 0x31a   :  { %v7113_v22 = vmax.f32 %v7095_v50, 0.0  ;;  %v7079_v30 = vmax.f32 %v13282_v61, %v5246_v28 }
 0x31b   :  { %7132 = vst [vmem:[%s12810_s2 + $0x458] sm:$0xff] %v7114_v51  ;;  %v7098_v40 = vmax.f32 %v7026_v27, %v7080_v20  ;;  %v8736_v12 = vpop.f32.mrb[30].mxu0 }
 0x31c   :  { %7131 = vst [vmem:[%s12810_s2 + $0x450] sm:$0xff] %v7113_v22  ;;  %v7097_v41 = vmax.f32 %v7025_v60, %v7079_v30  ;;  %v9168_v42 = vpop.f32.mrb[30].mxu1  ;;  %v7028_v36 = vmax.f32 %v13283_v9, %v8736_v12  ;;  %v3816_v38 = vpop.f32.mrb[31].mxu0 }
 0x31d   :  { %v7116_v8 = vmax.f32 %v7098_v40, 0.0  ;;  %v7082_v43 = vmax.f32 %v13284_v37, %v9168_v42  ;;  %v5256_v44 = vpop.f32.mrb[31].mxu1  ;;  %v7027_v10 = vmax.f32 %v13285_v39, %v3816_v38 }
 0x31e   :  { %v7115_v45 = vmax.f32 %v7097_v41, 0.0  ;;  %v7081_v13 = vmax.f32 %v13286_v11, %v5256_v44 }
 0x31f   :  { %7134 = vst [vmem:[%s12810_s2 + $0x468] sm:$0xff] %v7116_v8  ;;  %v7100_v56 = vmax.f32 %v7028_v36, %v7082_v43 }
 0x320   :  { %7133 = vst [vmem:[%s12810_s2 + $0x460] sm:$0xff] %v7115_v45  ;;  %v7099_v57 = vmax.f32 %v7027_v10, %v7081_v13 }
 0x321   :  { %v7118_v32 = vmax.f32 %v7100_v56, 0.0 }
 0x322   :  { %v7117_v58 = vmax.f32 %v7099_v57, 0.0 }
 0x323   :  { %7136 = vst [vmem:[%s12810_s2 + $0x478] sm:$0xff] %v7118_v32 }
 0x324   :  { %7135 = vst [vmem:[%s12810_s2 + $0x470] sm:$0xff] %v7117_v58 }

// kernel: cnn_forward.3
= control target key start
LH: loop header
LB: loop body
LE: loop exit
PB: predicated region body
PF: predicated region fallthrough
CT: control target
= control target key end

     0   :  { %v3718_v0 = vmov 0.0|0.0   ;;  %vm3719_vm0 = vmmov 0   ;;  %s5500_s1 = inlined_call_operand.vmem [shape: f32[256,128], index: 1, kind: input, shape index: {}]   ;;  %s5501_s0 = inlined_call_operand.vmem [shape: f32[512,256], index: 0, kind: input, shape index: {}]   ;;  %s5502_s2 = inlined_call_operand.vmem [shape: f32[16,128,128], index: 2, kind: input, shape index: {}]   ;;  %s5503_s4 = inlined_call_operand.vmem [shape: f32[128,128], index: 4, kind: output, shape index: {0}]   ;;  %s5504_s3 = inlined_call_operand.vmem [shape: f32[1,128], index: 3, kind: input, shape index: {}]   ;;  %s5505_s5 = inlined_call_operand.vmem [shape: f32[8,128], index: 5, kind: output, shape index: {1}]  }
   0x1   :  { %3283 = vmatprep.subr.bf16.mxu0 %v3718_v0  ;;  %v147_v1 = vld [vmem:[%s5500_s1] sm:$0xff]  ;;  %v148_v2 = vld [vmem:[%s5500_s1 + $0x8] sm:$0xff]  ;;  %v149_v3 = vld [vmem:[%s5500_s1 + $0x10] sm:$0xff]  ;;  %3331 = vmatprep.subr.bf16.mxu1 %v3718_v0 }
   0x2   :  { %v3284_v4 = vpack.c.bf16 %v148_v2, %v147_v1  ;;  %v150_v5 = vld [vmem:[%s5500_s1 + $0x18] sm:$0xff]  ;;  %v151_v7 = vld [vmem:[%s5500_s1 + $0x20] sm:$0xff]  ;;  %v152_v8 = vld [vmem:[%s5500_s1 + $0x28] sm:$0xff] }
   0x3   :  { %v3287_v6 = vpack.c.bf16 %v150_v5, %v149_v3  ;;  %v3290_v9 = vpack.c.bf16 %v152_v8, %v151_v7  ;;  %v153_v10 = vld [vmem:[%s5500_s1 + $0x30] sm:$0xff]  ;;  %v154_v11 = vld [vmem:[%s5500_s1 + $0x38] sm:$0xff]  ;;  %v20_v12 = vld [vmem:[%s5501_s0 + $0x8] sm:$0xff] }
   0x4   :  { %3285 = vmatpush1.bf16.msra.mxu0 %v3284_v4  ;;  %v3293_v13 = vpack.c.bf16 %v154_v11, %v153_v10  ;;  %243 = vmatprep.mubr.f32.mxu0 %v20_v12  ;;  %v155_v14 = vld [vmem:[%s5500_s1 + $0x40] sm:$0xff]  ;;  %v156_v15 = vld [vmem:[%s5500_s1 + $0x48] sm:$0xff]  ;;  %v157_v17 = vld [vmem:[%s5500_s1 + $0x50] sm:$0xff] }
   0x5   :  { %3286 = vmatprep.subr.bf16.mxu0 %v3718_v0  ;;  %v3296_v16 = vpack.c.bf16 %v156_v15, %v155_v14  ;;  %v158_v18 = vld [vmem:[%s5500_s1 + $0x58] sm:$0xff]  ;;  %v159_v20 = vld [vmem:[%s5500_s1 + $0x60] sm:$0xff]  ;;  %v160_v21 = vld [vmem:[%s5500_s1 + $0x68] sm:$0xff] }
   0x6   :  { %v3299_v19 = vpack.c.bf16 %v158_v18, %v157_v17  ;;  %v3302_v22 = vpack.c.bf16 %v160_v21, %v159_v20  ;;  %v161_v23 = vld [vmem:[%s5500_s1 + $0x70] sm:$0xff]  ;;  %v162_v24 = vld [vmem:[%s5500_s1 + $0x78] sm:$0xff]  ;;  %v163_v26 = vld [vmem:[%s5500_s1 + $0x80] sm:$0xff] }
   0x7   :  { %v3305_v25 = vpack.c.bf16 %v162_v24, %v161_v23  ;;  %v164_v27 = vld [vmem:[%s5500_s1 + $0x88] sm:$0xff]  ;;  %v165_v29 = vld [vmem:[%s5500_s1 + $0x90] sm:$0xff]  ;;  %v166_v30 = vld [vmem:[%s5500_s1 + $0x98] sm:$0xff] }
   0x8   :  { %3288 = vmatpush1.bf16.msra.mxu0 %v3287_v6  ;;  %v3308_v28 = vpack.c.bf16 %v164_v27, %v163_v26  ;;  %v3311_v31 = vpack.c.bf16 %v166_v30, %v165_v29  ;;  %v167_v32 = vld [vmem:[%s5500_s1 + $0xa0] sm:$0xff]  ;;  %v168_v33 = vld [vmem:[%s5500_s1 + $0xa8] sm:$0xff]  ;;  %v169_v35 = vld [vmem:[%s5500_s1 + $0xb0] sm:$0xff] }
   0x9   :  { %3289 = vmatprep.subr.bf16.mxu0 %v3718_v0  ;;  %v3314_v34 = vpack.c.bf16 %v168_v33, %v167_v32  ;;  %v170_v36 = vld [vmem:[%s5500_s1 + $0xb8] sm:$0xff]  ;;  %v171_v38 = vld [vmem:[%s5500_s1 + $0xc0] sm:$0xff]  ;;  %v172_v39 = vld [vmem:[%s5500_s1 + $0xc8] sm:$0xff] }
   0xa   :  { %v3317_v37 = vpack.c.bf16 %v170_v36, %v169_v35  ;;  %v3320_v40 = vpack.c.bf16 %v172_v39, %v171_v38  ;;  %v173_v41 = vld [vmem:[%s5500_s1 + $0xd0] sm:$0xff]  ;;  %v174_v42 = vld [vmem:[%s5500_s1 + $0xd8] sm:$0xff]  ;;  %v175_v44 = vld [vmem:[%s5500_s1 + $0xe0] sm:$0xff] }
   0xb   :  { %v3323_v43 = vpack.c.bf16 %v174_v42, %v173_v41  ;;  %v176_v45 = vld [vmem:[%s5500_s1 + $0xe8] sm:$0xff]  ;;  %v177_v47 = vld [vmem:[%s5500_s1 + $0xf0] sm:$0xff]  ;;  %v178_v48 = vld [vmem:[%s5500_s1 + $0xf8] sm:$0xff] }
   0xc   :  { %3291 = vmatpush1.bf16.msra.mxu0 %v3290_v9  ;;  %v3326_v46 = vpack.c.bf16 %v176_v45, %v175_v44  ;;  %v3329_v49 = vpack.c.bf16 %v178_v48, %v177_v47  ;;  %v19_v50 = vld [vmem:[%s5501_s0] sm:$0xff]  ;;  %v22_v51 = vld [vmem:[%s5501_s0 + $0x18] sm:$0xff]  ;;  %v21_v52 = vld [vmem:[%s5501_s0 + $0x10] sm:$0xff] }
   0xd   :  { %3292 = vmatprep.subr.bf16.mxu0 %v3718_v0  ;;  %v24_v53 = vld [vmem:[%s5501_s0 + $0x28] sm:$0xff]  ;;  %v23_v54 = vld [vmem:[%s5501_s0 + $0x20] sm:$0xff]  ;;  %v26_v55 = vld [vmem:[%s5501_s0 + $0x38] sm:$0xff] }
   0xe   :  { %v25_v56 = vld [vmem:[%s5501_s0 + $0x30] sm:$0xff]  ;;  %v28_v57 = vld [vmem:[%s5501_s0 + $0x48] sm:$0xff]  ;;  %v27_v58 = vld [vmem:[%s5501_s0 + $0x40] sm:$0xff] }
   0xf   :  { %v30_v59 = vld [vmem:[%s5501_s0 + $0x58] sm:$0xff]  ;;  %v29_v60 = vld [vmem:[%s5501_s0 + $0x50] sm:$0xff]  ;;  %v32_v61 = vld [vmem:[%s5501_s0 + $0x68] sm:$0xff] }
  0x10   :  { %3294 = vmatpush1.bf16.msra.mxu0 %v3293_v13  ;;  %v31_v62 = vld [vmem:[%s5501_s0 + $0x60] sm:$0xff]  ;;  %v34_v63 = vld [vmem:[%s5501_s0 + $0x78] sm:$0xff]  ;;  %v33_v1 = vld [vmem:[%s5501_s0 + $0x70] sm:$0xff] }
  0x11   :  { %3295 = vmatprep.subr.bf16.mxu0 %v3718_v0  ;;  %v36_v2 = vld [vmem:[%s5501_s0 + $0x88] sm:$0xff]  ;;  %v35_v3 = vld [vmem:[%s5501_s0 + $0x80] sm:$0xff]  ;;  %v38_v4 = vld [vmem:[%s5501_s0 + $0x98] sm:$0xff] }
  0x12   :  { %v37_v5 = vld [vmem:[%s5501_s0 + $0x90] sm:$0xff]  ;;  %v40_v6 = vld [vmem:[%s5501_s0 + $0xa8] sm:$0xff]  ;;  %v39_v7 = vld [vmem:[%s5501_s0 + $0xa0] sm:$0xff] }
  0x13   :  { %v42_v8 = vld [vmem:[%s5501_s0 + $0xb8] sm:$0xff]  ;;  %v41_v9 = vld [vmem:[%s5501_s0 + $0xb0] sm:$0xff]  ;;  %v44_v10 = vld [vmem:[%s5501_s0 + $0xc8] sm:$0xff] }
  0x14   :  { %3297 = vmatpush1.bf16.msra.mxu0 %v3296_v16  ;;  %v43_v11 = vld [vmem:[%s5501_s0 + $0xc0] sm:$0xff]  ;;  %v46_v12 = vld [vmem:[%s5501_s0 + $0xd8] sm:$0xff]  ;;  %v45_v13 = vld [vmem:[%s5501_s0 + $0xd0] sm:$0xff] }
  0x15   :  { %3298 = vmatprep.subr.bf16.mxu0 %v3718_v0  ;;  %v48_v14 = vld [vmem:[%s5501_s0 + $0xe8] sm:$0xff]  ;;  %v47_v15 = vld [vmem:[%s5501_s0 + $0xe0] sm:$0xff]  ;;  %v50_v16 = vld [vmem:[%s5501_s0 + $0xf8] sm:$0xff] }
  0x16   :  { %v49_v17 = vld [vmem:[%s5501_s0 + $0xf0] sm:$0xff]  ;;  %v52_v18 = vld [vmem:[%s5501_s0 + $0x108] sm:$0xff]  ;;  %v54_v20 = vld [vmem:[%s5501_s0 + $0x118] sm:$0xff] }
  0x17   :  { %v53_v21 = vld [vmem:[%s5501_s0 + $0x110] sm:$0xff]  ;;  %v55_v23 = vld [vmem:[%s5501_s0 + $0x120] sm:$0xff]  ;;  %v58_v24 = vld [vmem:[%s5501_s0 + $0x138] sm:$0xff] }
  0x18   :  { %3300 = vmatpush1.bf16.msra.mxu0 %v3299_v19  ;;  %v51_v19 = vld [vmem:[%s5501_s0 + $0x100] sm:$0xff]  ;;  %v60_v26 = vld [vmem:[%s5501_s0 + $0x148] sm:$0xff]  ;;  %v61_v29 = vld [vmem:[%s5501_s0 + $0x150] sm:$0xff] }
  0x19   :  { %3301 = vmatprep.subr.bf16.mxu0 %v3718_v0  ;;  %v59_v27 = vld [vmem:[%s5501_s0 + $0x140] sm:$0xff]  ;;  %v64_v30 = vld [vmem:[%s5501_s0 + $0x168] sm:$0xff]  ;;  %v66_v32 = vld [vmem:[%s5501_s0 + $0x178] sm:$0xff] }
  0x1a   :  { %v65_v33 = vld [vmem:[%s5501_s0 + $0x170] sm:$0xff]  ;;  %v67_v35 = vld [vmem:[%s5501_s0 + $0x180] sm:$0xff]  ;;  %v70_v36 = vld [vmem:[%s5501_s0 + $0x198] sm:$0xff] }
  0x1b   :  { %v72_v38 = vld [vmem:[%s5501_s0 + $0x1a8] sm:$0xff]  ;;  %v71_v39 = vld [vmem:[%s5501_s0 + $0x1a0] sm:$0xff]  ;;  %v73_v41 = vld [vmem:[%s5501_s0 + $0x1b0] sm:$0xff] }
  0x1c   :  { %3303 = vmatpush1.bf16.msra.mxu0 %v3302_v22  ;;  %v56_v22 = vld [vmem:[%s5501_s0 + $0x128] sm:$0xff]  ;;  %v78_v44 = vld [vmem:[%s5501_s0 + $0x1d8] sm:$0xff]  ;;  %v77_v45 = vld [vmem:[%s5501_s0 + $0x1d0] sm:$0xff] }
  0x1d   :  { %3304 = vmatprep.subr.bf16.mxu0 %v3718_v0  ;;  %v76_v42 = vld [vmem:[%s5501_s0 + $0x1c8] sm:$0xff]  ;;  %v79_v47 = vld [vmem:[%s5501_s0 + $0x1e0] sm:$0xff]  ;;  %v82_v48 = vld [vmem:[%s5501_s0 + $0x1f8] sm:$0xff] }
  0x20   :  { %3306 = vmatpush1.bf16.msra.mxu0 %v3305_v25  ;;  %v57_v25 = vld [vmem:[%s5501_s0 + $0x130] sm:$0xff] }
  0x21   :  { %3307 = vmatprep.subr.bf16.mxu0 %v3718_v0 }
  0x24   :  { %3309 = vmatpush1.bf16.msra.mxu0 %v3308_v28  ;;  %v62_v28 = vld [vmem:[%s5501_s0 + $0x158] sm:$0xff] }
  0x25   :  { %3310 = vmatprep.subr.bf16.mxu0 %v3718_v0 }
  0x28   :  { %3312 = vmatpush1.bf16.msra.mxu0 %v3311_v31  ;;  %v63_v31 = vld [vmem:[%s5501_s0 + $0x160] sm:$0xff] }
  0x29   :  { %3313 = vmatprep.subr.bf16.mxu0 %v3718_v0 }
  0x2c   :  { %3315 = vmatpush1.bf16.msra.mxu0 %v3314_v34  ;;  %v68_v34 = vld [vmem:[%s5501_s0 + $0x188] sm:$0xff] }
  0x2d   :  { %3316 = vmatprep.subr.bf16.mxu0 %v3718_v0 }
  0x30   :  { %3318 = vmatpush1.bf16.msra.mxu0 %v3317_v37  ;;  %v69_v37 = vld [vmem:[%s5501_s0 + $0x190] sm:$0xff] }
  0x31   :  { %3319 = vmatprep.subr.bf16.mxu0 %v3718_v0 }
  0x34   :  { %3321 = vmatpush1.bf16.msra.mxu0 %v3320_v40  ;;  %v74_v40 = vld [vmem:[%s5501_s0 + $0x1b8] sm:$0xff] }
  0x35   :  { %3322 = vmatprep.subr.bf16.mxu0 %v3718_v0 }
  0x38   :  { %3324 = vmatpush1.bf16.msra.mxu0 %v3323_v43  ;;  %v75_v43 = vld [vmem:[%s5501_s0 + $0x1c0] sm:$0xff] }
  0x39   :  { %3325 = vmatprep.subr.bf16.mxu0 %v3718_v0 }
  0x3c   :  { %3327 = vmatpush1.bf16.msra.mxu0 %v3326_v46  ;;  %v80_v46 = vld [vmem:[%s5501_s0 + $0x1e8] sm:$0xff] }
  0x3d   :  { %3328 = vmatprep.subr.bf16.mxu0 %v3718_v0 }
  0x40   :  { %3330 = vmatpush1.bf16.msra.mxu0 %v3329_v49  ;;  %v81_v49 = vld [vmem:[%s5501_s0 + $0x1f0] sm:$0xff] }
  0x41   :  { %3547 = vmatprep.subr.bf16.mxu0 %v3718_v0 }
  0x43   :  { %244 = vmatmul.mubr.f32.vlgmr.msra.gmra.mrb[0].mxu0 %v19_v50  ;;  %v84_v50 = vld [vmem:[%s5501_s0 + $0x208] sm:$0xff] }
  0x44   :  { %248 = vmatprep.mubr.f32.mxu0 %v22_v51  ;;  %v83_v51 = vld [vmem:[%s5501_s0 + $0x200] sm:$0xff] }
  0x47   :  { %249 = vmatmul.mubr.f32.gmra.mrb[2].mxu0 %v21_v52  ;;  %v86_v52 = vld [vmem:[%s5501_s0 + $0x218] sm:$0xff] }
  0x48   :  { %253 = vmatprep.mubr.f32.mxu0 %v24_v53  ;;  %v85_v53 = vld [vmem:[%s5501_s0 + $0x210] sm:$0xff] }
  0x4b   :  { %254 = vmatmul.mubr.f32.gmra.mrb[4].mxu0 %v23_v54  ;;  %v88_v54 = vld [vmem:[%s5501_s0 + $0x228] sm:$0xff] }
  0x4c   :  { %258 = vmatprep.mubr.f32.mxu0 %v26_v55  ;;  %v87_v55 = vld [vmem:[%s5501_s0 + $0x220] sm:$0xff] }
  0x4f   :  { %259 = vmatmul.mubr.f32.gmra.mrb[6].mxu0 %v25_v56  ;;  %v90_v56 = vld [vmem:[%s5501_s0 + $0x238] sm:$0xff] }
  0x50   :  { %263 = vmatprep.mubr.f32.mxu0 %v28_v57  ;;  %v89_v57 = vld [vmem:[%s5501_s0 + $0x230] sm:$0xff] }
  0x53   :  { %264 = vmatmul.mubr.f32.gmra.mrb[8].mxu0 %v27_v58  ;;  %v92_v58 = vld [vmem:[%s5501_s0 + $0x248] sm:$0xff] }
  0x54   :  { %268 = vmatprep.mubr.f32.mxu0 %v30_v59  ;;  %v91_v59 = vld [vmem:[%s5501_s0 + $0x240] sm:$0xff] }
  0x57   :  { %269 = vmatmul.mubr.f32.gmra.mrb[10].mxu0 %v29_v60  ;;  %v94_v60 = vld [vmem:[%s5501_s0 + $0x258] sm:$0xff] }
  0x58   :  { %273 = vmatprep.mubr.f32.mxu0 %v32_v61  ;;  %v93_v61 = vld [vmem:[%s5501_s0 + $0x250] sm:$0xff] }
  0x5b   :  { %274 = vmatmul.mubr.f32.gmra.mrb[12].mxu0 %v31_v62  ;;  %v96_v62 = vld [vmem:[%s5501_s0 + $0x268] sm:$0xff] }
  0x5c   :  { %278 = vmatprep.mubr.f32.mxu0 %v34_v63  ;;  %v95_v63 = vld [vmem:[%s5501_s0 + $0x260] sm:$0xff] }
  0x5f   :  { %279 = vmatmul.mubr.f32.gmra.mrb[14].mxu0 %v33_v1  ;;  %v98_v1 = vld [vmem:[%s5501_s0 + $0x278] sm:$0xff] }
  0x60   :  { %283 = vmatprep.mubr.f32.mxu0 %v36_v2  ;;  %v97_v2 = vld [vmem:[%s5501_s0 + $0x270] sm:$0xff] }
  0x63   :  { %284 = vmatmul.mubr.f32.gmra.mrb[16].mxu0 %v35_v3  ;;  %v100_v3 = vld [vmem:[%s5501_s0 + $0x288] sm:$0xff] }
  0x64   :  { %288 = vmatprep.mubr.f32.mxu0 %v38_v4  ;;  %v99_v4 = vld [vmem:[%s5501_s0 + $0x280] sm:$0xff] }
  0x67   :  { %289 = vmatmul.mubr.f32.gmra.mrb[18].mxu0 %v37_v5  ;;  %v102_v5 = vld [vmem:[%s5501_s0 + $0x298] sm:$0xff] }
  0x68   :  { %293 = vmatprep.mubr.f32.mxu0 %v40_v6  ;;  %v101_v6 = vld [vmem:[%s5501_s0 + $0x290] sm:$0xff] }
  0x6b   :  { %294 = vmatmul.mubr.f32.gmra.mrb[20].mxu0 %v39_v7  ;;  %v104_v7 = vld [vmem:[%s5501_s0 + $0x2a8] sm:$0xff] }
  0x6c   :  { %298 = vmatprep.mubr.f32.mxu0 %v42_v8  ;;  %v103_v8 = vld [vmem:[%s5501_s0 + $0x2a0] sm:$0xff] }
  0x6f   :  { %299 = vmatmul.mubr.f32.gmra.mrb[22].mxu0 %v41_v9  ;;  %v106_v9 = vld [vmem:[%s5501_s0 + $0x2b8] sm:$0xff] }
  0x70   :  { %303 = vmatprep.mubr.f32.mxu0 %v44_v10  ;;  %v105_v10 = vld [vmem:[%s5501_s0 + $0x2b0] sm:$0xff] }
  0x73   :  { %304 = vmatmul.mubr.f32.gmra.mrb[24].mxu0 %v43_v11  ;;  %v108_v11 = vld [vmem:[%s5501_s0 + $0x2c8] sm:$0xff] }
  0x74   :  { %308 = vmatprep.mubr.f32.mxu0 %v46_v12  ;;  %v107_v12 = vld [vmem:[%s5501_s0 + $0x2c0] sm:$0xff] }
  0x77   :  { %309 = vmatmul.mubr.f32.gmra.mrb[26].mxu0 %v45_v13  ;;  %v110_v13 = vld [vmem:[%s5501_s0 + $0x2d8] sm:$0xff] }
  0x78   :  { %313 = vmatprep.mubr.f32.mxu0 %v48_v14  ;;  %v109_v14 = vld [vmem:[%s5501_s0 + $0x2d0] sm:$0xff] }
  0x7b   :  { %314 = vmatmul.mubr.f32.gmra.mrb[28].mxu0 %v47_v15  ;;  %v112_v15 = vld [vmem:[%s5501_s0 + $0x2e8] sm:$0xff] }
  0x7c   :  { %318 = vmatprep.mubr.f32.mxu0 %v50_v16  ;;  %v111_v16 = vld [vmem:[%s5501_s0 + $0x2e0] sm:$0xff] }
  0x7f   :  { %319 = vmatmul.mubr.f32.gmra.mrb[30].mxu0 %v49_v17  ;;  %v114_v17 = vld [vmem:[%s5501_s0 + $0x2f8] sm:$0xff] }
  0x80   :  { %323 = vmatprep.mubr.f32.mxu0 %v52_v18  ;;  %v113_v18 = vld [vmem:[%s5501_s0 + $0x2f0] sm:$0xff] }
  0x83   :  { %324 = vmatmul.mubr.f32.gmra.mrb[32].mxu0 %v51_v19  ;;  %v116_v19 = vld [vmem:[%s5501_s0 + $0x308] sm:$0xff] }
  0x84   :  { %328 = vmatprep.mubr.f32.mxu0 %v54_v20  ;;  %v115_v20 = vld [vmem:[%s5501_s0 + $0x300] sm:$0xff] }
  0x87   :  { %329 = vmatmul.mubr.f32.gmra.mrb[34].mxu0 %v53_v21  ;;  %v118_v21 = vld [vmem:[%s5501_s0 + $0x318] sm:$0xff] }
  0x88   :  { %333 = vmatprep.mubr.f32.mxu0 %v56_v22  ;;  %v117_v22 = vld [vmem:[%s5501_s0 + $0x310] sm:$0xff] }
  0x8b   :  { %334 = vmatmul.mubr.f32.gmra.mrb[36].mxu0 %v55_v23  ;;  %v120_v23 = vld [vmem:[%s5501_s0 + $0x328] sm:$0xff] }
  0x8c   :  { %338 = vmatprep.mubr.f32.mxu0 %v58_v24  ;;  %v119_v24 = vld [vmem:[%s5501_s0 + $0x320] sm:$0xff] }
  0x8f   :  { %339 = vmatmul.mubr.f32.gmra.mrb[38].mxu0 %v57_v25  ;;  %v122_v25 = vld [vmem:[%s5501_s0 + $0x338] sm:$0xff] }
  0x90   :  { %343 = vmatprep.mubr.f32.mxu0 %v60_v26  ;;  %v121_v26 = vld [vmem:[%s5501_s0 + $0x330] sm:$0xff] }
  0x93   :  { %344 = vmatmul.mubr.f32.gmra.mrb[40].mxu0 %v59_v27  ;;  %v124_v27 = vld [vmem:[%s5501_s0 + $0x348] sm:$0xff] }
  0x94   :  { %348 = vmatprep.mubr.f32.mxu0 %v62_v28  ;;  %v123_v28 = vld [vmem:[%s5501_s0 + $0x340] sm:$0xff] }
  0x97   :  { %349 = vmatmul.mubr.f32.gmra.mrb[42].mxu0 %v61_v29  ;;  %v126_v29 = vld [vmem:[%s5501_s0 + $0x358] sm:$0xff] }
  0x98   :  { %353 = vmatprep.mubr.f32.mxu0 %v64_v30  ;;  %v125_v30 = vld [vmem:[%s5501_s0 + $0x350] sm:$0xff] }
  0x9b   :  { %354 = vmatmul.mubr.f32.gmra.mrb[44].mxu0 %v63_v31  ;;  %v128_v31 = vld [vmem:[%s5501_s0 + $0x368] sm:$0xff] }
  0x9c   :  { %358 = vmatprep.mubr.f32.mxu0 %v66_v32 }
  0x9f   :  { %359 = vmatmul.mubr.f32.gmra.mrb[46].mxu0 %v65_v33 }
  0xa0   :  { %363 = vmatprep.mubr.f32.mxu0 %v68_v34  ;;  %v127_v34 = vld [vmem:[%s5501_s0 + $0x360] sm:$0xff] }
  0xa3   :  { %364 = vmatmul.mubr.f32.gmra.mrb[48].mxu0 %v67_v35  ;;  %v130_v35 = vld [vmem:[%s5501_s0 + $0x378] sm:$0xff] }
  0xa4   :  { %368 = vmatprep.mubr.f32.mxu0 %v70_v36 }
  0xa7   :  { %369 = vmatmul.mubr.f32.gmra.mrb[50].mxu0 %v69_v37 }
  0xa8   :  { %373 = vmatprep.mubr.f32.mxu0 %v72_v38  ;;  %v129_v38 = vld [vmem:[%s5501_s0 + $0x370] sm:$0xff] }
  0xab   :  { %374 = vmatmul.mubr.f32.gmra.mrb[52].mxu0 %v71_v39  ;;  %v132_v39 = vld [vmem:[%s5501_s0 + $0x388] sm:$0xff] }
  0xac   :  { %378 = vmatprep.mubr.f32.mxu0 %v74_v40 }
  0xaf   :  { %379 = vmatmul.mubr.f32.gmra.mrb[54].mxu0 %v73_v41 }
  0xb0   :  { %383 = vmatprep.mubr.f32.mxu0 %v76_v42  ;;  %v131_v42 = vld [vmem:[%s5501_s0 + $0x380] sm:$0xff] }
  0xb3   :  { %384 = vmatmul.mubr.f32.gmra.mrb[56].mxu0 %v75_v43  ;;  %v134_v43 = vld [vmem:[%s5501_s0 + $0x398] sm:$0xff] }
  0xb4   :  { %388 = vmatprep.mubr.f32.mxu0 %v78_v44 }
  0xb7   :  { %389 = vmatmul.mubr.f32.gmra.mrb[58].mxu0 %v77_v45 }
  0xb8   :  { %393 = vmatprep.mubr.f32.mxu0 %v80_v46  ;;  %v133_v46 = vld [vmem:[%s5501_s0 + $0x390] sm:$0xff] }
  0xbb   :  { %394 = vmatmul.mubr.f32.gmra.mrb[60].mxu0 %v79_v47  ;;  %v136_v47 = vld [vmem:[%s5501_s0 + $0x3a8] sm:$0xff] }
  0xbc   :  { %398 = vmatprep.mubr.f32.mxu0 %v82_v48 }
  0xbf   :  { %399 = vmatmul.mubr.f32.gmra.mrb[62].mxu0 %v81_v49 }
  0xc0   :  { %403 = vmatprep.mubr.f32.mxu0 %v84_v50  ;;  %v135_v50 = vld [vmem:[%s5501_s0 + $0x3a0] sm:$0xff] }
  0xc3   :  { %404 = vmatmul.mubr.f32.gmra.mrb[64].mxu0 %v83_v51  ;;  %v138_v51 = vld [vmem:[%s5501_s0 + $0x3b8] sm:$0xff] }
  0xc4   :  { %408 = vmatprep.mubr.f32.mxu0 %v86_v52 }
  0xc7   :  { %409 = vmatmul.mubr.f32.gmra.mrb[66].mxu0 %v85_v53 }
  0xc8   :  { %413 = vmatprep.mubr.f32.mxu0 %v88_v54  ;;  %v137_v54 = vld [vmem:[%s5501_s0 + $0x3b0] sm:$0xff] }
  0xcb   :  { %414 = vmatmul.mubr.f32.gmra.mrb[68].mxu0 %v87_v55  ;;  %v140_v55 = vld [vmem:[%s5501_s0 + $0x3c8] sm:$0xff] }
  0xcc   :  { %418 = vmatprep.mubr.f32.mxu0 %v90_v56 }
  0xcf   :  { %419 = vmatmul.mubr.f32.gmra.mrb[70].mxu0 %v89_v57 }
  0xd0   :  { %423 = vmatprep.mubr.f32.mxu0 %v92_v58  ;;  %v139_v58 = vld [vmem:[%s5501_s0 + $0x3c0] sm:$0xff] }
  0xd3   :  { %424 = vmatmul.mubr.f32.gmra.mrb[72].mxu0 %v91_v59  ;;  %v142_v59 = vld [vmem:[%s5501_s0 + $0x3d8] sm:$0xff] }
  0xd4   :  { %428 = vmatprep.mubr.f32.mxu0 %v94_v60 }
  0xd7   :  { %429 = vmatmul.mubr.f32.gmra.mrb[74].mxu0 %v93_v61 }
  0xd8   :  { %433 = vmatprep.mubr.f32.mxu0 %v96_v62  ;;  %v141_v62 = vld [vmem:[%s5501_s0 + $0x3d0] sm:$0xff] }
  0xdb   :  { %434 = vmatmul.mubr.f32.gmra.mrb[76].mxu0 %v95_v63  ;;  %v144_v63 = vld [vmem:[%s5501_s0 + $0x3e8] sm:$0xff] }
  0xdc   :  { %438 = vmatprep.mubr.f32.mxu0 %v98_v1 }
  0xdf   :  { %439 = vmatmul.mubr.f32.gmra.mrb[78].mxu0 %v97_v2 }
  0xe0   :  { %443 = vmatprep.mubr.f32.mxu0 %v100_v3  ;;  %v143_v3 = vld [vmem:[%s5501_s0 + $0x3e0] sm:$0xff] }
  0xe3   :  { %444 = vmatmul.mubr.f32.gmra.mrb[80].mxu0 %v99_v4  ;;  %v146_v4 = vld [vmem:[%s5501_s0 + $0x3f8] sm:$0xff] }
  0xe4   :  { %448 = vmatprep.mubr.f32.mxu0 %v102_v5 }
  0xe7   :  { %449 = vmatmul.mubr.f32.gmra.mrb[82].mxu0 %v101_v6 }
  0xe8   :  { %453 = vmatprep.mubr.f32.mxu0 %v104_v7  ;;  %v145_v7 = vld [vmem:[%s5501_s0 + $0x3f0] sm:$0xff] }
  0xeb   :  { %454 = vmatmul.mubr.f32.gmra.mrb[84].mxu0 %v103_v8 }
  0xec   :  { %458 = vmatprep.mubr.f32.mxu0 %v106_v9  ;;  %v2210_v9 = vld [vmem:[%s5502_s2 + $0x80] sm:$0xff] }
  0xef   :  { %459 = vmatmul.mubr.f32.gmra.mrb[86].mxu0 %v105_v10  ;;  %v2211_v10 = vld [vmem:[%s5502_s2 + $0x88] sm:$0xff] }
  0xf0   :  { %463 = vmatprep.mubr.f32.mxu0 %v108_v11 }
  0xf3   :  { %464 = vmatmul.mubr.f32.gmra.mrb[88].mxu0 %v107_v12  ;;  %v3332_v12 = vpack.c.bf16 %v2211_v10, %v2210_v9  ;;  %v2341_v9 = vld [vmem:[%s5502_s2 + $0x498] sm:$0xff] }
  0xf4   :  { %468 = vmatprep.mubr.f32.mxu0 %v110_v13 }
  0xf5   :  { %3333 = vmatpush3.bf16.msra.mxu1 %v3332_v12 }
  0xf6   :  { %3334 = vmatprep.subr.bf16.mxu1 %v3718_v0 }
  0xf7   :  { %469 = vmatmul.mubr.f32.gmra.mrb[90].mxu0 %v109_v14  ;;  %v2212_v14 = vld [vmem:[%s5502_s2 + $0x90] sm:$0xff] }
  0xf8   :  { %473 = vmatprep.mubr.f32.mxu0 %v112_v15  ;;  %v2213_v15 = vld [vmem:[%s5502_s2 + $0x98] sm:$0xff] }
  0xfb   :  { %474 = vmatmul.mubr.f32.gmra.mrb[92].mxu0 %v111_v16 }
  0xfc   :  { %478 = vmatprep.mubr.f32.mxu0 %v114_v17  ;;  %v3335_v17 = vpack.c.bf16 %v2213_v15, %v2212_v14  ;;  %v2342_v15 = vld [vmem:[%s5502_s2 + $0x4a0] sm:$0xff] }
  0xfe   :  { %3336 = vmatpush3.bf16.msra.mxu1 %v3335_v17 }
  0xff   :  { %479 = vmatmul.mubr.f32.gmra.mrb[94].mxu0 %v113_v18  ;;  %3337 = vmatprep.subr.bf16.mxu1 %v3718_v0 }
 0x100   :  { %483 = vmatprep.mubr.f32.mxu0 %v116_v19  ;;  %v2214_v19 = vld [vmem:[%s5502_s2 + $0xa0] sm:$0xff] }
 0x103   :  { %484 = vmatmul.mubr.f32.gmra.mrb[96].mxu0 %v115_v20  ;;  %v2215_v20 = vld [vmem:[%s5502_s2 + $0xa8] sm:$0xff] }
 0x104   :  { %488 = vmatprep.mubr.f32.mxu0 %v118_v21 }
 0x107   :  { %489 = vmatmul.mubr.f32.gmra.mrb[98].mxu0 %v117_v22  ;;  %v3338_v22 = vpack.c.bf16 %v2215_v20, %v2214_v19 }
 0x108   :  { %493 = vmatprep.mubr.f32.mxu0 %v120_v23 }
 0x109   :  { %3339 = vmatpush3.bf16.msra.mxu1 %v3338_v22  ;;  %v2344_v22 = vld [vmem:[%s5502_s2 + $0x4b0] sm:$0xff] }
 0x10a   :  { %3340 = vmatprep.subr.bf16.mxu1 %v3718_v0 }
 0x10b   :  { %494 = vmatmul.mubr.f32.gmra.mrb[100].mxu0 %v119_v24  ;;  %v2216_v24 = vld [vmem:[%s5502_s2 + $0xb0] sm:$0xff] }
 0x10c   :  { %498 = vmatprep.mubr.f32.mxu0 %v122_v25  ;;  %v2217_v25 = vld [vmem:[%s5502_s2 + $0xb8] sm:$0xff] }
 0x10f   :  { %499 = vmatmul.mubr.f32.gmra.mrb[102].mxu0 %v121_v26 }
 0x110   :  { %503 = vmatprep.mubr.f32.mxu0 %v124_v27  ;;  %v3341_v27 = vpack.c.bf16 %v2217_v25, %v2216_v24  ;;  %v2345_v24 = vld [vmem:[%s5502_s2 + $0x4b8] sm:$0xff] }
 0x111   :  { %v3557_v25 = vpack.c.bf16 %v2345_v24, %v2344_v22 }
 0x112   :  { %3342 = vmatpush3.bf16.msra.mxu1 %v3341_v27 }
 0x113   :  { %504 = vmatmul.mubr.f32.gmra.mrb[104].mxu0 %v123_v28  ;;  %3343 = vmatprep.subr.bf16.mxu1 %v3718_v0 }
 0x114   :  { %508 = vmatprep.mubr.f32.mxu0 %v126_v29  ;;  %v2218_v29 = vld [vmem:[%s5502_s2 + $0xc0] sm:$0xff] }
 0x116   :  { %v4192_v32 = vpop.f32.mrb[0].mxu0 }
 0x117   :  { %v247_v33 = vpop.f32.mrb[1].mxu0  ;;  %509 = vmatmul.mubr.f32.gmra.mrb[106].mxu0 %v125_v30  ;;  %v2219_v30 = vld [vmem:[%s5502_s2 + $0xc8] sm:$0xff] }
 0x118   :  { %513 = vmatprep.mubr.f32.mxu0 %v128_v31  ;;  %v3344_v33 = vpack.c.bf16 %v2219_v30, %v2218_v29  ;;  %v2346_v30 = vld [vmem:[%s5502_s2 + $0x4c0] sm:$0xff] }
 0x11a   :  { %v4200_v36 = vpop.f32.mrb[2].mxu0  ;;  %3345 = vmatpush3.bf16.msra.mxu1 %v3344_v33 }
 0x11b   :  { %v252_v37 = vpop.f32.mrb[3].mxu0  ;;  %514 = vmatmul.mubr.f32.gmra.mrb[108].mxu0 %v127_v34  ;;  %3346 = vmatprep.subr.bf16.mxu1 %v3718_v0 }
 0x11c   :  { %518 = vmatprep.mubr.f32.mxu0 %v130_v35  ;;  %v2220_v35 = vld [vmem:[%s5502_s2 + $0xd0] sm:$0xff]  ;;  %v2221_v37 = vld [vmem:[%s5502_s2 + $0xd8] sm:$0xff] }
 0x11e   :  { %v4208_v40 = vpop.f32.mrb[4].mxu0 }
 0x11f   :  { %v257_v41 = vpop.f32.mrb[5].mxu0  ;;  %519 = vmatmul.mubr.f32.gmra.mrb[110].mxu0 %v129_v38 }
 0x120   :  { %523 = vmatprep.mubr.f32.mxu0 %v132_v39  ;;  %v3347_v39 = vpack.c.bf16 %v2221_v37, %v2220_v35 }
 0x122   :  { %v4216_v44 = vpop.f32.mrb[6].mxu0  ;;  %3348 = vmatpush3.bf16.msra.mxu1 %v3347_v39  ;;  %v2348_v39 = vld [vmem:[%s5502_s2 + $0x4d0] sm:$0xff] }
 0x123   :  { %v262_v45 = vpop.f32.mrb[7].mxu0  ;;  %524 = vmatmul.mubr.f32.gmra.mrb[112].mxu0 %v131_v42  ;;  %3349 = vmatprep.subr.bf16.mxu1 %v3718_v0  ;;  %v2222_v42 = vld [vmem:[%s5502_s2 + $0xe0] sm:$0xff] }
 0x124   :  { %528 = vmatprep.mubr.f32.mxu0 %v134_v43  ;;  %v2223_v43 = vld [vmem:[%s5502_s2 + $0xe8] sm:$0xff] }
 0x126   :  { %v4224_v48 = vpop.f32.mrb[8].mxu0 }
 0x127   :  { %v267_v49 = vpop.f32.mrb[9].mxu0  ;;  %529 = vmatmul.mubr.f32.gmra.mrb[114].mxu0 %v133_v46 }
 0x128   :  { %533 = vmatprep.mubr.f32.mxu0 %v136_v47  ;;  %v3350_v47 = vpack.c.bf16 %v2223_v43, %v2222_v42  ;;  %v2349_v42 = vld [vmem:[%s5502_s2 + $0x4d8] sm:$0xff] }
 0x129   :  { %v3563_v43 = vpack.c.bf16 %v2349_v42, %v2348_v39 }
 0x12a   :  { %v4232_v52 = vpop.f32.mrb[10].mxu0  ;;  %3351 = vmatpush3.bf16.msra.mxu1 %v3350_v47 }
 0x12b   :  { %v272_v53 = vpop.f32.mrb[11].mxu0  ;;  %534 = vmatmul.mubr.f32.gmra.mrb[116].mxu0 %v135_v50  ;;  %3352 = vmatprep.subr.bf16.mxu1 %v3718_v0  ;;  %v2224_v50 = vld [vmem:[%s5502_s2 + $0xf0] sm:$0xff] }
 0x12c   :  { %538 = vmatprep.mubr.f32.mxu0 %v138_v51  ;;  %v2225_v51 = vld [vmem:[%s5502_s2 + $0xf8] sm:$0xff] }
 0x12e   :  { %v4240_v56 = vpop.f32.mrb[12].mxu0 }
 0x12f   :  { %v277_v57 = vpop.f32.mrb[13].mxu0  ;;  %539 = vmatmul.mubr.f32.gmra.mrb[118].mxu0 %v137_v54 }
 0x130   :  { %543 = vmatprep.mubr.f32.mxu0 %v140_v55  ;;  %v3353_v55 = vpack.c.bf16 %v2225_v51, %v2224_v50  ;;  %v2350_v51 = vld [vmem:[%s5502_s2 + $0x4e0] sm:$0xff] }
 0x132   :  { %v4248_v60 = vpop.f32.mrb[14].mxu0  ;;  %3354 = vmatpush3.bf16.msra.mxu1 %v3353_v55 }
 0x133   :  { %v282_v61 = vpop.f32.mrb[15].mxu0  ;;  %544 = vmatmul.mubr.f32.gmra.mrb[120].mxu0 %v139_v58  ;;  %3355 = vmatprep.subr.bf16.mxu1 %v3718_v0 }
 0x134   :  { %548 = vmatprep.mubr.f32.mxu0 %v142_v59  ;;  %v2338_v61 = vld [vmem:[%s5502_s2 + $0x480] sm:$0xff] }
 0x136   :  { %v4256_v1 = vpop.f32.mrb[16].mxu0 }
 0x137   :  { %v287_v2 = vpop.f32.mrb[17].mxu0  ;;  %549 = vmatmul.mubr.f32.gmra.mrb[122].mxu0 %v141_v62  ;;  %v2339_v62 = vld [vmem:[%s5502_s2 + $0x488] sm:$0xff] }
 0x138   :  { %553 = vmatprep.mubr.f32.mxu0 %v144_v63  ;;  %v3720_v63 = vmov 0.0   ;;  %v3548_v2 = vpack.c.bf16 %v2339_v62, %v2338_v61 }
 0x139   :  { %2755 = vmatprep.mubr.msk.f32.mxu1 %vm3719_vm0, %v3720_v63 }
 0x13a   :  { %v4264_v5 = vpop.f32.mrb[18].mxu0  ;;  %3549 = vmatpush3.bf16.msra.mxu0 %v3548_v2  ;;  %v2352_v2 = vld [vmem:[%s5502_s2 + $0x4f0] sm:$0xff] }
 0x13b   :  { %v292_v6 = vpop.f32.mrb[19].mxu0  ;;  %554 = vmatmul.mubr.f32.gmra.mrb[124].mxu0 %v143_v3  ;;  %3550 = vmatprep.subr.bf16.mxu0 %v3718_v0 }
 0x13c   :  { %558 = vmatprep.mubr.f32.mxu0 %v146_v4 }
 0x13e   :  { %v4269_v8 = vpop.f32.mrb[20].mxu0 }
 0x13f   :  { %v297_v11 = vpop.f32.mrb[21].mxu0  ;;  %559 = vmatmul.mubr.f32.gmra.mrb[126].mxu0 %v145_v7  ;;  %v2340_v7 = vld [vmem:[%s5502_s2 + $0x490] sm:$0xff] }
 0x140   :  { %3070 = vmatprep.mubr.msk.f32.mxu0 %vm3719_vm0, %v3720_v63  ;;  %v3551_v10 = vpack.c.bf16 %v2341_v9, %v2340_v7 }
 0x142   :  { %v4277_v13 = vpop.f32.mrb[22].mxu0  ;;  %3552 = vmatpush3.bf16.msra.mxu0 %v3551_v10 }
 0x143   :  { %v302_v16 = vpop.f32.mrb[23].mxu0  ;;  %3553 = vmatprep.subr.bf16.mxu0 %v3718_v0 }
 0x144   :  { %v2343_v16 = vld [vmem:[%s5502_s2 + $0x4a8] sm:$0xff] }
 0x145   :  { %v3554_v17 = vpack.c.bf16 %v2343_v16, %v2342_v15 }
 0x146   :  { %v4286_v18 = vpop.f32.mrb[24].mxu0 }
 0x147   :  { %v307_v21 = vpop.f32.mrb[25].mxu0  ;;  %3555 = vmatpush3.bf16.msra.mxu0 %v3554_v17 }
 0x148   :  { %3556 = vmatprep.subr.bf16.mxu0 %v3718_v0 }
 0x14a   :  { %v4295_v23 = vpop.f32.mrb[26].mxu0 }
 0x14b   :  { %v312_v26 = vpop.f32.mrb[27].mxu0  ;;  %3558 = vmatpush3.bf16.msra.mxu0 %v3557_v25 }
 0x14c   :  { %3559 = vmatprep.subr.bf16.mxu0 %v3718_v0 }
 0x14e   :  { %v4304_v28 = vpop.f32.mrb[28].mxu0 }
 0x14f   :  { %v317_v31 = vpop.f32.mrb[29].mxu0 }
 0x150   :  { %v2347_v31 = vld [vmem:[%s5502_s2 + $0x4c8] sm:$0xff] }
 0x151   :  { %v3560_v33 = vpack.c.bf16 %v2347_v31, %v2346_v30 }
 0x152   :  { %v4313_v34 = vpop.f32.mrb[30].mxu0 }
 0x153   :  { %v322_v38 = vpop.f32.mrb[31].mxu0  ;;  %3561 = vmatpush3.bf16.msra.mxu0 %v3560_v33 }
 0x154   :  { %3562 = vmatprep.subr.bf16.mxu0 %v3718_v0 }
 0x156   :  { %v4322_v41 = vpop.f32.mrb[32].mxu0 }
 0x157   :  { %v660_v45 = vmax.f32 %v4192_v32, %v4322_v41  ;;  %v327_v46 = vpop.f32.mrb[33].mxu0  ;;  %3564 = vmatpush3.bf16.msra.mxu0 %v3563_v43 }
 0x158   :  { %3565 = vmatprep.subr.bf16.mxu0 %v3718_v0 }
 0x15a   :  { %v4333_v49 = vpop.f32.mrb[34].mxu0 }
 0x15b   :  { %v661_v53 = vmax.f32 %v4200_v36, %v4333_v49  ;;  %v332_v54 = vpop.f32.mrb[35].mxu0 }
 0x15c   :  { %v2351_v54 = vld [vmem:[%s5502_s2 + $0x4e8] sm:$0xff] }
 0x15d   :  { %v3566_v55 = vpack.c.bf16 %v2351_v54, %v2350_v51 }
 0x15e   :  { %v4344_v57 = vpop.f32.mrb[36].mxu0 }
 0x15f   :  { %v662_v58 = vmax.f32 %v4208_v40, %v4344_v57  ;;  %v337_v59 = vpop.f32.mrb[37].mxu0  ;;  %3567 = vmatpush3.bf16.msra.mxu0 %v3566_v55  ;;  %v778_v40 = vld [vmem:[%s5502_s2 + $0x28] sm:$0xff] }
 0x160   :  { %3568 = vmatprep.subr.bf16.mxu0 %v3718_v0 }
 0x162   :  { %v4359_v3 = vpop.f32.mrb[38].mxu0 }
 0x163   :  { %v342_v6 = vpop.f32.mrb[39].mxu0  ;;  %v5506_v57 = vmax.f32 %v4216_v44, %v4359_v3  ;;  %v780_v44 = vld [vmem:[%s5502_s2 + $0x38] sm:$0xff] }
 0x164   :  { %v2353_v6 = vld [vmem:[%s5502_s2 + $0x4f8] sm:$0xff] }
 0x165   :  { %v3569_v7 = vpack.c.bf16 %v2353_v6, %v2352_v2 }
 0x166   :  { %v4370_v11 = vpop.f32.mrb[40].mxu0 }
 0x167   :  { %v347_v14 = vpop.f32.mrb[41].mxu0  ;;  %3570 = vmatpush3.bf16.msra.mxu0 %v3569_v7  ;;  %v5507_v3 = vmax.f32 %v4224_v48, %v4370_v11  ;;  %v782_v48 = vld [vmem:[%s5502_s2 + $0x48] sm:$0xff] }
 0x168   :  { %3595 = vmatprep.subr.bf16.mxu0 %v3718_v0 }
 0x16a   :  { %v4381_v19 = vpop.f32.mrb[42].mxu0 }
 0x16b   :  { %v352_v21 = vpop.f32.mrb[43].mxu0  ;;  %v5508_v11 = vmax.f32 %v4232_v52, %v4381_v19  ;;  %v784_v52 = vld [vmem:[%s5502_s2 + $0x58] sm:$0xff] }
 0x16e   :  { %v4392_v26 = vpop.f32.mrb[44].mxu0 }
 0x16f   :  { %v357_v29 = vpop.f32.mrb[45].mxu0  ;;  %v5509_v19 = vmax.f32 %v4240_v56, %v4392_v26  ;;  %v786_v56 = vld [vmem:[%s5502_s2 + $0x68] sm:$0xff] }
 0x172   :  { %v4403_v35 = vpop.f32.mrb[46].mxu0 }
 0x173   :  { %v362_v38 = vpop.f32.mrb[47].mxu0  ;;  %v5510_v26 = vmax.f32 %v4248_v60, %v4403_v35  ;;  %v788_v60 = vld [vmem:[%s5502_s2 + $0x78] sm:$0xff] }
 0x176   :  { %v4414_v46 = vpop.f32.mrb[48].mxu0 }
 0x177   :  { %v367_v50 = vpop.f32.mrb[49].mxu0  ;;  %v5511_v35 = vmax.f32 %v4256_v1, %v4414_v46  ;;  %v2370_v1 = vld [vmem:[%s5502_s2 + $0x580] sm:$0xff]  ;;  %v2371_v46 = vld [vmem:[%s5502_s2 + $0x588] sm:$0xff] }
 0x17a   :  { %v4425_v59 = vpop.f32.mrb[50].mxu0 }
 0x17b   :  { %v372_v62 = vpop.f32.mrb[51].mxu0 }
 0x17e   :  { %v4436_v9 = vpop.f32.mrb[52].mxu0 }
 0x17f   :  { %v377_v14 = vpop.f32.mrb[53].mxu0 }
 0x182   :  { %v4441_v15 = vpop.f32.mrb[54].mxu0 }
 0x183   :  { %v382_v17 = vpop.f32.mrb[55].mxu0 }
 0x186   :  { %v4445_v21 = vpop.f32.mrb[56].mxu0 }
 0x187   :  { %v387_v24 = vpop.f32.mrb[57].mxu0 }
 0x18a   :  { %v4449_v25 = vpop.f32.mrb[58].mxu0 }
 0x18b   :  { %v392_v30 = vpop.f32.mrb[59].mxu0 }
 0x18e   :  { %v4453_v31 = vpop.f32.mrb[60].mxu0 }
 0x18f   :  { %v397_v38 = vpop.f32.mrb[61].mxu0 }
 0x192   :  { %v4457_v39 = vpop.f32.mrb[62].mxu0 }
 0x193   :  { %v402_v43 = vpop.f32.mrb[63].mxu0 }
 0x196   :  { %v405_v50 = vpop.f32.mrb[64].mxu0 }
 0x197   :  { %v407_v51 = vpop.f32.mrb[65].mxu0 }
 0x19a   :  { %v410_v54 = vpop.f32.mrb[66].mxu0 }
 0x19b   :  { %v412_v55 = vpop.f32.mrb[67].mxu0 }
 0x19e   :  { %v415_v62 = vpop.f32.mrb[68].mxu0 }
 0x19f   :  { %v417_v2 = vpop.f32.mrb[69].mxu0 }
 0x1a2   :  { %v420_v6 = vpop.f32.mrb[70].mxu0 }
 0x1a3   :  { %v422_v7 = vpop.f32.mrb[71].mxu0 }
 0x1a6   :  { %v4461_v14 = vpop.f32.mrb[72].mxu0 }
 0x1a7   :  { %v427_v17 = vpop.f32.mrb[73].mxu0 }
 0x1aa   :  { %v4463_v24 = vpop.f32.mrb[74].mxu0 }
 0x1ab   :  { %v432_v30 = vpop.f32.mrb[75].mxu0 }
 0x1ae   :  { %v4465_v38 = vpop.f32.mrb[76].mxu0 }
 0x1af   :  { %v437_v33 = vpop.f32.mrb[77].mxu0 }
 0x1b2   :  { %v4467_v29 = vpop.f32.mrb[78].mxu0 }
 0x1b3   :  { %v442_v43 = vpop.f32.mrb[79].mxu0 }
 0x1b6   :  { %v4469_v42 = vpop.f32.mrb[80].mxu0 }
 0x1b7   :  { %v447_v51 = vpop.f32.mrb[81].mxu0 }
 0x1ba   :  { %v4471_v55 = vpop.f32.mrb[82].mxu0 }
 0x1bb   :  { %v452_v2 = vpop.f32.mrb[83].mxu0 }
 0x1be   :  { %v4473_v22 = vpop.f32.mrb[84].mxu0 }
 0x1bf   :  { %v457_v7 = vpop.f32.mrb[85].mxu0 }
 0x1c2   :  { %v4475_v16 = vpop.f32.mrb[86].mxu0 }
 0x1c3   :  { %v462_v17 = vpop.f32.mrb[87].mxu0 }
 0x1c6   :  { %v4477_v10 = vpop.f32.mrb[88].mxu0 }
 0x1c7   :  { %v467_v30 = vpop.f32.mrb[89].mxu0 }
 0x1ca   :  { %v4479_v61 = vpop.f32.mrb[90].mxu0 }
 0x1cb   :  { %v472_v33 = vpop.f32.mrb[91].mxu0 }
 0x1cc   :  { %v773_v33 = vld [vmem:[%s5502_s2] sm:$0xff] }
 0x1ce   :  { %v4481_v47 = vpop.f32.mrb[92].mxu0 }
 0x1cf   :  { %v477_v43 = vpop.f32.mrb[93].mxu0 }
 0x1d0   :  { %v774_v43 = vld [vmem:[%s5502_s2 + $0x8] sm:$0xff] }
 0x1d2   :  { %v4483_v37 = vpop.f32.mrb[94].mxu0 }
 0x1d3   :  { %v482_v51 = vpop.f32.mrb[95].mxu0 }
 0x1d6   :  { %v485_v27 = vpop.f32.mrb[96].mxu0 }
 0x1d7   :  { %v708_v2 = vmax.f32 %v405_v50, %v485_v27  ;;  %v487_v20 = vpop.f32.mrb[97].mxu0  ;;  %v775_v50 = vld [vmem:[%s5502_s2 + $0x10] sm:$0xff] }
 0x1d9   :  { %v4488_v7 = vmax.f32 %v660_v45, %v708_v2  ;;  %v3356_v45 = vpack.c.bf16 %v774_v43, %v773_v33  ;;  %v777_v2 = vld [vmem:[%s5502_s2 + $0x20] sm:$0xff] }
 0x1da   :  { %v490_v17 = vpop.f32.mrb[98].mxu0 }
 0x1db   :  { %v740_v30 = vmax.f32 %v4488_v7, 0.0  ;;  %v709_v12 = vmax.f32 %v410_v54, %v490_v17  ;;  %v492_v4 = vpop.f32.mrb[99].mxu0  ;;  %v776_v54 = vld [vmem:[%s5502_s2 + $0x18] sm:$0xff]  ;;  %v3362_v17 = vpack.c.bf16 %v778_v40, %v777_v2  ;;  %v783_v40 = vld [vmem:[%s5502_s2 + $0x50] sm:$0xff]  ;;  %v2375_v7 = vld [vmem:[%s5502_s2 + $0x5a8] sm:$0xff] }
 0x1dd   :  { %756 = vst [vmem:[%s5503_s4] sm:$0xff] %v740_v30  ;;  %v725_v32 = vmax.f32 %v661_v53, %v709_v12  ;;  %v3359_v53 = vpack.c.bf16 %v776_v54, %v775_v50  ;;  %v781_v54 = vld [vmem:[%s5502_s2 + $0x40] sm:$0xff] }
 0x1de   :  { %v495_v41 = vpop.f32.mrb[100].mxu0 }
 0x1df   :  { %v741_v4 = vmax.f32 %v725_v32, 0.0  ;;  %v710_v20 = vmax.f32 %v415_v62, %v495_v41  ;;  %v497_v27 = vpop.f32.mrb[101].mxu0  ;;  %v779_v41 = vld [vmem:[%s5502_s2 + $0x30] sm:$0xff] }
 0x1e1   :  { %757 = vst [vmem:[%s5503_s4 + $0x8] sm:$0xff] %v741_v4  ;;  %v4517_v36 = vmax.f32 %v662_v58, %v710_v20  ;;  %2756 = vmatmul.mubr.f32.vlgmr.msra.gmra.mrb[0].mxu1 %v741_v4  ;;  %v3365_v4 = vpack.c.bf16 %v780_v44, %v779_v41  ;;  %v785_v41 = vld [vmem:[%s5502_s2 + $0x60] sm:$0xff] }
 0x1e2   :  { %v500_v49 = vpop.f32.mrb[102].mxu0  ;;  %3357 = vmatpush3.bf16.msra.mxu1 %v3356_v45  ;;  %2790 = vmatprep.mubr.msk.f32.mxu1 %vm3719_vm0, %v3720_v63 }
 0x1e3   :  { %v742_v12 = vmax.f32 %v4517_v36, 0.0  ;;  %v711_v62 = vmax.f32 %v420_v6, %v500_v49  ;;  %v502_v51 = vpop.f32.mrb[103].mxu0  ;;  %3358 = vmatprep.subr.bf16.mxu1 %v3718_v0  ;;  %v2247_v36 = vld [vmem:[%s5502_s2 + $0x1a8] sm:$0xff] }
 0x1e5   :  { %758 = vst [vmem:[%s5503_s4 + $0x10] sm:$0xff] %v742_v12  ;;  %v4537_v58 = vmax.f32 %v5506_v57, %v711_v62 }
 0x1e6   :  { %v505_v6 = vpop.f32.mrb[104].mxu0  ;;  %3360 = vmatpush3.bf16.msra.mxu1 %v3359_v53  ;;  %v3368_v53 = vpack.c.bf16 %v782_v48, %v781_v54 }
 0x1e7   :  { %v743_v33 = vmax.f32 %v4537_v58, 0.0  ;;  %v712_v43 = vmax.f32 %v4461_v14, %v505_v6  ;;  %v507_v32 = vpop.f32.mrb[105].mxu0  ;;  %3361 = vmatprep.subr.bf16.mxu1 %v3718_v0  ;;  %v3371_v6 = vpack.c.bf16 %v784_v52, %v783_v40  ;;  %v2263_v58 = vld [vmem:[%s5502_s2 + $0x228] sm:$0xff] }
 0x1e9   :  { %759 = vst [vmem:[%s5503_s4 + $0x18] sm:$0xff] %v743_v33  ;;  %v4556_v14 = vmax.f32 %v5507_v3, %v712_v43  ;;  %v3374_v3 = vpack.c.bf16 %v786_v56, %v785_v41  ;;  %v2229_v56 = vld [vmem:[%s5502_s2 + $0x118] sm:$0xff] }
 0x1ea   :  { %v510_v45 = vpop.f32.mrb[106].mxu0  ;;  %3363 = vmatpush3.bf16.msra.mxu1 %v3362_v17 }
 0x1eb   :  { %v744_v20 = vmax.f32 %v4556_v14, 0.0  ;;  %v713_v27 = vmax.f32 %v4463_v24, %v510_v45  ;;  %v512_v50 = vpop.f32.mrb[107].mxu0  ;;  %3364 = vmatprep.subr.bf16.mxu1 %v3718_v0 }
 0x1ec   :  { %v787_v50 = vld [vmem:[%s5502_s2 + $0x70] sm:$0xff] }
 0x1ed   :  { %760 = vst [vmem:[%s5503_s4 + $0x20] sm:$0xff] %v744_v20  ;;  %v4575_v24 = vmax.f32 %v5508_v11, %v713_v27  ;;  %v3377_v48 = vpack.c.bf16 %v788_v60, %v787_v50  ;;  %v2226_v11 = vld [vmem:[%s5502_s2 + $0x100] sm:$0xff] }
 0x1ee   :  { %v515_v49 = vpop.f32.mrb[108].mxu0  ;;  %3366 = vmatpush3.bf16.msra.mxu1 %v3365_v4 }
 0x1ef   :  { %v745_v62 = vmax.f32 %v4575_v24, 0.0  ;;  %v714_v51 = vmax.f32 %v4465_v38, %v515_v49  ;;  %v517_v2 = vpop.f32.mrb[109].mxu0  ;;  %3367 = vmatprep.subr.bf16.mxu1 %v3718_v0  ;;  %v2296_v24 = vld [vmem:[%s5502_s2 + $0x330] sm:$0xff] }
 0x1f0   :  { %v2227_v2 = vld [vmem:[%s5502_s2 + $0x108] sm:$0xff] }
 0x1f1   :  { %761 = vst [vmem:[%s5503_s4 + $0x28] sm:$0xff] %v745_v62  ;;  %v4594_v38 = vmax.f32 %v5509_v19, %v714_v51  ;;  %v3380_v19 = vpack.c.bf16 %v2227_v2, %v2226_v11  ;;  %v2232_v11 = vld [vmem:[%s5502_s2 + $0x130] sm:$0xff]  ;;  %v2377_v2 = vld [vmem:[%s5502_s2 + $0x5b8] sm:$0xff] }
 0x1f2   :  { %v520_v57 = vpop.f32.mrb[110].mxu0  ;;  %3369 = vmatpush3.bf16.msra.mxu1 %v3368_v53 }
 0x1f3   :  { %v746_v17 = vmax.f32 %v4594_v38, 0.0  ;;  %v715_v43 = vmax.f32 %v4467_v29, %v520_v57  ;;  %v522_v32 = vpop.f32.mrb[111].mxu0  ;;  %3370 = vmatprep.subr.bf16.mxu1 %v3718_v0  ;;  %v3596_v57 = vpack.c.bf16 %v2371_v46, %v2370_v1  ;;  %v2312_v38 = vld [vmem:[%s5502_s2 + $0x3b0] sm:$0xff] }
 0x1f5   :  { %762 = vst [vmem:[%s5503_s4 + $0x30] sm:$0xff] %v746_v17  ;;  %v4613_v29 = vmax.f32 %v5510_v26, %v715_v43 }
 0x1f6   :  { %v525_v44 = vpop.f32.mrb[112].mxu0  ;;  %3372 = vmatpush3.bf16.msra.mxu1 %v3371_v6  ;;  %v2228_v6 = vld [vmem:[%s5502_s2 + $0x110] sm:$0xff] }
 0x1f7   :  { %v747_v45 = vmax.f32 %v4613_v29, 0.0  ;;  %v716_v4 = vmax.f32 %v4469_v42, %v525_v44  ;;  %v527_v27 = vpop.f32.mrb[113].mxu0  ;;  %3373 = vmatprep.subr.bf16.mxu1 %v3718_v0  ;;  %v2328_v29 = vld [vmem:[%s5502_s2 + $0x430] sm:$0xff] }
 0x1f8   :  { %v2230_v27 = vld [vmem:[%s5502_s2 + $0x120] sm:$0xff] }
 0x1f9   :  { %763 = vst [vmem:[%s5503_s4 + $0x38] sm:$0xff] %v747_v45  ;;  %v732_v42 = vmax.f32 %v5511_v35, %v716_v4 }
 0x1fa   :  { %v530_v54 = vpop.f32.mrb[114].mxu0  ;;  %3375 = vmatpush3.bf16.msra.mxu1 %v3374_v3  ;;  %v3383_v3 = vpack.c.bf16 %v2229_v56, %v2228_v6 }
 0x1fb   :  { %v748_v49 = vmax.f32 %v732_v42, 0.0  ;;  %v717_v53 = vmax.f32 %v4471_v55, %v530_v54  ;;  %v532_v51 = vpop.f32.mrb[115].mxu0  ;;  %3376 = vmatprep.subr.bf16.mxu1 %v3718_v0  ;;  %v5512_v55 = vmax.f32 %v4264_v5, %v4425_v59  ;;  %v2372_v5 = vld [vmem:[%s5502_s2 + $0x590] sm:$0xff]  ;;  %v2373_v59 = vld [vmem:[%s5502_s2 + $0x598] sm:$0xff] }
 0x1fc   :  { %v3599_v4 = vpack.c.bf16 %v2373_v59, %v2372_v5  ;;  %v2236_v59 = vld [vmem:[%s5502_s2 + $0x150] sm:$0xff] }
 0x1fd   :  { %764 = vst [vmem:[%s5503_s4 + $0x40] sm:$0xff] %v748_v49  ;;  %v733_v40 = vmax.f32 %v5512_v55, %v717_v53 }
 0x1fe   :  { %v535_v52 = vpop.f32.mrb[116].mxu0  ;;  %3378 = vmatpush3.bf16.msra.mxu1 %v3377_v48 }
 0x1ff   :  { %v749_v43 = vmax.f32 %v733_v40, 0.0  ;;  %v718_v32 = vmax.f32 %v4473_v22, %v535_v52  ;;  %v537_v41 = vpop.f32.mrb[117].mxu0  ;;  %3379 = vmatprep.subr.bf16.mxu1 %v3718_v0  ;;  %v5513_v22 = vmax.f32 %v4269_v8, %v4436_v9  ;;  %v2231_v8 = vld [vmem:[%s5502_s2 + $0x128] sm:$0xff]  ;;  %v2374_v9 = vld [vmem:[%s5502_s2 + $0x5a0] sm:$0xff] }
 0x200   :  { %v3386_v54 = vpack.c.bf16 %v2231_v8, %v2230_v27  ;;  %v3602_v48 = vpack.c.bf16 %v2375_v7, %v2374_v9  ;;  %v2234_v52 = vld [vmem:[%s5502_s2 + $0x140] sm:$0xff]  ;;  %v2383_v7 = vld [vmem:[%s5502_s2 + $0x5e8] sm:$0xff] }
 0x201   :  { %765 = vst [vmem:[%s5503_s4 + $0x48] sm:$0xff] %v749_v43  ;;  %v734_v26 = vmax.f32 %v5513_v22, %v718_v32  ;;  %2791 = vmatmul.mubr.f32.vlgmr.msra.gmra.mrb[2].mxu1 %v740_v30  ;;  %3071 = vmatmul.mubr.f32.vlgmr.msra.gmra.mrb[128].mxu0 %v749_v43  ;;  %v2379_v43 = vld [vmem:[%s5502_s2 + $0x5c8] sm:$0xff] }
 0x202   :  { %v540_v44 = vpop.f32.mrb[118].mxu0  ;;  %3381 = vmatpush3.bf16.msra.mxu1 %v3380_v19  ;;  %3597 = vmatpush3.bf16.msra.mxu0 %v3596_v57 }
 0x203   :  { %v750_v50 = vmax.f32 %v734_v26, 0.0  ;;  %v719_v60 = vmax.f32 %v4475_v16, %v540_v44  ;;  %v542_v35 = vpop.f32.mrb[119].mxu0  ;;  %3382 = vmatprep.subr.bf16.mxu1 %v3718_v0  ;;  %3598 = vmatprep.subr.bf16.mxu0 %v3718_v0  ;;  %v5514_v16 = vmax.f32 %v4277_v13, %v4441_v15  ;;  %v2233_v13 = vld [vmem:[%s5502_s2 + $0x138] sm:$0xff]  ;;  %v2376_v15 = vld [vmem:[%s5502_s2 + $0x5b0] sm:$0xff] }
 0x204   :  { %2825 = vmatprep.mubr.msk.f32.mxu1 %vm3719_vm0, %v3720_v63  ;;  %3140 = vmatprep.mubr.msk.f32.mxu0 %vm3719_vm0, %v3720_v63  ;;  %v3389_v55 = vpack.c.bf16 %v2233_v13, %v2232_v11  ;;  %v3605_v40 = vpack.c.bf16 %v2377_v2, %v2376_v15  ;;  %v2238_v35 = vld [vmem:[%s5502_s2 + $0x160] sm:$0xff]  ;;  %v2240_v11 = vld [vmem:[%s5502_s2 + $0x170] sm:$0xff] }
 0x205   :  { %766 = vst [vmem:[%s5503_s4 + $0x50] sm:$0xff] %v750_v50  ;;  %v4699_v30 = vmax.f32 %v5514_v16, %v719_v60  ;;  %v2242_v2 = vld [vmem:[%s5502_s2 + $0x180] sm:$0xff] }
 0x206   :  { %v545_v42 = vpop.f32.mrb[120].mxu0  ;;  %3384 = vmatpush3.bf16.msra.mxu1 %v3383_v3  ;;  %3600 = vmatpush3.bf16.msra.mxu0 %v3599_v4  ;;  %v2381_v3 = vld [vmem:[%s5502_s2 + $0x5d8] sm:$0xff] }
 0x207   :  { %v751_v49 = vmax.f32 %v4699_v30, 0.0  ;;  %v720_v53 = vmax.f32 %v4477_v10, %v545_v42  ;;  %v547_v51 = vpop.f32.mrb[121].mxu0  ;;  %3385 = vmatprep.subr.bf16.mxu1 %v3718_v0  ;;  %3601 = vmatprep.subr.bf16.mxu0 %v3718_v0  ;;  %v5515_v10 = vmax.f32 %v4286_v18, %v4445_v21  ;;  %v2235_v18 = vld [vmem:[%s5502_s2 + $0x148] sm:$0xff]  ;;  %v2378_v21 = vld [vmem:[%s5502_s2 + $0x5c0] sm:$0xff] }
 0x208   :  { %v3392_v56 = vpack.c.bf16 %v2235_v18, %v2234_v52  ;;  %v3608_v5 = vpack.c.bf16 %v2379_v43, %v2378_v21  ;;  %v2385_v51 = vld [vmem:[%s5502_s2 + $0x5f8] sm:$0xff]  ;;  %v2244_v52 = vld [vmem:[%s5502_s2 + $0x190] sm:$0xff]  ;;  %v2246_v43 = vld [vmem:[%s5502_s2 + $0x1a0] sm:$0xff] }
 0x209   :  { %767 = vst [vmem:[%s5503_s4 + $0x58] sm:$0xff] %v751_v49  ;;  %v736_v1 = vmax.f32 %v5515_v10, %v720_v53  ;;  %v2243_v10 = vld [vmem:[%s5502_s2 + $0x188] sm:$0xff] }
 0x20a   :  { %v550_v46 = vpop.f32.mrb[122].mxu0  ;;  %3387 = vmatpush3.bf16.msra.mxu1 %v3386_v54  ;;  %3603 = vmatpush3.bf16.msra.mxu0 %v3602_v48  ;;  %v2407_v30 = vld [vmem:[%s5502_s2 + $0x6a8] sm:$0xff] }
 0x20b   :  { %v752_v19 = vmax.f32 %v736_v1, 0.0  ;;  %v721_v57 = vmax.f32 %v4479_v61, %v550_v46  ;;  %v552_v6 = vpop.f32.mrb[123].mxu0  ;;  %3388 = vmatprep.subr.bf16.mxu1 %v3718_v0  ;;  %3604 = vmatprep.subr.bf16.mxu0 %v3718_v0  ;;  %v5516_v61 = vmax.f32 %v4295_v23, %v4449_v25  ;;  %v2237_v23 = vld [vmem:[%s5502_s2 + $0x158] sm:$0xff]  ;;  %v2380_v25 = vld [vmem:[%s5502_s2 + $0x5d0] sm:$0xff]  ;;  %v2402_v1 = vld [vmem:[%s5502_s2 + $0x680] sm:$0xff] }
 0x20c   :  { %v3395_v50 = vpack.c.bf16 %v2237_v23, %v2236_v59  ;;  %v3611_v60 = vpack.c.bf16 %v2381_v3, %v2380_v25  ;;  %v2403_v46 = vld [vmem:[%s5502_s2 + $0x688] sm:$0xff]  ;;  %v2405_v6 = vld [vmem:[%s5502_s2 + $0x698] sm:$0xff]  ;;  %v2250_v23 = vld [vmem:[%s5502_s2 + $0x1c0] sm:$0xff] }
 0x20d   :  { %768 = vst [vmem:[%s5503_s4 + $0x60] sm:$0xff] %v752_v19  ;;  %v4746_v32 = vmax.f32 %v5516_v61, %v721_v57  ;;  %v2245_v19 = vld [vmem:[%s5502_s2 + $0x198] sm:$0xff]  ;;  %v2404_v57 = vld [vmem:[%s5502_s2 + $0x690] sm:$0xff]  ;;  %v2251_v25 = vld [vmem:[%s5502_s2 + $0x1c8] sm:$0xff] }
 0x20e   :  { %v555_v41 = vpop.f32.mrb[124].mxu0  ;;  %3390 = vmatpush3.bf16.msra.mxu1 %v3389_v55  ;;  %3606 = vmatpush3.bf16.msra.mxu0 %v3605_v40  ;;  %v3404_v55 = vpack.c.bf16 %v2243_v10, %v2242_v2  ;;  %v3644_v40 = vpack.c.bf16 %v2403_v46, %v2402_v1  ;;  %v3407_v18 = vpack.c.bf16 %v2245_v19, %v2244_v52  ;;  %v2409_v59 = vld [vmem:[%s5502_s2 + $0x6b8] sm:$0xff]  ;;  %v2410_v3 = vld [vmem:[%s5502_s2 + $0x6c0] sm:$0xff]  ;;  %v2259_v10 = vld [vmem:[%s5502_s2 + $0x208] sm:$0xff] }
 0x20f   :  { %v753_v22 = vmax.f32 %v4746_v32, 0.0  ;;  %v722_v26 = vmax.f32 %v4481_v47, %v555_v41  ;;  %v557_v44 = vpop.f32.mrb[125].mxu0  ;;  %3391 = vmatprep.subr.bf16.mxu1 %v3718_v0  ;;  %3607 = vmatprep.subr.bf16.mxu0 %v3718_v0  ;;  %v5517_v47 = vmax.f32 %v4304_v28, %v4453_v31  ;;  %v2239_v28 = vld [vmem:[%s5502_s2 + $0x168] sm:$0xff]  ;;  %v2382_v31 = vld [vmem:[%s5502_s2 + $0x5e0] sm:$0xff]  ;;  %v3647_v21 = vpack.c.bf16 %v2405_v6, %v2404_v57  ;;  %v2248_v41 = vld [vmem:[%s5502_s2 + $0x1b0] sm:$0xff] }
 0x210   :  { %v3398_v54 = vpack.c.bf16 %v2239_v28, %v2238_v35  ;;  %v3614_v48 = vpack.c.bf16 %v2383_v7, %v2382_v31  ;;  %v2412_v35 = vld [vmem:[%s5502_s2 + $0x6d0] sm:$0xff]  ;;  %v2254_v31 = vld [vmem:[%s5502_s2 + $0x1e0] sm:$0xff]  ;;  %v2255_v7 = vld [vmem:[%s5502_s2 + $0x1e8] sm:$0xff] }
 0x211   :  { %769 = vst [vmem:[%s5503_s4 + $0x68] sm:$0xff] %v753_v22  ;;  %v738_v4 = vmax.f32 %v5517_v47, %v722_v26  ;;  %v2411_v47 = vld [vmem:[%s5502_s2 + $0x6c8] sm:$0xff]  ;;  %v2258_v2 = vld [vmem:[%s5502_s2 + $0x200] sm:$0xff]  ;;  %v2260_v52 = vld [vmem:[%s5502_s2 + $0x210] sm:$0xff] }
 0x212   :  { %v560_v27 = vpop.f32.mrb[126].mxu0  ;;  %3393 = vmatpush3.bf16.msra.mxu1 %v3392_v56  ;;  %3609 = vmatpush3.bf16.msra.mxu0 %v3608_v5  ;;  %v2249_v56 = vld [vmem:[%s5502_s2 + $0x1b8] sm:$0xff]  ;;  %v2408_v5 = vld [vmem:[%s5502_s2 + $0x6b0] sm:$0xff]  ;;  %v2434_v1 = vld [vmem:[%s5502_s2 + $0x780] sm:$0xff] }
 0x213   :  { %v754_v8 = vmax.f32 %v738_v4, 0.0  ;;  %v723_v9 = vmax.f32 %v4483_v37, %v560_v27  ;;  %3394 = vmatprep.subr.bf16.mxu1 %v3718_v0  ;;  %3610 = vmatprep.subr.bf16.mxu0 %v3718_v0  ;;  %v562_v16 = vpop.f32.mrb[127].mxu0  ;;  %v5518_v37 = vmax.f32 %v4313_v34, %v4457_v39  ;;  %v2241_v34 = vld [vmem:[%s5502_s2 + $0x178] sm:$0xff]  ;;  %v2384_v39 = vld [vmem:[%s5502_s2 + $0x5f0] sm:$0xff]  ;;  %v3413_v26 = vpack.c.bf16 %v2249_v56, %v2248_v41  ;;  %v2435_v46 = vld [vmem:[%s5502_s2 + $0x788] sm:$0xff] }
 0x214   :  { %v3401_v13 = vpack.c.bf16 %v2241_v34, %v2240_v11  ;;  %v3617_v15 = vpack.c.bf16 %v2385_v51, %v2384_v39  ;;  %v3653_v44 = vpack.c.bf16 %v2409_v59, %v2408_v5  ;;  %v3416_v4 = vpack.c.bf16 %v2251_v25, %v2250_v23  ;;  %v2414_v16 = vld [vmem:[%s5502_s2 + $0x6e0] sm:$0xff]  ;;  %v2256_v11 = vld [vmem:[%s5502_s2 + $0x1f0] sm:$0xff]  ;;  %v2257_v34 = vld [vmem:[%s5502_s2 + $0x1f8] sm:$0xff] }
 0x215   :  { %770 = vst [vmem:[%s5503_s4 + $0x70] sm:$0xff] %v754_v8  ;;  %v4793_v42 = vmax.f32 %v5518_v37, %v723_v9  ;;  %v3656_v27 = vpack.c.bf16 %v2411_v47, %v2410_v3  ;;  %v2413_v8 = vld [vmem:[%s5502_s2 + $0x6d8] sm:$0xff]  ;;  %v2415_v37 = vld [vmem:[%s5502_s2 + $0x6e8] sm:$0xff]  ;;  %v2416_v39 = vld [vmem:[%s5502_s2 + $0x6f0] sm:$0xff] }
 0x216   :  { %3396 = vmatpush3.bf16.msra.mxu1 %v3395_v50  ;;  %3612 = vmatpush3.bf16.msra.mxu0 %v3611_v60  ;;  %v2252_v50 = vld [vmem:[%s5502_s2 + $0x1d0] sm:$0xff]  ;;  %v2253_v60 = vld [vmem:[%s5502_s2 + $0x1d8] sm:$0xff]  ;;  %v3659_v28 = vpack.c.bf16 %v2413_v8, %v2412_v35  ;;  %v2439_v32 = vld [vmem:[%s5502_s2 + $0x7a8] sm:$0xff] }
 0x217   :  { %v755_v53 = vmax.f32 %v4793_v42, 0.0  ;;  %3397 = vmatprep.subr.bf16.mxu1 %v3718_v0  ;;  %3613 = vmatprep.subr.bf16.mxu0 %v3718_v0  ;;  %v3419_v9 = vpack.c.bf16 %v2253_v60, %v2252_v50  ;;  %v2417_v51 = vld [vmem:[%s5502_s2 + $0x6f8] sm:$0xff]  ;;  %v2436_v57 = vld [vmem:[%s5502_s2 + $0x790] sm:$0xff]  ;;  %v2266_v5 = vld [vmem:[%s5502_s2 + $0x240] sm:$0xff] }
 0x218   :  { %v2261_v19 = vld [vmem:[%s5502_s2 + $0x218] sm:$0xff]  ;;  %v2267_v59 = vld [vmem:[%s5502_s2 + $0x248] sm:$0xff]  ;;  %v2268_v3 = vld [vmem:[%s5502_s2 + $0x250] sm:$0xff] }
 0x219   :  { %771 = vst [vmem:[%s5503_s4 + $0x78] sm:$0xff] %v755_v53  ;;  %v2437_v6 = vld [vmem:[%s5502_s2 + $0x798] sm:$0xff]  ;;  %v3440_v23 = vpack.c.bf16 %v2267_v59, %v2266_v5  ;;  %v2270_v35 = vld [vmem:[%s5502_s2 + $0x260] sm:$0xff]  ;;  %v2271_v8 = vld [vmem:[%s5502_s2 + $0x268] sm:$0xff] }
 0x21a   :  { %3399 = vmatpush3.bf16.msra.mxu1 %v3398_v54  ;;  %3615 = vmatpush3.bf16.msra.mxu0 %v3614_v48  ;;  %v3422_v54 = vpack.c.bf16 %v2255_v7, %v2254_v31  ;;  %v3662_v48 = vpack.c.bf16 %v2415_v37, %v2414_v16  ;;  %v2269_v47 = vld [vmem:[%s5502_s2 + $0x258] sm:$0xff]  ;;  %v3446_v31 = vpack.c.bf16 %v2271_v8, %v2270_v35  ;;  %v2272_v16 = vld [vmem:[%s5502_s2 + $0x270] sm:$0xff] }
 0x21b   :  { %3400 = vmatprep.subr.bf16.mxu1 %v3718_v0  ;;  %3616 = vmatprep.subr.bf16.mxu0 %v3718_v0  ;;  %v3443_v50 = vpack.c.bf16 %v2269_v47, %v2268_v3  ;;  %v2273_v37 = vld [vmem:[%s5502_s2 + $0x278] sm:$0xff] }
 0x21c   :  { %v2281_v42 = vld [vmem:[%s5502_s2 + $0x2b8] sm:$0xff] }
 0x21d   :  { %v2301_v3 = vld [vmem:[%s5502_s2 + $0x358] sm:$0xff] }
 0x21e   :  { %3402 = vmatpush3.bf16.msra.mxu1 %v3401_v13  ;;  %3618 = vmatpush3.bf16.msra.mxu0 %v3617_v15  ;;  %v3425_v13 = vpack.c.bf16 %v2257_v34, %v2256_v11  ;;  %v3665_v15 = vpack.c.bf16 %v2417_v51, %v2416_v39  ;;  %v3449_v11 = vpack.c.bf16 %v2273_v37, %v2272_v16  ;;  %v2274_v39 = vld [vmem:[%s5502_s2 + $0x280] sm:$0xff]  ;;  %v2275_v51 = vld [vmem:[%s5502_s2 + $0x288] sm:$0xff]  ;;  %v2305_v35 = vld [vmem:[%s5502_s2 + $0x378] sm:$0xff] }
 0x21f   :  { %3403 = vmatprep.subr.bf16.mxu1 %v3718_v0  ;;  %3643 = vmatprep.subr.bf16.mxu0 %v3718_v0  ;;  %v2309_v16 = vld [vmem:[%s5502_s2 + $0x398] sm:$0xff] }
 0x221   :  { %2826 = vmatmul.mubr.f32.vlgmr.msra.gmra.mrb[4].mxu1 %v742_v12  ;;  %3141 = vmatmul.mubr.f32.vlgmr.msra.gmra.mrb[130].mxu0 %v751_v49  ;;  %v2406_v12 = vld [vmem:[%s5502_s2 + $0x6a0] sm:$0xff]  ;;  %v3410_v49 = vpack.c.bf16 %v2247_v36, %v2246_v43 }
 0x222   :  { %3405 = vmatpush3.bf16.msra.mxu1 %v3404_v55  ;;  %3645 = vmatpush3.bf16.msra.mxu0 %v3644_v40  ;;  %v3650_v61 = vpack.c.bf16 %v2407_v30, %v2406_v12  ;;  %v3428_v55 = vpack.c.bf16 %v2259_v10, %v2258_v2  ;;  %v3692_v40 = vpack.c.bf16 %v2435_v46, %v2434_v1  ;;  %v2262_v43 = vld [vmem:[%s5502_s2 + $0x220] sm:$0xff]  ;;  %v2264_v12 = vld [vmem:[%s5502_s2 + $0x230] sm:$0xff]  ;;  %v2265_v30 = vld [vmem:[%s5502_s2 + $0x238] sm:$0xff] }
 0x223   :  { %3406 = vmatprep.subr.bf16.mxu1 %v3718_v0  ;;  %3646 = vmatprep.subr.bf16.mxu0 %v3718_v0  ;;  %v3437_v41 = vpack.c.bf16 %v2265_v30, %v2264_v12  ;;  %v2277_v2 = vld [vmem:[%s5502_s2 + $0x298] sm:$0xff]  ;;  %v2278_v1 = vld [vmem:[%s5502_s2 + $0x2a0] sm:$0xff]  ;;  %v2279_v46 = vld [vmem:[%s5502_s2 + $0x2a8] sm:$0xff] }
 0x224   :  { %2860 = vmatprep.mubr.msk.f32.mxu1 %vm3719_vm0, %v3720_v63  ;;  %3210 = vmatprep.mubr.msk.f32.mxu0 %vm3719_vm0, %v3720_v63  ;;  %v3458_v14 = vpack.c.bf16 %v2279_v46, %v2278_v1  ;;  %v2292_v30 = vld [vmem:[%s5502_s2 + $0x310] sm:$0xff]  ;;  %v2318_v1 = vld [vmem:[%s5502_s2 + $0x3e0] sm:$0xff]  ;;  %v2319_v46 = vld [vmem:[%s5502_s2 + $0x3e8] sm:$0xff] }
 0x226   :  { %3408 = vmatpush3.bf16.msra.mxu1 %v3407_v18  ;;  %3648 = vmatpush3.bf16.msra.mxu0 %v3647_v21  ;;  %v3431_v18 = vpack.c.bf16 %v2261_v19, %v2260_v52  ;;  %v3695_v21 = vpack.c.bf16 %v2437_v6, %v2436_v57  ;;  %v2284_v19 = vld [vmem:[%s5502_s2 + $0x2d0] sm:$0xff]  ;;  %v2285_v57 = vld [vmem:[%s5502_s2 + $0x2d8] sm:$0xff] }
 0x227   :  { %3409 = vmatprep.subr.bf16.mxu1 %v3718_v0  ;;  %3649 = vmatprep.subr.bf16.mxu0 %v3718_v0  ;;  %v3467_v6 = vpack.c.bf16 %v2285_v57, %v2284_v19  ;;  %v2323_v19 = vld [vmem:[%s5502_s2 + $0x408] sm:$0xff] }
 0x22a   :  { %3411 = vmatpush3.bf16.msra.mxu1 %v3410_v49  ;;  %3651 = vmatpush3.bf16.msra.mxu0 %v3650_v61  ;;  %v2440_v49 = vld [vmem:[%s5502_s2 + $0x7b0] sm:$0xff]  ;;  %v2441_v61 = vld [vmem:[%s5502_s2 + $0x7b8] sm:$0xff] }
 0x22b   :  { %3412 = vmatprep.subr.bf16.mxu1 %v3718_v0  ;;  %3652 = vmatprep.subr.bf16.mxu0 %v3718_v0  ;;  %v3701_v56 = vpack.c.bf16 %v2441_v61, %v2440_v49  ;;  %v2293_v49 = vld [vmem:[%s5502_s2 + $0x318] sm:$0xff] }
 0x22c   :  { %v3479_v61 = vpack.c.bf16 %v2293_v49, %v2292_v30  ;;  %v2332_v30 = vld [vmem:[%s5502_s2 + $0x450] sm:$0xff]  ;;  %v2333_v49 = vld [vmem:[%s5502_s2 + $0x458] sm:$0xff] }
 0x22e   :  { %3414 = vmatpush3.bf16.msra.mxu1 %v3413_v26  ;;  %3654 = vmatpush3.bf16.msra.mxu0 %v3653_v44  ;;  %v2442_v26 = vld [vmem:[%s5502_s2 + $0x7c0] sm:$0xff]  ;;  %v2443_v44 = vld [vmem:[%s5502_s2 + $0x7c8] sm:$0xff] }
 0x22f   :  { %3415 = vmatprep.subr.bf16.mxu1 %v3718_v0  ;;  %3655 = vmatprep.subr.bf16.mxu0 %v3718_v0  ;;  %v3704_v25 = vpack.c.bf16 %v2443_v44, %v2442_v26  ;;  %v2298_v26 = vld [vmem:[%s5502_s2 + $0x340] sm:$0xff]  ;;  %v2299_v44 = vld [vmem:[%s5502_s2 + $0x348] sm:$0xff] }
 0x232   :  { %3417 = vmatpush3.bf16.msra.mxu1 %v3416_v4  ;;  %3657 = vmatpush3.bf16.msra.mxu0 %v3656_v27  ;;  %v2444_v4 = vld [vmem:[%s5502_s2 + $0x7d0] sm:$0xff]  ;;  %v2445_v27 = vld [vmem:[%s5502_s2 + $0x7d8] sm:$0xff] }
 0x233   :  { %3418 = vmatprep.subr.bf16.mxu1 %v3718_v0  ;;  %3658 = vmatprep.subr.bf16.mxu0 %v3718_v0  ;;  %v3707_v60 = vpack.c.bf16 %v2445_v27, %v2444_v4  ;;  %v2302_v4 = vld [vmem:[%s5502_s2 + $0x360] sm:$0xff]  ;;  %v2303_v27 = vld [vmem:[%s5502_s2 + $0x368] sm:$0xff] }
 0x236   :  { %3420 = vmatpush3.bf16.msra.mxu1 %v3419_v9  ;;  %3660 = vmatpush3.bf16.msra.mxu0 %v3659_v28  ;;  %v2446_v9 = vld [vmem:[%s5502_s2 + $0x7e0] sm:$0xff]  ;;  %v2447_v28 = vld [vmem:[%s5502_s2 + $0x7e8] sm:$0xff] }
 0x237   :  { %3421 = vmatprep.subr.bf16.mxu1 %v3718_v0  ;;  %3661 = vmatprep.subr.bf16.mxu0 %v3718_v0  ;;  %v3710_v7 = vpack.c.bf16 %v2447_v28, %v2446_v9  ;;  %v2306_v9 = vld [vmem:[%s5502_s2 + $0x380] sm:$0xff]  ;;  %v2307_v28 = vld [vmem:[%s5502_s2 + $0x388] sm:$0xff] }
 0x23a   :  { %3423 = vmatpush3.bf16.msra.mxu1 %v3422_v54  ;;  %3663 = vmatpush3.bf16.msra.mxu0 %v3662_v48  ;;  %v2448_v54 = vld [vmem:[%s5502_s2 + $0x7f0] sm:$0xff]  ;;  %v2449_v48 = vld [vmem:[%s5502_s2 + $0x7f8] sm:$0xff] }
 0x23b   :  { %3424 = vmatprep.subr.bf16.mxu1 %v3718_v0  ;;  %3664 = vmatprep.subr.bf16.mxu0 %v3718_v0  ;;  %v3713_v34 = vpack.c.bf16 %v2449_v48, %v2448_v54  ;;  %v2310_v54 = vld [vmem:[%s5502_s2 + $0x3a0] sm:$0xff]  ;;  %v2311_v48 = vld [vmem:[%s5502_s2 + $0x3a8] sm:$0xff] }
 0x23e   :  { %3426 = vmatpush3.bf16.msra.mxu1 %v3425_v13  ;;  %3666 = vmatpush3.bf16.msra.mxu0 %v3665_v15  ;;  %v3452_v13 = vpack.c.bf16 %v2275_v51, %v2274_v39  ;;  %v2276_v15 = vld [vmem:[%s5502_s2 + $0x290] sm:$0xff]  ;;  %v2314_v39 = vld [vmem:[%s5502_s2 + $0x3c0] sm:$0xff]  ;;  %v2315_v51 = vld [vmem:[%s5502_s2 + $0x3c8] sm:$0xff] }
 0x23f   :  { %3427 = vmatprep.subr.bf16.mxu1 %v3718_v0  ;;  %3691 = vmatprep.subr.bf16.mxu0 %v3718_v0  ;;  %v3455_v10 = vpack.c.bf16 %v2277_v2, %v2276_v15  ;;  %v2316_v15 = vld [vmem:[%s5502_s2 + $0x3d0] sm:$0xff]  ;;  %v2317_v2 = vld [vmem:[%s5502_s2 + $0x3d8] sm:$0xff] }
 0x241   :  { %2861 = vmatmul.mubr.f32.vlgmr.msra.gmra.mrb[6].mxu1 %v743_v33  ;;  %3211 = vmatmul.mubr.f32.vlgmr.msra.gmra.mrb[132].mxu0 %v753_v22  ;;  %v2438_v33 = vld [vmem:[%s5502_s2 + $0x7a0] sm:$0xff]  ;;  %v3434_v22 = vpack.c.bf16 %v2263_v58, %v2262_v43  ;;  %v2288_v58 = vld [vmem:[%s5502_s2 + $0x2f0] sm:$0xff] }
 0x242   :  { %3429 = vmatpush3.bf16.msra.mxu1 %v3428_v55  ;;  %3693 = vmatpush3.bf16.msra.mxu0 %v3692_v40  ;;  %v3698_v36 = vpack.c.bf16 %v2439_v32, %v2438_v33  ;;  %v2282_v55 = vld [vmem:[%s5502_s2 + $0x2c0] sm:$0xff]  ;;  %v2283_v40 = vld [vmem:[%s5502_s2 + $0x2c8] sm:$0xff]  ;;  %v2289_v33 = vld [vmem:[%s5502_s2 + $0x2f8] sm:$0xff] }
 0x243   :  { %3430 = vmatprep.subr.bf16.mxu1 %v3718_v0  ;;  %3694 = vmatprep.subr.bf16.mxu0 %v3718_v0  ;;  %v3464_v52 = vpack.c.bf16 %v2283_v40, %v2282_v55  ;;  %v3473_v32 = vpack.c.bf16 %v2289_v33, %v2288_v58  ;;  %v2321_v55 = vld [vmem:[%s5502_s2 + $0x3f8] sm:$0xff]  ;;  %v2327_v58 = vld [vmem:[%s5502_s2 + $0x428] sm:$0xff] }
 0x244   :  { %2895 = vmatprep.mubr.msk.f32.mxu1 %vm3719_vm0, %v3720_v63  ;;  %3280 = vmatprep.mubr.msk.f32.mxu0 %vm3719_vm0, %v3720_v63 }
 0x246   :  { %3432 = vmatpush3.bf16.msra.mxu1 %v3431_v18  ;;  %3696 = vmatpush3.bf16.msra.mxu0 %v3695_v21  ;;  %v2286_v18 = vld [vmem:[%s5502_s2 + $0x2e0] sm:$0xff]  ;;  %v2287_v21 = vld [vmem:[%s5502_s2 + $0x2e8] sm:$0xff] }
 0x247   :  { %3433 = vmatprep.subr.bf16.mxu1 %v3718_v0  ;;  %3697 = vmatprep.subr.bf16.mxu0 %v3718_v0  ;;  %v3470_v43 = vpack.c.bf16 %v2287_v21, %v2286_v18  ;;  %v2325_v18 = vld [vmem:[%s5502_s2 + $0x418] sm:$0xff] }
 0x24a   :  { %3435 = vmatpush3.bf16.msra.mxu1 %v3434_v22  ;;  %3699 = vmatpush3.bf16.msra.mxu0 %v3698_v36  ;;  %v2290_v22 = vld [vmem:[%s5502_s2 + $0x300] sm:$0xff]  ;;  %v2291_v36 = vld [vmem:[%s5502_s2 + $0x308] sm:$0xff] }
 0x24b   :  { %3436 = vmatprep.subr.bf16.mxu1 %v3718_v0  ;;  %3700 = vmatprep.subr.bf16.mxu0 %v3718_v0  ;;  %v3476_v12 = vpack.c.bf16 %v2291_v36, %v2290_v22  ;;  %v2330_v22 = vld [vmem:[%s5502_s2 + $0x440] sm:$0xff]  ;;  %v2331_v36 = vld [vmem:[%s5502_s2 + $0x448] sm:$0xff] }
 0x24e   :  { %3438 = vmatpush3.bf16.msra.mxu1 %v3437_v41  ;;  %3702 = vmatpush3.bf16.msra.mxu0 %v3701_v56  ;;  %v2294_v41 = vld [vmem:[%s5502_s2 + $0x320] sm:$0xff]  ;;  %v2295_v56 = vld [vmem:[%s5502_s2 + $0x328] sm:$0xff] }
 0x24f   :  { %3439 = vmatprep.subr.bf16.mxu1 %v3718_v0  ;;  %3703 = vmatprep.subr.bf16.mxu0 %v3718_v0  ;;  %v3482_v5 = vpack.c.bf16 %v2295_v56, %v2294_v41  ;;  %v2334_v41 = vld [vmem:[%s5502_s2 + $0x460] sm:$0xff]  ;;  %v2335_v56 = vld [vmem:[%s5502_s2 + $0x468] sm:$0xff] }
 0x252   :  { %3441 = vmatpush3.bf16.msra.mxu1 %v3440_v23  ;;  %3705 = vmatpush3.bf16.msra.mxu0 %v3704_v25  ;;  %v3488_v23 = vpack.c.bf16 %v2299_v44, %v2298_v26  ;;  %v2300_v25 = vld [vmem:[%s5502_s2 + $0x350] sm:$0xff]  ;;  %v3542_v44 = vpack.c.bf16 %v2335_v56, %v2334_v41 }
 0x253   :  { %3442 = vmatprep.subr.bf16.mxu1 %v3718_v0  ;;  %3706 = vmatprep.subr.bf16.mxu0 %v3718_v0  ;;  %v3491_v47 = vpack.c.bf16 %v2301_v3, %v2300_v25  ;;  %v2337_v25 = vld [vmem:[%s5502_s2 + $0x478] sm:$0xff] }
 0x256   :  { %3444 = vmatpush3.bf16.msra.mxu1 %v3443_v50  ;;  %3708 = vmatpush3.bf16.msra.mxu0 %v3707_v60  ;;  %v3494_v50 = vpack.c.bf16 %v2303_v27, %v2302_v4  ;;  %v2304_v60 = vld [vmem:[%s5502_s2 + $0x370] sm:$0xff]  ;;  %v2355_v4 = vld [vmem:[%s5502_s2 + $0x508] sm:$0xff] }
 0x257   :  { %3445 = vmatprep.subr.bf16.mxu1 %v3718_v0  ;;  %3709 = vmatprep.subr.bf16.mxu0 %v3718_v0  ;;  %v3497_v8 = vpack.c.bf16 %v2305_v35, %v2304_v60  ;;  %v2357_v60 = vld [vmem:[%s5502_s2 + $0x518] sm:$0xff]  ;;  %v1481_v35 = vld [vmem:[%s5503_s4 + $0x40] sm:$0xff] }
 0x25a   :  { %3447 = vmatpush3.bf16.msra.mxu1 %v3446_v31  ;;  %3711 = vmatpush3.bf16.msra.mxu0 %v3710_v7  ;;  %v3500_v31 = vpack.c.bf16 %v2307_v28, %v2306_v9  ;;  %v2308_v7 = vld [vmem:[%s5502_s2 + $0x390] sm:$0xff]  ;;  %v2358_v9 = vld [vmem:[%s5502_s2 + $0x520] sm:$0xff]  ;;  %v2359_v28 = vld [vmem:[%s5502_s2 + $0x528] sm:$0xff] }
 0x25b   :  { %3448 = vmatprep.subr.bf16.mxu1 %v3718_v0  ;;  %3712 = vmatprep.subr.bf16.mxu0 %v3718_v0  ;;  %v3503_v37 = vpack.c.bf16 %v2309_v16, %v2308_v7  ;;  %v2360_v7 = vld [vmem:[%s5502_s2 + $0x530] sm:$0xff]  ;;  %v2361_v16 = vld [vmem:[%s5502_s2 + $0x538] sm:$0xff] }
 0x25e   :  { %3450 = vmatpush3.bf16.msra.mxu1 %v3449_v11  ;;  %3714 = vmatpush3.bf16.msra.mxu0 %v3713_v34  ;;  %v3506_v11 = vpack.c.bf16 %v2311_v48, %v2310_v54  ;;  %v2362_v54 = vld [vmem:[%s5502_s2 + $0x540] sm:$0xff]  ;;  %v2363_v48 = vld [vmem:[%s5502_s2 + $0x548] sm:$0xff] }
 0x25f   :  { %3451 = vmatprep.subr.bf16.mxu1 %v3718_v0 }
 0x261   :  { %2896 = vmatmul.mubr.f32.vlgmr.msra.gmra.mrb[8].mxu1 %v744_v20  ;;  %3281 = vmatmul.mubr.f32.vlgmr.msra.gmra.mrb[134].mxu0 %v755_v53  ;;  %v2280_v20 = vld [vmem:[%s5502_s2 + $0x2b0] sm:$0xff] }
 0x262   :  { %3453 = vmatpush3.bf16.msra.mxu1 %v3452_v13  ;;  %2930 = vmatprep.mubr.msk.f32.mxu1 %vm3719_vm0, %v3720_v63  ;;  %v3461_v53 = vpack.c.bf16 %v2281_v42, %v2280_v20  ;;  %v3512_v13 = vpack.c.bf16 %v2315_v51, %v2314_v39  ;;  %v3518_v42 = vpack.c.bf16 %v2319_v46, %v2318_v1  ;;  %v2366_v39 = vld [vmem:[%s5502_s2 + $0x560] sm:$0xff]  ;;  %v2367_v51 = vld [vmem:[%s5502_s2 + $0x568] sm:$0xff] }
 0x263   :  { %3454 = vmatprep.subr.bf16.mxu1 %v3718_v0  ;;  %v3590_v46 = vpack.c.bf16 %v2367_v51, %v2366_v39 }
 0x266   :  { %3456 = vmatpush3.bf16.msra.mxu1 %v3455_v10  ;;  %v3515_v10 = vpack.c.bf16 %v2317_v2, %v2316_v15 }
 0x267   :  { %3457 = vmatprep.subr.bf16.mxu1 %v3718_v0 }
 0x26a   :  { %3459 = vmatpush3.bf16.msra.mxu1 %v3458_v14 }
 0x26b   :  { %3460 = vmatprep.subr.bf16.mxu1 %v3718_v0 }
 0x26e   :  { %3462 = vmatpush3.bf16.msra.mxu1 %v3461_v53  ;;  %v2320_v53 = vld [vmem:[%s5502_s2 + $0x3f0] sm:$0xff] }
 0x26f   :  { %3463 = vmatprep.subr.bf16.mxu1 %v3718_v0  ;;  %v3521_v40 = vpack.c.bf16 %v2321_v55, %v2320_v53  ;;  %v2386_v53 = vld [vmem:[%s5502_s2 + $0x600] sm:$0xff]  ;;  %v2387_v55 = vld [vmem:[%s5502_s2 + $0x608] sm:$0xff] }
 0x272   :  { %3465 = vmatpush3.bf16.msra.mxu1 %v3464_v52  ;;  %v2322_v52 = vld [vmem:[%s5502_s2 + $0x400] sm:$0xff] }
 0x273   :  { %3466 = vmatprep.subr.bf16.mxu1 %v3718_v0  ;;  %v3524_v57 = vpack.c.bf16 %v2323_v19, %v2322_v52  ;;  %v2388_v52 = vld [vmem:[%s5502_s2 + $0x610] sm:$0xff]  ;;  %v2389_v19 = vld [vmem:[%s5502_s2 + $0x618] sm:$0xff] }
 0x276   :  { %3468 = vmatpush3.bf16.msra.mxu1 %v3467_v6  ;;  %v2324_v6 = vld [vmem:[%s5502_s2 + $0x410] sm:$0xff] }
 0x277   :  { %3469 = vmatprep.subr.bf16.mxu1 %v3718_v0  ;;  %v3527_v21 = vpack.c.bf16 %v2325_v18, %v2324_v6  ;;  %v3623_v6 = vpack.c.bf16 %v2389_v19, %v2388_v52  ;;  %v2390_v18 = vld [vmem:[%s5502_s2 + $0x620] sm:$0xff] }
 0x27a   :  { %3471 = vmatpush3.bf16.msra.mxu1 %v3470_v43  ;;  %v2326_v43 = vld [vmem:[%s5502_s2 + $0x420] sm:$0xff] }
 0x27b   :  { %3472 = vmatprep.subr.bf16.mxu1 %v3718_v0  ;;  %v3530_v33 = vpack.c.bf16 %v2327_v58, %v2326_v43  ;;  %v2392_v58 = vld [vmem:[%s5502_s2 + $0x630] sm:$0xff] }
 0x27e   :  { %3474 = vmatpush3.bf16.msra.mxu1 %v3473_v32 }
 0x27f   :  { %3475 = vmatprep.subr.bf16.mxu1 %v3718_v0 }
 0x281   :  { %2931 = vmatmul.mubr.f32.vlgmr.msra.gmra.mrb[10].mxu1 %v745_v62  ;;  %v2297_v62 = vld [vmem:[%s5502_s2 + $0x338] sm:$0xff] }
 0x282   :  { %3477 = vmatpush3.bf16.msra.mxu1 %v3476_v12  ;;  %2965 = vmatprep.mubr.msk.f32.mxu1 %vm3719_vm0, %v3720_v63  ;;  %v3485_v59 = vpack.c.bf16 %v2297_v62, %v2296_v24  ;;  %v3536_v12 = vpack.c.bf16 %v2331_v36, %v2330_v22  ;;  %v2396_v36 = vld [vmem:[%s5502_s2 + $0x650] sm:$0xff] }
 0x283   :  { %3478 = vmatprep.subr.bf16.mxu1 %v3718_v0 }
 0x286   :  { %3480 = vmatpush3.bf16.msra.mxu1 %v3479_v61  ;;  %v3539_v61 = vpack.c.bf16 %v2333_v49, %v2332_v30  ;;  %v2398_v49 = vld [vmem:[%s5502_s2 + $0x660] sm:$0xff] }
 0x287   :  { %3481 = vmatprep.subr.bf16.mxu1 %v3718_v0 }
 0x28a   :  { %3483 = vmatpush3.bf16.msra.mxu1 %v3482_v5 }
 0x28b   :  { %3484 = vmatprep.subr.bf16.mxu1 %v3718_v0 }
 0x28e   :  { %3486 = vmatpush3.bf16.msra.mxu1 %v3485_v59 }
 0x28f   :  { %3487 = vmatprep.subr.bf16.mxu1 %v3718_v0 }
 0x292   :  { %3489 = vmatpush3.bf16.msra.mxu1 %v3488_v23  ;;  %v2336_v23 = vld [vmem:[%s5502_s2 + $0x470] sm:$0xff] }
 0x293   :  { %3490 = vmatprep.subr.bf16.mxu1 %v3718_v0  ;;  %v3545_v3 = vpack.c.bf16 %v2337_v25, %v2336_v23  ;;  %v2401_v23 = vld [vmem:[%s5502_s2 + $0x678] sm:$0xff] }
 0x296   :  { %3492 = vmatpush3.bf16.msra.mxu1 %v3491_v47  ;;  %v2354_v47 = vld [vmem:[%s5502_s2 + $0x500] sm:$0xff] }
 0x297   :  { %3493 = vmatprep.subr.bf16.mxu1 %v3718_v0  ;;  %v3572_v27 = vpack.c.bf16 %v2355_v4, %v2354_v47  ;;  %v2419_v47 = vld [vmem:[%s5502_s2 + $0x708] sm:$0xff] }
 0x29a   :  { %3495 = vmatpush3.bf16.msra.mxu1 %v3494_v50  ;;  %v2356_v50 = vld [vmem:[%s5502_s2 + $0x510] sm:$0xff] }
 0x29b   :  { %3496 = vmatprep.subr.bf16.mxu1 %v3718_v0 }
 0x29e   :  { %3498 = vmatpush3.bf16.msra.mxu1 %v3497_v8  ;;  %v3575_v8 = vpack.c.bf16 %v2357_v60, %v2356_v50  ;;  %v2421_v50 = vld [vmem:[%s5502_s2 + $0x718] sm:$0xff]  ;;  %v1837_v60 = vld [vmem:[%s5503_s4 + $0x60] sm:$0xff] }
 0x29f   :  { %3499 = vmatprep.subr.bf16.mxu1 %v3718_v0 }
 0x2a1   :  { %2966 = vmatmul.mubr.f32.vlgmr.msra.gmra.mrb[12].mxu1 %v746_v17  ;;  %v2313_v17 = vld [vmem:[%s5502_s2 + $0x3b8] sm:$0xff] }
 0x2a2   :  { %3501 = vmatpush3.bf16.msra.mxu1 %v3500_v31  ;;  %3000 = vmatprep.mubr.msk.f32.mxu1 %vm3719_vm0, %v3720_v63  ;;  %v3509_v34 = vpack.c.bf16 %v2313_v17, %v2312_v38  ;;  %v3578_v31 = vpack.c.bf16 %v2359_v28, %v2358_v9  ;;  %v2364_v38 = vld [vmem:[%s5502_s2 + $0x550] sm:$0xff]  ;;  %v2365_v17 = vld [vmem:[%s5502_s2 + $0x558] sm:$0xff]  ;;  %v2423_v9 = vld [vmem:[%s5502_s2 + $0x728] sm:$0xff] }
 0x2a3   :  { %3502 = vmatprep.subr.bf16.mxu1 %v3718_v0 }
 0x2a6   :  { %3504 = vmatpush3.bf16.msra.mxu1 %v3503_v37  ;;  %v3581_v37 = vpack.c.bf16 %v2361_v16, %v2360_v7  ;;  %v2426_v16 = vld [vmem:[%s5502_s2 + $0x740] sm:$0xff] }
 0x2a7   :  { %3505 = vmatprep.subr.bf16.mxu1 %v3718_v0 }
 0x2aa   :  { %3507 = vmatpush3.bf16.msra.mxu1 %v3506_v11  ;;  %v3584_v11 = vpack.c.bf16 %v2363_v48, %v2362_v54  ;;  %v2428_v48 = vld [vmem:[%s5502_s2 + $0x750] sm:$0xff] }
 0x2ab   :  { %3508 = vmatprep.subr.bf16.mxu1 %v3718_v0 }
 0x2ae   :  { %3510 = vmatpush3.bf16.msra.mxu1 %v3509_v34  ;;  %v3587_v34 = vpack.c.bf16 %v2365_v17, %v2364_v38  ;;  %v2430_v17 = vld [vmem:[%s5502_s2 + $0x760] sm:$0xff] }
 0x2af   :  { %3511 = vmatprep.subr.bf16.mxu1 %v3718_v0 }
 0x2b2   :  { %3513 = vmatpush3.bf16.msra.mxu1 %v3512_v13 }
 0x2b3   :  { %3514 = vmatprep.subr.bf16.mxu1 %v3718_v0 }
 0x2b4   :  { %v873_v14 = vpop.f32.mrb[0].mxu1 }
 0x2b5   :  { %v2757_v20 = vpop.f32.mrb[1].mxu1 }
 0x2b6   :  { %3516 = vmatpush3.bf16.msra.mxu1 %v3515_v10  ;;  %v2369_v20 = vld [vmem:[%s5502_s2 + $0x578] sm:$0xff] }
 0x2b7   :  { %3517 = vmatprep.subr.bf16.mxu1 %v3718_v0 }
 0x2ba   :  { %3519 = vmatpush3.bf16.msra.mxu1 %v3518_v42 }
 0x2bb   :  { %3520 = vmatprep.subr.bf16.mxu1 %v3718_v0 }
 0x2be   :  { %3522 = vmatpush3.bf16.msra.mxu1 %v3521_v40  ;;  %v3620_v40 = vpack.c.bf16 %v2387_v55, %v2386_v53 }
 0x2bf   :  { %3523 = vmatprep.subr.bf16.mxu1 %v3718_v0 }
 0x2c1   :  { %3001 = vmatmul.mubr.f32.vlgmr.msra.gmra.mrb[14].mxu1 %v747_v45  ;;  %v2329_v45 = vld [vmem:[%s5502_s2 + $0x438] sm:$0xff] }
 0x2c2   :  { %3525 = vmatpush3.bf16.msra.mxu1 %v3524_v57  ;;  %3035 = vmatprep.mubr.msk.f32.mxu1 %vm3719_vm0, %v3720_v63  ;;  %v3533_v32 = vpack.c.bf16 %v2329_v45, %v2328_v29  ;;  %v1659_v57 = vld [vmem:[%s5503_s4 + $0x50] sm:$0xff]  ;;  %v2394_v45 = vld [vmem:[%s5502_s2 + $0x640] sm:$0xff] }
 0x2c3   :  { %3526 = vmatprep.subr.bf16.mxu1 %v3718_v0 }
 0x2c6   :  { %3528 = vmatpush3.bf16.msra.mxu1 %v3527_v21  ;;  %v2391_v21 = vld [vmem:[%s5502_s2 + $0x628] sm:$0xff] }
 0x2c7   :  { %3529 = vmatprep.subr.bf16.mxu1 %v3718_v0  ;;  %v3626_v43 = vpack.c.bf16 %v2391_v21, %v2390_v18 }
 0x2ca   :  { %3531 = vmatpush3.bf16.msra.mxu1 %v3530_v33  ;;  %v2393_v33 = vld [vmem:[%s5502_s2 + $0x638] sm:$0xff] }
 0x2cb   :  { %3532 = vmatprep.subr.bf16.mxu1 %v3718_v0  ;;  %v3629_v29 = vpack.c.bf16 %v2393_v33, %v2392_v58 }
 0x2ce   :  { %3534 = vmatpush3.bf16.msra.mxu1 %v3533_v32  ;;  %v2395_v32 = vld [vmem:[%s5502_s2 + $0x648] sm:$0xff] }
 0x2cf   :  { %3535 = vmatprep.subr.bf16.mxu1 %v3718_v0  ;;  %v3632_v22 = vpack.c.bf16 %v2395_v32, %v2394_v45 }
 0x2d2   :  { %3537 = vmatpush3.bf16.msra.mxu1 %v3536_v12  ;;  %v2397_v12 = vld [vmem:[%s5502_s2 + $0x658] sm:$0xff] }
 0x2d3   :  { %3538 = vmatprep.subr.bf16.mxu1 %v3718_v0  ;;  %v3635_v30 = vpack.c.bf16 %v2397_v12, %v2396_v36 }
 0x2d4   :  { %v943_v5 = vpop.f32.mrb[2].mxu1  ;;  %v5291_v24 = vpop.f32.mrb[128].mxu0 }
 0x2d5   :  { %v944_v62 = vadd.f32 %v943_v5, %v873_v14  ;;  %v2792_v59 = vpop.f32.mrb[3].mxu1  ;;  %v3072_v26 = vpop.f32.mrb[129].mxu0  ;;  %v2368_v14 = vld [vmem:[%s5502_s2 + $0x570] sm:$0xff] }
 0x2d6   :  { %3540 = vmatpush3.bf16.msra.mxu1 %v3539_v61  ;;  %v3593_v42 = vpack.c.bf16 %v2369_v20, %v2368_v14  ;;  %v2399_v61 = vld [vmem:[%s5502_s2 + $0x668] sm:$0xff]  ;;  %v2433_v14 = vld [vmem:[%s5502_s2 + $0x778] sm:$0xff] }
 0x2d7   :  { %3541 = vmatprep.subr.bf16.mxu1 %v3718_v0  ;;  %v3638_v26 = vpack.c.bf16 %v2399_v61, %v2398_v49 }
 0x2da   :  { %3543 = vmatpush3.bf16.msra.mxu1 %v3542_v44  ;;  %v2400_v44 = vld [vmem:[%s5502_s2 + $0x670] sm:$0xff] }
 0x2db   :  { %3544 = vmatprep.subr.bf16.mxu1 %v3718_v0  ;;  %v3641_v25 = vpack.c.bf16 %v2401_v23, %v2400_v44 }
 0x2de   :  { %3546 = vmatpush3.bf16.msra.mxu1 %v3545_v3  ;;  %v2418_v3 = vld [vmem:[%s5502_s2 + $0x700] sm:$0xff] }
 0x2df   :  { %3571 = vmatprep.subr.bf16.mxu1 %v3718_v0  ;;  %v3668_v4 = vpack.c.bf16 %v2419_v47, %v2418_v3 }
 0x2e1   :  { %3036 = vmatmul.mubr.f32.vlgmr.msra.gmra.mrb[16].mxu1 %v1481_v35 }
 0x2e2   :  { %3573 = vmatpush3.bf16.msra.mxu1 %v3572_v27  ;;  %3105 = vmatprep.mubr.msk.f32.mxu1 %vm3719_vm0, %v3720_v63  ;;  %v2420_v27 = vld [vmem:[%s5502_s2 + $0x710] sm:$0xff] }
 0x2e3   :  { %3574 = vmatprep.subr.bf16.mxu1 %v3718_v0  ;;  %v3671_v35 = vpack.c.bf16 %v2421_v50, %v2420_v27 }
 0x2e6   :  { %3576 = vmatpush3.bf16.msra.mxu1 %v3575_v8  ;;  %v2422_v8 = vld [vmem:[%s5502_s2 + $0x720] sm:$0xff] }
 0x2e7   :  { %3577 = vmatprep.subr.bf16.mxu1 %v3718_v0  ;;  %v3674_v28 = vpack.c.bf16 %v2423_v9, %v2422_v8 }
 0x2ea   :  { %3579 = vmatpush3.bf16.msra.mxu1 %v3578_v31  ;;  %v2424_v31 = vld [vmem:[%s5502_s2 + $0x730] sm:$0xff] }
 0x2eb   :  { %3580 = vmatprep.subr.bf16.mxu1 %v3718_v0 }
 0x2ee   :  { %3582 = vmatpush3.bf16.msra.mxu1 %v3581_v37  ;;  %v2427_v37 = vld [vmem:[%s5502_s2 + $0x748] sm:$0xff] }
 0x2ef   :  { %3583 = vmatprep.subr.bf16.mxu1 %v3718_v0  ;;  %v3680_v54 = vpack.c.bf16 %v2427_v37, %v2426_v16 }
 0x2f2   :  { %3585 = vmatpush3.bf16.msra.mxu1 %v3584_v11  ;;  %v2429_v11 = vld [vmem:[%s5502_s2 + $0x758] sm:$0xff] }
 0x2f3   :  { %3586 = vmatprep.subr.bf16.mxu1 %v3718_v0  ;;  %v3683_v38 = vpack.c.bf16 %v2429_v11, %v2428_v48 }
 0x2f4   :  { %v1031_v13 = vpop.f32.mrb[4].mxu1  ;;  %v5354_v15 = vpop.f32.mrb[130].mxu0 }
 0x2f5   :  { %v1035_v2 = vadd.f32 %v1031_v13, %v944_v62  ;;  %v2827_v10 = vpop.f32.mrb[5].mxu1  ;;  %v3142_v1 = vpop.f32.mrb[131].mxu0 }
 0x2f6   :  { %3588 = vmatpush3.bf16.msra.mxu1 %v3587_v34  ;;  %v2431_v34 = vld [vmem:[%s5502_s2 + $0x768] sm:$0xff] }
 0x2f7   :  { %3589 = vmatprep.subr.bf16.mxu1 %v3718_v0  ;;  %v3686_v1 = vpack.c.bf16 %v2431_v34, %v2430_v17 }
 0x2fa   :  { %3591 = vmatpush3.bf16.msra.mxu1 %v3590_v46  ;;  %v2432_v46 = vld [vmem:[%s5502_s2 + $0x770] sm:$0xff] }
 0x2fb   :  { %3592 = vmatprep.subr.bf16.mxu1 %v3718_v0  ;;  %v3689_v20 = vpack.c.bf16 %v2433_v14, %v2432_v46 }
 0x2fe   :  { %3594 = vmatpush3.bf16.msra.mxu1 %v3593_v42  ;;  %v2015_v42 = vld [vmem:[%s5503_s4 + $0x70] sm:$0xff] }
 0x2ff   :  { %3619 = vmatprep.subr.bf16.mxu1 %v3718_v0 }
 0x301   :  { %3106 = vmatmul.mubr.f32.vlgmr.msra.gmra.mrb[18].mxu1 %v1659_v57 }
 0x302   :  { %3621 = vmatpush3.bf16.msra.mxu1 %v3620_v40  ;;  %3175 = vmatprep.mubr.msk.f32.mxu1 %vm3719_vm0, %v3720_v63 }
 0x303   :  { %3622 = vmatprep.subr.bf16.mxu1 %v3718_v0 }
 0x306   :  { %3624 = vmatpush3.bf16.msra.mxu1 %v3623_v6 }
 0x307   :  { %3625 = vmatprep.subr.bf16.mxu1 %v3718_v0 }
 0x30a   :  { %3627 = vmatpush3.bf16.msra.mxu1 %v3626_v43 }
 0x30b   :  { %3628 = vmatprep.subr.bf16.mxu1 %v3718_v0 }
 0x30e   :  { %3630 = vmatpush3.bf16.msra.mxu1 %v3629_v29 }
 0x30f   :  { %3631 = vmatprep.subr.bf16.mxu1 %v3718_v0 }
 0x312   :  { %3633 = vmatpush3.bf16.msra.mxu1 %v3632_v22 }
 0x313   :  { %3634 = vmatprep.subr.bf16.mxu1 %v3718_v0 }
 0x314   :  { %v1120_v41 = vpop.f32.mrb[6].mxu1  ;;  %v5417_v56 = vpop.f32.mrb[132].mxu0 }
 0x315   :  { %v1124_v5 = vadd.f32 %v1120_v41, %v1035_v2  ;;  %v2862_v62 = vpop.f32.mrb[7].mxu1  ;;  %v3212_v59 = vpop.f32.mrb[133].mxu0 }
 0x316   :  { %3636 = vmatpush3.bf16.msra.mxu1 %v3635_v30  ;;  %v2450_v62 = vld [vmem:[%s5504_s3] ss:$0 sm:$0xff] }
 0x317   :  { %3637 = vmatprep.subr.bf16.mxu1 %v3718_v0 }
 0x31a   :  { %3639 = vmatpush3.bf16.msra.mxu1 %v3638_v26 }
 0x31b   :  { %3640 = vmatprep.subr.bf16.mxu1 %v3718_v0 }
 0x31e   :  { %3642 = vmatpush3.bf16.msra.mxu1 %v3641_v25 }
 0x31f   :  { %3667 = vmatprep.subr.bf16.mxu1 %v3718_v0 }
 0x321   :  { %3176 = vmatmul.mubr.f32.vlgmr.msra.gmra.mrb[20].mxu1 %v1837_v60 }
 0x322   :  { %3669 = vmatpush3.bf16.msra.mxu1 %v3668_v4  ;;  %3245 = vmatprep.mubr.msk.f32.mxu1 %vm3719_vm0, %v3720_v63  ;;  %v2425_v63 = vld [vmem:[%s5502_s2 + $0x738] sm:$0xff] }
 0x323   :  { %3670 = vmatprep.subr.bf16.mxu1 %v3718_v0  ;;  %v3677_v7 = vpack.c.bf16 %v2425_v63, %v2424_v31 }
 0x326   :  { %3672 = vmatpush3.bf16.msra.mxu1 %v3671_v35 }
 0x327   :  { %3673 = vmatprep.subr.bf16.mxu1 %v3718_v0 }
 0x32a   :  { %3675 = vmatpush3.bf16.msra.mxu1 %v3674_v28 }
 0x32b   :  { %3676 = vmatprep.subr.bf16.mxu1 %v3718_v0 }
 0x32e   :  { %3678 = vmatpush3.bf16.msra.mxu1 %v3677_v7 }
 0x32f   :  { %3679 = vmatprep.subr.bf16.mxu1 %v3718_v0 }
 0x332   :  { %3681 = vmatpush3.bf16.msra.mxu1 %v3680_v54 }
 0x333   :  { %3682 = vmatprep.subr.bf16.mxu1 %v3718_v0 }
 0x334   :  { %v1209_v39 = vpop.f32.mrb[8].mxu1  ;;  %v2188_v51 = vpop.f32.mrb[134].mxu0 }
 0x335   :  { %v1213_v13 = vadd.f32 %v1209_v39, %v1124_v5  ;;  %v2897_v2 = vpop.f32.mrb[9].mxu1  ;;  %v3282_v10 = vpop.f32.mrb[135].mxu0 }
 0x336   :  { %3684 = vmatpush3.bf16.msra.mxu1 %v3683_v38 }
 0x337   :  { %3685 = vmatprep.subr.bf16.mxu1 %v3718_v0 }
 0x33a   :  { %3687 = vmatpush3.bf16.msra.mxu1 %v3686_v1 }
 0x33b   :  { %3688 = vmatprep.subr.bf16.mxu1 %v3718_v0 }
 0x33e   :  { %3690 = vmatpush3.bf16.msra.mxu1 %v3689_v20 }
 0x341   :  { %3246 = vmatmul.mubr.f32.vlgmr.msra.gmra.mrb[22].mxu1 %v2015_v42 }
 0x354   :  { %v1298_v53 = vpop.f32.mrb[10].mxu1 }
 0x355   :  { %v1302_v55 = vadd.f32 %v1298_v53, %v1213_v13  ;;  %v2932_v40 = vpop.f32.mrb[11].mxu1 }
 0x374   :  { %v1387_v52 = vpop.f32.mrb[12].mxu1 }
 0x375   :  { %v1391_v19 = vadd.f32 %v1387_v52, %v1302_v55  ;;  %v2967_v57 = vpop.f32.mrb[13].mxu1 }
 0x394   :  { %v1476_v6 = vpop.f32.mrb[14].mxu1 }
 0x395   :  { %v1480_v18 = vadd.f32 %v1476_v6, %v1391_v19  ;;  %v3002_v21 = vpop.f32.mrb[15].mxu1 }
 0x3b4   :  { %v1565_v43 = vpop.f32.mrb[16].mxu1 }
 0x3b5   :  { %v1569_v58 = vadd.f32 %v1565_v43, %v1480_v18  ;;  %v3037_v33 = vpop.f32.mrb[17].mxu1 }
 0x3b7   :  { %v1658_v0 = vadd.f32 %v5291_v24, %v1569_v58 }
 0x3d4   :  { %v1743_v29 = vpop.f32.mrb[18].mxu1 }
 0x3d5   :  { %v1747_v45 = vadd.f32 %v1743_v29, %v1658_v0  ;;  %v3107_v32 = vpop.f32.mrb[19].mxu1 }
 0x3d7   :  { %v1836_v22 = vadd.f32 %v5354_v15, %v1747_v45 }
 0x3f4   :  { %v1921_v36 = vpop.f32.mrb[20].mxu1 }
 0x3f5   :  { %v1925_v12 = vadd.f32 %v1921_v36, %v1836_v22  ;;  %v3177_v30 = vpop.f32.mrb[21].mxu1 }
 0x3f7   :  { %v2014_v49 = vadd.f32 %v5417_v56, %v1925_v12 }
 0x414   :  { %v2099_v61 = vpop.f32.mrb[22].mxu1 }
 0x415   :  { %v2103_v41 = vadd.f32 %v2099_v61, %v2014_v49  ;;  %v3247_v5 = vpop.f32.mrb[23].mxu1 }
 0x417   :  { %v2192_v59 = vadd.f32 %v2188_v51, %v2103_v41 }
 0x419   :  { %v2200_v26 = vadd.f32 %v2450_v62, %v2192_v59 }
 0x41b   :  { %2201 = vst [vmem:[%s5505_s5] sm:$0xff] %v2200_v26 }

</bundles_post_ra>
